<compile_context>
chip_gen: v6e
topology: v6e:2x2x1
jax: 0.10.0
libtpu: 0.0.40
codegen_flags: <defaults>
</compile_context>

<pallas_src>
import functools

import jax
import jax.numpy as jnp
from jax.experimental import pallas as pl
from jax.experimental.pallas import tpu as pltpu


def _round_up(x, m):
    return (x + m - 1) // m * m


def _fold_bn(gamma, beta, mean, var, eps=1e-5):
    scale = gamma / jnp.sqrt(var + eps)
    bias = beta - mean * scale
    return scale, bias


def _mbconv_body(x, w1_ref, b1_ref, w2_ref, b2_ref, out_ref, *,
                 offsets, center_off, use_res):
    # x:       (tm + halo, C_in_p) bf16  window over flattened padded rows
    # w1_ref:  (k*k*C_in_p, C_exp_p) bf16  expand weights (BN scale folded)
    # b1_ref:  (1, C_exp_p) f32            expand folded-BN bias
    # w2_ref:  (K2, C_out_p) bf16          project weights (+ identity block)
    # b2_ref:  (1, C_out_p) f32            project folded-BN bias
    # out_ref: (tm, C_out_p) bf16          lane-dense output slab
    tm = out_ref.shape[0]

    # Expand conv: fold all k*k taps into the contraction dim -> a single MXU
    # matmul with K = k*k*C_in_p (vs. k*k lane-sparse matmuls + VPU adds).
    patches = jnp.concatenate([x[off:off + tm, :] for off in offsets], axis=1)
    h = jnp.dot(patches, w1_ref[...], preferred_element_type=jnp.float32)

    # Folded-BN bias + SiLU (f32 elementwise; reciprocal on the EUP slot).
    h = h + b1_ref[...]
    h = h * pl.reciprocal(1.0 + jnp.exp(-h), approx=True)

    z = h.astype(jnp.bfloat16)
    if use_res:
        # Residual = the center-tap row window; it is folded into the 1x1
        # projection matmul via an identity block appended to w2, so it rides
        # the MXU (no lane-pad temp, no extra store).
        z = jnp.concatenate([z, x[center_off:center_off + tm, :]], axis=1)

    out = jnp.dot(z, w2_ref[...], preferred_element_type=jnp.float32)
    out_ref[...] = (out + b2_ref[...]).astype(out_ref.dtype)


def _kernel_window(x_ref, w1_ref, b1_ref, w2_ref, b2_ref, out_ref, *,
                   offsets, center_off, use_res):
    _mbconv_body(x_ref[...], w1_ref, b1_ref, w2_ref, b2_ref, out_ref,
                 offsets=offsets, center_off=center_off, use_res=use_res)


def _kernel_split(a_ref, halo_ref, w1_ref, b1_ref, w2_ref, b2_ref, out_ref, *,
                  offsets, center_off, use_res):
    # Portability fallback: main tile + whole-next-tile halo, one VMEM concat.
    x = jnp.concatenate([a_ref[...], halo_ref[...]], axis=0)
    _mbconv_body(x, w1_ref, b1_ref, w2_ref, b2_ref, out_ref,
                 offsets=offsets, center_off=center_off, use_res=use_res)


def fused_mbconv_forward(x_nchw, params, *, kernel_size, stride, tm=1024):
    """FusedMBConv (expand_ratio != 1 branch) forward in eval mode."""
    (w1, g1, be1, m1, v1, w2, g2, be2, m2, v2) = params
    N, C_in, H, W = x_nchw.shape
    C_exp = w1.shape[0]
    C_out = w2.shape[0]
    k = kernel_size
    pad = (k - 1) // 2
    use_res = (stride == 1 and C_in == C_out)

    HP, WP = H + 2 * pad, W + 2 * pad
    H_out = (H + 2 * pad - k) // stride + 1
    W_out = (W + 2 * pad - k) // stride + 1

    # Channel padding: input lanes to a multiple of 16 (bf16 packing); matmul
    # output dims (C_exp, C_out) to lane-dense multiples of 128.
    C_in_p = max(16, _round_up(C_in, 16))
    C_exp_p = max(128, _round_up(C_exp, 128))
    C_out_p = max(128, _round_up(C_out, 128))

    # NCHW -> spatially padded NHWC flattened over (n, h, w) rows, bf16 in HBM.
    x_nhwc = jnp.transpose(x_nchw, (0, 2, 3, 1))
    xp = jnp.pad(x_nhwc, ((0, 0), (pad, pad), (pad, pad), (0, C_in_p - C_in)))
    NR = N * HP * WP
    xp_flat = xp.reshape(NR, C_in_p).astype(jnp.bfloat16)

    # Every conv tap (dh, dw) is a constant row offset in the flat layout.
    offsets = [dh * WP + dw for dh in range(k) for dw in range(k)]
    max_off = max(offsets)
    center_off = pad * WP + pad

    # Row tile: large enough to amortize per-step overhead, small enough that
    # tiny inputs do not mostly compute padding; even grid for megacore.
    tm = int(min(tm, max(512, _round_up(int(pl.cdiv(NR, 2)), 512))))
    T = int(pl.cdiv(NR, tm))
    if T % 2:
        T += 1
    halo = _round_up(max_off, 16)            # no power-of-2 / tm % halo limits
    rows_pad = max(T * tm + halo, (T + 1) * tm)
    xp_flat = jnp.pad(xp_flat, ((0, rows_pad - NR), (0, 0)))

    # Fold BN scales into the conv weights; biases remain as (1, C) adds.
    s1, bb1 = _fold_bn(g1, be1, m1, v1)
    s2, bb2 = _fold_bn(g2, be2, m2, v2)
    w1_f = jnp.transpose(w1, (2, 3, 1, 0)) * s1              # (k,k,C_in,C_exp)
    w1_f = w1_f.reshape(k * k, C_in, C_exp)
    w1_f = jnp.pad(w1_f, ((0, 0), (0, C_in_p - C_in), (0, C_exp_p - C_exp)))
    w1_f = w1_f.reshape(k * k * C_in_p, C_exp_p).astype(jnp.bfloat16)
    b1 = jnp.pad(bb1, (0, C_exp_p - C_exp)).reshape(1, C_exp_p)
    b1 = b1.astype(jnp.float32)
    w2_f = w2[:, :, 0, 0].T * s2                              # (C_exp, C_out)
    w2_f = jnp.pad(w2_f, ((0, C_exp_p - C_exp), (0, C_out_p - C_out)))
    w2_f = w2_f.astype(jnp.bfloat16)
    if use_res:
        # Identity block: residual channels pass straight through the MXU.
        eye = jnp.eye(C_in_p, C_out_p, dtype=jnp.float32).astype(jnp.bfloat16)
        w2_f = jnp.concatenate([w2_f, eye], axis=0)
    K2 = int(w2_f.shape[0])
    b2 = jnp.pad(bb2, (0, C_out_p - C_out)).reshape(1, C_out_p)
    b2 = b2.astype(jnp.float32)

    common = dict(offsets=offsets, center_off=center_off, use_res=use_res)
    K1 = k * k * C_in_p
    flops = 2 * T * tm * (K1 * C_exp_p + K2 * C_out_p)
    bytes_accessed = (T * (tm + halo) * C_in_p * 2       # bf16 input windows
                      + T * tm * C_out_p * 2             # bf16 output slab
                      + int(w1_f.size + w2_f.size) * 2
                      + int(b1.size + b2.size) * 4)
    cost = pl.CostEstimate(flops=flops,
                           transcendentals=2 * T * tm * C_exp_p,  # exp + recip
                           bytes_accessed=bytes_accessed)
    cparams = pltpu.CompilerParams(dimension_semantics=("parallel",),
                                   vmem_limit_bytes=48 * 1024 * 1024)
    weight_specs = [
        pl.BlockSpec((K1, C_exp_p), lambda i: (0, 0)),
        pl.BlockSpec((1, C_exp_p), lambda i: (0, 0)),
        pl.BlockSpec((K2, C_out_p), lambda i: (0, 0)),
        pl.BlockSpec((1, C_out_p), lambda i: (0, 0)),
    ]
    out_spec = pl.BlockSpec((tm, C_out_p), lambda i: (i, 0))
    out_shape = jax.ShapeDtypeStruct((T * tm, C_out_p), jnp.bfloat16)

    def run_element_window():
        # One overlapping (tm + halo)-row window per step: element-indexed row
        # dim -> no halo DMA stream, no in-kernel row concat.
        win_spec = pl.BlockSpec((pl.Element(tm + halo), pl.Element(C_in_p)),
                                lambda i: (i * tm, 0))
        return pl.pallas_call(
            functools.partial(_kernel_window, **common),
            out_shape=out_shape,
            grid_spec=pltpu.PrefetchScalarGridSpec(
                num_scalar_prefetch=0, grid=(T,),
                in_specs=[win_spec] + weight_specs,
                out_specs=out_spec),
            compiler_params=cparams, cost_estimate=cost,
        )(xp_flat, w1_f, b1, w2_f, b2)

    def run_split_halo():
        # Fallback for Pallas builds without element-indexed windows.
        assert max_off <= tm, (max_off, tm)
        return pl.pallas_call(
            functools.partial(_kernel_split, **common),
            out_shape=out_shape,
            grid_spec=pltpu.PrefetchScalarGridSpec(
                num_scalar_prefetch=0, grid=(T,),
                in_specs=[pl.BlockSpec((tm, C_in_p), lambda i: (i, 0)),
                          pl.BlockSpec((tm, C_in_p), lambda i: (i + 1, 0))]
                         + weight_specs,
                out_specs=out_spec),
            compiler_params=cparams, cost_estimate=cost,
        )(xp_flat, xp_flat, w1_f, b1, w2_f, b2)

    try:
        out_fat = run_element_window()
    except Exception:  # pragma: no cover — portability fallback
        out_fat = run_split_halo()

    # Valid rows of the fat grid are the (n, s*ho, s*wo) base positions.
    out = out_fat[:NR].reshape(N, HP, WP, C_out_p)
    out = out[:, 0:stride * H_out:stride, 0:stride * W_out:stride, :C_out]
    return jnp.transpose(out, (0, 3, 1, 2)).astype(x_nchw.dtype)  # NCHW


def _reference_forward(x, params, *, kernel_size, stride, eps=1e-5):
    """Pure-JAX reference matching the PyTorch module in eval mode."""
    (w1, g1, be1, m1, v1, w2, g2, be2, m2, v2) = params
    pad = (kernel_size - 1) // 2
    use_res = (stride == 1 and x.shape[1] == w2.shape[0])

    h = jax.lax.conv_general_dilated(
        x, w1, (stride, stride), ((pad, pad), (pad, pad)),
        dimension_numbers=("NCHW", "OIHW", "NCHW"))
    h = ((h - m1[None, :, None, None]) / jnp.sqrt(v1[None, :, None, None] + eps)
         * g1[None, :, None, None] + be1[None, :, None, None])
    h = h * jax.nn.sigmoid(h)

    o = jax.lax.conv_general_dilated(
        h, w2, (1, 1), ((0, 0), (0, 0)),
        dimension_numbers=("NCHW", "OIHW", "NCHW"))
    o = ((o - m2[None, :, None, None]) / jnp.sqrt(v2[None, :, None, None] + eps)
         * g2[None, :, None, None] + be2[None, :, None, None])
    if use_res:
        o = o + x  # DropPath is identity in eval mode
    return o


if __name__ == "__main__":
    # Module config: kernel_size=3, in=4, out=4, expand_ratio=4, stride=1,
    # se_ratio=0, drop_rate=0.0 -> has_expansion=True, use_res_connect=True.
    kernel_size = 3
    in_channels = 4
    out_channels = 4
    expand_ratio = 4
    stride = 1
    expanded = in_channels * expand_ratio

    key = jax.random.PRNGKey(0)
    keys = jax.random.split(key, 9)

    x = jax.random.normal(keys[0], (2, in_channels, 16, 16), dtype=jnp.float32)

    # Deterministic synthetic parameters (PyTorch Conv2d OIHW layout, no bias).
    w1 = jax.random.normal(keys[1], (expanded, in_channels, kernel_size,
                                     kernel_size), jnp.float32) * 0.1
    g1 = 1.0 + 0.1 * jax.random.normal(keys[2], (expanded,), jnp.float32)
    be1 = 0.1 * jax.random.normal(keys[3], (expanded,), jnp.float32)
    m1 = 0.05 * jax.random.normal(keys[4], (expanded,), jnp.float32)
    v1 = 1.0 + 0.1 * jax.nn.softplus(jax.random.normal(keys[5], (expanded,),
                                                       jnp.float32))

    w2 = jax.random.normal(keys[6], (out_channels, expanded, 1, 1),
                           jnp.float32) * 0.1
    g2 = 1.0 + 0.1 * jax.random.normal(keys[7], (out_channels,), jnp.float32)
    be2 = 0.1 * jax.random.normal(keys[8], (out_channels,), jnp.float32)
    m2 = jnp.zeros((out_channels,), jnp.float32)
    v2 = jnp.ones((out_channels,), jnp.float32)

    params = (w1, g1, be1, m1, v1, w2, g2, be2, m2, v2)

    out = fused_mbconv_forward(x, params, kernel_size=kernel_size,
                               stride=stride)
    out = jax.block_until_ready(out)

    ref = _reference_forward(x, params, kernel_size=kernel_size, stride=stride)
    ref = jax.block_until_ready(ref)

    assert out.shape == ref.shape, (out.shape, ref.shape)
    # bf16 input/residual/output storage + bf16 MXU operands + approx-EUP
    # reciprocal in SiLU -> a few 1e-2 absolute error vs. the f32 reference.
    assert jnp.allclose(out, ref, rtol=5e-2, atol=5e-2), (
        float(jnp.max(jnp.abs(out - ref))))

    print("KERNEL_OK")
</pallas_src>

<mosaic_0001>
module attributes {stable_mosaic.version = 11 : i64} {
  func.func @_kernel_window(%arg0: i32, %arg1: memref<560x16xbf16, #tpu.memory_space<vmem>>, %arg2: memref<144x128xbf16, #tpu.memory_space<vmem>>, %arg3: memref<1x128xf32, #tpu.memory_space<vmem>>, %arg4: memref<144x128xbf16, #tpu.memory_space<vmem>>, %arg5: memref<1x128xf32, #tpu.memory_space<vmem>>, %arg6: memref<512x128xbf16, #tpu.memory_space<vmem>>) attributes {dimension_semantics = [#tpu.dimension_semantics<parallel>], iteration_bounds = array<i64: 2>, scalar_prefetch = 0 : i64, scratch_operands = 0 : i64, tpu.core_type = #tpu.core_type<tc>, window_params = [{transform_indices = @transform_0, window_bounds = array<i64: 560, 16>, window_kind = #tpu.element_window<[0, 0], [0, 0]>}, {pipeline_mode = #tpu.pipeline_mode<synchronous>, transform_indices = @transform_1, window_bounds = array<i64: 144, 128>}, {pipeline_mode = #tpu.pipeline_mode<synchronous>, transform_indices = @transform_2, window_bounds = array<i64: 1, 128>}, {pipeline_mode = #tpu.pipeline_mode<synchronous>, transform_indices = @transform_3, window_bounds = array<i64: 144, 128>}, {pipeline_mode = #tpu.pipeline_mode<synchronous>, transform_indices = @transform_4, window_bounds = array<i64: 1, 128>}, {transform_indices = @transform_5, window_bounds = array<i64: 512, 128>}]} {
    %c0 = arith.constant 0 : index
    %c0_0 = arith.constant 0 : index
    %0 = vector.load %arg1[%c0, %c0_0] : memref<560x16xbf16, #tpu.memory_space<vmem>>, vector<560x16xbf16>
    %1 = vector.extract_strided_slice %0 {offsets = [0, 0], sizes = [512, 16], strides = [1, 1]} : vector<560x16xbf16> to vector<512x16xbf16>
    %2 = vector.extract_strided_slice %0 {offsets = [1, 0], sizes = [512, 16], strides = [1, 1]} : vector<560x16xbf16> to vector<512x16xbf16>
    %3 = vector.extract_strided_slice %0 {offsets = [2, 0], sizes = [512, 16], strides = [1, 1]} : vector<560x16xbf16> to vector<512x16xbf16>
    %4 = vector.extract_strided_slice %0 {offsets = [18, 0], sizes = [512, 16], strides = [1, 1]} : vector<560x16xbf16> to vector<512x16xbf16>
    %5 = vector.extract_strided_slice %0 {offsets = [19, 0], sizes = [512, 16], strides = [1, 1]} : vector<560x16xbf16> to vector<512x16xbf16>
    %6 = vector.extract_strided_slice %0 {offsets = [20, 0], sizes = [512, 16], strides = [1, 1]} : vector<560x16xbf16> to vector<512x16xbf16>
    %7 = vector.extract_strided_slice %0 {offsets = [36, 0], sizes = [512, 16], strides = [1, 1]} : vector<560x16xbf16> to vector<512x16xbf16>
    %8 = vector.extract_strided_slice %0 {offsets = [37, 0], sizes = [512, 16], strides = [1, 1]} : vector<560x16xbf16> to vector<512x16xbf16>
    %9 = vector.extract_strided_slice %0 {offsets = [38, 0], sizes = [512, 16], strides = [1, 1]} : vector<560x16xbf16> to vector<512x16xbf16>
    %10 = tpu.concatenate %1, %2, %3, %4, %5, %6, %7, %8, %9 in 1 : vector<512x16xbf16>, vector<512x16xbf16>, vector<512x16xbf16>, vector<512x16xbf16>, vector<512x16xbf16>, vector<512x16xbf16>, vector<512x16xbf16>, vector<512x16xbf16>, vector<512x16xbf16> -> vector<512x144xbf16>
    %c0_1 = arith.constant 0 : index
    %c0_2 = arith.constant 0 : index
    %11 = vector.load %arg2[%c0_1, %c0_2] : memref<144x128xbf16, #tpu.memory_space<vmem>>, vector<144x128xbf16>
    %cst = arith.constant dense<0.000000e+00> : vector<512x128xf32>
    %12 = tpu.matmul %10, %11, %cst {dimension_numbers = #tpu.dot_dimension_numbers<[1], [0], [0], [1], [0, 0, 1, 1], [], []>} : vector<512x144xbf16>, vector<144x128xbf16>, vector<512x128xf32> -> vector<512x128xf32>
    %c0_3 = arith.constant 0 : index
    %c0_4 = arith.constant 0 : index
    %13 = vector.load %arg3[%c0_3, %c0_4] : memref<1x128xf32, #tpu.memory_space<vmem>>, vector<1x128xf32>
    %14 = vector.broadcast %13 : vector<1x128xf32> to vector<512x128xf32>
    %15 = arith.addf %12, %14 : vector<512x128xf32>
    %cst_5 = arith.constant 0.000000e+00 : f32
    %16 = vector.broadcast %cst_5 : f32 to vector<512x128xf32>
    %17 = arith.subf %16, %15 : vector<512x128xf32>
    %18 = math.exp %17 : vector<512x128xf32>
    %cst_6 = arith.constant 1.000000e+00 : f32
    %19 = vector.broadcast %cst_6 : f32 to vector<512x128xf32>
    %20 = arith.addf %19, %18 : vector<512x128xf32>
    %21 = tpu.reciprocal %20 {approx = true} : vector<512x128xf32> -> vector<512x128xf32>
    %22 = arith.mulf %15, %21 : vector<512x128xf32>
    %23 = arith.truncf %22 : vector<512x128xf32> to vector<512x128xbf16>
    %24 = vector.extract_strided_slice %0 {offsets = [19, 0], sizes = [512, 16], strides = [1, 1]} : vector<560x16xbf16> to vector<512x16xbf16>
    %25 = tpu.concatenate %23, %24 in 1 : vector<512x128xbf16>, vector<512x16xbf16> -> vector<512x144xbf16>
    %c0_7 = arith.constant 0 : index
    %c0_8 = arith.constant 0 : index
    %26 = vector.load %arg4[%c0_7, %c0_8] : memref<144x128xbf16, #tpu.memory_space<vmem>>, vector<144x128xbf16>
    %cst_9 = arith.constant dense<0.000000e+00> : vector<512x128xf32>
    %27 = tpu.matmul %25, %26, %cst_9 {dimension_numbers = #tpu.dot_dimension_numbers<[1], [0], [0], [1], [0, 0, 1, 1], [], []>} : vector<512x144xbf16>, vector<144x128xbf16>, vector<512x128xf32> -> vector<512x128xf32>
    %c0_10 = arith.constant 0 : index
    %c0_11 = arith.constant 0 : index
    %28 = vector.load %arg5[%c0_10, %c0_11] : memref<1x128xf32, #tpu.memory_space<vmem>>, vector<1x128xf32>
    %29 = vector.broadcast %28 : vector<1x128xf32> to vector<512x128xf32>
    %30 = arith.addf %27, %29 : vector<512x128xf32>
    %31 = arith.truncf %30 : vector<512x128xf32> to vector<512x128xbf16>
    %c0_12 = arith.constant 0 : index
    %c0_13 = arith.constant 0 : index
    %32 = vector.load %arg6[%c0_12, %c0_13] : memref<512x128xbf16, #tpu.memory_space<vmem>>, vector<512x128xbf16>
    tpu.vector_store %arg6[%c0_12, %c0_13], %31 {strides = array<i32>} : memref<512x128xbf16, #tpu.memory_space<vmem>>, vector<512x128xbf16>,
    return
  }
  func.func @transform_0(%arg0: i32) -> (i32, i32) {
    %c512_i32 = arith.constant 512 : i32
    %0 = arith.muli %arg0, %c512_i32 : i32
    %c0_i32 = arith.constant 0 : i32
    %c0_i32_0 = arith.constant 0 : i32
    return %0, %c0_i32 : i32, i32
  }
  func.func @transform_1(%arg0: i32) -> (i32, i32) {
    %c0_i32 = arith.constant 0 : i32
    %c0_i32_0 = arith.constant 0 : i32
    %c0_i32_1 = arith.constant 0 : i32
    return %c0_i32, %c0_i32_0 : i32, i32
  }
  func.func @transform_2(%arg0: i32) -> (i32, i32) {
    %c0_i32 = arith.constant 0 : i32
    %c0_i32_0 = arith.constant 0 : i32
    %c0_i32_1 = arith.constant 0 : i32
    return %c0_i32, %c0_i32_0 : i32, i32
  }
  func.func @transform_3(%arg0: i32) -> (i32, i32) {
    %c0_i32 = arith.constant 0 : i32
    %c0_i32_0 = arith.constant 0 : i32
    %c0_i32_1 = arith.constant 0 : i32
    return %c0_i32, %c0_i32_0 : i32, i32
  }
  func.func @transform_4(%arg0: i32) -> (i32, i32) {
    %c0_i32 = arith.constant 0 : i32
    %c0_i32_0 = arith.constant 0 : i32
    %c0_i32_1 = arith.constant 0 : i32
    return %c0_i32, %c0_i32_0 : i32, i32
  }
  func.func @transform_5(%arg0: i32) -> (i32, i32) {
    %c0_i32 = arith.constant 0 : i32
    %c0_i32_0 = arith.constant 0 : i32
    return %arg0, %c0_i32 : i32, i32
  }
}

module attributes {stable_mosaic.version = 11 : i64} {
  func.func @_kernel_split(%arg0: i32, %arg1: memref<512x16xbf16, #tpu.memory_space<vmem>>, %arg2: memref<512x16xbf16, #tpu.memory_space<vmem>>, %arg3: memref<144x128xbf16, #tpu.memory_space<vmem>>, %arg4: memref<1x128xf32, #tpu.memory_space<vmem>>, %arg5: memref<144x128xbf16, #tpu.memory_space<vmem>>, %arg6: memref<1x128xf32, #tpu.memory_space<vmem>>, %arg7: memref<512x128xbf16, #tpu.memory_space<vmem>>) attributes {dimension_semantics = [#tpu.dimension_semantics<parallel>], iteration_bounds = array<i64: 2>, scalar_prefetch = 0 : i64, scratch_operands = 0 : i64, tpu.core_type = #tpu.core_type<tc>, window_params = [{transform_indices = @transform_0, window_bounds = array<i64: 512, 16>}, {transform_indices = @transform_1, window_bounds = array<i64: 512, 16>}, {pipeline_mode = #tpu.pipeline_mode<synchronous>, transform_indices = @transform_2, window_bounds = array<i64: 144, 128>}, {pipeline_mode = #tpu.pipeline_mode<synchronous>, transform_indices = @transform_3, window_bounds = array<i64: 1, 128>}, {pipeline_mode = #tpu.pipeline_mode<synchronous>, transform_indices = @transform_4, window_bounds = array<i64: 144, 128>}, {pipeline_mode = #tpu.pipeline_mode<synchronous>, transform_indices = @transform_5, window_bounds = array<i64: 1, 128>}, {transform_indices = @transform_6, window_bounds = array<i64: 512, 128>}]} {
    %c0 = arith.constant 0 : index
    %c0_0 = arith.constant 0 : index
    %0 = vector.load %arg1[%c0, %c0_0] : memref<512x16xbf16, #tpu.memory_space<vmem>>, vector<512x16xbf16>
    %c0_1 = arith.constant 0 : index
    %c0_2 = arith.constant 0 : index
    %1 = vector.load %arg2[%c0_1, %c0_2] : memref<512x16xbf16, #tpu.memory_space<vmem>>, vector<512x16xbf16>
    %2 = tpu.concatenate %0, %1 in 0 : vector<512x16xbf16>, vector<512x16xbf16> -> vector<1024x16xbf16>
    %3 = vector.extract_strided_slice %2 {offsets = [0, 0], sizes = [512, 16], strides = [1, 1]} : vector<1024x16xbf16> to vector<512x16xbf16>
    %4 = vector.extract_strided_slice %2 {offsets = [1, 0], sizes = [512, 16], strides = [1, 1]} : vector<1024x16xbf16> to vector<512x16xbf16>
    %5 = vector.extract_strided_slice %2 {offsets = [2, 0], sizes = [512, 16], strides = [1, 1]} : vector<1024x16xbf16> to vector<512x16xbf16>
    %6 = vector.extract_strided_slice %2 {offsets = [18, 0], sizes = [512, 16], strides = [1, 1]} : vector<1024x16xbf16> to vector<512x16xbf16>
    %7 = vector.extract_strided_slice %2 {offsets = [19, 0], sizes = [512, 16], strides = [1, 1]} : vector<1024x16xbf16> to vector<512x16xbf16>
    %8 = vector.extract_strided_slice %2 {offsets = [20, 0], sizes = [512, 16], strides = [1, 1]} : vector<1024x16xbf16> to vector<512x16xbf16>
    %9 = vector.extract_strided_slice %2 {offsets = [36, 0], sizes = [512, 16], strides = [1, 1]} : vector<1024x16xbf16> to vector<512x16xbf16>
    %10 = vector.extract_strided_slice %2 {offsets = [37, 0], sizes = [512, 16], strides = [1, 1]} : vector<1024x16xbf16> to vector<512x16xbf16>
    %11 = vector.extract_strided_slice %2 {offsets = [38, 0], sizes = [512, 16], strides = [1, 1]} : vector<1024x16xbf16> to vector<512x16xbf16>
    %12 = tpu.concatenate %3, %4, %5, %6, %7, %8, %9, %10, %11 in 1 : vector<512x16xbf16>, vector<512x16xbf16>, vector<512x16xbf16>, vector<512x16xbf16>, vector<512x16xbf16>, vector<512x16xbf16>, vector<512x16xbf16>, vector<512x16xbf16>, vector<512x16xbf16> -> vector<512x144xbf16>
    %c0_3 = arith.constant 0 : index
    %c0_4 = arith.constant 0 : index
    %13 = vector.load %arg3[%c0_3, %c0_4] : memref<144x128xbf16, #tpu.memory_space<vmem>>, vector<144x128xbf16>
    %cst = arith.constant dense<0.000000e+00> : vector<512x128xf32>
    %14 = tpu.matmul %12, %13, %cst {dimension_numbers = #tpu.dot_dimension_numbers<[1], [0], [0], [1], [0, 0, 1, 1], [], []>} : vector<512x144xbf16>, vector<144x128xbf16>, vector<512x128xf32> -> vector<512x128xf32>
    %c0_5 = arith.constant 0 : index
    %c0_6 = arith.constant 0 : index
    %15 = vector.load %arg4[%c0_5, %c0_6] : memref<1x128xf32, #tpu.memory_space<vmem>>, vector<1x128xf32>
    %16 = vector.broadcast %15 : vector<1x128xf32> to vector<512x128xf32>
    %17 = arith.addf %14, %16 : vector<512x128xf32>
    %cst_7 = arith.constant 0.000000e+00 : f32
    %18 = vector.broadcast %cst_7 : f32 to vector<512x128xf32>
    %19 = arith.subf %18, %17 : vector<512x128xf32>
    %20 = math.exp %19 : vector<512x128xf32>
    %cst_8 = arith.constant 1.000000e+00 : f32
    %21 = vector.broadcast %cst_8 : f32 to vector<512x128xf32>
    %22 = arith.addf %21, %20 : vector<512x128xf32>
    %23 = tpu.reciprocal %22 {approx = true} : vector<512x128xf32> -> vector<512x128xf32>
    %24 = arith.mulf %17, %23 : vector<512x128xf32>
    %25 = arith.truncf %24 : vector<512x128xf32> to vector<512x128xbf16>
    %26 = vector.extract_strided_slice %2 {offsets = [19, 0], sizes = [512, 16], strides = [1, 1]} : vector<1024x16xbf16> to vector<512x16xbf16>
    %27 = tpu.concatenate %25, %26 in 1 : vector<512x128xbf16>, vector<512x16xbf16> -> vector<512x144xbf16>
    %c0_9 = arith.constant 0 : index
    %c0_10 = arith.constant 0 : index
    %28 = vector.load %arg5[%c0_9, %c0_10] : memref<144x128xbf16, #tpu.memory_space<vmem>>, vector<144x128xbf16>
    %cst_11 = arith.constant dense<0.000000e+00> : vector<512x128xf32>
    %29 = tpu.matmul %27, %28, %cst_11 {dimension_numbers = #tpu.dot_dimension_numbers<[1], [0], [0], [1], [0, 0, 1, 1], [], []>} : vector<512x144xbf16>, vector<144x128xbf16>, vector<512x128xf32> -> vector<512x128xf32>
    %c0_12 = arith.constant 0 : index
    %c0_13 = arith.constant 0 : index
    %30 = vector.load %arg6[%c0_12, %c0_13] : memref<1x128xf32, #tpu.memory_space<vmem>>, vector<1x128xf32>
    %31 = vector.broadcast %30 : vector<1x128xf32> to vector<512x128xf32>
    %32 = arith.addf %29, %31 : vector<512x128xf32>
    %33 = arith.truncf %32 : vector<512x128xf32> to vector<512x128xbf16>
    %c0_14 = arith.constant 0 : index
    %c0_15 = arith.constant 0 : index
    %34 = vector.load %arg7[%c0_14, %c0_15] : memref<512x128xbf16, #tpu.memory_space<vmem>>, vector<512x128xbf16>
    tpu.vector_store %arg7[%c0_14, %c0_15], %33 {strides = array<i32>} : memref<512x128xbf16, #tpu.memory_space<vmem>>, vector<512x128xbf16>,
    return
  }
  func.func @transform_0(%arg0: i32) -> (i32, i32) {
    %c0_i32 = arith.constant 0 : i32
    %c0_i32_0 = arith.constant 0 : i32
    return %arg0, %c0_i32 : i32, i32
  }
  func.func @transform_1(%arg0: i32) -> (i32, i32) {
    %c1_i32 = arith.constant 1 : i32
    %0 = arith.addi %arg0, %c1_i32 : i32
    %c0_i32 = arith.constant 0 : i32
    %c0_i32_0 = arith.constant 0 : i32
    return %0, %c0_i32 : i32, i32
  }
  func.func @transform_2(%arg0: i32) -> (i32, i32) {
    %c0_i32 = arith.constant 0 : i32
    %c0_i32_0 = arith.constant 0 : i32
    %c0_i32_1 = arith.constant 0 : i32
    return %c0_i32, %c0_i32_0 : i32, i32
  }
  func.func @transform_3(%arg0: i32) -> (i32, i32) {
    %c0_i32 = arith.constant 0 : i32
    %c0_i32_0 = arith.constant 0 : i32
    %c0_i32_1 = arith.constant 0 : i32
    return %c0_i32, %c0_i32_0 : i32, i32
  }
  func.func @transform_4(%arg0: i32) -> (i32, i32) {
    %c0_i32 = arith.constant 0 : i32
    %c0_i32_0 = arith.constant 0 : i32
    %c0_i32_1 = arith.constant 0 : i32
    return %c0_i32, %c0_i32_0 : i32, i32
  }
  func.func @transform_5(%arg0: i32) -> (i32, i32) {
    %c0_i32 = arith.constant 0 : i32
    %c0_i32_0 = arith.constant 0 : i32
    %c0_i32_1 = arith.constant 0 : i32
    return %c0_i32, %c0_i32_0 : i32, i32
  }
  func.func @transform_6(%arg0: i32) -> (i32, i32) {
    %c0_i32 = arith.constant 0 : i32
    %c0_i32_0 = arith.constant 0 : i32
    return %arg0, %c0_i32 : i32, i32
  }
}

</mosaic_0001>

<bundles_post_ra>
// kernel: tpu_custom_call.1
= control target key start
LH: loop header
LB: loop body
LE: loop exit
PB: predicated region body
PF: predicated region fallthrough
CT: control target
= control target key end

     0   :  { %10 = vsyncpa [#allocation3], 0  ;;  %s7359_s0 = inlined_call_operand.vmem [shape: bf16[1536,16], index: 0, kind: input, shape index: {}]   ;;  %s7360_s1 = inlined_call_operand.vmem [shape: bf16[144,128], index: 1, kind: input, shape index: {}]   ;;  %s7361_s2 = inlined_call_operand.vmem [shape: f32[1,128], index: 2, kind: input, shape index: {}]   ;;  %s7362_s3 = inlined_call_operand.vmem [shape: bf16[144,128], index: 3, kind: input, shape index: {}]   ;;  %s7363_s4 = inlined_call_operand.vmem [shape: f32[1,128], index: 4, kind: input, shape index: {}]   ;;  %s7364_s5 = inlined_call_operand.hbm [shape: bf16[1024,128], index: 5, kind: output, shape index: {}]  }
   0x1   :  { %12 = vsyncpa [#allocation3 + $0x1], 0  ;;  %s4900_s18 = smov 0   ;;  %s4902_s19 = smov 0  }
   0x2   :  { %s4904_s20 = smov 0   ;;  %s4906_s21 = smov 0  }
   0x3 LB: > { %s4921_s22 = sadd.s32 4294967295, %s4858_s21   ;;  %s3955_s23 = sadd.s32 4294967294, %s4858_s21   ;;  %s4858_s21 = sphi %s4906_s21, %s7421_s21   ;;  %s4854_s20 = sphi %s4904_s20, %s7420_s20   ;;  %s4850_s19 = sphi %s4902_s19, %s7419_s19   ;;  %s4846_s18 = sphi %s4900_s18, %s7418_s18  }
   0x4   : > { %s4925_s24 = sadd.s32 1, %s4858_s21   ;;  %s153_s25 = sadd.s32 1, %s4854_s20 }
   0x5   : > { %s150_s26 = ssub.s32 %s4858_s21, %s4925_s24  ;;  %p163_p0 = scmp.ne.s32.totalorder %s4854_s20, %s4850_s19 }
   0x6   : > { %p151_p1 = scmp.eq.s32.totalorder %s150_s26, 0  ;;  %p164_p2 = scmp.eq.s32.totalorder %s4921_s22, 1 }
   0x7   : > { %p169_p3 = scmp.ne.s32.totalorder %s4850_s19, %s4846_s18  ;;  %p170_p4 = scmp.eq.s32.totalorder %s3955_s23, 1 }
   0x8   : > { %s4936_s27 = scalar_select %p151_p1, %s4854_s20, %s153_s25  }
   0x9   : > { %p4938_p5 = por %p164_p2, %p163_p0  ;;  %p4942_p6 = por %p170_p4, %p169_p3 }
   0xa   : > { %p3962_p7 = scmp.ge.s32.totalorder %s4858_s21, 1  ;;  %p225_p8 = scmp.lt.s32.totalorder %s4858_s21, 3 }
   0xc   : > { %p226_p9 = pnand %p3962_p7, %p225_p8 }
   0xe   : > { %229 = sbr.rel (%p226_p9) target bundleno = 1049 (0x419), region = 40 }
  0x13   : > { %s3964_s30 = sshll.u32 %s4921_s22, 9  ;;  %v4860_v0 = vmov 0   ;;  %v4473_v1 = vld [vmem:[%s7360_s1 + $0x38] sm:$0xff]   ;;  %v4474_v2 = vld [vmem:[%s7360_s1 + $0x30] sm:$0xff]   ;;  %v4475_v3 = vld [vmem:[%s7360_s1 + $0x28] sm:$0xff]   ;;  %vm842_vm0 = vcmask 1046528  }
  0x14   : > { %p264_p10 = scmp.lt.s32.totalorder %s3964_s30, 0  ;;  %s265_s6 = ssub.s32 0, %s3964_s30  ;;  %2390 = vmatprep.subr.bf16.mxu0 %v4860_v0  ;;  %3270 = vmatprep.subr.bf16.mxu1 %v4860_v0  ;;  %v4477_v4 = vld [vmem:[%s7360_s1 + $0x20] sm:$0xff]   ;;  %vm1252_vm1 = vcmask 1045504   ;;  %v4478_v14 = vld [vmem:[%s7360_s1 + $0x18] sm:$0xff]   ;;  %v4479_v28 = vld [vmem:[%s7360_s1 + $0x10] sm:$0xff]  }
  0x15   : > { %s3965_s7 = smin.u32 %s3964_s30, %s265_s6  ;;  %2391 = vmatpush1.bf16.msra.mxu0 %v4473_v1  ;;  %s4862_s9 = smov 32   ;;  %vm517_vm2 = vsmask.f32 7424  ;;  %vm1046_vm3 = vsmask.f32 6400  ;;  %v4481_v52 = vld [vmem:[%s7360_s1 + $0x8] sm:$0xff]  }
  0x16   : > { %s267_s8 = sshrl.u32 %s3965_s7, 3  ;;  %2392 = vmatprep.subr.bf16.mxu0 %v4860_v0  ;;  %s4863_s12 = smov 96   ;;  %vm1456_vm4 = vsmask.f32 5376  ;;  %v4482_v54 = vld [vmem:[%s7360_s1] sm:$0xff]   ;;  %vm1728_vm5 = vcmask 130048  }
  0x17   : > { %s268_s11 = ssub.s32 0, %s267_s8  ;;  %s4864_s13 = smov 80   ;;  %v4483_v61 = vld [vmem:[%s7360_s1 + $0x40] sm:$0xff]   ;;  %vm1662_vm6 = vcmask 1044480   ;;  %vm1793_vm7 = vcmask 261120   ;;  %vm1858_vm8 = vcmask 392192  }
  0x18   : > { %s7423_s11 = smov (!%p264_p10, %s268_s11), %s267_s8  ;;  %s4861_s8 = smov 48   ;;  %vm1923_vm9 = vcmask 523264   ;;  %vm1988_vm10 = vcmask 654336   ;;  %vm2053_vm11 = vcmask 785408   ;;  %vm2118_vm12 = vcmask 916480  }
  0x19   : > { %p270_p11 = scmp.lt.s32.totalorder %s7423_s11, 191  ;;  %2393 = vmatpush1.bf16.msra.mxu0 %v4474_v2  ;;  %s4865_s23 = smov 16  }
  0x1a   : > { %2394 = vmatprep.subr.bf16.mxu0 %v4860_v0  ;;  %s4866_s25 = smov 64   ;;  %s4867_s7 = smov 112  }
  0x1b   : > { %s7425_s11 = smov (!%p270_p11, %s7423_s11), 191  ;;  %s4223_s10 = sshll.u32 %s4921_s22, 12 }
  0x1c   : > { %s3966_s16 = sshll.u32 %s7425_s11, 2 }
  0x1d   : > { %s4968_s30 = scalar_lea.vmem %s7359_s0, %s3966_s16  ;;  %2395 = vmatpush1.bf16.msra.mxu0 %v4475_v3  ;;  %s7310_s16 = scalar_lea.hbm %s7364_s5, %s4223_s10 }
  0x1e   : > { %v4971_v5 = vld [vmem:[%s4968_s30 + $0x8] sm:$0xff]   ;;  %v4974_v6 = vld [vmem:[%s4968_s30 + $0x10] sm:$0xff]   ;;  %2396 = vmatprep.subr.bf16.mxu0 %v4860_v0  ;;  %v4978_v7 = vld [vmem:[%s4968_s30] sm:$0xff]  }
  0x1f   : > { %v844_v8 = vrot.slane %v4971_v5, 1  ;;  %v846_v9 = vrot.slane %v4974_v6, 1  ;;  %v843_v10 = vrot.slane %v4978_v7, 1  ;;  %v4984_v11 = vld [vmem:[%s4968_s30 + $0x18] sm:$0xff]   ;;  %v1254_v12 = vrot.slane %v4974_v6, 2  ;;  %v5019_v30 = vld [vmem:[%s4968_s30 + $0x20] sm:$0xff]  }
  0x20   : > { %v1253_v13 = vrot.slane %v4971_v5, 2  ;;  %v519_v16 = vshrl.u32 %v4978_v7, 16  ;;  %v521_v17 = vshll.u32 %v4978_v7, 16  ;;  %v526_v18 = vshll.u32 %v4971_v5, 16 }
  0x21   : > { %2397 = vmatpush1.bf16.msra.mxu0 %v4477_v4  ;;  %v847_v15 = vsel %vm842_vm0, %v844_v8, %v846_v9  ;;  %v845_v19 = vsel %vm842_vm0, %v843_v10, %v844_v8  ;;  %v1256_v20 = vrot.slane %v4984_v11, 2  ;;  %v530_v21 = vshrl.u32 %v4971_v5, 16 }
  0x22   : > { %2398 = vmatprep.subr.bf16.mxu0 %v4860_v0  ;;  %982 = vrot.lane.b32.xlu1 %v847_v15, %s4861_s8  ;;  %v848_v22 = vrot.slane %v4984_v11, 1  ;;  %v523_v23 = vrot.slane %v521_v17, 1  ;;  %v5003_v24 = vshll.u32 %v4974_v6, 16  ;;  %v5006_v25 = vshrl.u32 %v4974_v6, 16 }
  0x23   : > { %908 = vrot.lane.b32.xlu0 %v845_v19, %s4862_s9  ;;  %v1257_v26 = vsel %vm1252_vm1, %v1254_v12, %v1256_v20  ;;  %v1255_v27 = vsel %vm1252_vm1, %v1253_v13, %v1254_v12  ;;  %v5016_v29 = vshll.u32 %v4984_v11, 16  ;;  %v528_v31 = vrot.slane %v526_v18, 1  ;;  %v5088_v13 = vld [vmem:[%s4968_s30 + $0x28] sm:$0xff]  }
  0x24   : > { %v1047_v32 = vrot.slane %v530_v21, 1  ;;  %v1048_v33 = vrot.slane %v526_v18, 2  ;;  %v5024_v34 = vshrl.u32 %v4984_v11, 16  ;;  %v5030_v35 = vsel %vm842_vm0, %v846_v9, %v848_v22 }
  0x25   : > { %2399 = vmatpush1.bf16.msra.mxu0 %v4478_v14  ;;  %v524_v36 = vor.u32 %v523_v23, %v519_v16  ;;  %v1050_v37 = vrot.slane %v5006_v25, 1  ;;  %v1051_v38 = vrot.slane %v5003_v24, 2  ;;  %v1457_v39 = vrot.slane %v5006_v25, 2 }
  0x26   : > { %2400 = vmatprep.subr.bf16.mxu0 %v4860_v0  ;;  %1392 = vrot.lane.b32.xlu1 %v1257_v26, %s4863_s12  ;;  %v1458_v40 = vrot.slane %v5003_v24, 3  ;;  %v1460_v41 = vrot.slane %v5024_v34, 2  ;;  %v1461_v42 = vrot.slane %v5016_v29, 3  ;;  %v1049_v43 = vor.u32 %v1048_v33, %v1047_v32 }
  0x27   : > { %1318 = vrot.lane.b32.xlu0 %v1255_v27, %s4864_s13  ;;  %v529_v44 = vsel %vm517_vm2, %v524_v36, %v528_v31  ;;  %v1052_v45 = vor.u32 %v1051_v38, %v1050_v37  ;;  %v5044_v46 = vshll.u32 %v5019_v30, 16  ;;  %v5047_v47 = vshrl.u32 %v5019_v30, 16 }
  0x28   : > { %v1459_v48 = vor.u32 %v1458_v40, %v1457_v39  ;;  %v1462_v49 = vor.u32 %v1461_v42, %v1460_v41  ;;  %v1054_v50 = vrot.slane %v5024_v34, 1  ;;  %v1055_v51 = vrot.slane %v5016_v29, 2 }
  0x29   : > { %2401 = vmatpush1.bf16.msra.mxu0 %v4479_v28  ;;  %v536_v53 = vrot.slane %v5003_v24, 1  ;;  %v1053_v55 = vsel %vm1046_vm3, %v1049_v43, %v1052_v45  ;;  %v532_v56 = vor.u32 %v530_v21, %v528_v31  ;;  %v1464_v57 = vrot.slane %v5047_v47, 2  ;;  %v5119_v28 = vld [vmem:[%s4968_s30 + $0x30] sm:$0xff]  }
  0x2a   : > { %2402 = vmatprep.subr.bf16.mxu0 %v4860_v0  ;;  %984 = vrot.lane.b32.xlu1 %v5030_v35, %s4861_s8  ;;  %v1465_v58 = vrot.slane %v5044_v46, 3  ;;  %v1463_v59 = vsel %vm1456_vm4, %v1459_v48, %v1462_v49  ;;  %v1056_v60 = vor.u32 %v1055_v51, %v1054_v50  ;;  %v1258_v2 = vrot.slane %v5019_v30, 2 }
  0x2b   : > { %910 = vrot.lane.b32.xlu0 %v847_v15, %s4862_s9  ;;  %v537_v62 = vsel %vm517_vm2, %v532_v56, %v536_v53  ;;  %v1058_v4 = vrot.slane %v5047_v47, 1  ;;  %v1059_v8 = vrot.slane %v5044_v46, 2  ;;  %v540_v10 = vor.u32 %v5006_v25, %v536_v53  ;;  %4056 = vmatprep.mubr.msk.bf16.mxu1 %vm1728_vm5, %v1053_v55 }
  0x2c   : > { %v1466_v63 = vor.u32 %v1465_v58, %v1464_v57  ;;  %v5073_v1 = vsel %vm1046_vm3, %v1052_v45, %v1056_v60  ;;  %v1259_v9 = vsel %vm1252_vm1, %v1256_v20, %v1258_v2  ;;  %v544_v12 = vrot.slane %v5016_v29, 1 }
  0x2d   : > { %2403 = vmatpush1.bf16.msra.mxu0 %v4481_v52  ;;  %v850_v14 = vrot.slane %v5019_v30, 1  ;;  %v1060_v15 = vor.u32 %v1059_v8, %v1058_v4  ;;  %v5095_v17 = vshll.u32 %v5088_v13, 16  ;;  %v5098_v18 = vshrl.u32 %v5088_v13, 16  ;;  %v5187_v8 = vld [vmem:[%s4968_s30 + $0x40] sm:$0xff]  }
  0x2e   : > { %1320 = vrot.lane.b32.xlu1 %v1257_v26, %s4864_s13  ;;  %2404 = vmatprep.subr.bf16.mxu0 %v4860_v0  ;;  %v1467_v3 = vsel %vm1456_vm4, %v1462_v49, %v1466_v63  ;;  %v545_v16 = vsel %vm517_vm2, %v540_v10, %v544_v12  ;;  %v1260_v20 = vrot.slane %v5088_v13, 2  ;;  %v548_v26 = vor.u32 %v5024_v34, %v544_v12 }
  0x2f   : > { %778 = vrot.lane.b32.xlu0 %v529_v44, %s4865_s23  ;;  %v5104_v19 = vsel %vm1046_vm3, %v1056_v60, %v1060_v15  ;;  %v851_v21 = vsel %vm842_vm0, %v848_v22, %v850_v14  ;;  %v1468_v23 = vrot.slane %v5098_v18, 2  ;;  %v1469_v24 = vrot.slane %v5095_v17, 3 }
  0x30   : > { %v1261_v25 = vsel %vm1252_vm1, %v1258_v2, %v1260_v20  ;;  %v552_v27 = vrot.slane %v5044_v46, 1  ;;  %v852_v31 = vrot.slane %v5088_v13, 1  ;;  %v5126_v32 = vshll.u32 %v5119_v28, 16 }
  0x31   : > { %2405 = vmatpush1.bf16.msra.mxu0 %v4482_v54  ;;  %v1470_v29 = vor.u32 %v1469_v24, %v1468_v23  ;;  %v5129_v33 = vshrl.u32 %v5119_v28, 16  ;;  %v1063_v36 = vrot.slane %v5095_v17, 2  ;;  %v1663_v41 = vrot.slane %v4974_v6, 3  ;;  %v5162_v54 = vld [vmem:[%s4968_s30 + $0x38] sm:$0xff]  }
  0x32   : > { %1188 = vrot.lane.b32.xlu1 %v1053_v55, %s4866_s25  ;;  %2420 = vmatprep.subr.bf16.mxu0 %v4860_v0  ;;  %v553_v22 = vsel %vm517_vm2, %v548_v26, %v552_v27  ;;  %v853_v37 = vsel %vm842_vm0, %v850_v14, %v852_v31  ;;  %v1473_v39 = vrot.slane %v5126_v32, 3  ;;  %v1664_v42 = vrot.slane %v4984_v11, 3 }
  0x33   : > { %1598 = vrot.lane.b32.xlu0 %v1463_v59, %s4867_s7  ;;  %v1471_v34 = vsel %vm1456_vm4, %v1466_v63, %v1470_v29  ;;  %v1472_v38 = vrot.slane %v5129_v33, 2  ;;  %v1262_v46 = vrot.slane %v5119_v28, 2  ;;  %v1066_v49 = vrot.slane %v5129_v33, 1 }
  0x34   : > { %v1665_v44 = vsel %vm1662_vm6, %v1663_v41, %v1664_v42  ;;  %v1067_v50 = vrot.slane %v5126_v32, 2  ;;  %v556_v52 = vor.u32 %v5047_v47, %v552_v27  ;;  %v560_v53 = vrot.slane %v5095_v17, 1 }
  0x35   : > { %2421 = vmatpush2.bf16.msra.mxu0 %v4483_v61  ;;  %v1474_v43 = vor.u32 %v1473_v39, %v1472_v38  ;;  %4014 = vmatprep.mubr.msk.bf16.mxu0 %vm1728_vm5, %v1665_v44  ;;  %v1263_v51 = vsel %vm1252_vm1, %v1260_v20, %v1262_v46  ;;  %v854_v57 = vrot.slane %v5119_v28, 1  ;;  %v5169_v58 = vshll.u32 %v5162_v54, 16 }
  0x36   : > { %780 = vrot.lane.b32.xlu1 %v537_v62, %s4865_s23  ;;  %v1068_v55 = vor.u32 %v1067_v50, %v1066_v49  ;;  %v561_v56 = vsel %vm517_vm2, %v556_v52, %v560_v53  ;;  %v578_v59 = vshrl.u32 %v5162_v54, 16  ;;  %v1264_v60 = vrot.slane %v5162_v54, 2  ;;  %v5249_v52 = vld [vmem:[%s4968_s30 + $0x50] sm:$0xff]  }
  0x37   : > { %1190 = vrot.lane.b32.xlu0 %v5073_v1, %s4866_s25  ;;  %v1475_v48 = vsel %vm1456_vm4, %v1470_v29, %v1474_v43  ;;  %v855_v61 = vsel %vm842_vm0, %v852_v31, %v854_v57  ;;  %v1477_v63 = vrot.slane %v5169_v58, 3  ;;  %v568_v4 = vrot.slane %v5126_v32, 1 }
  0x38   : > { %v1476_v62 = vrot.slane %v578_v59, 2  ;;  %v1265_v2 = vsel %vm1252_vm1, %v1262_v46, %v1264_v60  ;;  %v856_v12 = vrot.slane %v5162_v54, 1  ;;  %v5194_v14 = vshll.u32 %v5187_v8, 16 }
  0x39   : > { %v1070_v17 = vrot.slane %v578_v59, 1  ;;  %v1266_v27 = vrot.slane %v5187_v8, 2  ;;  %v858_v39 = vrot.slane %v5187_v8, 1 }
  0x3a   : > { %1600 = vrot.lane.b32.xlu1 %v1467_v3, %s4867_s7  ;;  %v564_v3 = vor.u32 %v5098_v18, %v560_v53  ;;  %v857_v20 = vsel %vm842_vm0, %v854_v57, %v856_v12  ;;  %v1481_v23 = vrot.slane %v5194_v14, 3  ;;  %v1075_v31 = vrot.slane %v5194_v14, 2 }
  0x3b   : > { %1394 = vrot.lane.b32.xlu0 %v1259_v9, %s4863_s12  ;;  %v1267_v32 = vsel %vm1252_vm1, %v1264_v60, %v1266_v27  ;;  %v859_v44 = vsel %vm842_vm0, %v856_v12, %v858_v39  ;;  %v5256_v57 = vshll.u32 %v5249_v52, 16 }
  0x3c   : > { %v569_v10 = vsel %vm517_vm2, %v564_v3, %v568_v4 }
  0x3e   : > { %912 = vrot.lane.b32.xlu1 %v5030_v35, %s4862_s9  ;;  %v1062_v35 = vrot.slane %v5098_v18, 1  ;;  %v1071_v18 = vrot.slane %v5169_v58, 2 }
  0x3f   : > { %782 = vrot.lane.b32.xlu0 %v545_v16, %s4865_s23 }
  0x40   : > { %v1064_v40 = vor.u32 %v1063_v36, %v1062_v35  ;;  %v1072_v24 = vor.u32 %v1071_v18, %v1070_v17  ;;  %v576_v35 = vrot.slane %v5169_v58, 1  ;;  %v5222_v36 = vld [vmem:[%s4968_s30 + $0x48] sm:$0xff]   ;;  %v5259_v58 = vshrl.u32 %v5249_v52, 16 }
  0x41   : > { %v5232_v41 = vshrl.u32 %v5222_v36, 16 }
  0x42   : > { %1192 = vrot.lane.b32.xlu1 %v5104_v19, %s4866_s25  ;;  %v5148_v45 = vsel %vm1046_vm3, %v1060_v15, %v1064_v40  ;;  %v5175_v47 = vsel %vm1046_vm3, %v1064_v40, %v1068_v55  ;;  %v5197_v15 = vshrl.u32 %v5187_v8, 16  ;;  %v5209_v26 = vsel %vm1046_vm3, %v1068_v55, %v1072_v24 }
  0x43   : > { %986 = vrot.lane.b32.xlu0 %v851_v21, %s4861_s8  ;;  %v5229_v40 = vshll.u32 %v5222_v36, 16  ;;  %v1484_v46 = vrot.slane %v5232_v41, 2  ;;  %v580_v50 = vor.u32 %v578_v59, %v576_v35  ;;  %v1078_v60 = vrot.slane %v5232_v41, 1 }
  0x46   : > { %1396 = vrot.lane.b32.xlu1 %v1261_v25, %s4863_s12 }
  0x47   : > { %1322 = vrot.lane.b32.xlu0 %v1259_v9, %s4864_s13  ;;  %v1478_v9 = vor.u32 %v1477_v63, %v1476_v62  ;;  %v1488_v63 = vrot.slane %v5259_v58, 2 }
  0x49   : > { %v1479_v16 = vsel %vm1456_vm4, %v1474_v43, %v1478_v9  ;;  %v1268_v43 = vrot.slane %v5222_v36, 2 }
  0x4a   : > { %784 = vrot.lane.b32.xlu1 %v553_v22, %s4865_s23  ;;  %v1074_v22 = vrot.slane %v5197_v15, 1 }
  0x4b   : > { %1602 = vrot.lane.b32.xlu0 %v1471_v34, %s4867_s7  ;;  %v572_v34 = vor.u32 %v5129_v33, %v568_v4  ;;  %v1269_v49 = vsel %vm1252_vm1, %v1266_v27, %v1268_v43 }
  0x4d   : > { %v577_v38 = vsel %vm517_vm2, %v572_v34, %v576_v35 }
  0x4e   : > { %988 = vrot.lane.b32.xlu1 %v853_v37, %s4861_s8 }
  0x4f   : > { %914 = vrot.lane.b32.xlu0 %v851_v21, %s4862_s9  ;;  %v1480_v21 = vrot.slane %v5197_v15, 2 }
  0x52   : > { %1324 = vrot.lane.b32.xlu1 %v1261_v25, %s4864_s13  ;;  %v1482_v25 = vor.u32 %v1481_v23, %v1480_v21  ;;  %v5285_v21 = vld [vmem:[%s4968_s30 + $0x58] sm:$0xff]  }
  0x53   : > { %1194 = vrot.lane.b32.xlu0 %v5148_v45, %s4866_s25  ;;  %v5292_v27 = vshll.u32 %v5285_v21, 16 }
  0x54   : > { %v1483_v29 = vsel %vm1456_vm4, %v1478_v9, %v1482_v25 }
  0x55   : > { %v1493_v35 = vrot.slane %v5292_v27, 3 }
  0x56   : > { %1604 = vrot.lane.b32.xlu1 %v1475_v48, %s4867_s7  ;;  %v1485_v48 = vrot.slane %v5229_v40, 3 }
  0x57   : > { %1398 = vrot.lane.b32.xlu0 %v1263_v51, %s4863_s12 }
  0x58   : > { %v1486_v53 = vor.u32 %v1485_v48, %v1484_v46 }
  0x5a   : > { %916 = vrot.lane.b32.xlu1 %v853_v37, %s4862_s9  ;;  %v1076_v37 = vor.u32 %v1075_v31, %v1074_v22  ;;  %v1487_v59 = vsel %vm1456_vm4, %v1482_v25, %v1486_v53  ;;  %v862_v25 = vrot.slane %v5249_v52, 1  ;;  %v1272_v22 = vrot.slane %v5285_v21, 2 }
  0x5b   : > { %786 = vrot.lane.b32.xlu0 %v561_v56, %s4865_s23  ;;  %v860_v56 = vrot.slane %v5222_v36, 1 }
  0x5c   : > { %v5237_v33 = vsel %vm1046_vm3, %v1072_v24, %v1076_v37 }
  0x5d   : > { %v861_v62 = vsel %vm842_vm0, %v858_v39, %v860_v56 }
  0x5e   : > { %1196 = vrot.lane.b32.xlu1 %v5175_v47, %s4866_s25 }
  0x5f   : > { %990 = vrot.lane.b32.xlu0 %v855_v61, %s4861_s8 }
  0x62   : > { %1400 = vrot.lane.b32.xlu1 %v1265_v2, %s4863_s12 }
  0x63   : > { %1326 = vrot.lane.b32.xlu0 %v1263_v51, %s4864_s13  ;;  %v584_v51 = vrot.slane %v5194_v14, 1  ;;  %v1082_v14 = vrot.slane %v5259_v58, 1 }
  0x65   : > { %v585_v55 = vsel %vm517_vm2, %v580_v50, %v584_v51  ;;  %v588_v18 = vor.u32 %v5197_v15, %v584_v51  ;;  %v864_v50 = vrot.slane %v5285_v21, 1 }
  0x66   : > { %788 = vrot.lane.b32.xlu1 %v569_v10, %s4865_s23  ;;  %v1270_v10 = vrot.slane %v5249_v52, 2 }
  0x67   : > { %1606 = vrot.lane.b32.xlu0 %v1479_v16, %s4867_s7  ;;  %v1083_v16 = vrot.slane %v5256_v57, 2 }
  0x68   : > { %v1271_v17 = vsel %vm1252_vm1, %v1268_v43, %v1270_v10  ;;  %v5315_v43 = vld [vmem:[%s4968_s30 + $0x60] sm:$0xff]  }
  0x69   : > { %v1084_v23 = vor.u32 %v1083_v16, %v1082_v14  ;;  %v5322_v51 = vshll.u32 %v5315_v43, 16 }
  0x6a   : > { %992 = vrot.lane.b32.xlu1 %v857_v20, %s4861_s8 }
  0x6b   : > { %918 = vrot.lane.b32.xlu0 %v855_v61, %s4862_s9  ;;  %v1079_v61 = vrot.slane %v5229_v40, 2 }
  0x6d   : > { %v1080_v3 = vor.u32 %v1079_v61, %v1078_v60  ;;  %v865_v60 = vsel %vm842_vm0, %v862_v25, %v864_v50 }
  0x6e   : > { %1328 = vrot.lane.b32.xlu1 %v1265_v2, %s4864_s13  ;;  %v1489_v2 = vrot.slane %v5256_v57, 3 }
  0x6f   : > { %1198 = vrot.lane.b32.xlu0 %v5209_v26, %s4866_s25  ;;  %v5272_v9 = vsel %vm1046_vm3, %v1076_v37, %v1080_v3  ;;  %v5300_v15 = vsel %vm1046_vm3, %v1080_v3, %v1084_v23 }
  0x70   : > { %v1490_v4 = vor.u32 %v1489_v2, %v1488_v63 }
  0x72   : > { %1608 = vrot.lane.b32.xlu1 %v1483_v29, %s4867_s7  ;;  %v1491_v12 = vsel %vm1456_vm4, %v1486_v53, %v1490_v4  ;;  %v5295_v29 = vshrl.u32 %v5285_v21, 16 }
  0x73   : > { %1402 = vrot.lane.b32.xlu0 %v1267_v32, %s4863_s12 }
  0x74   : > { %v1492_v34 = vrot.slane %v5295_v29, 2 }
  0x76   : > { %920 = vrot.lane.b32.xlu1 %v857_v20, %s4862_s9  ;;  %v592_v20 = vrot.slane %v5229_v40, 1  ;;  %v600_v40 = vrot.slane %v5256_v57, 1  ;;  %v1494_v46 = vor.u32 %v1493_v35, %v1492_v34  ;;  %v1087_v57 = vrot.slane %v5292_v27, 2 }
  0x77   : > { %790 = vrot.lane.b32.xlu0 %v577_v38, %s4865_s23  ;;  %v1273_v38 = vsel %vm1252_vm1, %v1270_v10, %v1272_v22  ;;  %v1666_v10 = vrot.slane %v5019_v30, 3  ;;  %v1091_v35 = vrot.slane %v5322_v51, 2 }
  0x78   : > { %v593_v24 = vsel %vm517_vm2, %v588_v18, %v592_v20  ;;  %v596_v39 = vor.u32 %v5232_v41, %v592_v20  ;;  %v5325_v41 = vshrl.u32 %v5315_v43, 16 }
  0x7a   : > { %1200 = vrot.lane.b32.xlu1 %v5237_v33, %s4866_s25  ;;  %v1496_v61 = vrot.slane %v5325_v41, 2  ;;  %v1090_v34 = vrot.slane %v5325_v41, 1 }
  0x7b   : > { %994 = vrot.lane.b32.xlu0 %v859_v44, %s4861_s8 }
  0x7e   : > { %1404 = vrot.lane.b32.xlu1 %v1269_v49, %s4863_s12 }
  0x7f   : > { %1330 = vrot.lane.b32.xlu0 %v1267_v32, %s4864_s13  ;;  %v863_v32 = vsel %vm842_vm0, %v860_v56, %v862_v25  ;;  %v1086_v56 = vrot.slane %v5295_v29, 1 }
  0x81   : > { %v1088_v2 = vor.u32 %v1087_v57, %v1086_v56 }
  0x82   : > { %792 = vrot.lane.b32.xlu1 %v585_v55, %s4865_s23  ;;  %v1495_v55 = vsel %vm1456_vm4, %v1490_v4, %v1494_v46 }
  0x83   : > { %1610 = vrot.lane.b32.xlu0 %v1487_v59, %s4867_s7  ;;  %v5347_v18 = vsel %vm1046_vm3, %v1084_v23, %v1088_v2 }
  0x86   : > { %996 = vrot.lane.b32.xlu1 %v861_v62, %s4861_s8 }
  0x87   : > { %922 = vrot.lane.b32.xlu0 %v859_v44, %s4862_s9 }
  0x8a   : > { %1332 = vrot.lane.b32.xlu1 %v1269_v49, %s4864_s13  ;;  %v601_v49 = vsel %vm517_vm2, %v596_v39, %v600_v40 }
  0x8b   : > { %1202 = vrot.lane.b32.xlu0 %v5272_v9, %s4866_s25 }
  0x8e   : > { %1612 = vrot.lane.b32.xlu1 %v1491_v12, %s4867_s7 }
  0x8f   : > { %1406 = vrot.lane.b32.xlu0 %v1271_v17, %s4863_s12 }
  0x92   : > { %924 = vrot.lane.b32.xlu1 %v861_v62, %s4862_s9  ;;  %v1497_v62 = vrot.slane %v5322_v51, 3 }
  0x93   : > { %794 = vrot.lane.b32.xlu0 %v593_v24, %s4865_s23 }
  0x94   : > { %v983_v31 = vpop.permute.xlu1 %982  ;;  %v5343_v14 = vor.u32 %v1497_v62, %v1496_v61 }
  0x95   : > { %v909_v37 = vpop.permute.xlu0 %908 }
  0x96   : > { %1204 = vrot.lane.b32.xlu1 %v5300_v15, %s4866_s25 }
  0x97   : > { %998 = vrot.lane.b32.xlu0 %v863_v32, %s4861_s8 }
  0x98   : > { %v1393_v44 = vpop.permute.xlu1 %1392 }
  0x99   : > { %v1319_v48 = vpop.permute.xlu0 %1318 }
  0x9a   : > { %1408 = vrot.lane.b32.xlu1 %v1273_v38, %s4863_s12 }
  0x9b   : > { %1334 = vrot.lane.b32.xlu0 %v1271_v17, %s4864_s13 }
  0x9c   : > { %v985_v53 = vpop.permute.xlu1 %984 }
  0x9d   : > { %v911_v59 = vpop.permute.xlu0 %910 }
  0x9e   : > { %796 = vrot.lane.b32.xlu1 %v601_v49, %s4865_s23  ;;  %v5370_v49 = vld [vmem:[%s4968_s30 + $0x68] sm:$0xff]  }
  0x9f   : > { %1614 = vrot.lane.b32.xlu0 %v1495_v55, %s4867_s7  ;;  %v5389_v61 = vshrl.u32 %v5370_v49, 16 }
  0xa0   : > { %v1321_v63 = vpop.permute.xlu1 %1320 }
  0xa1   : > { %v779_v3 = vpop.permute.xlu0 %778 }
  0xa2   : > { %v1730_v4 = vsel %vm1728_vm5, %v4978_v7, %v779_v3  ;;  %1000 = vrot.lane.b32.xlu1 %v865_v60, %s4861_s8  ;;  %v1274_v7 = vrot.slane %v5315_v43, 2 }
  0xa3   : > { %v1795_v12 = vsel %vm1793_vm7, %v1730_v4, %v909_v37  ;;  %926 = vrot.lane.b32.xlu0 %v863_v32, %s4862_s9  ;;  %v1667_v32 = vsel %vm1662_vm6, %v1664_v42, %v1666_v10  ;;  %v604_v42 = vor.u32 %v5259_v58, %v600_v40  ;;  %v866_v58 = vrot.slane %v5315_v43, 1 }
  0xa4   : > { %v1189_v16 = vpop.permute.xlu1 %1188  ;;  %v1860_v17 = vsel %vm1858_vm8, %v1795_v12, %v983_v31  ;;  %v1499_v31 = vsel %vm1456_vm4, %v1494_v46, %v5343_v14 }
  0xa5   : > { %v1925_v20 = vsel %vm1923_vm9, %v1860_v17, %v1189_v16  ;;  %v1599_v24 = vpop.permute.xlu0 %1598  ;;  %v1276_v16 = vrot.slane %v5370_v49, 2 }
  0xa6   : > { %v1990_v25 = vsel %vm1988_vm10, %v1925_v20, %v1319_v48  ;;  %1336 = vrot.lane.b32.xlu1 %v1273_v38, %s4864_s13  ;;  %v1275_v38 = vsel %vm1252_vm1, %v1272_v22, %v1274_v7  ;;  %v608_v48 = vrot.slane %v5292_v27, 1  ;;  %v5380_v27 = vor.u32 %v1091_v35, %v1090_v34 }
  0xa7   : > { %1206 = vrot.lane.b32.xlu0 %v5347_v18, %s4866_s25  ;;  %v2055_v23 = vsel %vm2053_vm11, %v1990_v25, %v1393_v44  ;;  %v1668_v22 = vrot.slane %v5088_v13, 3 }
  0xa8   : > { %v781_v37 = vpop.permute.xlu1 %780  ;;  %v2120_v39 = vsel %vm2118_vm12, %v2055_v23, %v1599_v24  ;;  %v609_v57 = vsel %vm517_vm2, %v604_v42, %v608_v48  ;;  %v5398_v12 = vsel %vm1046_vm3, %v1088_v2, %v5380_v27  ;;  %v5419_v23 = vld [vmem:[%s4968_s30 + $0x70] sm:$0xff]  }
  0xa9   : > { %v1732_v44 = vsel %vm1728_vm5, %v4971_v5, %v781_v37  ;;  %v1191_v46 = vpop.permute.xlu0 %1190  ;;  %2423 = vmatmul.mubr.bf16.vlgmr.msra.gmra.mxu0 %v2120_v39  ;;  %v1669_v17 = vsel %vm1662_vm6, %v1666_v10, %v1668_v22  ;;  %v612_v10 = vor.u32 %v5295_v29, %v608_v48  ;;  %v5428_v29 = vshll.u32 %v5419_v23, 16 }
  0xaa   : > { %v1797_v55 = vsel %vm1793_vm7, %v1732_v44, %v911_v59  ;;  %1616 = vrot.lane.b32.xlu1 %v1499_v31, %s4867_s7  ;;  %4015 = vmatprep.mubr.msk.bf16.mxu0 %vm1728_vm5, %v1667_v32  ;;  %v5386_v59 = vshll.u32 %v5370_v49, 16  ;;  %v616_v32 = vrot.slane %v5322_v51, 1  ;;  %v5431_v51 = vshrl.u32 %v5419_v23, 16 }
  0xab   : > { %v1862_v56 = vsel %vm1858_vm8, %v1797_v55, %v985_v53  ;;  %1410 = vrot.lane.b32.xlu0 %v1275_v38, %s4863_s12  ;;  %v1094_v44 = vrot.slane %v5389_v61, 1 }
  0xac   : > { %v1927_v5 = vsel %vm1923_vm9, %v1862_v56, %v1191_v46  ;;  %v1601_v40 = vpop.permute.xlu1 %1600  ;;  %v1501_v24 = vrot.slane %v5386_v59, 3  ;;  %v617_v39 = vsel %vm517_vm2, %v612_v10, %v616_v32  ;;  %v1095_v46 = vrot.slane %v5386_v59, 2 }
  0xad   : > { %v1992_v53 = vsel %vm1988_vm10, %v1927_v5, %v1321_v63  ;;  %v1395_v62 = vpop.permute.xlu0 %1394  ;;  %v867_v63 = vsel %vm842_vm0, %v864_v50, %v866_v58  ;;  %v1277_v50 = vsel %vm1252_vm1, %v1274_v7, %v1276_v16  ;;  %v868_v7 = vrot.slane %v5370_v49, 1 }
  0xae   : > { %v2057_v3 = vsel %vm2053_vm11, %v1992_v53, %v1395_v62  ;;  %928 = vrot.lane.b32.xlu1 %v865_v60, %s4862_s9  ;;  %v1500_v60 = vrot.slane %v5389_v61, 2  ;;  %v1670_v56 = vrot.slane %v5119_v28, 3  ;;  %v1096_v62 = vor.u32 %v1095_v46, %v1094_v44 }
  0xaf   : > { %798 = vrot.lane.b32.xlu0 %v609_v57, %s4865_s23  ;;  %v2123_v4 = vsel %vm2118_vm12, %v2057_v3, %v1601_v40  ;;  %v869_v40 = vsel %vm842_vm0, %v866_v58, %v868_v7  ;;  %v1505_v57 = vrot.slane %v5428_v29, 3 }
  0xb0   : > { %v913_v20 = vpop.permute.xlu1 %912  ;;  %v1502_v34 = vor.u32 %v1501_v24, %v1500_v60  ;;  %v5456_v24 = vsel %vm1046_vm3, %v5380_v27, %v1096_v62  ;;  %v1098_v27 = vrot.slane %v5431_v51, 1 }
  0xb1   : > { %v783_v25 = vpop.permute.xlu0 %782  ;;  %2431 = vmatmul.mubr.bf16.gmra.mxu0 %v2123_v4 }
  0xb2   : > { %v1734_v2 = vsel %vm1728_vm5, %v4974_v6, %v783_v25  ;;  %1208 = vrot.lane.b32.xlu1 %v5398_v12, %s4866_s25  ;;  %4016 = vmatprep.mubr.msk.bf16.mxu0 %vm1728_vm5, %v1669_v17  ;;  %v1503_v48 = vsel %vm1456_vm4, %v5343_v14, %v1502_v34  ;;  %v1504_v14 = vrot.slane %v5431_v51, 2  ;;  %v1671_v17 = vsel %vm1662_vm6, %v1668_v22, %v1670_v56 }
  0xb3   : > { %1002 = vrot.lane.b32.xlu0 %v867_v63, %s4861_s8  ;;  %v1799_v6 = vsel %vm1793_vm7, %v1734_v2, %v913_v20  ;;  %v1278_v25 = vrot.slane %v5419_v23, 2 }
  0xb4   : > { %v1193_v31 = vpop.permute.xlu1 %1192  ;;  %v5452_v60 = vor.u32 %v1505_v57, %v1504_v14 }
  0xb5   : > { %v987_v35 = vpop.permute.xlu0 %986 }
  0xb6   : > { %v1864_v37 = vsel %vm1858_vm8, %v1799_v6, %v987_v35  ;;  %1412 = vrot.lane.b32.xlu1 %v1277_v50, %s4863_s12  ;;  %v620_v35 = vor.u32 %v5325_v41, %v616_v32 }
  0xb7   : > { %1338 = vrot.lane.b32.xlu0 %v1275_v38, %s4864_s13  ;;  %v1929_v38 = vsel %vm1923_vm9, %v1864_v37, %v1193_v31  ;;  %v1099_v31 = vrot.slane %v5428_v29, 2  ;;  %v624_v37 = vrot.slane %v5386_v59, 1  ;;  %v870_v59 = vrot.slane %v5419_v23, 1 }
  0xb8   : > { %v1397_v42 = vpop.permute.xlu1 %1396 }
  0xb9   : > { %v1323_v55 = vpop.permute.xlu0 %1322  ;;  %v5483_v44 = vor.u32 %v1099_v31, %v1098_v27  ;;  %v625_v41 = vsel %vm517_vm2, %v620_v35, %v624_v37 }
  0xba   : > { %v1994_v5 = vsel %vm1988_vm10, %v1929_v38, %v1323_v55  ;;  %800 = vrot.lane.b32.xlu1 %v617_v39, %s4865_s23 }
  0xbb   : > { %1618 = vrot.lane.b32.xlu0 %v1503_v48, %s4867_s7  ;;  %v2059_v3 = vsel %vm2053_vm11, %v1994_v5, %v1397_v42  ;;  %v1672_v48 = vrot.slane %v5162_v54, 3 }
  0xbc   : > { %v785_v53 = vpop.permute.xlu1 %784 }
  0xbd   : > { %v1603_v4 = vpop.permute.xlu0 %1602  ;;  %v1736_v22 = vsel %vm1728_vm5, %v4984_v11, %v785_v53  ;;  %v1279_v11 = vsel %vm1252_vm1, %v1276_v16, %v1278_v25  ;;  %v1673_v14 = vsel %vm1662_vm6, %v1670_v56, %v1672_v48  ;;  %v5501_v53 = vsel %vm1046_vm3, %v1096_v62, %v5483_v44 }
  0xbe   : > { %v2126_v20 = vsel %vm2118_vm12, %v2059_v3, %v1603_v4  ;;  %1004 = vrot.lane.b32.xlu1 %v869_v40, %s4861_s8 }
  0xbf   : > { %930 = vrot.lane.b32.xlu0 %v867_v63, %s4862_s9  ;;  %2439 = vmatmul.mubr.bf16.gmra.mxu0 %v2126_v20  ;;  %v1507_v63 = vsel %vm1456_vm4, %v1502_v34, %v5452_v60 }
  0xc0   : > { %v989_v58 = vpop.permute.xlu1 %988  ;;  %4017 = vmatprep.mubr.msk.bf16.mxu0 %vm1728_vm5, %v1671_v17  ;;  %v871_v17 = vsel %vm842_vm0, %v868_v7, %v870_v59  ;;  %v628_v7 = vor.u32 %v5389_v61, %v624_v37 }
  0xc1   : > { %v915_v2 = vpop.permute.xlu0 %914 }
  0xc2   : > { %v1801_v10 = vsel %vm1793_vm7, %v1736_v22, %v915_v2  ;;  %1340 = vrot.lane.b32.xlu1 %v1277_v50, %s4864_s13  ;;  %v5476_v50 = vld [vmem:[%s4968_s30 + $0x78] sm:$0xff]   ;;  %v632_v22 = vrot.slane %v5428_v29, 1  ;;  %v5521_v2 = vld [vmem:[%s4968_s30 + $0x80] sm:$0xff]  }
  0xc3   : > { %1210 = vrot.lane.b32.xlu0 %v5456_v24, %s4866_s25  ;;  %v1866_v39 = vsel %vm1858_vm8, %v1801_v10, %v989_v58  ;;  %v5488_v32 = vshll.u32 %v5476_v50, 16  ;;  %v5491_v46 = vshrl.u32 %v5476_v50, 16  ;;  %v1280_v3 = vrot.slane %v5476_v50, 2 }
  0xc4   : > { %v1325_v6 = vpop.permute.xlu1 %1324  ;;  %v5530_v61 = vshll.u32 %v5521_v2, 16  ;;  %v5533_v29 = vshrl.u32 %v5521_v2, 16 }
  0xc5   : > { %v1195_v42 = vpop.permute.xlu0 %1194  ;;  %v1509_v56 = vrot.slane %v5488_v32, 3  ;;  %v1281_v62 = vsel %vm1252_vm1, %v1278_v25, %v1280_v3  ;;  %v872_v25 = vrot.slane %v5476_v50, 1 }
  0xc6   : > { %v1931_v34 = vsel %vm1923_vm9, %v1866_v39, %v1195_v42  ;;  %1620 = vrot.lane.b32.xlu1 %v1507_v63, %s4867_s7  ;;  %v1102_v39 = vrot.slane %v5491_v46, 1  ;;  %v1103_v42 = vrot.slane %v5488_v32, 2 }
  0xc7   : > { %1414 = vrot.lane.b32.xlu0 %v1279_v11, %s4863_s12  ;;  %v1996_v38 = vsel %vm1988_vm10, %v1931_v34, %v1325_v6  ;;  %v633_v6 = vsel %vm517_vm2, %v628_v7, %v632_v22  ;;  %v1282_v7 = vrot.slane %v5521_v2, 2 }
  0xc8   : > { %v1605_v16 = vpop.permute.xlu1 %1604 }
  0xc9   : > { %v1399_v55 = vpop.permute.xlu0 %1398 }
  0xca   : > { %v2061_v5 = vsel %vm2053_vm11, %v1996_v38, %v1399_v55  ;;  %932 = vrot.lane.b32.xlu1 %v869_v40, %s4862_s9  ;;  %v1508_v40 = vrot.slane %v5491_v46, 2  ;;  %v873_v38 = vsel %vm842_vm0, %v870_v59, %v872_v25  ;;  %v1513_v55 = vrot.slane %v5530_v61, 3 }
  0xcb   : > { %802 = vrot.lane.b32.xlu0 %v625_v41, %s4865_s23  ;;  %v2129_v57 = vsel %vm2118_vm12, %v2061_v5, %v1605_v16  ;;  %v1674_v16 = vrot.slane %v5187_v8, 3 }
  0xcc   : > { %2447 = vmatmul.mubr.bf16.gmra.mxu0 %v2129_v57  ;;  %v917_v4 = vpop.permute.xlu1 %916  ;;  %v1510_v63 = vor.u32 %v1509_v56, %v1508_v40 }
  0xcd   : > { %v787_v20 = vpop.permute.xlu0 %786  ;;  %4018 = vmatprep.mubr.msk.bf16.mxu0 %vm1728_vm5, %v1673_v14  ;;  %v1104_v14 = vor.u32 %v1103_v42, %v1102_v39  ;;  %v1675_v40 = vsel %vm1662_vm6, %v1672_v48, %v1674_v16  ;;  %v1676_v42 = vrot.slane %v5222_v36, 3 }
  0xce   : > { %v1738_v58 = vsel %vm1728_vm5, %v5019_v30, %v787_v20  ;;  %1212 = vrot.lane.b32.xlu1 %v5501_v53, %s4866_s25  ;;  %v1511_v37 = vsel %vm1456_vm4, %v5452_v60, %v1510_v63  ;;  %v1512_v60 = vrot.slane %v5533_v29, 2 }
  0xcf   : > { %1006 = vrot.lane.b32.xlu0 %v871_v17, %s4861_s8  ;;  %v1803_v27 = vsel %vm1793_vm7, %v1738_v58, %v917_v4  ;;  %v5558_v58 = vsel %vm1046_vm3, %v5483_v44, %v1104_v14  ;;  %v1106_v44 = vrot.slane %v5533_v29, 1 }
  0xd0   : > { %v1197_v10 = vpop.permute.xlu1 %1196  ;;  %v5554_v20 = vor.u32 %v1513_v55, %v1512_v60 }
  0xd1   : > { %v991_v30 = vpop.permute.xlu0 %990 }
  0xd2   : > { %v1868_v31 = vsel %vm1858_vm8, %v1803_v27, %v991_v30  ;;  %1416 = vrot.lane.b32.xlu1 %v1281_v62, %s4863_s12  ;;  %v1107_v30 = vrot.slane %v5530_v61, 2 }
  0xd3   : > { %1342 = vrot.lane.b32.xlu0 %v1279_v11, %s4864_s13  ;;  %v1933_v11 = vsel %vm1923_vm9, %v1868_v31, %v1197_v10 }
  0xd4   : > { %v1401_v35 = vpop.permute.xlu1 %1400 }
  0xd5   : > { %v1327_v34 = vpop.permute.xlu0 %1326 }
  0xd6   : > { %v1998_v41 = vsel %vm1988_vm10, %v1933_v11, %v1327_v34  ;;  %804 = vrot.lane.b32.xlu1 %v633_v6, %s4865_s23  ;;  %v636_v6 = vor.u32 %v5431_v51, %v632_v22  ;;  %v5585_v11 = vor.u32 %v1107_v30, %v1106_v44 }
  0xd7   : > { %1622 = vrot.lane.b32.xlu0 %v1511_v37, %s4867_s7  ;;  %v2063_v57 = vsel %vm2053_vm11, %v1998_v41, %v1401_v35  ;;  %v640_v35 = vrot.slane %v5488_v32, 1  ;;  %v874_v32 = vrot.slane %v5521_v2, 1 }
  0xd8   : > { %v789_v5 = vpop.permute.xlu1 %788 }
  0xd9   : > { %v1607_v4 = vpop.permute.xlu0 %1606  ;;  %v1740_v48 = vsel %vm1728_vm5, %v5088_v13, %v789_v5  ;;  %v1283_v13 = vsel %vm1252_vm1, %v1280_v3, %v1282_v7  ;;  %v641_v51 = vsel %vm517_vm2, %v636_v6, %v640_v35  ;;  %v1677_v5 = vsel %vm1662_vm6, %v1674_v16, %v1676_v42 }
  0xda   : > { %v2132_v56 = vsel %vm2118_vm12, %v2063_v57, %v1607_v4  ;;  %1008 = vrot.lane.b32.xlu1 %v873_v38, %s4861_s8  ;;  %v5603_v4 = vsel %vm1046_vm3, %v1104_v14, %v5585_v11 }
  0xdb   : > { %934 = vrot.lane.b32.xlu0 %v871_v17, %s4862_s9  ;;  %2455 = vmatmul.mubr.bf16.gmra.mxu0 %v2132_v56  ;;  %v1515_v17 = vsel %vm1456_vm4, %v1510_v63, %v5554_v20 }
  0xdc   : > { %v993_v59 = vpop.permute.xlu1 %992  ;;  %4019 = vmatprep.mubr.msk.bf16.mxu0 %vm1728_vm5, %v1675_v40 }
  0xdd   : > { %v919_v10 = vpop.permute.xlu0 %918 }
  0xde   : > { %v1805_v27 = vsel %vm1793_vm7, %v1740_v48, %v919_v10  ;;  %1344 = vrot.lane.b32.xlu1 %v1281_v62, %s4864_s13  ;;  %v5578_v62 = vld [vmem:[%s4968_s30 + $0x88] sm:$0xff]  }
  0xdf   : > { %1214 = vrot.lane.b32.xlu0 %v5558_v58, %s4866_s25  ;;  %v1870_v37 = vsel %vm1858_vm8, %v1805_v27, %v993_v59  ;;  %v5590_v22 = vshll.u32 %v5578_v62, 16  ;;  %v5593_v34 = vshrl.u32 %v5578_v62, 16  ;;  %v1284_v40 = vrot.slane %v5578_v62, 2 }
  0xe0   : > { %v1329_v31 = vpop.permute.xlu1 %1328  ;;  %v875_v59 = vsel %vm842_vm0, %v872_v25, %v874_v32  ;;  %v644_v25 = vor.u32 %v5491_v46, %v640_v35  ;;  %v648_v27 = vrot.slane %v5530_v61, 1 }
  0xe1   : > { %v1199_v39 = vpop.permute.xlu0 %1198  ;;  %v1517_v16 = vrot.slane %v5590_v22, 3  ;;  %v1285_v14 = vsel %vm1252_vm1, %v1282_v7, %v1284_v40  ;;  %v876_v7 = vrot.slane %v5578_v62, 1 }
  0xe2   : > { %v1935_v63 = vsel %vm1923_vm9, %v1870_v37, %v1199_v39  ;;  %1624 = vrot.lane.b32.xlu1 %v1515_v17, %s4867_s7  ;;  %v5623_v17 = vld [vmem:[%s4968_s30 + $0x90] sm:$0xff]   ;;  %v649_v37 = vsel %vm517_vm2, %v644_v25, %v648_v27 }
  0xe3   : > { %1418 = vrot.lane.b32.xlu0 %v1283_v13, %s4863_s12  ;;  %v2000_v41 = vsel %vm1988_vm10, %v1935_v63, %v1329_v31  ;;  %v5632_v46 = vshll.u32 %v5623_v17, 16  ;;  %v5635_v61 = vshrl.u32 %v5623_v17, 16  ;;  %v1110_v63 = vrot.slane %v5593_v34, 1 }
  0xe4   : > { %v1609_v3 = vpop.permute.xlu1 %1608 }
  0xe5   : > { %v1403_v60 = vpop.permute.xlu0 %1402 }
  0xe6   : > { %v2065_v55 = vsel %vm2053_vm11, %v2000_v41, %v1403_v60  ;;  %936 = vrot.lane.b32.xlu1 %v873_v38, %s4862_s9  ;;  %v1516_v38 = vrot.slane %v5593_v34, 2  ;;  %v1678_v41 = vrot.slane %v5249_v52, 3 }
  0xe7   : > { %806 = vrot.lane.b32.xlu0 %v641_v51, %s4865_s23  ;;  %v2135_v57 = vsel %vm2118_vm12, %v2065_v55, %v1609_v3  ;;  %v1111_v3 = vrot.slane %v5590_v22, 2  ;;  %v4499_v55 = vld [vmem:[%s7362_s3 + $0x38] sm:$0xff]  }
  0xe8   : > { %2463 = vmatmul.mubr.bf16.gmra.mxu0 %v2135_v57  ;;  %v921_v56 = vpop.permute.xlu1 %920  ;;  %v1518_v30 = vor.u32 %v1517_v16, %v1516_v38  ;;  %v1521_v57 = vrot.slane %v5632_v46, 3  ;;  %3271 = vmatpush1.bf16.msra.mxu1 %v4499_v55 }
  0xe9   : > { %v791_v48 = vpop.permute.xlu0 %790  ;;  %4020 = vmatprep.mubr.msk.bf16.mxu0 %vm1728_vm5, %v1677_v5  ;;  %v1520_v5 = vrot.slane %v5635_v61, 2  ;;  %v1112_v38 = vor.u32 %v1111_v3, %v1110_v63  ;;  %3272 = vmatprep.subr.bf16.mxu1 %v4860_v0 }
  0xea   : > { %v1742_v10 = vsel %vm1728_vm5, %v5119_v28, %v791_v48  ;;  %1216 = vrot.lane.b32.xlu1 %v5603_v4, %s4866_s25  ;;  %v1519_v39 = vsel %vm1456_vm4, %v5554_v20, %v1518_v30  ;;  %v877_v20 = vsel %vm842_vm0, %v874_v32, %v876_v7  ;;  %v4500_v32 = vld [vmem:[%s7362_s3 + $0x30] sm:$0xff]  }
  0xeb   : > { %1010 = vrot.lane.b32.xlu0 %v875_v59, %s4861_s8  ;;  %v1807_v31 = vsel %vm1793_vm7, %v1742_v10, %v921_v56  ;;  %v1679_v10 = vsel %vm1662_vm6, %v1676_v42, %v1678_v41  ;;  %v1286_v42 = vrot.slane %v5623_v17, 2 }
  0xec   : > { %v1201_v44 = vpop.permute.xlu1 %1200  ;;  %3273 = vmatpush1.bf16.msra.mxu1 %v4500_v32 }
  0xed   : > { %v995_v28 = vpop.permute.xlu0 %994  ;;  %3274 = vmatprep.subr.bf16.mxu1 %v4860_v0  ;;  %v1287_v3 = vsel %vm1252_vm1, %v1284_v40, %v1286_v42 }
  0xee   : > { %v1872_v6 = vsel %vm1858_vm8, %v1807_v31, %v995_v28  ;;  %1420 = vrot.lane.b32.xlu1 %v1285_v14, %s4863_s12  ;;  %v5669_v28 = vsel %vm1046_vm3, %v5585_v11, %v1112_v38  ;;  %v4501_v11 = vld [vmem:[%s7362_s3 + $0x28] sm:$0xff]  }
  0xef   : > { %1346 = vrot.lane.b32.xlu0 %v1283_v13, %s4864_s13  ;;  %v1937_v13 = vsel %vm1923_vm9, %v1872_v6, %v1201_v44  ;;  %v5665_v44 = vor.u32 %v1521_v57, %v1520_v5  ;;  %v1680_v5 = vrot.slane %v5285_v21, 3  ;;  %v878_v57 = vrot.slane %v5623_v17, 1 }
  0xf0   : > { %v1405_v35 = vpop.permute.xlu1 %1404  ;;  %3275 = vmatpush1.bf16.msra.mxu1 %v4501_v11 }
  0xf1   : > { %v1331_v51 = vpop.permute.xlu0 %1330  ;;  %3276 = vmatprep.subr.bf16.mxu1 %v4860_v0  ;;  %v1681_v32 = vsel %vm1662_vm6, %v1678_v41, %v1680_v5  ;;  %v879_v41 = vsel %vm842_vm0, %v876_v7, %v878_v57  ;;  %v4505_v7 = vld [vmem:[%s7362_s3 + $0x10] sm:$0xff]  }
  0xf2   : > { %v2002_v60 = vsel %vm1988_vm10, %v1937_v13, %v1331_v51  ;;  %808 = vrot.lane.b32.xlu1 %v649_v37, %s4865_s23  ;;  %v656_v13 = vrot.slane %v5590_v22, 1  ;;  %v5693_v51 = vld [vmem:[%s4968_s30 + $0x98] sm:$0xff]  }
  0xf3   : > { %1626 = vrot.lane.b32.xlu0 %v1519_v39, %s4867_s7  ;;  %v2067_v16 = vsel %vm2053_vm11, %v2002_v60, %v1405_v35  ;;  %v1523_v35 = vsel %vm1456_vm4, %v1518_v30, %v5665_v44  ;;  %v1114_v39 = vrot.slane %v5635_v61, 1 }
  0xf4   : > { %v793_v56 = vpop.permute.xlu1 %792 }
  0xf5   : > { %v1611_v48 = vpop.permute.xlu0 %1610  ;;  %v1744_v6 = vsel %vm1728_vm5, %v5162_v54, %v793_v56  ;;  %v1115_v54 = vrot.slane %v5632_v46, 2  ;;  %v5709_v56 = vshll.u32 %v5693_v51, 16 }
  0xf6   : > { %v2138_v25 = vsel %vm2118_vm12, %v2067_v16, %v1611_v48  ;;  %1012 = vrot.lane.b32.xlu1 %v877_v20, %s4861_s8  ;;  %v5712_v16 = vshrl.u32 %v5693_v51, 16 }
  0xf7   : > { %938 = vrot.lane.b32.xlu0 %v875_v59, %s4862_s9  ;;  %2471 = vmatmul.mubr.bf16.gmra.mxu0 %v2138_v25  ;;  %v5704_v22 = vor.u32 %v1115_v54, %v1114_v39 }
  0xf8   : > { %v997_v31 = vpop.permute.xlu1 %996  ;;  %4021 = vmatprep.mubr.msk.bf16.mxu0 %vm1728_vm5, %v1679_v10  ;;  %v1524_v11 = vrot.slane %v5712_v16, 2 }
  0xf9   : > { %v923_v37 = vpop.permute.xlu0 %922 }
  0xfa   : > { %v1809_v59 = vsel %vm1793_vm7, %v1744_v6, %v923_v37  ;;  %1348 = vrot.lane.b32.xlu1 %v1285_v14, %s4864_s13  ;;  %v652_v14 = vor.u32 %v5533_v29, %v648_v27  ;;  %v4503_v29 = vld [vmem:[%s7362_s3 + $0x20] sm:$0xff]   ;;  %v5730_v37 = vsel %vm1046_vm3, %v1112_v38, %v5704_v22 }
  0xfb   : > { %1218 = vrot.lane.b32.xlu0 %v5669_v28, %s4866_s25  ;;  %v1874_v60 = vsel %vm1858_vm8, %v1809_v59, %v997_v31  ;;  %3277 = vmatpush1.bf16.msra.mxu1 %v4503_v29  ;;  %v4504_v31 = vld [vmem:[%s7362_s3 + $0x18] sm:$0xff]  }
  0xfc   : > { %v1333_v63 = vpop.permute.xlu1 %1332  ;;  %v657_v27 = vsel %vm517_vm2, %v652_v14, %v656_v13  ;;  %3278 = vmatprep.subr.bf16.mxu1 %v4860_v0  ;;  %v664_v14 = vrot.slane %v5632_v46, 1 }
  0xfd   : > { %v1203_v55 = vpop.permute.xlu0 %1202 }
  0xfe   : > { %v1939_v30 = vsel %vm1923_vm9, %v1874_v60, %v1203_v55  ;;  %1628 = vrot.lane.b32.xlu1 %v1523_v35, %s4867_s7  ;;  %v1525_v35 = vrot.slane %v5709_v56, 3  ;;  %v5754_v60 = vld [vmem:[%s4968_s30 + $0xa0] sm:$0xff]  }
  0xff   : > { %1422 = vrot.lane.b32.xlu0 %v1287_v3, %s4863_s12  ;;  %v2004_v48 = vsel %vm1988_vm10, %v1939_v30, %v1333_v63  ;;  %3279 = vmatpush1.bf16.msra.mxu1 %v4504_v31  ;;  %v660_v63 = vor.u32 %v5593_v34, %v656_v13  ;;  %v4507_v34 = vld [vmem:[%s7362_s3 + $0x8] sm:$0xff]   ;;  %v5767_v13 = vshll.u32 %v5754_v60, 16 }
 0x100   : > { %v1613_v40 = vpop.permute.xlu1 %1612  ;;  %3280 = vmatprep.subr.bf16.mxu1 %v4860_v0  ;;  %v1526_v55 = vor.u32 %v1525_v35, %v1524_v11 }
 0x101   : > { %v1407_v10 = vpop.permute.xlu0 %1406  ;;  %v665_v46 = vsel %vm517_vm2, %v660_v63, %v664_v14 }
 0x102   : > { %v2069_v25 = vsel %vm2053_vm11, %v2004_v48, %v1407_v10  ;;  %940 = vrot.lane.b32.xlu1 %v877_v20, %s4862_s9  ;;  %v1288_v20 = vrot.slane %v5693_v51, 2  ;;  %v1527_v10 = vsel %vm1456_vm4, %v5665_v44, %v1526_v55  ;;  %v4508_v44 = vld [vmem:[%s7362_s3] sm:$0xff]  }
 0x103   : > { %810 = vrot.lane.b32.xlu0 %v657_v27, %s4865_s23  ;;  %v2141_v6 = vsel %vm2118_vm12, %v2069_v25, %v1613_v40  ;;  %3281 = vmatpush1.bf16.msra.mxu1 %v4505_v7  ;;  %v5770_v27 = vshrl.u32 %v5754_v60, 16  ;;  %v1118_v25 = vrot.slane %v5712_v16, 1 }
 0x104   : > { %2479 = vmatmul.mubr.bf16.gmra.mxu0 %v2141_v6  ;;  %v925_v59 = vpop.permute.xlu1 %924  ;;  %v1289_v54 = vsel %vm1252_vm1, %v1286_v42, %v1288_v20  ;;  %3282 = vmatprep.subr.bf16.mxu1 %v4860_v0  ;;  %v880_v42 = vrot.slane %v5693_v51, 1  ;;  %v1682_v6 = vrot.slane %v5315_v43, 3  ;;  %v1529_v43 = vrot.slane %v5767_v13, 3 }
 0x105   : > { %v795_v39 = vpop.permute.xlu0 %794  ;;  %4022 = vmatprep.mubr.msk.bf16.mxu0 %vm1728_vm5, %v1681_v32  ;;  %v1119_v32 = vrot.slane %v5709_v56, 2  ;;  %v1528_v35 = vrot.slane %v5770_v27, 2 }
 0x106   : > { %v1746_v38 = vsel %vm1728_vm5, %v5187_v8, %v795_v39  ;;  %1220 = vrot.lane.b32.xlu1 %v5730_v37, %s4866_s25  ;;  %v881_v11 = vsel %vm842_vm0, %v878_v57, %v880_v42  ;;  %v4509_v57 = vld [vmem:[%s7362_s3 + $0x40] sm:$0xff]  }
 0x107   : > { %1014 = vrot.lane.b32.xlu0 %v879_v41, %s4861_s8  ;;  %v1811_v30 = vsel %vm1793_vm7, %v1746_v38, %v925_v59  ;;  %3283 = vmatpush1.bf16.msra.mxu1 %v4507_v34  ;;  %v1120_v38 = vor.u32 %v1119_v32, %v1118_v25  ;;  %v668_v25 = vor.u32 %v5635_v61, %v664_v14  ;;  %v672_v32 = vrot.slane %v5709_v56, 1 }
 0x108   : > { %v1205_v8 = vpop.permute.xlu1 %1204  ;;  %3284 = vmatprep.subr.bf16.mxu1 %v4860_v0  ;;  %v882_v56 = vrot.slane %v5754_v60, 1 }
 0x109   : > { %v999_v29 = vpop.permute.xlu0 %998  ;;  %v5805_v21 = vsel %vm1046_vm3, %v5704_v22, %v1120_v38  ;;  %v673_v61 = vsel %vm517_vm2, %v668_v25, %v672_v32 }
 0x10a   : > { %v1876_v40 = vsel %vm1858_vm8, %v1811_v30, %v999_v29  ;;  %1424 = vrot.lane.b32.xlu1 %v1289_v54, %s4863_s12  ;;  %v5801_v29 = vor.u32 %v1529_v43, %v1528_v35 }
 0x10b   : > { %1350 = vrot.lane.b32.xlu0 %v1287_v3, %s4864_s13  ;;  %v1941_v3 = vsel %vm1923_vm9, %v1876_v40, %v1205_v8  ;;  %3285 = vmatpush1.bf16.msra.mxu1 %v4508_v44  ;;  %v1683_v8 = vsel %vm1662_vm6, %v1680_v5, %v1682_v6 }
 0x10c   : > { %v1409_v48 = vpop.permute.xlu1 %1408  ;;  %3300 = vmatprep.subr.bf16.mxu1 %v4860_v0  ;;  %v1290_v0 = vrot.slane %v5754_v60, 2  ;;  %v1531_v22 = vsel %vm1456_vm4, %v1526_v55, %v5801_v29 }
 0x10d   : > { %v1335_v31 = vpop.permute.xlu0 %1334 }
 0x10e   : > { %v2006_v59 = vsel %vm1988_vm10, %v1941_v3, %v1335_v31  ;;  %812 = vrot.lane.b32.xlu1 %v665_v46, %s4865_s23  ;;  %v1122_v46 = vrot.slane %v5770_v27, 1 }
 0x10f   : > { %1630 = vrot.lane.b32.xlu0 %v1527_v10, %s4867_s7  ;;  %v2071_v7 = vsel %vm2053_vm11, %v2006_v59, %v1409_v48  ;;  %3301 = vmatpush2.bf16.msra.mxu1 %v4509_v57  ;;  %v1123_v48 = vrot.slane %v5767_v13, 2  ;;  %v1684_v59 = vrot.slane %v5370_v49, 3 }
 0x110   : > { %v797_v39 = vpop.permute.xlu1 %796 }
 0x111   : > { %v1615_v63 = vpop.permute.xlu0 %1614  ;;  %v1748_v5 = vsel %vm1728_vm5, %v5222_v36, %v797_v39  ;;  %v1291_v36 = vsel %vm1252_vm1, %v1288_v20, %v1290_v0  ;;  %v5832_v44 = vor.u32 %v1123_v48, %v1122_v46 }
 0x112   : > { %v2144_v30 = vsel %vm2118_vm12, %v2071_v7, %v1615_v63  ;;  %1016 = vrot.lane.b32.xlu1 %v881_v11, %s4861_s8  ;;  %v1685_v7 = vsel %vm1662_vm6, %v1682_v6, %v1684_v59 }
 0x113   : > { %942 = vrot.lane.b32.xlu0 %v879_v41, %s4862_s9  ;;  %2487 = vmatmul.mubr.bf16.gmra.mxu0 %v2144_v30 }
 0x114   : > { %v1001_v40 = vpop.permute.xlu1 %1000  ;;  %4023 = vmatprep.mubr.msk.bf16.mxu0 %vm1728_vm5, %v1683_v8  ;;  %v5850_v8 = vsel %vm1046_vm3, %v1120_v38, %v5832_v44 }
 0x115   : > { %v927_v34 = vpop.permute.xlu0 %926 }
 0x116   : > { %v1813_v41 = vsel %vm1793_vm7, %v1748_v5, %v927_v34  ;;  %1352 = vrot.lane.b32.xlu1 %v1289_v54, %s4864_s13  ;;  %v5825_v54 = vld [vmem:[%s4968_s30 + $0xa8] sm:$0xff]  }
 0x117   : > { %1222 = vrot.lane.b32.xlu0 %v5805_v21, %s4866_s25  ;;  %v1878_v3 = vsel %vm1858_vm8, %v1813_v41, %v1001_v40  ;;  %v5837_v14 = vshll.u32 %v5825_v54, 16  ;;  %v5840_v35 = vshrl.u32 %v5825_v54, 16  ;;  %v1292_v30 = vrot.slane %v5825_v54, 2 }
 0x118   : > { %v1337_v10 = vpop.permute.xlu1 %1336  ;;  %v883_v40 = vsel %vm842_vm0, %v880_v42, %v882_v56  ;;  %v676_v42 = vor.u32 %v5712_v16, %v672_v32  ;;  %v680_v41 = vrot.slane %v5767_v13, 1 }
 0x119   : > { %v1207_v31 = vpop.permute.xlu0 %1206  ;;  %v1533_v6 = vrot.slane %v5837_v14, 3  ;;  %v1293_v38 = vsel %vm1252_vm1, %v1290_v0, %v1292_v30  ;;  %v884_v0 = vrot.slane %v5825_v54, 1 }
 0x11a   : > { %v1943_v55 = vsel %vm1923_vm9, %v1878_v3, %v1207_v31  ;;  %1632 = vrot.lane.b32.xlu1 %v1531_v22, %s4867_s7  ;;  %v5870_v22 = vld [vmem:[%s4968_s30 + $0xb0] sm:$0xff]   ;;  %v681_v3 = vsel %vm517_vm2, %v676_v42, %v680_v41 }
 0x11b   : > { %1426 = vrot.lane.b32.xlu0 %v1291_v36, %s4863_s12  ;;  %v2008_v43 = vsel %vm1988_vm10, %v1943_v55, %v1337_v10  ;;  %v5879_v16 = vshll.u32 %v5870_v22, 16  ;;  %v5882_v13 = vshrl.u32 %v5870_v22, 16  ;;  %v1126_v55 = vrot.slane %v5840_v35, 1 }
 0x11c   : > { %v1617_v20 = vpop.permute.xlu1 %1616 }
 0x11d   : > { %v1411_v39 = vpop.permute.xlu0 %1410 }
 0x11e   : > { %v2073_v49 = vsel %vm2053_vm11, %v2008_v43, %v1411_v39  ;;  %944 = vrot.lane.b32.xlu1 %v881_v11, %s4862_s9  ;;  %v1532_v11 = vrot.slane %v5840_v35, 2  ;;  %v1686_v43 = vrot.slane %v5419_v23, 3 }
 0x11f   : > { %814 = vrot.lane.b32.xlu0 %v673_v61, %s4865_s23  ;;  %v2147_v63 = vsel %vm2118_vm12, %v2073_v49, %v1617_v20  ;;  %v1127_v20 = vrot.slane %v5837_v14, 2  ;;  %v885_v49 = vsel %vm842_vm0, %v882_v56, %v884_v0 }
 0x120   : > { %2495 = vmatmul.mubr.bf16.gmra.mxu0 %v2147_v63  ;;  %v929_v57 = vpop.permute.xlu1 %928  ;;  %v1534_v48 = vor.u32 %v1533_v6, %v1532_v11  ;;  %v1687_v6 = vsel %vm1662_vm6, %v1684_v59, %v1686_v43  ;;  %v4774_v59 = vld [vmem:[%s4968_s30 + $0x58] sm:$0xff]  }
 0x121   : > { %v799_v5 = vpop.permute.xlu0 %798  ;;  %4024 = vmatprep.mubr.msk.bf16.mxu0 %vm1728_vm5, %v1685_v7  ;;  %v1537_v7 = vrot.slane %v5879_v16, 3 }
 0x122   : > { %v1750_v34 = vsel %vm1728_vm5, %v5249_v52, %v799_v5  ;;  %1224 = vrot.lane.b32.xlu1 %v5850_v8, %s4866_s25  ;;  %v1535_v31 = vsel %vm1456_vm4, %v5801_v29, %v1534_v48  ;;  %v1536_v29 = vrot.slane %v5882_v13, 2 }
 0x123   : > { %1018 = vrot.lane.b32.xlu0 %v883_v40, %s4861_s8  ;;  %v1815_v10 = vsel %vm1793_vm7, %v1750_v34, %v929_v57  ;;  %v1128_v57 = vor.u32 %v1127_v20, %v1126_v55  ;;  %v684_v55 = vor.u32 %v5770_v27, %v680_v41  ;;  %v688_v20 = vrot.slane %v5837_v14, 1 }
 0x124   : > { %v1209_v46 = vpop.permute.xlu1 %1208  ;;  %v5903_v56 = vor.u32 %v1537_v7, %v1536_v29  ;;  %v886_v14 = vrot.slane %v5870_v22, 1 }
 0x125   : > { %v1003_v52 = vpop.permute.xlu0 %1002  ;;  %v5907_v42 = vsel %vm1046_vm3, %v5832_v44, %v1128_v57  ;;  %v689_v27 = vsel %vm517_vm2, %v684_v55, %v688_v20 }
 0x126   : > { %v1880_v25 = vsel %vm1858_vm8, %v1815_v10, %v1003_v52  ;;  %1428 = vrot.lane.b32.xlu1 %v1293_v38, %s4863_s12  ;;  %v1539_v44 = vsel %vm1456_vm4, %v1534_v48, %v5903_v56 }
 0x127   : > { %1354 = vrot.lane.b32.xlu0 %v1291_v36, %s4864_s13  ;;  %v1945_v36 = vsel %vm1923_vm9, %v1880_v25, %v1209_v46  ;;  %v1294_v46 = vrot.slane %v5870_v22, 2 }
 0x128   : > { %v1413_v32 = vpop.permute.xlu1 %1412 }
 0x129   : > { %v1339_v61 = vpop.permute.xlu0 %1338 }
 0x12a   : > { %v2010_v39 = vsel %vm1988_vm10, %v1945_v36, %v1339_v61  ;;  %816 = vrot.lane.b32.xlu1 %v681_v3, %s4865_s23  ;;  %v1131_v3 = vrot.slane %v5879_v16, 2 }
 0x12b   : > { %1634 = vrot.lane.b32.xlu0 %v1535_v31, %s4867_s7  ;;  %v2075_v11 = vsel %vm2053_vm11, %v2010_v39, %v1413_v32  ;;  %v1295_v31 = vsel %vm1252_vm1, %v1292_v30, %v1294_v46  ;;  %v1688_v39 = vrot.slane %v5476_v50, 3 }
 0x12c   : > { %v801_v63 = vpop.permute.xlu1 %800 }
 0x12d   : > { %v1619_v23 = vpop.permute.xlu0 %1618  ;;  %v1752_v10 = vsel %vm1728_vm5, %v4774_v59, %v801_v63 }
 0x12e   : > { %v2150_v5 = vsel %vm2118_vm12, %v2075_v11, %v1619_v23  ;;  %1020 = vrot.lane.b32.xlu1 %v885_v49, %s4861_s8  ;;  %v1689_v23 = vsel %vm1662_vm6, %v1686_v43, %v1688_v39 }
 0x12f   : > { %946 = vrot.lane.b32.xlu0 %v883_v40, %s4862_s9  ;;  %2503 = vmatmul.mubr.bf16.gmra.mxu0 %v2150_v5  ;;  %v1130_v40 = vrot.slane %v5882_v13, 1 }
 0x130   : > { %v1005_v34 = vpop.permute.xlu1 %1004  ;;  %4025 = vmatprep.mubr.msk.bf16.mxu0 %vm1728_vm5, %v1687_v6 }
 0x131   : > { %v931_v52 = vpop.permute.xlu0 %930  ;;  %v5934_v29 = vor.u32 %v1131_v3, %v1130_v40  ;;  %v696_v40 = vrot.slane %v5879_v16, 1  ;;  %v5972_v3 = vld [vmem:[%s4968_s30 + $0xc0] sm:$0xff]  }
 0x132   : > { %v1817_v25 = vsel %vm1793_vm7, %v1752_v10, %v931_v52  ;;  %1356 = vrot.lane.b32.xlu1 %v1293_v38, %s4864_s13  ;;  %v5927_v38 = vld [vmem:[%s4968_s30 + $0xb8] sm:$0xff]   ;;  %v887_v10 = vsel %vm842_vm0, %v884_v0, %v886_v14  ;;  %v692_v0 = vor.u32 %v5840_v35, %v688_v20  ;;  %v5981_v35 = vshll.u32 %v5972_v3, 16 }
 0x133   : > { %1226 = vrot.lane.b32.xlu0 %v5907_v42, %s4866_s25  ;;  %v1882_v36 = vsel %vm1858_vm8, %v1817_v25, %v1005_v34  ;;  %v5939_v41 = vshll.u32 %v5927_v38, 16  ;;  %v5942_v7 = vshrl.u32 %v5927_v38, 16  ;;  %v5952_v5 = vsel %vm1046_vm3, %v1128_v57, %v5934_v29  ;;  %v4775_v25 = vld [vmem:[%s4968_s30 + $0x60] sm:$0xff]  }
 0x134   : > { %v1341_v32 = vpop.permute.xlu1 %1340  ;;  %7387 = vst [vmem:[#allocation5_spill] sm:$0xff] %v5952_v5  ;;  %v1296_v34 = vrot.slane %v5927_v38, 2  ;;  %v5984_v16 = vshrl.u32 %v5972_v3, 16 }
 0x135   : > { %v1211_v61 = vpop.permute.xlu0 %1210  ;;  %v1541_v43 = vrot.slane %v5939_v41, 3 }
 0x136   : > { %v1947_v48 = vsel %vm1923_vm9, %v1882_v36, %v1211_v61  ;;  %1636 = vrot.lane.b32.xlu1 %v1539_v44, %s4867_s7  ;;  %v1297_v44 = vsel %vm1252_vm1, %v1294_v46, %v1296_v34  ;;  %v888_v46 = vrot.slane %v5927_v38, 1 }
 0x137   : > { %1430 = vrot.lane.b32.xlu0 %v1295_v31, %s4863_s12  ;;  %v2012_v63 = vsel %vm1988_vm10, %v1947_v48, %v1341_v32 }
 0x138   : > { %v1621_v30 = vpop.permute.xlu1 %1620 }
 0x139   : > { %v1415_v11 = vpop.permute.xlu0 %1414 }
 0x13a   : > { %v2077_v50 = vsel %vm2053_vm11, %v2012_v63, %v1415_v11  ;;  %948 = vrot.lane.b32.xlu1 %v885_v49, %s4862_s9  ;;  %v1540_v49 = vrot.slane %v5942_v7, 2  ;;  %v1134_v63 = vrot.slane %v5942_v7, 1  ;;  %v1135_v11 = vrot.slane %v5939_v41, 2 }
 0x13b   : > { %818 = vrot.lane.b32.xlu0 %v689_v27, %s4865_s23  ;;  %v2153_v6 = vsel %vm2118_vm12, %v2077_v50, %v1621_v30  ;;  %v697_v30 = vsel %vm517_vm2, %v692_v0, %v696_v40 }
 0x13c   : > { %2511 = vmatmul.mubr.bf16.gmra.mxu0 %v2153_v6  ;;  %v933_v59 = vpop.permute.xlu1 %932  ;;  %v1542_v55 = vor.u32 %v1541_v43, %v1540_v49  ;;  %v1545_v49 = vrot.slane %v5981_v35, 3 }
 0x13d   : > { %v803_v52 = vpop.permute.xlu0 %802  ;;  %4026 = vmatprep.mubr.msk.bf16.mxu0 %vm1728_vm5, %v1689_v23  ;;  %v1690_v23 = vrot.slane %v5521_v2, 3 }
 0x13e   : > { %v1754_v57 = vsel %vm1728_vm5, %v4775_v25, %v803_v52  ;;  %1228 = vrot.lane.b32.xlu1 %v5952_v5, %s4866_s25  ;;  %v1543_v27 = vsel %vm1456_vm4, %v5903_v56, %v1542_v55  ;;  %v1544_v56 = vrot.slane %v5984_v16, 2  ;;  %v1136_v52 = vor.u32 %v1135_v11, %v1134_v63 }
 0x13f   : > { %1022 = vrot.lane.b32.xlu0 %v887_v10, %s4861_s8  ;;  %v1819_v36 = vsel %vm1793_vm7, %v1754_v57, %v933_v59  ;;  %v889_v59 = vsel %vm842_vm0, %v886_v14, %v888_v46  ;;  %v1691_v57 = vsel %vm1662_vm6, %v1688_v39, %v1690_v23  ;;  %v4776_v39 = vld [vmem:[%s4968_s30 + $0x68] sm:$0xff]  }
 0x140   : > { %v1213_v32 = vpop.permute.xlu1 %1212  ;;  %v6005_v14 = vor.u32 %v1545_v49, %v1544_v56  ;;  %v1692_v49 = vrot.slane %v5578_v62, 3 }
 0x141   : > { %v1007_v61 = vpop.permute.xlu0 %1006 }
 0x142   : > { %v1884_v48 = vsel %vm1858_vm8, %v1819_v36, %v1007_v61  ;;  %1432 = vrot.lane.b32.xlu1 %v1297_v44, %s4863_s12  ;;  %v6009_v36 = vsel %vm1046_vm3, %v5934_v29, %v1136_v52  ;;  %v1298_v61 = vrot.slane %v5972_v3, 2  ;;  %v1547_v29 = vsel %vm1456_vm4, %v1542_v55, %v6005_v14 }
 0x143   : > { %1358 = vrot.lane.b32.xlu0 %v1295_v31, %s4864_s13  ;;  %v1949_v31 = vsel %vm1923_vm9, %v1884_v48, %v1213_v32  ;;  %7388 = vst [vmem:[#allocation6_spill] sm:$0xff] %v6009_v36 }
 0x144   : > { %v1417_v20 = vpop.permute.xlu1 %1416  ;;  %v1299_v11 = vsel %vm1252_vm1, %v1296_v34, %v1298_v61 }
 0x145   : > { %v1343_v50 = vpop.permute.xlu0 %1342 }
 0x146   : > { %v2014_v6 = vsel %vm1988_vm10, %v1949_v31, %v1343_v50  ;;  %820 = vrot.lane.b32.xlu1 %v697_v30, %s4865_s23  ;;  %v700_v31 = vor.u32 %v5882_v13, %v696_v40  ;;  %v704_v50 = vrot.slane %v5939_v41, 1  ;;  %v890_v41 = vrot.slane %v5972_v3, 1 }
 0x147   : > { %1638 = vrot.lane.b32.xlu0 %v1543_v27, %s4867_s7  ;;  %v2079_v25 = vsel %vm2053_vm11, %v2014_v6, %v1417_v20  ;;  %v1139_v27 = vrot.slane %v5981_v35, 2 }
 0x148   : > { %v805_v43 = vpop.permute.xlu1 %804  ;;  %v705_v13 = vsel %vm517_vm2, %v700_v31, %v704_v50  ;;  %v712_v31 = vrot.slane %v5981_v35, 1 }
 0x149   : > { %v1623_v2 = vpop.permute.xlu0 %1622  ;;  %v1756_v48 = vsel %vm1728_vm5, %v4776_v39, %v805_v43 }
 0x14a   : > { %v2156_v0 = vsel %vm2118_vm12, %v2079_v25, %v1623_v2  ;;  %1024 = vrot.lane.b32.xlu1 %v889_v59, %s4861_s8 }
 0x14b   : > { %950 = vrot.lane.b32.xlu0 %v887_v10, %s4862_s9  ;;  %2519 = vmatmul.mubr.bf16.gmra.mxu0 %v2156_v0  ;;  %v1138_v10 = vrot.slane %v5984_v16, 1  ;;  %v1693_v0 = vsel %vm1662_vm6, %v1690_v23, %v1692_v49 }
 0x14c   : > { %v1009_v32 = vpop.permute.xlu1 %1008  ;;  %4027 = vmatprep.mubr.msk.bf16.mxu0 %vm1728_vm5, %v1691_v57 }
 0x14d   : > { %v935_v30 = vpop.permute.xlu0 %934  ;;  %v6036_v43 = vor.u32 %v1139_v27, %v1138_v10  ;;  %v4777_v10 = vld [vmem:[%s4968_s30 + $0x70] sm:$0xff]  }
 0x14e   : > { %v1821_v20 = vsel %vm1793_vm7, %v1756_v48, %v935_v30  ;;  %1360 = vrot.lane.b32.xlu1 %v1297_v44, %s4864_s13  ;;  %v6029_v44 = vld [vmem:[%s4968_s30 + $0xc8] sm:$0xff]  }
 0x14f   : > { %1230 = vrot.lane.b32.xlu0 %v6009_v36, %s4866_s25  ;;  %v1886_v6 = vsel %vm1858_vm8, %v1821_v20, %v1009_v32  ;;  %v6041_v40 = vshll.u32 %v6029_v44, 16  ;;  %v6044_v25 = vshrl.u32 %v6029_v44, 16  ;;  %v6054_v39 = vsel %vm1046_vm3, %v1136_v52, %v6036_v43  ;;  %v6068_v52 = vld [vmem:[%s4968_s30 + $0xd0] sm:$0xff]  }
 0x150   : > { %v1345_v63 = vpop.permute.xlu1 %1344  ;;  %7389 = vst [vmem:[#allocation7_spill] sm:$0xff] %v6054_v39  ;;  %v1300_v48 = vrot.slane %v6029_v44, 2  ;;  %v891_v20 = vsel %vm842_vm0, %v888_v46, %v890_v41  ;;  %v892_v35 = vrot.slane %v6029_v44, 1 }
 0x151   : > { %v1215_v56 = vpop.permute.xlu0 %1214  ;;  %v1549_v23 = vrot.slane %v6041_v40, 3 }
 0x152   : > { %v1951_v55 = vsel %vm1923_vm9, %v1886_v6, %v1215_v56  ;;  %1640 = vrot.lane.b32.xlu1 %v1547_v29, %s4867_s7  ;;  %v1301_v46 = vsel %vm1252_vm1, %v1298_v61, %v1300_v48 }
 0x153   : > { %1434 = vrot.lane.b32.xlu0 %v1299_v11, %s4863_s12  ;;  %v2016_v2 = vsel %vm1988_vm10, %v1951_v55, %v1345_v63  ;;  %v708_v63 = vor.u32 %v5942_v7, %v704_v50 }
 0x154   : > { %v1625_v34 = vpop.permute.xlu1 %1624 }
 0x155   : > { %v1419_v57 = vpop.permute.xlu0 %1418  ;;  %v713_v7 = vsel %vm517_vm2, %v708_v63, %v712_v31 }
 0x156   : > { %v2081_v62 = vsel %vm2053_vm11, %v2016_v2, %v1419_v57  ;;  %952 = vrot.lane.b32.xlu1 %v889_v59, %s4862_s9  ;;  %v1548_v59 = vrot.slane %v6044_v25, 2  ;;  %v6080_v2 = vshll.u32 %v6068_v52, 16  ;;  %v6083_v57 = vshrl.u32 %v6068_v52, 16 }
 0x157   : > { %822 = vrot.lane.b32.xlu0 %v705_v13, %s4865_s23  ;;  %v2159_v32 = vsel %vm2118_vm12, %v2081_v62, %v1625_v34  ;;  %v1142_v62 = vrot.slane %v6044_v25, 1 }
 0x158   : > { %2527 = vmatmul.mubr.bf16.gmra.mxu0 %v2159_v32  ;;  %v937_v30 = vpop.permute.xlu1 %936  ;;  %v1550_v56 = vor.u32 %v1549_v23, %v1548_v59  ;;  %v1694_v59 = vrot.slane %v5623_v17, 3 }
 0x159   : > { %v807_v29 = vpop.permute.xlu0 %806  ;;  %4028 = vmatprep.mubr.msk.bf16.mxu0 %vm1728_vm5, %v1693_v0  ;;  %v1143_v0 = vrot.slane %v6041_v40, 2 }
 0x15a   : > { %v1758_v27 = vsel %vm1728_vm5, %v4777_v10, %v807_v29  ;;  %1232 = vrot.lane.b32.xlu1 %v6054_v39, %s4866_s25  ;;  %v1551_v50 = vsel %vm1456_vm4, %v6005_v14, %v1550_v56  ;;  %v1553_v29 = vrot.slane %v6080_v2, 3  ;;  %v893_v14 = vsel %vm842_vm0, %v890_v41, %v892_v35  ;;  %v6116_v41 = vld [vmem:[%s7361_s2] ss:$0 sm:$0xff] }
 0x15b   : > { %1026 = vrot.lane.b32.xlu0 %v891_v20, %s4861_s8  ;;  %v1823_v55 = vsel %vm1793_vm7, %v1758_v27, %v937_v30  ;;  %v6102_v27 = vor.u32 %v1143_v0, %v1142_v62 }
 0x15c   : > { %v1217_v6 = vpop.permute.xlu1 %1216 }
 0x15d   : > { %v1011_v34 = vpop.permute.xlu0 %1010 }
 0x15e   : > { %v1888_v13 = vsel %vm1858_vm8, %v1823_v55, %v1011_v34  ;;  %1436 = vrot.lane.b32.xlu1 %v1301_v46, %s4863_s12  ;;  %v1695_v55 = vsel %vm1662_vm6, %v1692_v49, %v1694_v59  ;;  %v7365_v49 = vrot.slane %v6068_v52, 2 }
 0x15f   : > { %1362 = vrot.lane.b32.xlu0 %v1299_v11, %s4864_s13  ;;  %v1953_v32 = vsel %vm1923_vm9, %v1888_v13, %v1217_v6  ;;  %v1552_v11 = vrot.slane %v6083_v57, 2 }
 0x160   : > { %v1421_v61 = vpop.permute.xlu1 %1420 }
 0x161   : > { %v1347_v30 = vpop.permute.xlu0 %1346  ;;  %v6110_v13 = vor.u32 %v1553_v29, %v1552_v11  ;;  %v716_v11 = vor.u32 %v5984_v16, %v712_v31  ;;  %v720_v29 = vrot.slane %v6041_v40, 1 }
 0x162   : > { %v2018_v23 = vsel %vm1988_vm10, %v1953_v32, %v1347_v30  ;;  %824 = vrot.lane.b32.xlu1 %v713_v7, %s4865_s23 }
 0x163   : > { %1642 = vrot.lane.b32.xlu0 %v1551_v50, %s4867_s7  ;;  %v2083_v63 = vsel %vm2053_vm11, %v2018_v23, %v1421_v61  ;;  %v6121_v61 = vsel %vm1046_vm3, %v6036_v43, %v6102_v27  ;;  %v4778_v50 = vld [vmem:[%s4968_s30 + $0x78] sm:$0xff]   ;;  %v1555_v43 = vsel %vm1456_vm4, %v1550_v56, %v6110_v13 }
 0x164   : > { %v809_v10 = vpop.permute.xlu1 %808  ;;  %7390 = vst [vmem:[#allocation8_spill] sm:$0xff] %v6121_v61  ;;  %v6149_v56 = vld [vmem:[%s4968_s30 + $0xd8] sm:$0xff]  }
 0x165   : > { %v1627_v6 = vpop.permute.xlu0 %1626  ;;  %v1760_v62 = vsel %vm1728_vm5, %v4778_v50, %v809_v10  ;;  %v1146_v10 = vrot.slane %v6083_v57, 1  ;;  %v7369_v17 = vrot.slane %v6149_v56, 2 }
 0x166   : > { %v2162_v34 = vsel %vm2118_vm12, %v2083_v63, %v1627_v6  ;;  %1028 = vrot.lane.b32.xlu1 %v893_v14, %s4861_s8  ;;  %v1147_v63 = vrot.slane %v6080_v2, 2 }
 0x167   : > { %954 = vrot.lane.b32.xlu0 %v891_v20, %s4862_s9  ;;  %2535 = vmatmul.mubr.bf16.gmra.mxu0 %v2162_v34 }
 0x168   : > { %v1013_v7 = vpop.permute.xlu1 %1012  ;;  %4029 = vmatprep.mubr.msk.bf16.mxu0 %vm1728_vm5, %v1695_v55 }
 0x169   : > { %v939_v20 = vpop.permute.xlu0 %938  ;;  %v2424_v0 = vpop.f32.mrf.mxu0 }
 0x16a   : > { %v1825_v32 = vsel %vm1793_vm7, %v1760_v62, %v939_v20  ;;  %v6129_v30 = vadd.f32 %v6116_v41, %v2424_v0  ;;  %1364 = vrot.lane.b32.xlu1 %v1301_v46, %s4864_s13  ;;  %v6146_v46 = vsel %vm1252_vm1, %v1300_v48, %v7365_v49  ;;  %v7366_v20 = vrot.slane %v5693_v51, 3 }
 0x16b   : > { %1234 = vrot.lane.b32.xlu0 %v6121_v61, %s4866_s25  ;;  %v2426_v23 = vpop.f32.mrf.mxu0  ;;  %v1890_v16 = vsel %vm1858_vm8, %v1825_v32, %v1013_v7  ;;  %v721_v0 = vsel %vm517_vm2, %v716_v11, %v720_v29  ;;  %v7367_v7 = vrot.slane %v6068_v52, 1  ;;  %v6162_v32 = vor.u32 %v1147_v63, %v1146_v10 }
 0x16c   : > { %v2679_v6 = vsub.f32 0.0, %v6129_v30  ;;  %v1349_v55 = vpop.permute.xlu1 %1348  ;;  %v1697_v63 = vsel %vm1662_vm6, %v1694_v59, %v7366_v20  ;;  %v7394_v61 = vrot.slane %v6068_v52, 1 }
 0x16d   : > { %v1219_v31 = vpop.permute.xlu0 %1218  ;;  %v2427_v40 = vpop.f32.mrf.mxu0 }
 0x16e   : > { %v2743_v34 = vmul.f32 1.442695, %v2679_v6  ;;  %v1955_v50 = vsel %vm1923_vm9, %v1890_v16, %v1219_v31  ;;  %v6154_v62 = vadd.f32 %v6116_v41, %v2427_v40  ;;  %1644 = vrot.lane.b32.xlu1 %v1555_v43, %s4867_s7  ;;  %v6166_v16 = vshll.u32 %v6149_v56, 16 }
 0x16f   : > { %1438 = vrot.lane.b32.xlu0 %v6146_v46, %s4863_s12  ;;  %v2429_v48 = vpop.f32.mrf.mxu0  ;;  %v6169_v43 = vshrl.u32 %v6149_v56, 16  ;;  %v2020_v31 = vsel %vm1988_vm10, %v1955_v50, %v1349_v55  ;;  %v6189_v50 = vsel %vm842_vm0, %v892_v35, %v7367_v7 }
 0x170   : > { %4518 = vpow2.f32 %v2743_v34  ;;  %v2680_v23 = vsub.f32 0.0, %v6154_v62  ;;  %v1629_v6 = vpop.permute.xlu1 %1628 }
 0x171   : > { %v1423_v40 = vpop.permute.xlu0 %1422  ;;  %v2432_v48 = vpop.f32.mrf.mxu0 }
 0x172   : > { %v2745_v49 = vmul.f32 1.442695, %v2680_v23  ;;  %v2085_v11 = vsel %vm2053_vm11, %v2020_v31, %v1423_v40  ;;  %v6174_v10 = vadd.f32 %v6116_v41, %v2432_v48  ;;  %956 = vrot.lane.b32.xlu1 %v893_v14, %s4862_s9  ;;  %v6194_v14 = vsel %vm1046_vm3, %v6102_v27, %v6162_v32  ;;  %v4779_v48 = vld [vmem:[%s4968_s30 + $0x80] sm:$0xff]  }
 0x173   : > { %826 = vrot.lane.b32.xlu0 %v721_v0, %s4865_s23  ;;  %v2434_v34 = vpop.f32.mrf.mxu0  ;;  %v2165_v55 = vsel %vm2118_vm12, %v2085_v11, %v1629_v6  ;;  %7391 = vst [vmem:[#allocation9_spill] sm:$0xff] %v6194_v14  ;;  %v1556_v23 = vrot.slane %v6169_v43, 2  ;;  %v1557_v6 = vrot.slane %v6166_v16, 3  ;;  %v724_v40 = vor.u32 %v6044_v25, %v720_v29 }
 0x174   : > { %4520 = vpow2.f32 %v2745_v49  ;;  %v2681_v59 = vsub.f32 0.0, %v6174_v10  ;;  %2543 = vmatmul.mubr.bf16.gmra.mxu0 %v2165_v55  ;;  %v941_v0 = vpop.permute.xlu1 %940  ;;  %v7368_v34 = vrot.slane %v6080_v2, 1  ;;  %v7392_v25 = vrot.slane %v6068_v52, 2 }
 0x175   : > { %v811_v31 = vpop.permute.xlu0 %810  ;;  %v2435_v35 = vpop.f32.mrf.mxu0  ;;  %4030 = vmatprep.mubr.msk.bf16.mxu0 %vm1728_vm5, %v1697_v63  ;;  %v6220_v63 = vld [vmem:[%s4968_s30 + $0xe0] sm:$0xff]   ;;  %v7395_v52 = vrot.slane %v5754_v60, 3 }
 0x176   : > { %v2747_v27 = vmul.f32 1.442695, %v2681_v59  ;;  %v1762_v11 = vsel %vm1728_vm5, %v4779_v48, %v811_v31  ;;  %v6205_v49 = vadd.f32 %v6116_v41, %v2435_v35  ;;  %1236 = vrot.lane.b32.xlu1 %v6194_v14, %s4866_s25  ;;  %v6217_v29 = vsel %vm1252_vm1, %v7392_v25, %v7369_v17 }
 0x177   : > { %1030 = vrot.lane.b32.xlu0 %v6189_v50, %s4861_s8  ;;  %v2437_v55 = vpop.f32.mrf.mxu0  ;;  %v6223_v35 = vor.u32 %v1557_v6, %v1556_v23  ;;  %v1827_v48 = vsel %vm1793_vm7, %v1762_v11, %v941_v0  ;;  %v729_v25 = vsel %vm517_vm2, %v724_v40, %v7368_v34  ;;  %v1150_v23 = vrot.slane %v6169_v43, 1 }
 0x178   : > { %4522 = vpow2.f32 %v2747_v27  ;;  %v2682_v59 = vsub.f32 0.0, %v6205_v49  ;;  %v1221_v31 = vpop.permute.xlu1 %1220  ;;  %v1151_v0 = vrot.slane %v6166_v16, 2  ;;  %v6238_v6 = vshll.u32 %v6220_v63, 16 }
 0x179   : > { %v1015_v20 = vpop.permute.xlu0 %1014  ;;  %v1559_v40 = vsel %vm1456_vm4, %v6110_v13, %v6223_v35 }
 0x17a   : > { %v2749_v7 = vmul.f32 1.442695, %v2682_v59  ;;  %v1892_v55 = vsel %vm1858_vm8, %v1827_v48, %v1015_v20  ;;  %1440 = vrot.lane.b32.xlu1 %v6217_v29, %s4863_s12  ;;  %v6241_v20 = vshrl.u32 %v6220_v63, 16  ;;  %v6258_v39 = vor.u32 %v1151_v0, %v1150_v23 }
 0x17b   : > { %1366 = vrot.lane.b32.xlu0 %v6146_v46, %s4864_s13  ;;  %v1957_v48 = vsel %vm1923_vm9, %v1892_v55, %v1221_v31  ;;  %v1561_v55 = vrot.slane %v6238_v6, 3 }
 0x17c   : > { %4524 = vpow2.f32 %v2749_v7  ;;  %v1425_v11 = vpop.permute.xlu1 %1424  ;;  %v7393_v7 = vrot.slane %v6149_v56, 1  ;;  %v1560_v31 = vrot.slane %v6241_v20, 2 }
 0x17d   : > { %v4519_v59 = vpop.eup %4518  ;;  %v1351_v46 = vpop.permute.xlu0 %1350 }
 0x17e   : > { %v2871_v17 = vadd.f32 1.0, %v4519_v59  ;;  %v2022_v27 = vsel %vm1988_vm10, %v1957_v48, %v1351_v46  ;;  %828 = vrot.lane.b32.xlu1 %v729_v25, %s4865_s23  ;;  %v6256_v13 = vsel %vm842_vm0, %v7394_v61, %v7393_v7  ;;  %v7396_v61 = vrot.slane %v5693_v51, 3 }
 0x17f   : > { %v2440_v14 = vpop.f32.mrf.mxu0  ;;  %1646 = vrot.lane.b32.xlu0 %v1559_v40, %s4867_s7  ;;  %v2087_v40 = vsel %vm2053_vm11, %v2022_v27, %v1425_v11  ;;  %v6280_v51 = vsel %vm1046_vm3, %v6162_v32, %v6258_v39  ;;  %v6292_v32 = vld [vmem:[%s4968_s30 + $0xe8] sm:$0xff]  }
 0x180   : > { %v6263_v59 = vadd.f32 %v6116_v41, %v2440_v14  ;;  %v813_v25 = vpop.permute.xlu1 %812  ;;  %v1699_v23 = vsel %vm1662_vm6, %v7396_v61, %v7395_v52  ;;  %4526 = vrcp.f32 %v2871_v17  ;;  %7397 = vst [vmem:[#allocation10_spill] sm:$0xff] %v6280_v51  ;;  %v6282_v17 = vor.u32 %v1561_v55, %v1560_v31 }
 0x181   : > { %v4521_v48 = vpop.eup %4520  ;;  %v2442_v46 = vpop.f32.mrf.mxu0 }
 0x182   : > { %v1631_v34 = vpop.permute.xlu0 %1630  ;;  %v2872_v0 = vadd.f32 1.0, %v4521_v48  ;;  %v2683_v7 = vsub.f32 0.0, %v6263_v59  ;;  %1032 = vrot.lane.b32.xlu1 %v6256_v13, %s4861_s8  ;;  %v7377_v48 = vrot.slane %v6220_v63, 2 }
 0x183   : > { %v2168_v14 = vsel %vm2118_vm12, %v2087_v40, %v1631_v34  ;;  %v2443_v36 = vpop.f32.mrf.mxu0  ;;  %958 = vrot.lane.b32.xlu0 %v6189_v50, %s4862_s9  ;;  %v4780_v50 = vld [vmem:[%s4968_s30 + $0x88] sm:$0xff]  }
 0x184   : > { %2551 = vmatmul.mubr.bf16.gmra.mxu0 %v2168_v14  ;;  %4528 = vrcp.f32 %v2872_v0  ;;  %v2751_v27 = vmul.f32 1.442695, %v2683_v7  ;;  %v6285_v34 = vadd.f32 %v6116_v41, %v2443_v36  ;;  %v1017_v11 = vpop.permute.xlu1 %1016  ;;  %v1764_v46 = vsel %vm1728_vm5, %v4780_v50, %v813_v25 }
 0x185   : > { %4031 = vmatprep.mubr.msk.bf16.mxu0 %vm1728_vm5, %v1699_v23  ;;  %v4523_v40 = vpop.eup %4522  ;;  %v2445_v52 = vpop.f32.mrf.mxu0  ;;  %v1563_v25 = vsel %vm1456_vm4, %v6223_v35, %v6282_v17  ;;  %v1154_v23 = vrot.slane %v6241_v20, 1  ;;  %v1155_v0 = vrot.slane %v6238_v6, 2 }
 0x186   : > { %v943_v61 = vpop.permute.xlu0 %942  ;;  %v2873_v31 = vadd.f32 1.0, %v4523_v40  ;;  %4530 = vpow2.f32 %v2751_v27  ;;  %v2684_v55 = vsub.f32 0.0, %v6285_v34  ;;  %1368 = vrot.lane.b32.xlu1 %v6217_v29, %s4864_s13  ;;  %v7398_v27 = vrot.slane %v6149_v56, 2 }
 0x187   : > { %v1829_v36 = vsel %vm1793_vm7, %v1764_v46, %v943_v61  ;;  %1238 = vrot.lane.b32.xlu0 %v6280_v51, %s4866_s25  ;;  %v7399_v29 = vrot.slane %v6080_v2, 1  ;;  %v736_v46 = vrot.slane %v6166_v16, 1  ;;  %v6321_v51 = vshrl.u32 %v6292_v32, 16 }
 0x188   : > { %v2753_v7 = vmul.f32 1.442695, %v2684_v55  ;;  %v1353_v14 = vpop.permute.xlu1 %1352  ;;  %v6310_v40 = vsel %vm1252_vm1, %v7398_v27, %v7377_v48  ;;  %4532 = vrcp.f32 %v2873_v31  ;;  %v1894_v52 = vsel %vm1858_vm8, %v1829_v36, %v1017_v11  ;;  %v4781_v48 = vld [vmem:[%s4968_s30 + $0x90] sm:$0xff]  }
 0x189   : > { %v732_v50 = vor.u32 %v6083_v57, %v7399_v29  ;;  %v4525_v35 = vpop.eup %4524  ;;  %v6318_v55 = vshll.u32 %v6292_v32, 16  ;;  %v7376_v2 = vrot.slane %v5825_v54, 3  ;;  %v6328_v57 = vor.u32 %v1155_v0, %v1154_v23 }
 0x18a   : > { %v1223_v61 = vpop.permute.xlu0 %1222  ;;  %v2874_v5 = vadd.f32 1.0, %v4525_v35  ;;  %4534 = vpow2.f32 %v2753_v7  ;;  %1648 = vrot.lane.b32.xlu1 %v1563_v25, %s4867_s7  ;;  %v7378_v36 = vrot.slane %v6220_v63, 1  ;;  %v1564_v35 = vrot.slane %v6321_v51, 2 }
 0x18b   : > { %v1959_v27 = vsel %vm1923_vm9, %v1894_v52, %v1223_v61  ;;  %1442 = vrot.lane.b32.xlu0 %v6310_v40, %s4863_s12  ;;  %v737_v31 = vsel %vm517_vm2, %v732_v50, %v736_v46  ;;  %v1565_v52 = vrot.slane %v6318_v55, 3 }
 0x18c   : > { %4536 = vrcp.f32 %v2874_v5  ;;  %v2448_v16 = vpop.f32.mrf.mxu0  ;;  %v1633_v11 = vpop.permute.xlu1 %1632  ;;  %v2024_v7 = vsel %vm1988_vm10, %v1959_v27, %v1353_v14  ;;  %v7400_v5 = vrot.slane %v5754_v60, 3 }
 0x18d   : > { %v6334_v29 = vadd.f32 %v6116_v41, %v2448_v16  ;;  %v4527_v50 = vpop.eup %4526  ;;  %v6352_v16 = vsel %vm1046_vm3, %v6258_v39, %v6328_v57  ;;  %v6365_v39 = vor.u32 %v1565_v52, %v1564_v35 }
 0x18e   : > { %v1427_v25 = vpop.permute.xlu0 %1426  ;;  %v2450_v0 = vpop.f32.mrf.mxu0  ;;  %960 = vrot.lane.b32.xlu1 %v6256_v13, %s4862_s9  ;;  %v1701_v14 = vsel %vm1662_vm6, %v7400_v5, %v7376_v2  ;;  %v1308_v13 = vrot.slane %v6292_v32, 2  ;;  %v740_v2 = vor.u32 %v6169_v43, %v736_v46  ;;  %v6387_v43 = vld [vmem:[%s4968_s30 + $0xf0] sm:$0xff]  }
 0x18f   : > { %v2089_v23 = vsel %vm2053_vm11, %v2024_v7, %v1427_v25  ;;  %v2685_v61 = vsub.f32 0.0, %v6334_v29  ;;  %830 = vrot.lane.b32.xlu0 %v737_v31, %s4865_s23  ;;  %v7401_v25 = vrot.slane %v6149_v56, 1 }
 0x190   : > { %v2171_v27 = vsel %vm2118_vm12, %v2089_v23, %v1633_v11  ;;  %v2451_v7 = vpop.f32.mrf.mxu0  ;;  %v945_v60 = vpop.permute.xlu1 %944 }
 0x191   : > { %2559 = vmatmul.mubr.bf16.gmra.mxu0 %v2171_v27  ;;  %v6360_v0 = vsel %vm842_vm0, %v7401_v25, %v7378_v36  ;;  %v4529_v31 = vpop.eup %4528  ;;  %v2755_v11 = vmul.f32 1.442695, %v2685_v61  ;;  %v6363_v23 = vadd.f32 %v6116_v41, %v2451_v7  ;;  %v2999_v27 = vmul.f32 %v4527_v50, %v6129_v30 }
 0x192   : > { %v815_v5 = vpop.permute.xlu0 %814  ;;  %4032 = vmatprep.mubr.msk.bf16.mxu0 %vm1728_vm5, %v1701_v14  ;;  %v3000_v56 = vmul.f32 %v4529_v31, %v6154_v62  ;;  %v2453_v36 = vpop.f32.mrf.mxu0  ;;  %1240 = vrot.lane.b32.xlu1 %v6352_v16, %s4866_s25  ;;  %v7379_v61 = vrot.slane %v6238_v6, 1  ;;  %v7402_v30 = vrot.slane %v6220_v63, 2 }
 0x193   : > { %v1766_v25 = vsel %vm1728_vm5, %v4781_v48, %v815_v5  ;;  %v4531_v7 = vpop.eup %4530  ;;  %4538 = vpow2.f32 %v2755_v11  ;;  %v2686_v35 = vsub.f32 0.0, %v6363_v23  ;;  %1034 = vrot.lane.b32.xlu0 %v6360_v0, %s4861_s8  ;;  %v1567_v5 = vsel %vm1456_vm4, %v6282_v17, %v6365_v39 }
 0x194   : > { %v6384_v62 = vsel %vm1252_vm1, %v7402_v30, %v1308_v13  ;;  %v2875_v48 = vadd.f32 1.0, %v4531_v7  ;;  %v1225_v46 = vpop.permute.xlu1 %1224  ;;  %v3063_v36 = vpack.c.bf16 %v3000_v56, %v2999_v27  ;;  %v1831_v14 = vsel %vm1793_vm7, %v1766_v25, %v945_v60 }
 0x195   : > { %v2757_v52 = vmul.f32 1.442695, %v2686_v35  ;;  %v4533_v31 = vpop.eup %4532  ;;  %v745_v7 = vsel %vm517_vm2, %v740_v2, %v7379_v61  ;;  %v7380_v60 = vrot.slane %v6292_v32, 1  ;;  %v6405_v56 = vshll.u32 %v6387_v43, 16 }
 0x196   : > { %v1019_v50 = vpop.permute.xlu0 %1018  ;;  %3303 = vmatmul.mubr.bf16.vlgmr.msra.gmra.mxu1 %v3063_v36  ;;  %1444 = vrot.lane.b32.xlu1 %v6384_v62, %s4863_s12  ;;  %v6408_v25 = vshrl.u32 %v6387_v43, 16  ;;  %v1158_v2 = vrot.slane %v6321_v51, 1  ;;  %v1159_v30 = vrot.slane %v6318_v55, 2 }
 0x197   : > { %v1896_v11 = vsel %vm1858_vm8, %v1831_v14, %v1019_v50  ;;  %v4535_v27 = vpop.eup %4534  ;;  %4540 = vpow2.f32 %v2757_v52  ;;  %1370 = vrot.lane.b32.xlu0 %v6310_v40, %s4864_s13  ;;  %4057 = vmatprep.mubr.msk.bf16.mxu1 %vm1728_vm5, %v5073_v1  ;;  %v1702_v1 = vrot.slane %v5870_v22, 3  ;;  %v3001_v14 = vmul.f32 %v4533_v31, %v6174_v10 }
 0x198   : > { %4542 = vrcp.f32 %v2875_v48  ;;  %v2876_v17 = vadd.f32 1.0, %v4535_v27  ;;  %v1429_v35 = vpop.permute.xlu1 %1428  ;;  %v1961_v40 = vsel %vm1923_vm9, %v1896_v11, %v1225_v46  ;;  %v7403_v27 = vrot.slane %v6220_v63, 1 }
 0x199   : > { %v4537_v36 = vpop.eup %4536  ;;  %v1568_v11 = vrot.slane %v6408_v25, 2  ;;  %v1569_v10 = vrot.slane %v6405_v56, 3  ;;  %v7404_v63 = vrot.slane %v5825_v54, 3 }
 0x19a   : > { %v1355_v52 = vpop.permute.xlu0 %1354  ;;  %v3002_v50 = vmul.f32 %v4537_v36, %v6205_v49  ;;  %4544 = vrcp.f32 %v2876_v17  ;;  %832 = vrot.lane.b32.xlu1 %v745_v7, %s4865_s23  ;;  %v6424_v46 = vsel %vm842_vm0, %v7403_v27, %v7380_v60  ;;  %v6431_v7 = vor.u32 %v1159_v30, %v1158_v2 }
 0x19b   : > { %v2026_v61 = vsel %vm1988_vm10, %v1961_v40, %v1355_v52  ;;  %v2456_v48 = vpop.f32.mrf.mxu0  ;;  %1650 = vrot.lane.b32.xlu0 %v1567_v5, %s4867_s7  ;;  %v1703_v52 = vsel %vm1662_vm6, %v7404_v63, %v1702_v1 }
 0x19c   : > { %v6429_v49 = vadd.f32 %v6116_v41, %v2456_v48  ;;  %v817_v31 = vpop.permute.xlu1 %816  ;;  %v3064_v17 = vpack.c.bf16 %v3002_v50, %v3001_v14  ;;  %v2091_v5 = vsel %vm2053_vm11, %v2026_v61, %v1429_v35  ;;  %v6445_v61 = vor.u32 %v1569_v10, %v1568_v11  ;;  %v4782_v11 = vld [vmem:[%s4968_s30 + $0x98] sm:$0xff]  }
 0x19d   : > { %v2458_v36 = vpop.f32.mrf.mxu0  ;;  %v6453_v50 = vsel %vm1046_vm3, %v6328_v57, %v6431_v7  ;;  %v1768_v10 = vsel %vm1728_vm5, %v4782_v11, %v817_v31  ;;  %v1162_v31 = vrot.slane %v6408_v25, 1 }
 0x19e   : > { %v1635_v40 = vpop.permute.xlu0 %1634  ;;  %v2687_v27 = vsub.f32 0.0, %v6429_v49  ;;  %3311 = vmatmul.mubr.bf16.gmra.mxu1 %v3064_v17  ;;  %1036 = vrot.lane.b32.xlu1 %v6424_v46, %s4861_s8  ;;  %v1310_v17 = vrot.slane %v6387_v43, 2 }
 0x19f   : > { %v2174_v48 = vsel %vm2118_vm12, %v2091_v5, %v1635_v40  ;;  %v2459_v2 = vpop.f32.mrf.mxu0  ;;  %962 = vrot.lane.b32.xlu0 %v6360_v0, %s4862_s9  ;;  %4058 = vmatprep.mubr.msk.bf16.mxu1 %vm1728_vm5, %v5104_v19  ;;  %v6462_v40 = vld [vmem:[%s4968_s30 + $0xf8] sm:$0xff]   ;;  %v1571_v19 = vsel %vm1456_vm4, %v6365_v39, %v6445_v61  ;;  %v752_v39 = vrot.slane %v6318_v55, 1 }
 0x1a0   : > { %2567 = vmatmul.mubr.bf16.gmra.mxu0 %v2174_v48  ;;  %v4539_v54 = vpop.eup %4538  ;;  %v2759_v35 = vmul.f32 1.442695, %v2687_v27  ;;  %v6448_v30 = vadd.f32 %v6116_v41, %v2459_v2  ;;  %v1021_v14 = vpop.permute.xlu1 %1020 }
 0x1a1   : > { %4033 = vmatprep.mubr.msk.bf16.mxu0 %vm1728_vm5, %v1703_v52  ;;  %v2877_v0 = vadd.f32 1.0, %v4539_v54  ;;  %v2461_v5 = vpop.f32.mrf.mxu0  ;;  %v1163_v52 = vrot.slane %v6405_v56, 2  ;;  %v7405_v54 = vrot.slane %v6238_v6, 1  ;;  %v6493_v6 = vshll.u32 %v6462_v40, 16 }
 0x1a2   : > { %v947_v36 = vpop.permute.xlu0 %946  ;;  %4546 = vpow2.f32 %v2759_v35  ;;  %v2688_v63 = vsub.f32 0.0, %v6448_v30  ;;  %1372 = vrot.lane.b32.xlu1 %v6384_v62, %s4864_s13  ;;  %v6480_v62 = vsel %vm1252_vm1, %v1308_v13, %v1310_v17 }
 0x1a3   : > { %v1833_v57 = vsel %vm1793_vm7, %v1768_v10, %v947_v36  ;;  %1242 = vrot.lane.b32.xlu0 %v6453_v50, %s4866_s25  ;;  %v748_v35 = vor.u32 %v6241_v20, %v7405_v54  ;;  %4548 = vrcp.f32 %v2877_v0  ;;  %v1704_v20 = vrot.slane %v5927_v38, 3 }
 0x1a4   : > { %v4541_v27 = vpop.eup %4540  ;;  %v2761_v48 = vmul.f32 1.442695, %v2688_v63  ;;  %v1357_v2 = vpop.permute.xlu1 %1356  ;;  %v1898_v5 = vsel %vm1858_vm8, %v1833_v57, %v1021_v14  ;;  %v6488_v63 = vshrl.u32 %v6462_v40, 16  ;;  %v6498_v13 = vor.u32 %v1163_v52, %v1162_v31 }
 0x1a5   : > { %v4543_v11 = vpop.eup %4542  ;;  %v2878_v10 = vadd.f32 1.0, %v4541_v27  ;;  %v1573_v52 = vrot.slane %v6493_v6, 3 }
 0x1a6   : > { %v1227_v36 = vpop.permute.xlu0 %1226  ;;  %4550 = vpow2.f32 %v2761_v48  ;;  %1652 = vrot.lane.b32.xlu1 %v1571_v19, %s4867_s7  ;;  %v3003_v14 = vmul.f32 %v4543_v11, %v6263_v59  ;;  %v753_v19 = vsel %vm517_vm2, %v748_v35, %v752_v39  ;;  %v902_v48 = vrot.slane %v6387_v43, 1 }
 0x1a7   : > { %v1963_v60 = vsel %vm1923_vm9, %v1898_v5, %v1227_v36  ;;  %v4545_v55 = vpop.eup %4544  ;;  %4552 = vrcp.f32 %v2878_v10  ;;  %1446 = vrot.lane.b32.xlu0 %v6480_v62, %s4863_s12  ;;  %v1572_v36 = vrot.slane %v6488_v63, 2  ;;  %v7382_v11 = vrot.slane %v6462_v40, 2 }
 0x1a8   : > { %v3004_v0 = vmul.f32 %v4545_v55, %v6285_v34  ;;  %v2464_v57 = vpop.f32.mrf.mxu0  ;;  %v1637_v27 = vpop.permute.xlu1 %1636  ;;  %v2028_v54 = vsel %vm1988_vm10, %v1963_v60, %v1357_v2  ;;  %v1705_v60 = vsel %vm1662_vm6, %v1702_v1, %v1704_v20  ;;  %v7406_v1 = vrot.slane %v6292_v32, 1 }
 0x1a9   : > { %v6506_v5 = vadd.f32 %v6116_v41, %v2464_v57  ;;  %v350_v57 = vld [vmem:[%s4968_s30 + $0x104] sm:$0xf] }
 0x1aa   : > { %v1431_v10 = vpop.permute.xlu0 %1430  ;;  %v2466_v59 = vpop.f32.mrf.mxu0  ;;  %964 = vrot.lane.b32.xlu1 %v6424_v46, %s4862_s9  ;;  %v3065_v34 = vpack.c.bf16 %v3004_v0, %v3003_v14  ;;  %v6524_v46 = vsel %vm1046_vm3, %v6431_v7, %v6498_v13  ;;  %v6532_v14 = vsel %vm842_vm0, %v7406_v1, %v902_v48  ;;  %v6535_v0 = vld [vmem:[%s4968_s30 + $0x100] sm:$0xf] }
 0x1ab   : > { %v2093_v31 = vsel %vm2053_vm11, %v2028_v54, %v1431_v10  ;;  %v2689_v2 = vsub.f32 0.0, %v6506_v5  ;;  %834 = vrot.lane.b32.xlu0 %v753_v19, %s4865_s23  ;;  %v4783_v54 = vld [vmem:[%s4968_s30 + $0xa0] sm:$0xff]   ;;  %v756_v59 = vor.u32 %v6321_v51, %v752_v39 }
 0x1ac   : > { %v2177_v35 = vsel %vm2118_vm12, %v2093_v31, %v1637_v27  ;;  %v2467_v55 = vpop.f32.mrf.mxu0  ;;  %3319 = vmatmul.mubr.bf16.gmra.mxu1 %v3065_v34  ;;  %v949_v22 = vpop.permute.xlu1 %948  ;;  %v6548_v31 = vor.u32 %v1573_v52, %v1572_v36  ;;  %v7381_v34 = vrot.slane %v6405_v56, 1  ;;  %v6563_v36 = vcombine.low %v6535_v0, %v350_v57 }
 0x1ad   : > { %2575 = vmatmul.mubr.bf16.gmra.mxu0 %v2177_v35  ;;  %v2763_v27 = vmul.f32 1.442695, %v2689_v2  ;;  %v6539_v7 = vadd.f32 %v6116_v41, %v2467_v55  ;;  %4059 = vmatprep.mubr.msk.bf16.mxu1 %vm1728_vm5, %v5148_v45  ;;  %v6560_v45 = vsel %vm1252_vm1, %v1310_v17, %v7382_v11 }
 0x1ae   : > { %v819_v19 = vpop.permute.xlu0 %818  ;;  %4034 = vmatprep.mubr.msk.bf16.mxu0 %vm1728_vm5, %v1705_v60  ;;  %v2469_v32 = vpop.f32.mrf.mxu0  ;;  %1244 = vrot.lane.b32.xlu1 %v6524_v46, %s4866_s25  ;;  %v1575_v17 = vsel %vm1456_vm4, %v6445_v61, %v6548_v31  ;;  %v761_v57 = vsel %vm517_vm2, %v756_v59, %v7381_v34  ;;  %v1167_v59 = vrot.slane %v6493_v6, 2  ;;  %v7383_v34 = vrot.slane %v5972_v3, 3 }
 0x1af   : > { %v1770_v10 = vsel %vm1728_vm5, %v4783_v54, %v819_v19  ;;  %v4547_v2 = vpop.eup %4546  ;;  %4554 = vpow2.f32 %v2763_v27  ;;  %v2690_v35 = vsub.f32 0.0, %v6539_v7  ;;  %1038 = vrot.lane.b32.xlu0 %v6532_v14, %s4861_s8  ;;  %v1171_v54 = vshrl.u32 %v6563_v36, 16 }
 0x1b0   : > { %v2879_v51 = vadd.f32 1.0, %v4547_v2  ;;  %v1229_v39 = vpop.permute.xlu1 %1228  ;;  %v1835_v60 = vsel %vm1793_vm7, %v1770_v10, %v949_v22  ;;  %v4549_v1 = vpop.eup %4548  ;;  %v6578_v22 = vrot.slane %v6462_v40, 1  ;;  %v1174_v10 = vshll.u32 %v6563_v36, 16 }
 0x1b1   : > { %v2765_v52 = vmul.f32 1.442695, %v2690_v35  ;;  %v1166_v35 = vrot.slane %v6488_v63, 1  ;;  %v6621_v38 = vrot.slane %v6563_v36, 2 }
 0x1b2   : > { %v1023_v55 = vpop.permute.xlu0 %1022  ;;  %1448 = vrot.lane.b32.xlu1 %v6560_v45, %s4863_s12 }
 0x1b3   : > { %v1900_v27 = vsel %vm1858_vm8, %v1835_v60, %v1023_v55  ;;  %v4551_v19 = vpop.eup %4550  ;;  %4556 = vpow2.f32 %v2765_v52  ;;  %1374 = vrot.lane.b32.xlu0 %v6480_v62, %s4864_s13  ;;  %v3005_v52 = vmul.f32 %v4549_v1, %v6334_v29  ;;  %v6595_v29 = vsel %vm842_vm0, %v902_v48, %v6578_v22 }
 0x1b4   : > { %v4553_v32 = vpop.eup %4552  ;;  %4558 = vrcp.f32 %v2879_v51  ;;  %v2880_v2 = vadd.f32 1.0, %v4551_v19  ;;  %v1433_v61 = vpop.permute.xlu1 %1432  ;;  %v1965_v62 = vsel %vm1923_vm9, %v1900_v27, %v1229_v39  ;;  %v1577_v39 = vrot.slane %v1174_v10, 3 }
 0x1b5   : > { %v3006_v60 = vmul.f32 %v4553_v32, %v6363_v23  ;;  %v1576_v23 = vrot.slane %v1171_v54, 2  ;;  %v6600_v32 = vor.u32 %v1167_v59, %v1166_v35  ;;  %v1707_v48 = vsel %vm1662_vm6, %v1704_v20, %v7383_v34 }
 0x1b6   : > { %v1359_v55 = vpop.permute.xlu0 %1358  ;;  %4560 = vrcp.f32 %v2880_v2  ;;  %836 = vrot.lane.b32.xlu1 %v761_v57, %s4865_s23 }
 0x1b7   : > { %v2030_v11 = vsel %vm1988_vm10, %v1965_v62, %v1359_v55  ;;  %v2472_v51 = vpop.f32.mrf.mxu0  ;;  %1654 = vrot.lane.b32.xlu0 %v1575_v17, %s4867_s7  ;;  %v3066_v19 = vpack.c.bf16 %v3006_v60, %v3005_v52  ;;  %v6609_v52 = vld [vmem:[%s4968_s30 + $0x108] sm:$0xf]  ;;  %v352_v60 = vld [vmem:[%s4968_s30 + $0x10c] sm:$0xf]  ;;  %v6623_v20 = vor.u32 %v1577_v39, %v1576_v23 }
 0x1b8   : > { %v6598_v1 = vadd.f32 %v6116_v41, %v2472_v51  ;;  %v821_v27 = vpop.permute.xlu1 %820  ;;  %v2095_v57 = vsel %vm2053_vm11, %v2030_v11, %v1433_v61 }
 0x1b9   : > { %v2474_v2 = vpop.f32.mrf.mxu0  ;;  %3327 = vmatmul.mubr.bf16.gmra.mxu1 %v3066_v19 }
 0x1ba   : > { %v1639_v17 = vpop.permute.xlu0 %1638  ;;  %v2691_v62 = vsub.f32 0.0, %v6598_v1  ;;  %1040 = vrot.lane.b32.xlu1 %v6595_v29, %s4861_s8  ;;  %4060 = vmatprep.mubr.msk.bf16.mxu1 %vm1728_vm5, %v5175_v47  ;;  %v6631_v47 = vsel %vm1046_vm3, %v6498_v13, %v6600_v32  ;;  %v7408_v13 = vrot.slane %v6462_v40, 2 }
 0x1bb   : > { %v2180_v55 = vsel %vm2118_vm12, %v2095_v57, %v1639_v17  ;;  %v2475_v11 = vpop.f32.mrf.mxu0  ;;  %966 = vrot.lane.b32.xlu0 %v6532_v14, %s4862_s9  ;;  %7407 = vst [vmem:[#allocation11_spill] sm:$0xff] %v6631_v47  ;;  %v6635_v14 = vcombine.low %v6609_v52, %v352_v60  ;;  %v4784_v57 = vld [vmem:[%s4968_s30 + $0xa8] sm:$0xff]   ;;  %v1173_v60 = vrot.slane %v1171_v54, 1 }
 0x1bc   : > { %2583 = vmatmul.mubr.bf16.gmra.mxu0 %v2180_v55  ;;  %v4555_v61 = vpop.eup %4554  ;;  %v2767_v35 = vmul.f32 1.442695, %v2691_v62  ;;  %v6626_v59 = vadd.f32 %v6116_v41, %v2475_v11  ;;  %v1025_v51 = vpop.permute.xlu1 %1024  ;;  %v1772_v23 = vsel %vm1728_vm5, %v4784_v57, %v821_v27  ;;  %v1579_v27 = vsel %vm1456_vm4, %v6548_v31, %v6623_v20 }
 0x1bd   : > { %4035 = vmatprep.mubr.msk.bf16.mxu0 %vm1728_vm5, %v1707_v48  ;;  %v2881_v19 = vadd.f32 1.0, %v4555_v61  ;;  %v2477_v39 = vpop.f32.mrf.mxu0  ;;  %v6649_v48 = vsel %vm1252_vm1, %v7408_v13, %v6621_v38  ;;  %v1176_v55 = vrot.slane %v1174_v10, 2  ;;  %v1584_v31 = vshll.u32 %v6635_v14, 16 }
 0x1be   : > { %v951_v2 = vpop.permute.xlu0 %950  ;;  %4562 = vpow2.f32 %v2767_v35  ;;  %v2692_v17 = vsub.f32 0.0, %v6626_v59  ;;  %1376 = vrot.lane.b32.xlu1 %v6560_v45, %s4864_s13  ;;  %v7409_v45 = vrot.slane %v6405_v56, 1  ;;  %v1581_v39 = vshrl.u32 %v6635_v14, 16 }
 0x1bf   : > { %v1837_v62 = vsel %vm1793_vm7, %v1772_v23, %v951_v2  ;;  %1246 = vrot.lane.b32.xlu0 %v6631_v47, %s4866_s25  ;;  %v768_v23 = vrot.slane %v6493_v6, 1  ;;  %4564 = vrcp.f32 %v2881_v19  ;;  %v6665_v56 = vcombine.low %v6535_v0, %v6535_v0 }
 0x1c0   : > { %v4557_v11 = vpop.eup %4556  ;;  %v2769_v61 = vmul.f32 1.442695, %v2692_v17  ;;  %v1361_v35 = vpop.permute.xlu1 %1360  ;;  %v764_v57 = vor.u32 %v6408_v25, %v7409_v45  ;;  %v1902_v34 = vsel %vm1858_vm8, %v1837_v62, %v1025_v51  ;;  %v1708_v25 = vrot.slane %v6029_v44, 3 }
 0x1c1   : > { %v4559_v2 = vpop.eup %4558  ;;  %v2882_v13 = vadd.f32 1.0, %v4557_v11  ;;  %v6670_v10 = vor.u32 %v1176_v55, %v1173_v60  ;;  %v978_v0 = vrot.slane %v6563_v36, 1  ;;  %v1586_v45 = vrot.slane %v1584_v31, 3 }
 0x1c2   : > { %v1231_v47 = vpop.permute.xlu0 %1230  ;;  %4566 = vpow2.f32 %v2769_v61  ;;  %1656 = vrot.lane.b32.xlu1 %v1579_v27, %s4867_s7  ;;  %v3007_v51 = vmul.f32 %v4559_v2, %v6429_v49  ;;  %v769_v17 = vsel %vm517_vm2, %v764_v57, %v768_v23  ;;  %v1583_v61 = vrot.slane %v1581_v39, 2 }
 0x1c3   : > { %v1967_v54 = vsel %vm1923_vm9, %v1902_v34, %v1231_v47  ;;  %v4561_v6 = vpop.eup %4560  ;;  %4568 = vrcp.f32 %v2882_v13  ;;  %1450 = vrot.lane.b32.xlu0 %v6649_v48, %s4863_s12  ;;  %v7410_v57 = vrot.slane %v5972_v3, 3  ;;  %v1388_v13 = vrot.slane %v6635_v14, 2 }
 0x1c4   : > { %v3008_v19 = vmul.f32 %v4561_v6, %v6448_v30  ;;  %v2480_v34 = vpop.f32.mrf.mxu0  ;;  %v1641_v47 = vpop.permute.xlu1 %1640  ;;  %v2032_v62 = vsel %vm1988_vm10, %v1967_v54, %v1361_v35  ;;  %v774_v30 = vshll.u32 %v6665_v56, 16  ;;  %v979_v54 = vsel %vm842_vm0, %v6578_v22, %v978_v0 }
 0x1c5   : > { %v6678_v27 = vadd.f32 %v6116_v41, %v2480_v34  ;;  %v1709_v35 = vsel %vm1662_vm6, %v7410_v57, %v1708_v25  ;;  %v6704_v6 = vcombine.low %v6609_v52, %v6609_v52  ;;  %v4785_v34 = vld [vmem:[%s4968_s30 + $0xb0] sm:$0xff]   ;;  %v6716_v52 = vor.u32 %v1586_v45, %v1583_v61 }
 0x1c6   : > { %v1435_v11 = vpop.permute.xlu0 %1434  ;;  %v2482_v55 = vpop.f32.mrf.mxu0  ;;  %968 = vrot.lane.b32.xlu1 %v6595_v29, %s4862_s9  ;;  %v3067_v49 = vpack.c.bf16 %v3008_v19, %v3007_v51  ;;  %v6695_v29 = vsel %vm1046_vm3, %v6600_v32, %v6670_v10 }
 0x1c7   : > { %v2097_v60 = vsel %vm2053_vm11, %v2032_v62, %v1435_v11  ;;  %v2693_v2 = vsub.f32 0.0, %v6678_v27  ;;  %838 = vrot.lane.b32.xlu0 %v769_v17, %s4865_s23  ;;  %v772_v62 = vor.u32 %v6488_v63, %v768_v23  ;;  %v6726_v55 = vld [vmem:[%s4968_s30 + $0x110] ss:$0 sps:$4 sm:$0xff]   ;;  %v1180_v61 = vshrl.u32 %v6704_v6, 16 }
 0x1c8   : > { %v2183_v39 = vsel %vm2118_vm12, %v2097_v60, %v1641_v47  ;;  %v2483_v31 = vpop.f32.mrf.mxu0  ;;  %3335 = vmatmul.mubr.bf16.gmra.mxu1 %v3067_v49  ;;  %v953_v3 = vpop.permute.xlu1 %952  ;;  %v1183_v63 = vshll.u32 %v6704_v6, 16 }
 0x1c9   : > { %2591 = vmatmul.mubr.bf16.gmra.mxu0 %v2183_v39  ;;  %v2771_v51 = vmul.f32 1.442695, %v2693_v2  ;;  %v6707_v19 = vadd.f32 %v6116_v41, %v2483_v31  ;;  %4061 = vmatprep.mubr.msk.bf16.mxu1 %vm1728_vm5, %v5209_v26  ;;  %v776_v41 = vrot.slane %v774_v30, 1  ;;  %v1389_v26 = vsel %vm1252_vm1, %v6621_v38, %v1388_v13 }
 0x1ca   : > { %v823_v32 = vpop.permute.xlu0 %822  ;;  %4036 = vmatprep.mubr.msk.bf16.mxu0 %vm1728_vm5, %v1709_v35  ;;  %v2485_v17 = vpop.f32.mrf.mxu0  ;;  %1248 = vrot.lane.b32.xlu1 %v6695_v29, %s4866_s25  ;;  %v1588_v39 = vsel %vm1456_vm4, %v6623_v20, %v6716_v52 }
 0x1cb   : > { %v1774_v47 = vsel %vm1728_vm5, %v4785_v34, %v823_v32  ;;  %v4563_v11 = vpop.eup %4562  ;;  %4570 = vpow2.f32 %v2771_v51  ;;  %v2694_v60 = vsub.f32 0.0, %v6707_v19  ;;  %1042 = vrot.lane.b32.xlu0 %v979_v54, %s4861_s8  ;;  %v777_v31 = vsel %vm517_vm2, %v772_v62, %v776_v41 }
 0x1cc   : > { %v2883_v49 = vadd.f32 1.0, %v4563_v11  ;;  %v1233_v57 = vpop.permute.xlu1 %1232  ;;  %v1839_v45 = vsel %vm1793_vm7, %v1774_v47, %v953_v3  ;;  %v4565_v35 = vpop.eup %4564  ;;  %v980_v54 = vrot.slane %v6704_v6, 1  ;;  %v906_v3 = vrot.slane %v6665_v56, 1 }
 0x1cd   : > { %v2773_v23 = vmul.f32 1.442695, %v2694_v60  ;;  %v1590_v32 = vshrl.u32 %v6726_v55, 16  ;;  %v1593_v34 = vshll.u32 %v6726_v55, 16  ;;  %v1182_v11 = vrot.slane %v1180_v61, 1 }
 0x1ce   : > { %v1027_v30 = vpop.permute.xlu0 %1026  ;;  %1452 = vrot.lane.b32.xlu1 %v1389_v26, %s4863_s12  ;;  %v1185_v62 = vrot.slane %v1183_v63, 2  ;;  %v3009_v41 = vmul.f32 %v4565_v35, %v6506_v5 }
 0x1cf   : > { %v1904_v2 = vsel %vm1858_vm8, %v1839_v45, %v1027_v30  ;;  %v4567_v51 = vpop.eup %4566  ;;  %4572 = vpow2.f32 %v2773_v23  ;;  %1378 = vrot.lane.b32.xlu0 %v6649_v48, %s4864_s13  ;;  %v6747_v48 = vld [vmem:[%s4968_s30 + $0xd0] sm:$0xff]   ;;  %v1595_v63 = vrot.slane %v1593_v34, 3  ;;  %v6760_v30 = vld [vmem:[%s7361_s2] ss:$0 sm:$0xff] }
 0x1d0   : > { %v4569_v47 = vpop.eup %4568  ;;  %4574 = vrcp.f32 %v2883_v49  ;;  %v2884_v17 = vadd.f32 1.0, %v4567_v51  ;;  %v1437_v20 = vpop.permute.xlu1 %1436  ;;  %v1969_v26 = vsel %vm1923_vm9, %v1904_v2, %v1233_v57  ;;  %v1710_v56 = vrot.slane %v6747_v48, 3 }
 0x1d1   : > { %v3010_v60 = vmul.f32 %v4569_v47, %v6539_v7  ;;  %v981_v49 = vsel %vm842_vm0, %v978_v0, %v980_v54  ;;  %v1316_v7 = vrot.slane %v6704_v6, 2  ;;  %v1592_v57 = vrot.slane %v1590_v32, 2 }
 0x1d2   : > { %v1363_v23 = vpop.permute.xlu0 %1362  ;;  %4576 = vrcp.f32 %v2884_v17  ;;  %840 = vrot.lane.b32.xlu1 %v777_v31, %s4865_s23  ;;  %v907_v0 = vsel %vm842_vm0, %v6578_v22, %v906_v3  ;;  %v1186_v31 = vor.u32 %v1185_v62, %v1182_v11  ;;  %v1711_v51 = vsel %vm1662_vm6, %v1708_v25, %v1710_v56 }
 0x1d3   : > { %v2034_v45 = vsel %vm1988_vm10, %v1969_v26, %v1363_v23  ;;  %v2488_v61 = vpop.f32.mrf.mxu0  ;;  %1658 = vrot.lane.b32.xlu0 %v1588_v39, %s4867_s7  ;;  %v3068_v5 = vpack.c.bf16 %v3010_v60, %v3009_v41  ;;  %v1317_v3 = vsel %vm1252_vm1, %v6621_v38, %v1316_v7  ;;  %v1596_v44 = vor.u32 %v1595_v63, %v1592_v57  ;;  %v4788_v41 = vld [vmem:[%s4968_s30 + $0xb8] sm:$0xff]  }
 0x1d4   : > { %v6763_v35 = vadd.f32 %v6760_v30, %v2488_v61  ;;  %v825_v2 = vpop.permute.xlu1 %824  ;;  %v2099_v39 = vsel %vm2053_vm11, %v2034_v45, %v1437_v20  ;;  %v6786_v11 = vsel %vm1046_vm3, %v6670_v10, %v1186_v31 }
 0x1d5   : > { %v2490_v54 = vpop.f32.mrf.mxu0  ;;  %3343 = vmatmul.mubr.bf16.gmra.mxu1 %v3068_v5  ;;  %v1776_v60 = vsel %vm1728_vm5, %v4788_v41, %v825_v2  ;;  %v1597_v10 = vsel %vm1456_vm4, %v6716_v52, %v1596_v44 }
 0x1d6   : > { %v1643_v6 = vpop.permute.xlu0 %1642  ;;  %v2695_v32 = vsub.f32 0.0, %v6763_v35  ;;  %1044 = vrot.lane.b32.xlu1 %v981_v49, %s4861_s8  ;;  %4062 = vmatprep.mubr.msk.bf16.mxu1 %vm1728_vm5, %v5237_v33  ;;  %v1390_v33 = vrot.slane %v6726_v55, 2  ;;  %s4868_s8 = smov [#allocation2]  }
 0x1d7   : > { %v2186_v34 = vsel %vm2118_vm12, %v2099_v39, %v1643_v6  ;;  %v2491_v22 = vpop.f32.mrf.mxu0  ;;  %970 = vrot.lane.b32.xlu0 %v907_v0, %s4862_s9  ;;  %v6806_v39 = vld [vmem:[%s4968_s30 + $0xd8] sm:$0xff]   ;;  %s4802_s9 = sshll.u32 %s4868_s8, 4  ;;  %s4803_s9 = int_to_ptr.vmem [resolvable:$false] %s4802_s9 }
 0x1d8   : > { %2599 = vmatmul.mubr.bf16.gmra.mxu0 %v2186_v34  ;;  %v4571_v47 = vpop.eup %4570  ;;  %v2775_v25 = vmul.f32 1.442695, %v2695_v32  ;;  %v6782_v17 = vadd.f32 %v6760_v30, %v2491_v22  ;;  %v1029_v20 = vpop.permute.xlu1 %1028  ;;  %v1391_v7 = vsel %vm1252_vm1, %v1388_v13, %v1390_v33  ;;  %v1712_v52 = vrot.slane %v6806_v39, 3 }
 0x1d9   : > { %4037 = vmatprep.mubr.msk.bf16.mxu0 %vm1728_vm5, %v1711_v51  ;;  %v2885_v62 = vadd.f32 1.0, %v4571_v47  ;;  %v2493_v38 = vpop.f32.mrf.mxu0 }
 0x1da   : > { %v955_v26 = vpop.permute.xlu0 %954  ;;  %4578 = vpow2.f32 %v2775_v25  ;;  %v2696_v23 = vsub.f32 0.0, %v6782_v17  ;;  %1380 = vrot.lane.b32.xlu1 %v1317_v3, %s4864_s13 }
 0x1db   : > { %v1841_v45 = vsel %vm1793_vm7, %v1776_v60, %v955_v26  ;;  %1250 = vrot.lane.b32.xlu0 %v6786_v11, %s4866_s25  ;;  %4580 = vrcp.f32 %v2885_v62  ;;  %v4790_v26 = vld [vmem:[%s4968_s30 + $0xc0] sm:$0xff]  }
 0x1dc   : > { %v4573_v49 = vpop.eup %4572  ;;  %v2777_v61 = vmul.f32 1.442695, %v2696_v23  ;;  %v1365_v5 = vpop.permute.xlu1 %1364  ;;  %v1906_v2 = vsel %vm1858_vm8, %v1841_v45, %v1029_v20  ;;  %v1713_v20 = vsel %vm1662_vm6, %v1710_v56, %v1712_v52 }
 0x1dd   : > { %v4575_v57 = vpop.eup %4574  ;;  %v2886_v63 = vadd.f32 1.0, %v4573_v49 }
 0x1de   : > { %v1235_v0 = vpop.permute.xlu0 %1234  ;;  %4582 = vpow2.f32 %v2777_v61  ;;  %1660 = vrot.lane.b32.xlu1 %v1597_v10, %s4867_s7  ;;  %v3011_v13 = vmul.f32 %v4575_v57, %v6598_v1 }
 0x1df   : > { %v1971_v31 = vsel %vm1923_vm9, %v1906_v2, %v1235_v0  ;;  %v4577_v54 = vpop.eup %4576  ;;  %4584 = vrcp.f32 %v2886_v63  ;;  %1454 = vrot.lane.b32.xlu0 %v1391_v7, %s4863_s12 }
 0x1e0   : > { %v3012_v6 = vmul.f32 %v4577_v54, %v6626_v59  ;;  %v2496_v51 = vpop.f32.mrf.mxu0  ;;  %v1645_v32 = vpop.permute.xlu1 %1644  ;;  %v2036_v34 = vsel %vm1988_vm10, %v1971_v31, %v1365_v5 }
 0x1e1   : > { %v6814_v22 = vadd.f32 %v6760_v30, %v2496_v51 }
 0x1e2   : > { %v1439_v3 = vpop.permute.xlu0 %1438  ;;  %v2498_v47 = vpop.f32.mrf.mxu0  ;;  %v3069_v25 = vpack.c.bf16 %v3012_v6, %v3011_v13 }
 0x1e3   : > { %v2101_v44 = vsel %vm2053_vm11, %v2036_v34, %v1439_v3  ;;  %v2697_v1 = vsub.f32 0.0, %v6814_v22  ;;  %v6837_v34 = vld [vmem:[%s4968_s30 + $0xe0] sm:$0xff]  }
 0x1e4   : > { %v2189_v59 = vsel %vm2118_vm12, %v2101_v44, %v1645_v32  ;;  %v2499_v33 = vpop.f32.mrf.mxu0  ;;  %3351 = vmatmul.mubr.bf16.gmra.mxu1 %v3069_v25  ;;  %v957_v62 = vpop.permute.xlu1 %956  ;;  %v1714_v3 = vrot.slane %v6837_v34, 3 }
 0x1e5   : > { %2607 = vmatmul.mubr.bf16.gmra.mxu0 %v2189_v59  ;;  %v2779_v41 = vmul.f32 1.442695, %v2697_v1  ;;  %v6823_v60 = vadd.f32 %v6760_v30, %v2499_v33  ;;  %4063 = vmatprep.mubr.msk.bf16.mxu1 %vm1728_vm5, %v5272_v9 }
 0x1e6   : > { %v827_v38 = vpop.permute.xlu0 %826  ;;  %4038 = vmatprep.mubr.msk.bf16.mxu0 %vm1728_vm5, %v1713_v20  ;;  %v2501_v23 = vpop.f32.mrf.mxu0  ;;  %v1715_v33 = vsel %vm1662_vm6, %v1712_v52, %v1714_v3 }
 0x1e7   : > { %v1778_v56 = vsel %vm1728_vm5, %v4790_v26, %v827_v38  ;;  %v4579_v45 = vpop.eup %4578  ;;  %4586 = vpow2.f32 %v2779_v41  ;;  %v2698_v10 = vsub.f32 0.0, %v6823_v60 }
 0x1e8   : > { %v2887_v49 = vadd.f32 1.0, %v4579_v45  ;;  %v1237_v61 = vpop.permute.xlu1 %1236  ;;  %v1843_v7 = vsel %vm1793_vm7, %v1778_v56, %v957_v62  ;;  %v4581_v63 = vpop.eup %4580 }
 0x1e9   : > { %v2781_v5 = vmul.f32 1.442695, %v2698_v10  ;;  %v3013_v13 = vmul.f32 %v4581_v63, %v6678_v27 }
 0x1ea   : > { %v1031_v57 = vpop.permute.xlu0 %1030 }
 0x1eb   : > { %v1908_v9 = vsel %vm1858_vm8, %v1843_v7, %v1031_v57  ;;  %v4583_v2 = vpop.eup %4582  ;;  %4588 = vpow2.f32 %v2781_v5 }
 0x1ec   : > { %v4585_v0 = vpop.eup %4584  ;;  %4590 = vrcp.f32 %v2887_v49  ;;  %v2888_v31 = vadd.f32 1.0, %v4583_v2  ;;  %v1441_v54 = vpop.permute.xlu1 %1440  ;;  %v1973_v51 = vsel %vm1923_vm9, %v1908_v9, %v1237_v61  ;;  %v4792_v49 = vld [vmem:[%s4968_s30 + $0xc8] sm:$0xff]  }
 0x1ed   : > { %v3014_v6 = vmul.f32 %v4585_v0, %v6707_v19 }
 0x1ee   : > { %v1367_v32 = vpop.permute.xlu0 %1366  ;;  %4592 = vrcp.f32 %v2888_v31 }
 0x1ef   : > { %v2038_v44 = vsel %vm1988_vm10, %v1973_v51, %v1367_v32  ;;  %v2504_v47 = vpop.f32.mrf.mxu0  ;;  %v3070_v25 = vpack.c.bf16 %v3014_v6, %v3013_v13  ;;  %v6861_v6 = vld [vmem:[%s4968_s30 + $0xe8] sm:$0xff]  }
 0x1f0   : > { %v6842_v20 = vadd.f32 %v6760_v30, %v2504_v47  ;;  %v829_v1 = vpop.permute.xlu1 %828  ;;  %v2103_v27 = vsel %vm2053_vm11, %v2038_v44, %v1441_v54  ;;  %v1716_v51 = vrot.slane %v6861_v6, 3 }
 0x1f1   : > { %v2506_v19 = vpop.f32.mrf.mxu0  ;;  %3359 = vmatmul.mubr.bf16.gmra.mxu1 %v3070_v25  ;;  %v1780_v52 = vsel %vm1728_vm5, %v4792_v49, %v829_v1 }
 0x1f2   : > { %v1647_v59 = vpop.permute.xlu0 %1646  ;;  %v2699_v62 = vsub.f32 0.0, %v6842_v20  ;;  %4064 = vmatprep.mubr.msk.bf16.mxu1 %vm1728_vm5, %v5300_v15 }
 0x1f3   : > { %v2192_v41 = vsel %vm2118_vm12, %v2103_v27, %v1647_v59  ;;  %v2507_v38 = vpop.f32.mrf.mxu0 }
 0x1f4   : > { %2615 = vmatmul.mubr.bf16.gmra.mxu0 %v2192_v41  ;;  %v4587_v26 = vpop.eup %4586  ;;  %v2783_v56 = vmul.f32 1.442695, %v2699_v62  ;;  %v6851_v23 = vadd.f32 %v6760_v30, %v2507_v38  ;;  %v1033_v45 = vpop.permute.xlu1 %1032  ;;  %v1717_v38 = vsel %vm1662_vm6, %v1714_v3, %v1716_v51 }
 0x1f5   : > { %4039 = vmatprep.mubr.msk.bf16.mxu0 %vm1728_vm5, %v1715_v33  ;;  %v2889_v10 = vadd.f32 1.0, %v4587_v26  ;;  %v2509_v61 = vpop.f32.mrf.mxu0 }
 0x1f6   : > { %v959_v5 = vpop.permute.xlu0 %958  ;;  %4594 = vpow2.f32 %v2783_v56  ;;  %v2700_v15 = vsub.f32 0.0, %v6851_v23 }
 0x1f7   : > { %v1845_v7 = vsel %vm1793_vm7, %v1780_v52, %v959_v5  ;;  %4596 = vrcp.f32 %v2889_v10 }
 0x1f8   : > { %v4589_v57 = vpop.eup %4588  ;;  %v2785_v63 = vmul.f32 1.442695, %v2700_v15  ;;  %v1369_v9 = vpop.permute.xlu1 %1368  ;;  %v1910_v31 = vsel %vm1858_vm8, %v1845_v7, %v1033_v45 }
 0x1f9   : > { %v4591_v2 = vpop.eup %4590  ;;  %v2890_v0 = vadd.f32 1.0, %v4589_v57 }
 0x1fa   : > { %v1239_v54 = vpop.permute.xlu0 %1238  ;;  %4598 = vpow2.f32 %v2785_v63  ;;  %v3015_v44 = vmul.f32 %v4591_v2, %v6763_v35 }
 0x1fb   : > { %v1975_v13 = vsel %vm1923_vm9, %v1910_v31, %v1239_v54  ;;  %v4593_v32 = vpop.eup %4592  ;;  %4600 = vrcp.f32 %v2890_v0 }
 0x1fc   : > { %v3016_v47 = vmul.f32 %v4593_v32, %v6782_v17  ;;  %v2512_v25 = vpop.f32.mrf.mxu0  ;;  %v1649_v1 = vpop.permute.xlu1 %1648  ;;  %v2040_v27 = vsel %vm1988_vm10, %v1975_v13, %v1369_v9 }
 0x1fd   : > { %v6868_v19 = vadd.f32 %v6760_v30, %v2512_v25  ;;  %v1718_v25 = vrot.slane %v6387_v43, 3 }
 0x1fe   : > { %v1443_v59 = vpop.permute.xlu0 %1442  ;;  %v2514_v62 = vpop.f32.mrf.mxu0  ;;  %v3071_v41 = vpack.c.bf16 %v3016_v47, %v3015_v44 }
 0x1ff   : > { %v2105_v33 = vsel %vm2053_vm11, %v2040_v27, %v1443_v59  ;;  %v2701_v26 = vsub.f32 0.0, %v6868_v19 }
 0x200   : > { %v2195_v35 = vsel %vm2118_vm12, %v2105_v33, %v1649_v1  ;;  %v2515_v56 = vpop.f32.mrf.mxu0  ;;  %3367 = vmatmul.mubr.bf16.gmra.mxu1 %v3071_v41  ;;  %v961_v17 = vpop.permute.xlu1 %960 }
 0x201   : > { %2623 = vmatmul.mubr.bf16.gmra.mxu0 %v2195_v35  ;;  %v2787_v45 = vmul.f32 1.442695, %v2701_v26  ;;  %v6875_v10 = vadd.f32 %v6760_v30, %v2515_v56  ;;  %4065 = vmatprep.mubr.msk.bf16.mxu1 %vm1728_vm5, %v5347_v18 }
 0x202   : > { %v831_v49 = vpop.permute.xlu0 %830  ;;  %4040 = vmatprep.mubr.msk.bf16.mxu0 %vm1728_vm5, %v1717_v38  ;;  %v2517_v52 = vpop.f32.mrf.mxu0 }
 0x203   : > { %v1782_v3 = vsel %vm1728_vm5, %v6747_v48, %v831_v49  ;;  %v4595_v61 = vpop.eup %4594  ;;  %4602 = vpow2.f32 %v2787_v45  ;;  %v2702_v5 = vsub.f32 0.0, %v6875_v10 }
 0x204   : > { %v2891_v15 = vadd.f32 1.0, %v4595_v61  ;;  %v1241_v7 = vpop.permute.xlu1 %1240  ;;  %v1847_v63 = vsel %vm1793_vm7, %v1782_v3, %v961_v17  ;;  %v4597_v2 = vpop.eup %4596 }
 0x205   : > { %v2789_v57 = vmul.f32 1.442695, %v2702_v5  ;;  %v3017_v13 = vmul.f32 %v4597_v2, %v6814_v22 }
 0x206   : > { %v1035_v9 = vpop.permute.xlu0 %1034 }
 0x207   : > { %v1912_v0 = vsel %vm1858_vm8, %v1847_v63, %v1035_v9  ;;  %v4599_v18 = vpop.eup %4598  ;;  %4604 = vpow2.f32 %v2789_v57 }
 0x208   : > { %v4601_v31 = vpop.eup %4600  ;;  %4606 = vrcp.f32 %v2891_v15  ;;  %v2892_v54 = vadd.f32 1.0, %v4599_v18  ;;  %v1445_v48 = vpop.permute.xlu1 %1444  ;;  %v1977_v44 = vsel %vm1923_vm9, %v1912_v0, %v1241_v7 }
 0x209   : > { %v3018_v32 = vmul.f32 %v4601_v31, %v6823_v60  ;;  %v1719_v60 = vsel %vm1662_vm6, %v1716_v51, %v1718_v25 }
 0x20a   : > { %v1371_v47 = vpop.permute.xlu0 %1370  ;;  %4608 = vrcp.f32 %v2892_v54 }
 0x20b   : > { %v2042_v1 = vsel %vm1988_vm10, %v1977_v44, %v1371_v47  ;;  %v2520_v27 = vpop.f32.mrf.mxu0  ;;  %v3072_v59 = vpack.c.bf16 %v3018_v32, %v3017_v13 }
 0x20c   : > { %v6891_v33 = vadd.f32 %v6760_v30, %v2520_v27  ;;  %v833_v62 = vpop.permute.xlu1 %832  ;;  %v2107_v41 = vsel %vm2053_vm11, %v2042_v1, %v1445_v48 }
 0x20d   : > { %v2522_v38 = vpop.f32.mrf.mxu0  ;;  %3375 = vmatmul.mubr.bf16.gmra.mxu1 %v3072_v59  ;;  %v1784_v51 = vsel %vm1728_vm5, %v6806_v39, %v833_v62  ;;  %v1720_v39 = vrot.slane %v6462_v40, 3 }
 0x20e   : > { %v1651_v22 = vpop.permute.xlu0 %1650  ;;  %v2703_v26 = vsub.f32 0.0, %v6891_v33  ;;  %4066 = vmatprep.mubr.msk.bf16.mxu1 %vm1728_vm5, %v5398_v12 }
 0x20f   : > { %v2198_v43 = vsel %vm2118_vm12, %v2107_v41, %v1651_v22  ;;  %v2523_v35 = vpop.f32.mrf.mxu0  ;;  %v1721_v40 = vsel %vm1662_vm6, %v1718_v25, %v1720_v39 }
 0x210   : > { %2631 = vmatmul.mubr.bf16.gmra.mxu0 %v2198_v43  ;;  %v4603_v56 = vpop.eup %4602  ;;  %v2791_v17 = vmul.f32 1.442695, %v2703_v26  ;;  %v6900_v45 = vadd.f32 %v6760_v30, %v2523_v35  ;;  %v1037_v49 = vpop.permute.xlu1 %1036 }
 0x211   : > { %4041 = vmatprep.mubr.msk.bf16.mxu0 %vm1728_vm5, %v1719_v60  ;;  %v2893_v3 = vadd.f32 1.0, %v4603_v56  ;;  %v2525_v52 = vpop.f32.mrf.mxu0 }
 0x212   : > { %v963_v61 = vpop.permute.xlu0 %962  ;;  %4610 = vpow2.f32 %v2791_v17  ;;  %v2704_v5 = vsub.f32 0.0, %v6900_v45 }
 0x213   : > { %v1849_v12 = vsel %vm1793_vm7, %v1784_v51, %v963_v61  ;;  %4612 = vrcp.f32 %v2893_v3 }
 0x214   : > { %v4605_v15 = vpop.eup %4604  ;;  %v2793_v7 = vmul.f32 1.442695, %v2704_v5  ;;  %v1373_v57 = vpop.permute.xlu1 %1372  ;;  %v1914_v2 = vsel %vm1858_vm8, %v1849_v12, %v1037_v49 }
 0x215   : > { %v4607_v63 = vpop.eup %4606  ;;  %v2894_v9 = vadd.f32 1.0, %v4605_v15 }
 0x216   : > { %v1243_v0 = vpop.permute.xlu0 %1242  ;;  %4614 = vpow2.f32 %v2793_v7  ;;  %v3019_v54 = vmul.f32 %v4607_v63, %v6842_v20 }
 0x217   : > { %v1979_v18 = vsel %vm1923_vm9, %v1914_v2, %v1243_v0  ;;  %v4609_v31 = vpop.eup %4608  ;;  %4616 = vrcp.f32 %v2894_v9  ;;  %v1722_v2 = vrot.slane %v6563_v36, 3 }
 0x218   : > { %v3020_v48 = vmul.f32 %v4609_v31, %v6851_v23  ;;  %v2528_v13 = vpop.f32.mrf.mxu0  ;;  %v1653_v32 = vpop.permute.xlu1 %1652  ;;  %v2044_v44 = vsel %vm1988_vm10, %v1979_v18, %v1373_v57 }
 0x219   : > { %v6914_v47 = vadd.f32 %v6760_v30, %v2528_v13 }
 0x21a   : > { %v1447_v1 = vpop.permute.xlu0 %1446  ;;  %v2530_v59 = vpop.f32.mrf.mxu0  ;;  %v3073_v62 = vpack.c.bf16 %v3020_v48, %v3019_v54 }
 0x21b   : > { %v2109_v27 = vsel %vm2053_vm11, %v2044_v44, %v1447_v1  ;;  %v2705_v41 = vsub.f32 0.0, %v6914_v47 }
 0x21c   : > { %v2201_v20 = vsel %vm2118_vm12, %v2109_v27, %v1653_v32  ;;  %v2531_v38 = vpop.f32.mrf.mxu0  ;;  %3383 = vmatmul.mubr.bf16.gmra.mxu1 %v3073_v62  ;;  %v965_v23 = vpop.permute.xlu1 %964 }
 0x21d   : > { %2639 = vmatmul.mubr.bf16.gmra.mxu0 %v2201_v20  ;;  %v2795_v22 = vmul.f32 1.442695, %v2705_v41  ;;  %v6921_v60 = vadd.f32 %v6760_v30, %v2531_v38  ;;  %4067 = vmatprep.mubr.msk.bf16.mxu1 %vm1728_vm5, %v5456_v24 }
 0x21e   : > { %v835_v26 = vpop.permute.xlu0 %834  ;;  %4042 = vmatprep.mubr.msk.bf16.mxu0 %vm1728_vm5, %v1721_v40  ;;  %v2533_v43 = vpop.f32.mrf.mxu0 }
 0x21f   : > { %v1786_v25 = vsel %vm1728_vm5, %v6837_v34, %v835_v26  ;;  %v4611_v35 = vpop.eup %4610  ;;  %4618 = vpow2.f32 %v2795_v22  ;;  %v2706_v56 = vsub.f32 0.0, %v6921_v60 }
 0x220   : > { %v2895_v17 = vadd.f32 1.0, %v4611_v35  ;;  %v1245_v49 = vpop.permute.xlu1 %1244  ;;  %v1851_v51 = vsel %vm1793_vm7, %v1786_v25, %v965_v23  ;;  %v4613_v61 = vpop.eup %4612 }
 0x221   : > { %v2797_v3 = vmul.f32 1.442695, %v2706_v56  ;;  %v3021_v7 = vmul.f32 %v4613_v61, %v6868_v19 }
 0x222   : > { %v1039_v52 = vpop.permute.xlu0 %1038 }
 0x223   : > { %v1916_v5 = vsel %vm1858_vm8, %v1851_v51, %v1039_v52  ;;  %v4615_v24 = vpop.eup %4614  ;;  %4620 = vpow2.f32 %v2797_v3 }
 0x224   : > { %v4617_v12 = vpop.eup %4616  ;;  %4622 = vrcp.f32 %v2895_v17  ;;  %v2896_v15 = vadd.f32 1.0, %v4615_v24  ;;  %v1449_v34 = vpop.permute.xlu1 %1448  ;;  %v1981_v63 = vsel %vm1923_vm9, %v1916_v5, %v1245_v49 }
 0x225   : > { %v3022_v57 = vmul.f32 %v4617_v12, %v6875_v10  ;;  %v1723_v10 = vsel %vm1662_vm6, %v1720_v39, %v1722_v2 }
 0x226   : > { %v1375_v9 = vpop.permute.xlu0 %1374  ;;  %4624 = vrcp.f32 %v2896_v15 }
 0x227   : > { %v2046_v0 = vsel %vm1988_vm10, %v1981_v63, %v1375_v9  ;;  %v2536_v18 = vpop.f32.mrf.mxu0  ;;  %v3074_v31 = vpack.c.bf16 %v3022_v57, %v3021_v7 }
 0x228   : > { %v6937_v54 = vadd.f32 %v6760_v30, %v2536_v18  ;;  %v837_v48 = vpop.permute.xlu1 %836  ;;  %v2111_v13 = vsel %vm2053_vm11, %v2046_v0, %v1449_v34 }
 0x229   : > { %v2538_v32 = vpop.f32.mrf.mxu0  ;;  %3391 = vmatmul.mubr.bf16.gmra.mxu1 %v3074_v31  ;;  %v1788_v39 = vsel %vm1728_vm5, %v6861_v6, %v837_v48  ;;  %v1724_v6 = vrot.slane %v6635_v14, 3  ;;  %v4794_v48 = vld [vmem:[%s4968_s30 + $0xf0] sm:$0xff]  }
 0x22a   : > { %v1655_v19 = vpop.permute.xlu0 %1654  ;;  %v2707_v44 = vsub.f32 0.0, %v6937_v54  ;;  %4068 = vmatprep.mubr.msk.bf16.mxu1 %vm1728_vm5, %v5501_v53 }
 0x22b   : > { %v2204_v36 = vsel %vm2118_vm12, %v2111_v13, %v1655_v19  ;;  %v2539_v1 = vpop.f32.mrf.mxu0  ;;  %v1725_v14 = vsel %vm1662_vm6, %v1722_v2, %v1724_v6 }
 0x22c   : > { %2647 = vmatmul.mubr.bf16.gmra.mxu0 %v2204_v36  ;;  %v4619_v27 = vpop.eup %4618  ;;  %v2799_v59 = vmul.f32 1.442695, %v2707_v44  ;;  %v6946_v62 = vadd.f32 %v6760_v30, %v2539_v1  ;;  %v1041_v40 = vpop.permute.xlu1 %1040 }
 0x22d   : > { %4043 = vmatprep.mubr.msk.bf16.mxu0 %vm1728_vm5, %v1723_v10  ;;  %v2897_v41 = vadd.f32 1.0, %v4619_v27  ;;  %v2541_v20 = vpop.f32.mrf.mxu0 }
 0x22e   : > { %v967_v38 = vpop.permute.xlu0 %966  ;;  %4626 = vpow2.f32 %v2799_v59  ;;  %v2708_v23 = vsub.f32 0.0, %v6946_v62 }
 0x22f   : > { %v1853_v53 = vsel %vm1793_vm7, %v1788_v39, %v967_v38  ;;  %4628 = vrcp.f32 %v2897_v41 }
 0x230   : > { %v4621_v22 = vpop.eup %4620  ;;  %v2801_v26 = vmul.f32 1.442695, %v2708_v23  ;;  %v1377_v25 = vpop.permute.xlu1 %1376  ;;  %v1918_v56 = vsel %vm1858_vm8, %v1853_v53, %v1041_v40 }
 0x231   : > { %v4623_v43 = vpop.eup %4622  ;;  %v2898_v35 = vadd.f32 1.0, %v4621_v22 }
 0x232   : > { %v1247_v17 = vpop.permute.xlu0 %1246  ;;  %4630 = vpow2.f32 %v2801_v26  ;;  %v3023_v51 = vmul.f32 %v4623_v43, %v6891_v33  ;;  %v1726_v26 = vrot.slane %v6726_v55, 3 }
 0x233   : > { %v1983_v49 = vsel %vm1923_vm9, %v1918_v56, %v1247_v17  ;;  %v4625_v3 = vpop.eup %4624  ;;  %4632 = vrcp.f32 %v2898_v35 }
 0x234   : > { %v3024_v52 = vmul.f32 %v4625_v3, %v6900_v45  ;;  %v2544_v61 = vpop.f32.mrf.mxu0  ;;  %v1657_v5 = vpop.permute.xlu1 %1656  ;;  %v2048_v24 = vsel %vm1988_vm10, %v1983_v49, %v1377_v25  ;;  %v1727_v3 = vsel %vm1662_vm6, %v1724_v6, %v1726_v26 }
 0x235   : > { %v6960_v12 = vadd.f32 %v6760_v30, %v2544_v61 }
 0x236   : > { %v1451_v15 = vpop.permute.xlu0 %1450  ;;  %v2546_v7 = vpop.f32.mrf.mxu0  ;;  %v3075_v57 = vpack.c.bf16 %v3024_v52, %v3023_v51 }
 0x237   : > { %v2113_v34 = vsel %vm2053_vm11, %v2048_v24, %v1451_v15  ;;  %v2709_v63 = vsub.f32 0.0, %v6960_v12  ;;  %v4795_v7 = vld [vmem:[%s4968_s30 + $0xf8] sm:$0xff]   ;;  %s258_s30 = sand.u32 1, %s4850_s19  }
 0x238   : > { %v2207_v33 = vsel %vm2118_vm12, %v2113_v34, %v1657_v5  ;;  %v2547_v45 = vpop.f32.mrf.mxu0  ;;  %3399 = vmatmul.mubr.bf16.gmra.mxu1 %v3075_v57  ;;  %v969_v9 = vpop.permute.xlu1 %968  ;;  %s3963_s12 = sshll.u32 %s258_s30, 8  ;;  %s7317_s22 = scalar_lea.sflag [#allocation3], %s258_s30 }
 0x239   : > { %2655 = vmatmul.mubr.bf16.gmra.mxu0 %v2207_v33  ;;  %v2803_v0 = vmul.f32 1.442695, %v2709_v63  ;;  %v6967_v18 = vadd.f32 %v6760_v30, %v2547_v45  ;;  %4069 = vmatprep.mubr.msk.bf16.mxu1 %vm1728_vm5, %v5558_v58  ;;  %s7028_s13 = scalar_lea.vmem [#allocation2], %s3963_s12  ;;  %s4804_s12 = scalar_lea.vmem %s4803_s9, 8192 }
 0x23a   : > { %v839_v31 = vpop.permute.xlu0 %838  ;;  %4044 = vmatprep.mubr.msk.bf16.mxu0 %vm1728_vm5, %v1725_v14  ;;  %v2549_v13 = vpop.f32.mrf.mxu0  ;;  %s3893_s11 = sshll.u32 %s7028_s13, 4  ;;  %s7312_s11 = int_to_ptr.vmem [resolvable:$true] %s3893_s11 }
 0x23b   : > { %v1790_v2 = vsel %vm1728_vm5, %v4794_v48, %v839_v31  ;;  %v4627_v32 = vpop.eup %4626  ;;  %4634 = vpow2.f32 %v2803_v0  ;;  %v2710_v19 = vsub.f32 0.0, %v6967_v18  ;;  %s4798_s17 = scalar_lea.vmem %s7312_s11, 4096  ;;  %p4805_p1 = scmp.lt.s32.totalorder %s7312_s11, %s4803_s9 }
 0x23c   : > { %v2899_v10 = vadd.f32 1.0, %v4627_v32  ;;  %v1249_v44 = vpop.permute.xlu1 %1248  ;;  %v1855_v1 = vsel %vm1793_vm7, %v1790_v2, %v969_v9  ;;  %v4629_v59 = vpop.eup %4628  ;;  %p4799_p12 = scmp.ne.s32.totalorder %s7312_s11, %s4798_s17  ;;  %p4806_p2 = scmp.lt.s32.totalorder %s4804_s12, %s4798_s17 }
 0x23d   : > { %v2805_v36 = vmul.f32 1.442695, %v2710_v19  ;;  %v3025_v38 = vmul.f32 %v4629_v59, %v6914_v47 }
 0x23e   : > { %v1043_v27 = vpop.permute.xlu0 %1042  ;;  %p4800_p13 = pnand %p4799_p12, %p4938_p5  ;;  %p4807_p3 = por %p4806_p2, %p4805_p1 }
 0x23f   : > { %v1920_v40 = vsel %vm1858_vm8, %v1855_v1, %v1043_v27  ;;  %v4631_v58 = vpop.eup %4630  ;;  %4636 = vpow2.f32 %v2805_v36 }
 0x240   : > { %v4633_v41 = vpop.eup %4632  ;;  %4638 = vrcp.f32 %v2899_v10  ;;  %v2900_v39 = vadd.f32 1.0, %v4631_v58  ;;  %v1453_v20 = vpop.permute.xlu1 %1452  ;;  %v1985_v53 = vsel %vm1923_vm9, %v1920_v40, %v1249_v44  ;;  %p4801_p0 = pneg %p4800_p13 }
 0x241   : > { %v3026_v23 = vmul.f32 %v4633_v41, %v6921_v60 }
 0x242   : > { %v1379_v22 = vpop.permute.xlu0 %1378  ;;  %4640 = vrcp.f32 %v2900_v39  ;;  %p4808_p4 = pnand %p4807_p3, %p4801_p0 }
 0x243   : > { %v2050_v25 = vsel %vm1988_vm10, %v1985_v53, %v1379_v22  ;;  %v3076_v35 = vpack.c.bf16 %v3026_v23, %v3025_v38 }
 0x244   : > { %v2552_v43 = vpop.f32.mrf.mxu0  ;;  %v841_v17 = vpop.permute.xlu1 %840  ;;  %v2115_v49 = vsel %vm2053_vm11, %v2050_v25, %v1453_v20 }
 0x245   : > { %v6983_v56 = vadd.f32 %v6760_v30, %v2552_v43  ;;  %3407 = vmatmul.mubr.bf16.gmra.mxu1 %v3076_v35  ;;  %v1792_v6 = vsel %vm1728_vm5, %v4795_v7, %v841_v17  ;;  %v7020_v43 = vld [vmem:[%s7363_s4] ss:$0 sm:$0xff] }
 0x246   : > { %v2554_v47 = vpop.f32.mrf.mxu0  ;;  %v1659_v60 = vpop.permute.xlu0 %1658  ;;  %4070 = vmatprep.mubr.msk.bf16.mxu1 %vm1728_vm5, %v5603_v4 }
 0x247   : > { %v2711_v51 = vsub.f32 0.0, %v6983_v56  ;;  %v2210_v55 = vsel %vm2118_vm12, %v2115_v49, %v1659_v60 }
 0x248   : > { %v2555_v52 = vpop.f32.mrf.mxu0  ;;  %2663 = vmatmul.mubr.bf16.gmra.mxu0 %v2210_v55  ;;  %v4635_v61 = vpop.eup %4634 }
 0x249   : > { %v2807_v5 = vmul.f32 1.442695, %v2711_v51  ;;  %v6992_v24 = vadd.f32 %v6760_v30, %v2555_v52  ;;  %v1045_v15 = vpop.permute.xlu1 %1044  ;;  %4045 = vmatprep.mubr.msk.bf16.mxu0 %vm1728_vm5, %v1727_v3  ;;  %v2901_v34 = vadd.f32 1.0, %v4635_v61 }
 0x24a   : > { %v2557_v57 = vpop.f32.mrf.mxu0  ;;  %v971_v14 = vpop.permute.xlu0 %970 }
 0x24b   : > { %4642 = vpow2.f32 %v2807_v5  ;;  %v2712_v63 = vsub.f32 0.0, %v6992_v24  ;;  %v1857_v4 = vsel %vm1793_vm7, %v1792_v6, %v971_v14 }
 0x24c   : > { %v4637_v33 = vpop.eup %4636  ;;  %4644 = vrcp.f32 %v2901_v34  ;;  %v1922_v48 = vsel %vm1858_vm8, %v1857_v4, %v1045_v15 }
 0x24d   : > { %v2809_v45 = vmul.f32 1.442695, %v2712_v63  ;;  %v1381_v9 = vpop.permute.xlu1 %1380  ;;  %v4639_v0 = vpop.eup %4638  ;;  %v2902_v31 = vadd.f32 1.0, %v4637_v33 }
 0x24e   : > { %v1251_v2 = vpop.permute.xlu0 %1250  ;;  %v3027_v19 = vmul.f32 %v4639_v0, %v6937_v54 }
 0x24f   : > { %4646 = vpow2.f32 %v2809_v45  ;;  %v1987_v13 = vsel %vm1923_vm9, %v1922_v48, %v1251_v2  ;;  %v4641_v32 = vpop.eup %4640 }
 0x250   : > { %4648 = vrcp.f32 %v2902_v31  ;;  %v3028_v10 = vmul.f32 %v4641_v32, %v6946_v62  ;;  %v2052_v1 = vsel %vm1988_vm10, %v1987_v13, %v1381_v9 }
 0x251   : > { %v2560_v44 = vpop.f32.mrf.mxu0  ;;  %v1661_v36 = vpop.permute.xlu1 %1660 }
 0x252   : > { %v7005_v27 = vadd.f32 %v6760_v30, %v2560_v44  ;;  %v1455_v59 = vpop.permute.xlu0 %1454  ;;  %v3077_v41 = vpack.c.bf16 %v3028_v10, %v3027_v19 }
 0x253   : > { %v2117_v40 = vsel %vm2053_vm11, %v2052_v1, %v1455_v59  ;;  %v2562_v58 = vpop.f32.mrf.mxu0 }
 0x254   : > { %v2713_v39 = vsub.f32 0.0, %v7005_v27  ;;  %v2213_v20 = vsel %vm2118_vm12, %v2117_v40, %v1661_v36  ;;  %3415 = vmatmul.mubr.bf16.gmra.mxu1 %v3077_v41 }
 0x255   : > { %v2563_v54 = vpop.f32.mrf.mxu0  ;;  %2671 = vmatmul.mubr.bf16.gmra.mxu0 %v2213_v20  ;;  %4071 = vmatprep.mubr.msk.bf16.mxu1 %vm1728_vm5, %v5669_v28 }
 0x256   : > { %v2811_v62 = vmul.f32 1.442695, %v2713_v39  ;;  %v7011_v38 = vadd.f32 %v6760_v30, %v2563_v54  ;;  %v3304_v53 = vpop.f32.mrf.mxu1 }
 0x257   : > { %v2565_v23 = vpop.f32.mrf.mxu0  ;;  %v3305_v60 = vadd.f32 %v7020_v43, %v3304_v53 }
 0x258   : > { %v4643_v22 = vpop.eup %4642  ;;  %4650 = vpow2.f32 %v2811_v62  ;;  %v2714_v26 = vsub.f32 0.0, %v7011_v38  ;;  %v3306_v35 = vpop.f32.mrf.mxu1 }
 0x259   : > { %v2903_v25 = vadd.f32 1.0, %v4643_v22  ;;  %v4645_v49 = vpop.eup %4644 }
 0x25a   : > { %v2813_v17 = vmul.f32 1.442695, %v2714_v26  ;;  %v3307_v47 = vpop.f32.mrf.mxu1  ;;  %v3029_v61 = vmul.f32 %v4645_v49, %v6960_v12 }
 0x25b   : > { %v3308_v3 = vadd.f32 %v7020_v43, %v3307_v47 }
 0x25c   : > { %v4647_v28 = vpop.eup %4646  ;;  %4652 = vpow2.f32 %v2813_v17  ;;  %v3309_v52 = vpop.f32.mrf.mxu1 }
 0x25d   : > { %v4649_v51 = vpop.eup %4648  ;;  %4654 = vrcp.f32 %v2903_v25  ;;  %v2904_v55 = vadd.f32 1.0, %v4647_v28  ;;  %v4227_v15 = vpack.c.bf16 %v3308_v3, %v3305_v60 }
 0x25e   : > { %v3030_v5 = vmul.f32 %v4649_v51, %v6967_v18  ;;  %v3312_v34 = vpop.f32.mrf.mxu1 }
 0x25f   : > { %4656 = vrcp.f32 %v2904_v55  ;;  %4228 = vst [vmem:[%s7028_s13] sm:$0xff] %v4227_v15   ;;  %v3313_v18 = vadd.f32 %v7020_v43, %v3312_v34 }
 0x260   : > { %v2568_v7 = vpop.f32.mrf.mxu0  ;;  %v3078_v6 = vpack.c.bf16 %v3030_v5, %v3029_v61  ;;  %v3314_v14 = vpop.f32.mrf.mxu1 }
 0x261   : > { %v7032_v57 = vadd.f32 %v6760_v30, %v2568_v7 }
 0x262   : > { %v2570_v63 = vpop.f32.mrf.mxu0  ;;  %3423 = vmatmul.mubr.bf16.gmra.mxu1 %v3078_v6  ;;  %v3315_v4 = vpop.f32.mrf.mxu1 }
 0x263   : > { %v2715_v12 = vsub.f32 0.0, %v7032_v57  ;;  %4072 = vmatprep.mubr.msk.bf16.mxu1 %vm1728_vm5, %v5730_v37  ;;  %v3316_v45 = vadd.f32 %v7020_v43, %v3315_v4 }
 0x264   : > { %v2571_v33 = vpop.f32.mrf.mxu0  ;;  %v3317_v48 = vpop.f32.mrf.mxu1 }
 0x265   : > { %v4651_v9 = vpop.eup %4650  ;;  %v2815_v0 = vmul.f32 1.442695, %v2715_v12  ;;  %v7040_v31 = vadd.f32 %v6760_v30, %v2571_v33  ;;  %v4232_v13 = vpack.c.bf16 %v3316_v45, %v3313_v18 }
 0x266   : > { %v2905_v2 = vadd.f32 1.0, %v4651_v9  ;;  %v2573_v32 = vpop.f32.mrf.mxu0 }
 0x267   : > { %4658 = vpow2.f32 %v2815_v0  ;;  %v2716_v19 = vsub.f32 0.0, %v7040_v31  ;;  %4384 = vst [vmem:[%s7028_s13 + $0x8] sm:$0xff] %v4232_v13  }
 0x268   : > { %4660 = vrcp.f32 %v2905_v2 }
 0x269   : > { %v4653_v10 = vpop.eup %4652  ;;  %v2817_v37 = vmul.f32 1.442695, %v2716_v19 }
 0x26a   : > { %v4655_v44 = vpop.eup %4654  ;;  %v2906_v36 = vadd.f32 1.0, %v4653_v10 }
 0x26b   : > { %4662 = vpow2.f32 %v2817_v37  ;;  %v3031_v59 = vmul.f32 %v4655_v44, %v6983_v56 }
 0x26c   : > { %v4657_v1 = vpop.eup %4656  ;;  %4664 = vrcp.f32 %v2906_v36  ;;  %v3320_v41 = vpop.f32.mrf.mxu1 }
 0x26d   : > { %v3032_v40 = vmul.f32 %v4657_v1, %v6992_v24  ;;  %v2576_v58 = vpop.f32.mrf.mxu0  ;;  %v3321_v25 = vadd.f32 %v7020_v43, %v3320_v41 }
 0x26e   : > { %v7047_v39 = vadd.f32 %v6760_v30, %v2576_v58  ;;  %v3322_v54 = vpop.f32.mrf.mxu1 }
 0x26f   : > { %v2578_v20 = vpop.f32.mrf.mxu0  ;;  %v3079_v62 = vpack.c.bf16 %v3032_v40, %v3031_v59 }
 0x270   : > { %v2717_v23 = vsub.f32 0.0, %v7047_v39  ;;  %v3323_v22 = vpop.f32.mrf.mxu1 }
 0x271   : > { %v2579_v53 = vpop.f32.mrf.mxu0  ;;  %3431 = vmatmul.mubr.bf16.gmra.mxu1 %v3079_v62  ;;  %v3324_v24 = vadd.f32 %v7020_v43, %v3323_v22 }
 0x272   : > { %v2819_v26 = vmul.f32 1.442695, %v2717_v23  ;;  %v7052_v56 = vadd.f32 %v6760_v30, %v2579_v53  ;;  %4073 = vmatprep.mubr.msk.bf16.mxu1 %vm1728_vm5, %v5805_v21  ;;  %v3325_v17 = vpop.f32.mrf.mxu1 }
 0x273   : > { %v2581_v35 = vpop.f32.mrf.mxu0  ;;  %v4237_v28 = vpack.c.bf16 %v3324_v24, %v3321_v25 }
 0x274   : > { %v4659_v49 = vpop.eup %4658  ;;  %4666 = vpow2.f32 %v2819_v26  ;;  %v2718_v47 = vsub.f32 0.0, %v7052_v56 }
 0x275   : > { %v2907_v60 = vadd.f32 1.0, %v4659_v49  ;;  %4385 = vst [vmem:[%s7028_s13 + $0x10] sm:$0xff] %v4237_v28   ;;  %v4661_v51 = vpop.eup %4660 }
 0x276   : > { %v2821_v3 = vmul.f32 1.442695, %v2718_v47  ;;  %v3033_v5 = vmul.f32 %v4661_v51, %v7005_v27 }
 0x278   : > { %v4663_v55 = vpop.eup %4662  ;;  %4668 = vpow2.f32 %v2821_v3 }
 0x279   : > { %v4665_v52 = vpop.eup %4664  ;;  %4670 = vrcp.f32 %v2907_v60  ;;  %v2908_v61 = vadd.f32 1.0, %v4663_v55  ;;  %v3328_v15 = vpop.f32.mrf.mxu1 }
 0x27a   : > { %v3034_v21 = vmul.f32 %v4665_v52, %v7011_v38  ;;  %v3329_v4 = vadd.f32 %v7020_v43, %v3328_v15 }
 0x27b   : > { %4672 = vrcp.f32 %v2908_v61  ;;  %v3330_v7 = vpop.f32.mrf.mxu1 }
 0x27c   : > { %v2584_v34 = vpop.f32.mrf.mxu0  ;;  %v3080_v6 = vpack.c.bf16 %v3034_v21, %v3033_v5 }
 0x27d   : > { %v7062_v14 = vadd.f32 %v6760_v30, %v2584_v34  ;;  %v3331_v12 = vpop.f32.mrf.mxu1  ;;  %v7072_v30 = vld [vmem:[%s7361_s2] ss:$0 sm:$0xff] }
 0x27e   : > { %v2586_v63 = vpop.f32.mrf.mxu0  ;;  %3439 = vmatmul.mubr.bf16.gmra.mxu1 %v3080_v6  ;;  %v3332_v27 = vadd.f32 %v7020_v43, %v3331_v12 }
 0x27f   : > { %v2719_v18 = vsub.f32 0.0, %v7062_v14  ;;  %4074 = vmatprep.mubr.msk.bf16.mxu1 %vm1728_vm5, %v5850_v8  ;;  %v3333_v33 = vpop.f32.mrf.mxu1 }
 0x280   : > { %v2587_v38 = vpop.f32.mrf.mxu0  ;;  %v4242_v0 = vpack.c.bf16 %v3332_v27, %v3329_v4  ;;  %v7411_v4 = vld [vmem:[#allocation5_spill] sm:$0xff] }
 0x281   : > { %v4667_v45 = vpop.eup %4666  ;;  %v2823_v9 = vmul.f32 1.442695, %v2719_v18  ;;  %v7075_v48 = vadd.f32 %v7072_v30, %v2587_v38 }
 0x282   : > { %v2909_v2 = vadd.f32 1.0, %v4667_v45  ;;  %v2589_v13 = vpop.f32.mrf.mxu0  ;;  %4386 = vst [vmem:[%s7028_s13 + $0x18] sm:$0xff] %v4242_v0  }
 0x283   : > { %4674 = vpow2.f32 %v2823_v9  ;;  %v2720_v32 = vsub.f32 0.0, %v7075_v48 }
 0x284   : > { %4676 = vrcp.f32 %v2909_v2 }
 0x285   : > { %v4669_v8 = vpop.eup %4668  ;;  %v2825_v19 = vmul.f32 1.442695, %v2720_v32 }
 0x286   : > { %v4671_v10 = vpop.eup %4670  ;;  %v2910_v37 = vadd.f32 1.0, %v4669_v8 }
 0x287   : > { %4678 = vpow2.f32 %v2825_v19  ;;  %v3035_v36 = vmul.f32 %v4671_v10, %v7032_v57 }
 0x288   : > { %v4673_v44 = vpop.eup %4672  ;;  %4680 = vrcp.f32 %v2910_v37  ;;  %v3336_v40 = vpop.f32.mrf.mxu1 }
 0x289   : > { %v3036_v1 = vmul.f32 %v4673_v44, %v7040_v31  ;;  %v2592_v59 = vpop.f32.mrf.mxu0  ;;  %v3337_v26 = vadd.f32 %v7020_v43, %v3336_v40 }
 0x28a   : > { %v7082_v58 = vadd.f32 %v7072_v30, %v2592_v59  ;;  %v3338_v20 = vpop.f32.mrf.mxu1 }
 0x28b   : > { %v2594_v41 = vpop.f32.mrf.mxu0  ;;  %v3081_v54 = vpack.c.bf16 %v3036_v1, %v3035_v36 }
 0x28c   : > { %v2721_v62 = vsub.f32 0.0, %v7082_v58  ;;  %v3339_v53 = vpop.f32.mrf.mxu1 }
 0x28d   : > { %v2595_v23 = vpop.f32.mrf.mxu0  ;;  %3447 = vmatmul.mubr.bf16.gmra.mxu1 %v3081_v54  ;;  %v3340_v31 = vadd.f32 %v7020_v43, %v3339_v53 }
 0x28e   : > { %v2827_v22 = vmul.f32 1.442695, %v2721_v62  ;;  %v7087_v57 = vadd.f32 %v7072_v30, %v2595_v23  ;;  %4075 = vmatprep.mubr.msk.bf16.mxu1 %vm1728_vm5, %v5907_v42  ;;  %v3341_v24 = vpop.f32.mrf.mxu1 }
 0x28f   : > { %v2597_v25 = vpop.f32.mrf.mxu0  ;;  %v4247_v49 = vpack.c.bf16 %v3340_v31, %v3337_v26  ;;  %v7412_v26 = vld [vmem:[#allocation6_spill] sm:$0xff] }
 0x290   : > { %v4675_v35 = vpop.eup %4674  ;;  %4682 = vpow2.f32 %v2827_v22  ;;  %v2722_v17 = vsub.f32 0.0, %v7087_v57 }
 0x291   : > { %v2911_v47 = vadd.f32 1.0, %v4675_v35  ;;  %4387 = vst [vmem:[%s7028_s13 + $0x20] sm:$0xff] %v4247_v49   ;;  %v4677_v60 = vpop.eup %4676 }
 0x292   : > { %v2829_v28 = vmul.f32 1.442695, %v2722_v17  ;;  %v3037_v52 = vmul.f32 %v4677_v60, %v7047_v39 }
 0x294   : > { %v4679_v3 = vpop.eup %4678  ;;  %4684 = vpow2.f32 %v2829_v28 }
 0x295   : > { %v4681_v51 = vpop.eup %4680  ;;  %4686 = vrcp.f32 %v2911_v47  ;;  %v2912_v55 = vadd.f32 1.0, %v4679_v3  ;;  %v3344_v61 = vpop.f32.mrf.mxu1 }
 0x296   : > { %v3038_v42 = vmul.f32 %v4681_v51, %v7052_v56  ;;  %v3345_v63 = vadd.f32 %v7020_v43, %v3344_v61 }
 0x297   : > { %4688 = vrcp.f32 %v2912_v55  ;;  %v3346_v21 = vpop.f32.mrf.mxu1 }
 0x298   : > { %v2600_v5 = vpop.f32.mrf.mxu0  ;;  %v3082_v15 = vpack.c.bf16 %v3038_v42, %v3037_v52 }
 0x299   : > { %v7097_v34 = vadd.f32 %v7072_v30, %v2600_v5  ;;  %v3347_v6 = vpop.f32.mrf.mxu1 }
 0x29a   : > { %v2602_v7 = vpop.f32.mrf.mxu0  ;;  %3455 = vmatmul.mubr.bf16.gmra.mxu1 %v3082_v15  ;;  %v3348_v39 = vadd.f32 %v7020_v43, %v3347_v6 }
 0x29b   : > { %v2723_v12 = vsub.f32 0.0, %v7097_v34  ;;  %4076 = vmatprep.mubr.msk.bf16.mxu1 %vm1728_vm5, %v7411_v4  ;;  %v3349_v18 = vpop.f32.mrf.mxu1 }
 0x29c   : > { %v2603_v56 = vpop.f32.mrf.mxu0  ;;  %v4252_v33 = vpack.c.bf16 %v3348_v39, %v3345_v63  ;;  %v7413_v39 = vld [vmem:[#allocation7_spill] sm:$0xff] }
 0x29d   : > { %v4683_v27 = vpop.eup %4682  ;;  %v2831_v38 = vmul.f32 1.442695, %v2723_v12  ;;  %v7105_v45 = vadd.f32 %v7072_v30, %v2603_v56 }
 0x29e   : > { %v2913_v9 = vadd.f32 1.0, %v4683_v27  ;;  %v2605_v0 = vpop.f32.mrf.mxu0  ;;  %4388 = vst [vmem:[%s7028_s13 + $0x28] sm:$0xff] %v4252_v33  }
 0x29f   : > { %4690 = vpow2.f32 %v2831_v38  ;;  %v2724_v2 = vsub.f32 0.0, %v7105_v45 }
 0x2a0   : > { %4692 = vrcp.f32 %v2913_v9 }
 0x2a1   : > { %v4685_v13 = vpop.eup %4684  ;;  %v2833_v32 = vmul.f32 1.442695, %v2724_v2 }
 0x2a2   : > { %v4687_v8 = vpop.eup %4686  ;;  %v2914_v19 = vadd.f32 1.0, %v4685_v13 }
 0x2a3   : > { %4694 = vpow2.f32 %v2833_v32  ;;  %v3039_v37 = vmul.f32 %v4687_v8, %v7062_v14 }
 0x2a4   : > { %v4689_v10 = vpop.eup %4688  ;;  %4696 = vrcp.f32 %v2914_v19  ;;  %v3352_v1 = vpop.f32.mrf.mxu1 }
 0x2a5   : > { %v3040_v44 = vmul.f32 %v4689_v10, %v7075_v48  ;;  %v2608_v36 = vpop.f32.mrf.mxu0  ;;  %v3353_v22 = vadd.f32 %v7020_v43, %v3352_v1 }
 0x2a6   : > { %v7112_v59 = vadd.f32 %v7072_v30, %v2608_v36  ;;  %v3354_v41 = vpop.f32.mrf.mxu1 }
 0x2a7   : > { %v2610_v40 = vpop.f32.mrf.mxu0  ;;  %v3083_v20 = vpack.c.bf16 %v3040_v44, %v3039_v37 }
 0x2a8   : > { %v2725_v54 = vsub.f32 0.0, %v7112_v59  ;;  %v3355_v23 = vpop.f32.mrf.mxu1 }
 0x2a9   : > { %v2611_v62 = vpop.f32.mrf.mxu0  ;;  %3463 = vmatmul.mubr.bf16.gmra.mxu1 %v3083_v20  ;;  %v3356_v48 = vadd.f32 %v7020_v43, %v3355_v23 }
 0x2aa   : > { %v2835_v53 = vmul.f32 1.442695, %v2725_v54  ;;  %v7117_v14 = vadd.f32 %v7072_v30, %v2611_v62  ;;  %4077 = vmatprep.mubr.msk.bf16.mxu1 %vm1728_vm5, %v7412_v26  ;;  %v3357_v25 = vpop.f32.mrf.mxu1 }
 0x2ab   : > { %v2613_v31 = vpop.f32.mrf.mxu0  ;;  %v4257_v17 = vpack.c.bf16 %v3356_v48, %v3353_v22  ;;  %v7414_v48 = vld [vmem:[#allocation8_spill] sm:$0xff] }
 0x2ac   : > { %v4691_v24 = vpop.eup %4690  ;;  %4698 = vpow2.f32 %v2835_v53  ;;  %v2726_v35 = vsub.f32 0.0, %v7117_v14 }
 0x2ad   : > { %v2915_v49 = vadd.f32 1.0, %v4691_v24  ;;  %4389 = vst [vmem:[%s7028_s13 + $0x30] sm:$0xff] %v4257_v17   ;;  %v4693_v28 = vpop.eup %4692 }
 0x2ae   : > { %v2837_v47 = vmul.f32 1.442695, %v2726_v35  ;;  %v3041_v55 = vmul.f32 %v4693_v28, %v7082_v58 }
 0x2b0   : > { %v4695_v60 = vpop.eup %4694  ;;  %4700 = vpow2.f32 %v2837_v47 }
 0x2b1   : > { %v4697_v3 = vpop.eup %4696  ;;  %4702 = vrcp.f32 %v2915_v49  ;;  %v2916_v51 = vadd.f32 1.0, %v4695_v60  ;;  %v3360_v42 = vpop.f32.mrf.mxu1 }
 0x2b2   : > { %v3042_v52 = vmul.f32 %v4697_v3, %v7087_v57  ;;  %v3361_v63 = vadd.f32 %v7020_v43, %v3360_v42 }
 0x2b3   : > { %4704 = vrcp.f32 %v2916_v51  ;;  %v3362_v5 = vpop.f32.mrf.mxu1 }
 0x2b4   : > { %v2616_v61 = vpop.f32.mrf.mxu0  ;;  %v3084_v21 = vpack.c.bf16 %v3042_v52, %v3041_v55 }
 0x2b5   : > { %v7127_v15 = vadd.f32 %v7072_v30, %v2616_v61  ;;  %v3363_v6 = vpop.f32.mrf.mxu1 }
 0x2b6   : > { %v2618_v7 = vpop.f32.mrf.mxu0  ;;  %3471 = vmatmul.mubr.bf16.gmra.mxu1 %v3084_v21  ;;  %v3364_v58 = vadd.f32 %v7020_v43, %v3363_v6 }
 0x2b7   : > { %v2727_v12 = vsub.f32 0.0, %v7127_v15  ;;  %4078 = vmatprep.mubr.msk.bf16.mxu1 %vm1728_vm5, %v7413_v39  ;;  %v3365_v4 = vpop.f32.mrf.mxu1 }
 0x2b8   : > { %v2619_v57 = vpop.f32.mrf.mxu0  ;;  %v4262_v27 = vpack.c.bf16 %v3364_v58, %v3361_v63  ;;  %v7415_v58 = vld [vmem:[#allocation9_spill] sm:$0xff] }
 0x2b9   : > { %v4699_v56 = vpop.eup %4698  ;;  %v2839_v18 = vmul.f32 1.442695, %v2727_v12  ;;  %v7135_v38 = vadd.f32 %v7072_v30, %v2619_v57 }
 0x2ba   : > { %v2917_v33 = vadd.f32 1.0, %v4699_v56  ;;  %v2621_v9 = vpop.f32.mrf.mxu0  ;;  %4390 = vst [vmem:[%s7028_s13 + $0x38] sm:$0xff] %v4262_v27  }
 0x2bb   : > { %4706 = vpow2.f32 %v2839_v18  ;;  %v2728_v0 = vsub.f32 0.0, %v7135_v38 }
 0x2bc   : > { %4708 = vrcp.f32 %v2917_v33 }
 0x2bd   : > { %v4701_v2 = vpop.eup %4700  ;;  %v2841_v13 = vmul.f32 1.442695, %v2728_v0 }
 0x2be   : > { %v4703_v32 = vpop.eup %4702  ;;  %v2918_v8 = vadd.f32 1.0, %v4701_v2 }
 0x2bf   : > { %4710 = vpow2.f32 %v2841_v13  ;;  %v3043_v10 = vmul.f32 %v4703_v32, %v7097_v34 }
 0x2c0   : > { %v4705_v19 = vpop.eup %4704  ;;  %4712 = vrcp.f32 %v2918_v8  ;;  %v3368_v36 = vpop.f32.mrf.mxu1 }
 0x2c1   : > { %v3044_v37 = vmul.f32 %v4705_v19, %v7105_v45  ;;  %v2624_v44 = vpop.f32.mrf.mxu0  ;;  %v3369_v22 = vadd.f32 %v7020_v43, %v3368_v36 }
 0x2c2   : > { %v7142_v1 = vadd.f32 %v7072_v30, %v2624_v44  ;;  %v3370_v41 = vpop.f32.mrf.mxu1 }
 0x2c3   : > { %v2626_v40 = vpop.f32.mrf.mxu0  ;;  %v3085_v20 = vpack.c.bf16 %v3044_v37, %v3043_v10 }
 0x2c4   : > { %v2729_v54 = vsub.f32 0.0, %v7142_v1  ;;  %v3371_v23 = vpop.f32.mrf.mxu1 }
 0x2c5   : > { %v2627_v62 = vpop.f32.mrf.mxu0  ;;  %3479 = vmatmul.mubr.bf16.gmra.mxu1 %v3085_v20  ;;  %v3372_v45 = vadd.f32 %v7020_v43, %v3371_v23 }
 0x2c6   : > { %v2843_v53 = vmul.f32 1.442695, %v2729_v54  ;;  %v7147_v34 = vadd.f32 %v7072_v30, %v2627_v62  ;;  %4079 = vmatprep.mubr.msk.bf16.mxu1 %vm1728_vm5, %v7414_v48  ;;  %v3373_v31 = vpop.f32.mrf.mxu1 }
 0x2c7   : > { %v2629_v26 = vpop.f32.mrf.mxu0  ;;  %v4267_v35 = vpack.c.bf16 %v3372_v45, %v3369_v22  ;;  %v7416_v45 = vld [vmem:[#allocation10_spill] sm:$0xff] }
 0x2c8   : > { %v4707_v25 = vpop.eup %4706  ;;  %4714 = vpow2.f32 %v2843_v53  ;;  %v2730_v24 = vsub.f32 0.0, %v7147_v34 }
 0x2c9   : > { %v2919_v17 = vadd.f32 1.0, %v4707_v25  ;;  %4391 = vst [vmem:[%s7028_s13 + $0x40] sm:$0xff] %v4267_v35   ;;  %v4709_v47 = vpop.eup %4708 }
 0x2ca   : > { %v2845_v49 = vmul.f32 1.442695, %v2730_v24  ;;  %v3045_v51 = vmul.f32 %v4709_v47, %v7112_v59 }
 0x2cc   : > { %v4711_v28 = vpop.eup %4710  ;;  %4716 = vpow2.f32 %v2845_v49 }
 0x2cd   : > { %v4713_v60 = vpop.eup %4712  ;;  %4718 = vrcp.f32 %v2919_v17  ;;  %v2920_v3 = vadd.f32 1.0, %v4711_v28  ;;  %v3376_v52 = vpop.f32.mrf.mxu1 }
 0x2ce   : > { %v3046_v55 = vmul.f32 %v4713_v60, %v7117_v14  ;;  %v3377_v63 = vadd.f32 %v7020_v43, %v3376_v52 }
 0x2cf   : > { %4720 = vrcp.f32 %v2920_v3  ;;  %v3378_v61 = vpop.f32.mrf.mxu1 }
 0x2d0   : > { %v2632_v42 = vpop.f32.mrf.mxu0  ;;  %v3086_v5 = vpack.c.bf16 %v3046_v55, %v3045_v51 }
 0x2d1   : > { %v7157_v21 = vadd.f32 %v7072_v30, %v2632_v42  ;;  %v3379_v6 = vpop.f32.mrf.mxu1 }
 0x2d2   : > { %v2634_v7 = vpop.f32.mrf.mxu0  ;;  %3487 = vmatmul.mubr.bf16.gmra.mxu1 %v3086_v5  ;;  %v3380_v59 = vadd.f32 %v7020_v43, %v3379_v6 }
 0x2d3   : > { %v2731_v12 = vsub.f32 0.0, %v7157_v21  ;;  %4080 = vmatprep.mubr.msk.bf16.mxu1 %vm1728_vm5, %v7415_v58  ;;  %v3381_v39 = vpop.f32.mrf.mxu1 }
 0x2d4   : > { %v2635_v14 = vpop.f32.mrf.mxu0  ;;  %v4272_v56 = vpack.c.bf16 %v3380_v59, %v3377_v63 }
 0x2d5   : > { %v4715_v57 = vpop.eup %4714  ;;  %v2847_v4 = vmul.f32 1.442695, %v2731_v12  ;;  %v7165_v18 = vadd.f32 %v7072_v30, %v2635_v14 }
 0x2d6   : > { %v2921_v27 = vadd.f32 1.0, %v4715_v57  ;;  %v2637_v33 = vpop.f32.mrf.mxu0  ;;  %4392 = vst [vmem:[%s7028_s13 + $0x48] sm:$0xff] %v4272_v56  }
 0x2d7   : > { %4722 = vpow2.f32 %v2847_v4  ;;  %v2732_v9 = vsub.f32 0.0, %v7165_v18 }
 0x2d8   : > { %4724 = vrcp.f32 %v2921_v27 }
 0x2d9   : > { %v4717_v0 = vpop.eup %4716  ;;  %v2849_v2 = vmul.f32 1.442695, %v2732_v9 }
 0x2da   : > { %v4719_v13 = vpop.eup %4718  ;;  %v2922_v32 = vadd.f32 1.0, %v4717_v0 }
 0x2db   : > { %4726 = vpow2.f32 %v2849_v2  ;;  %v3047_v19 = vmul.f32 %v4719_v13, %v7127_v15 }
 0x2dc   : > { %v4721_v8 = vpop.eup %4720  ;;  %4728 = vrcp.f32 %v2922_v32  ;;  %v3384_v44 = vpop.f32.mrf.mxu1 }
 0x2dd   : > { %v3048_v10 = vmul.f32 %v4721_v8, %v7135_v38  ;;  %v2640_v37 = vpop.f32.mrf.mxu0  ;;  %v3385_v22 = vadd.f32 %v7020_v43, %v3384_v44 }
 0x2de   : > { %v7172_v36 = vadd.f32 %v7072_v30, %v2640_v37  ;;  %v3386_v41 = vpop.f32.mrf.mxu1 }
 0x2df   : > { %v2642_v40 = vpop.f32.mrf.mxu0  ;;  %v3087_v20 = vpack.c.bf16 %v3048_v10, %v3047_v19 }
 0x2e0   : > { %v2733_v54 = vsub.f32 0.0, %v7172_v36  ;;  %v3387_v23 = vpop.f32.mrf.mxu1 }
 0x2e1   : > { %v2643_v62 = vpop.f32.mrf.mxu0  ;;  %3495 = vmatmul.mubr.bf16.gmra.mxu1 %v3087_v20  ;;  %v3388_v38 = vadd.f32 %v7020_v43, %v3387_v23 }
 0x2e2   : > { %v2851_v53 = vmul.f32 1.442695, %v2733_v54  ;;  %v7177_v15 = vadd.f32 %v7072_v30, %v2643_v62  ;;  %4081 = vmatprep.mubr.msk.bf16.mxu1 %vm1728_vm5, %v7416_v45  ;;  %v3389_v26 = vpop.f32.mrf.mxu1 }
 0x2e3   : > { %v2645_v48 = vpop.f32.mrf.mxu0  ;;  %v4277_v24 = vpack.c.bf16 %v3388_v38, %v3385_v22 }
 0x2e4   : > { %v4723_v31 = vpop.eup %4722  ;;  %4730 = vpow2.f32 %v2851_v53  ;;  %v2734_v25 = vsub.f32 0.0, %v7177_v15 }
 0x2e5   : > { %v2923_v35 = vadd.f32 1.0, %v4723_v31  ;;  %4393 = vst [vmem:[%s7028_s13 + $0x50] sm:$0xff] %v4277_v24   ;;  %v4725_v49 = vpop.eup %4724 }
 0x2e6   : > { %v2853_v17 = vmul.f32 1.442695, %v2734_v25  ;;  %v3049_v3 = vmul.f32 %v4725_v49, %v7142_v1 }
 0x2e8   : > { %v4727_v47 = vpop.eup %4726  ;;  %4732 = vpow2.f32 %v2853_v17 }
 0x2e9   : > { %v4729_v28 = vpop.eup %4728  ;;  %4734 = vrcp.f32 %v2923_v35  ;;  %v2924_v60 = vadd.f32 1.0, %v4727_v47  ;;  %v3392_v55 = vpop.f32.mrf.mxu1 }
 0x2ea   : > { %v3050_v51 = vmul.f32 %v4729_v28, %v7147_v34  ;;  %v3393_v63 = vadd.f32 %v7020_v43, %v3392_v55 }
 0x2eb   : > { %4736 = vrcp.f32 %v2924_v60  ;;  %v3394_v42 = vpop.f32.mrf.mxu1 }
 0x2ec   : > { %v2648_v52 = vpop.f32.mrf.mxu0  ;;  %v3088_v61 = vpack.c.bf16 %v3050_v51, %v3049_v3 }
 0x2ed   : > { %v7187_v5 = vadd.f32 %v7072_v30, %v2648_v52  ;;  %v3395_v6 = vpop.f32.mrf.mxu1 }
 0x2ee   : > { %v2650_v7 = vpop.f32.mrf.mxu0  ;;  %3503 = vmatmul.mubr.bf16.gmra.mxu1 %v3088_v61  ;;  %v3396_v1 = vadd.f32 %v7020_v43, %v3395_v6 }
 0x2ef   : > { %v2735_v12 = vsub.f32 0.0, %v7187_v5  ;;  %4082 = vmatprep.mubr.msk.bf16.mxu1 %vm1728_vm5, %v6352_v16  ;;  %v3397_v59 = vpop.f32.mrf.mxu1 }
 0x2f0   : > { %v2651_v34 = vpop.f32.mrf.mxu0  ;;  %v4282_v39 = vpack.c.bf16 %v3396_v1, %v3393_v63 }
 0x2f1   : > { %v4731_v58 = vpop.eup %4730  ;;  %v2855_v14 = vmul.f32 1.442695, %v2735_v12  ;;  %v7195_v57 = vadd.f32 %v7072_v30, %v2651_v34 }
 0x2f2   : > { %v2925_v4 = vadd.f32 1.0, %v4731_v58  ;;  %v2653_v56 = vpop.f32.mrf.mxu0  ;;  %4394 = vst [vmem:[%s7028_s13 + $0x58] sm:$0xff] %v4282_v39  }
 0x2f3   : > { %4738 = vpow2.f32 %v2855_v14  ;;  %v2736_v27 = vsub.f32 0.0, %v7195_v57 }
 0x2f4   : > { %4740 = vrcp.f32 %v2925_v4 }
 0x2f5   : > { %v4733_v33 = vpop.eup %4732  ;;  %v2857_v9 = vmul.f32 1.442695, %v2736_v27 }
 0x2f6   : > { %v4735_v0 = vpop.eup %4734  ;;  %v2926_v2 = vadd.f32 1.0, %v4733_v33 }
 0x2f7   : > { %4742 = vpow2.f32 %v2857_v9  ;;  %v3051_v13 = vmul.f32 %v4735_v0, %v7157_v21 }
 0x2f8   : > { %v4737_v16 = vpop.eup %4736  ;;  %4744 = vrcp.f32 %v2926_v2  ;;  %v3400_v19 = vpop.f32.mrf.mxu1 }
 0x2f9   : > { %v3052_v32 = vmul.f32 %v4737_v16, %v7165_v18  ;;  %v2656_v8 = vpop.f32.mrf.mxu0  ;;  %v3401_v23 = vadd.f32 %v7020_v43, %v3400_v19 }
 0x2fa   : > { %v7202_v10 = vadd.f32 %v7072_v30, %v2656_v8  ;;  %v3402_v44 = vpop.f32.mrf.mxu1 }
 0x2fb   : > { %v2658_v37 = vpop.f32.mrf.mxu0  ;;  %v3089_v40 = vpack.c.bf16 %v3052_v32, %v3051_v13 }
 0x2fc   : > { %v2737_v41 = vsub.f32 0.0, %v7202_v10  ;;  %v3403_v54 = vpop.f32.mrf.mxu1 }
 0x2fd   : > { %v2659_v20 = vpop.f32.mrf.mxu0  ;;  %3511 = vmatmul.mubr.bf16.gmra.mxu1 %v3089_v40  ;;  %v3404_v18 = vadd.f32 %v7020_v43, %v3403_v54 }
 0x2fe   : > { %v2859_v62 = vmul.f32 1.442695, %v2737_v41  ;;  %v7207_v21 = vadd.f32 %v7072_v30, %v2659_v20  ;;  %4083 = vmatprep.mubr.msk.bf16.mxu1 %vm1728_vm5, %v6453_v50  ;;  %v3405_v22 = vpop.f32.mrf.mxu1  ;;  %v7417_v41 = vld [vmem:[#allocation11_spill] sm:$0xff] }
 0x2ff   : > { %v2661_v53 = vpop.f32.mrf.mxu0  ;;  %v4287_v48 = vpack.c.bf16 %v3404_v18, %v3401_v23 }
 0x300   : > { %v4739_v38 = vpop.eup %4738  ;;  %4746 = vpow2.f32 %v2859_v62  ;;  %v2738_v45 = vsub.f32 0.0, %v7207_v21 }
 0x301   : > { %v2927_v26 = vadd.f32 1.0, %v4739_v38  ;;  %4395 = vst [vmem:[%s7028_s13 + $0x60] sm:$0xff] %v4287_v48   ;;  %v4741_v25 = vpop.eup %4740 }
 0x302   : > { %v2861_v31 = vmul.f32 1.442695, %v2738_v45  ;;  %v3053_v49 = vmul.f32 %v4741_v25, %v7172_v36 }
 0x304   : > { %v4743_v24 = vpop.eup %4742  ;;  %4748 = vpow2.f32 %v2861_v31 }
 0x305   : > { %v4745_v35 = vpop.eup %4744  ;;  %4750 = vrcp.f32 %v2927_v26  ;;  %v2928_v17 = vadd.f32 1.0, %v4743_v24  ;;  %v3408_v47 = vpop.f32.mrf.mxu1 }
 0x306   : > { %v3054_v50 = vmul.f32 %v4745_v35, %v7177_v15  ;;  %v3409_v42 = vadd.f32 %v7020_v43, %v3408_v47 }
 0x307   : > { %4752 = vrcp.f32 %v2928_v17  ;;  %v3410_v60 = vpop.f32.mrf.mxu1 }
 0x308   : > { %v2664_v28 = vpop.f32.mrf.mxu0  ;;  %v3090_v3 = vpack.c.bf16 %v3054_v50, %v3053_v49 }
 0x309   : > { %v7217_v51 = vadd.f32 %v7072_v30, %v2664_v28  ;;  %v3411_v52 = vpop.f32.mrf.mxu1 }
 0x30a   : > { %v2666_v55 = vpop.f32.mrf.mxu0  ;;  %3519 = vmatmul.mubr.bf16.gmra.mxu1 %v3090_v3  ;;  %v3412_v36 = vadd.f32 %v7020_v43, %v3411_v52 }
 0x30b   : > { %v2739_v61 = vsub.f32 0.0, %v7217_v51  ;;  %4084 = vmatprep.mubr.msk.bf16.mxu1 %vm1728_vm5, %v6524_v46  ;;  %v3413_v7 = vpop.f32.mrf.mxu1 }
 0x30c   : > { %v2667_v15 = vpop.f32.mrf.mxu0  ;;  %v4292_v12 = vpack.c.bf16 %v3412_v36, %v3409_v42 }
 0x30d   : > { %v4747_v6 = vpop.eup %4746  ;;  %v2863_v63 = vmul.f32 1.442695, %v2739_v61  ;;  %v7225_v1 = vadd.f32 %v7072_v30, %v2667_v15 }
 0x30e   : > { %v2929_v34 = vadd.f32 1.0, %v4747_v6  ;;  %v2669_v59 = vpop.f32.mrf.mxu0  ;;  %4396 = vst [vmem:[%s7028_s13 + $0x68] sm:$0xff] %v4292_v12  }
 0x30f   : > { %4754 = vpow2.f32 %v2863_v63  ;;  %v2740_v58 = vsub.f32 0.0, %v7225_v1 }
 0x310   : > { %4756 = vrcp.f32 %v2929_v34 }
 0x311   : > { %v4749_v14 = vpop.eup %4748  ;;  %v2865_v39 = vmul.f32 1.442695, %v2740_v58 }
 0x312   : > { %v4751_v4 = vpop.eup %4750  ;;  %v2930_v56 = vadd.f32 1.0, %v4749_v14 }
 0x313   : > { %4758 = vpow2.f32 %v2865_v39  ;;  %v3055_v27 = vmul.f32 %v4751_v4, %v7187_v5 }
 0x314   : > { %v4753_v46 = vpop.eup %4752  ;;  %4760 = vrcp.f32 %v2930_v56  ;;  %v3416_v0 = vpop.f32.mrf.mxu1 }
 0x315   : > { %v3056_v33 = vmul.f32 %v4753_v46, %v7195_v57  ;;  %v2672_v9 = vpop.f32.mrf.mxu0  ;;  %v3417_v40 = vadd.f32 %v7020_v43, %v3416_v0 }
 0x316   : > { %v7232_v2 = vadd.f32 %v7072_v30, %v2672_v9  ;;  %v3418_v32 = vpop.f32.mrf.mxu1 }
 0x317   : > { %v3091_v16 = vpack.c.bf16 %v3056_v33, %v3055_v27  ;;  %v2674_v13 = vpop.f32.mrf.mxu0 }
 0x318   : > { %v2741_v8 = vsub.f32 0.0, %v7232_v2  ;;  %v3419_v37 = vpop.f32.mrf.mxu1 }
 0x319   : > { %v2675_v19 = vpop.f32.mrf.mxu0  ;;  %3527 = vmatmul.mubr.bf16.gmra.mxu1 %v3091_v16  ;;  %v3420_v57 = vadd.f32 %v7020_v43, %v3419_v37 }
 0x31a   : > { %v2867_v44 = vmul.f32 1.442695, %v2741_v8  ;;  %v2676_v5 = vadd.f32 %v7072_v30, %v2675_v19  ;;  %4085 = vmatprep.mubr.msk.bf16.mxu1 %vm1728_vm5, %v7417_v41  ;;  %v3421_v54 = vpop.f32.mrf.mxu1 }
 0x31b   : > { %v2677_v20 = vpop.f32.mrf.mxu0  ;;  %v4297_v18 = vpack.c.bf16 %v3420_v57, %v3417_v40 }
 0x31c   : > { %v4755_v62 = vpop.eup %4754  ;;  %4762 = vpow2.f32 %v2867_v44  ;;  %v2742_v23 = vsub.f32 0.0, %v2676_v5 }
 0x31d   : > { %v2931_v53 = vadd.f32 1.0, %v4755_v62  ;;  %4397 = vst [vmem:[%s7028_s13 + $0x70] sm:$0xff] %v4297_v18   ;;  %v4757_v38 = vpop.eup %4756 }
 0x31e   : > { %v2869_v22 = vmul.f32 1.442695, %v2742_v23  ;;  %v3057_v26 = vmul.f32 %v4757_v38, %v7202_v10 }
 0x320   : > { %v4759_v45 = vpop.eup %4758  ;;  %4764 = vpow2.f32 %v2869_v22 }
 0x321   : > { %v4761_v48 = vpop.eup %4760  ;;  %4766 = vrcp.f32 %v2931_v53  ;;  %v2932_v30 = vadd.f32 1.0, %v4759_v45 }
 0x322   : > { %v3058_v31 = vmul.f32 %v4761_v48, %v7207_v21  ;;  %v3424_v25 = vpop.f32.mrf.mxu1 }
 0x323   : > { %4768 = vrcp.f32 %v2932_v30  ;;  %v3425_v49 = vadd.f32 %v7020_v43, %v3424_v25 }
 0x324   : > { %v3092_v24 = vpack.c.bf16 %v3058_v31, %v3057_v26  ;;  %v3426_v35 = vpop.f32.mrf.mxu1 }
 0x326   : > { %v3427_v17 = vpop.f32.mrf.mxu1  ;;  %3535 = vmatmul.mubr.bf16.gmra.mxu1 %v3092_v24 }
 0x327   : > { %v3428_v50 = vadd.f32 %v7020_v43, %v3427_v17  ;;  %4086 = vmatprep.mubr.msk.bf16.mxu1 %vm1728_vm5, %v6695_v29 }
 0x328   : > { %v3429_v47 = vpop.f32.mrf.mxu1 }
 0x329   : > { %v4763_v28 = vpop.eup %4762  ;;  %v4302_v60 = vpack.c.bf16 %v3428_v50, %v3425_v49 }
 0x32a   : > { %v2933_v3 = vadd.f32 1.0, %v4763_v28 }
 0x32b   : > { %4398 = vst [vmem:[%s7028_s13 + $0x78] sm:$0xff] %v4302_v60  }
 0x32c   : > { %4770 = vrcp.f32 %v2933_v3 }
 0x32d   : > { %v4765_v10 = vpop.eup %4764 }
 0x32e   : > { %v4767_v21 = vpop.eup %4766  ;;  %v2934_v55 = vadd.f32 1.0, %v4765_v10 }
 0x32f   : > { %v3059_v42 = vmul.f32 %v4767_v21, %v7217_v51 }
 0x330   : > { %v4769_v52 = vpop.eup %4768  ;;  %4772 = vrcp.f32 %v2934_v55 }
 0x331   : > { %v3060_v61 = vmul.f32 %v4769_v52, %v7225_v1  ;;  %v3432_v36 = vpop.f32.mrf.mxu1 }
 0x332   : > { %v3433_v6 = vadd.f32 %v7020_v43, %v3432_v36 }
 0x333   : > { %v3093_v15 = vpack.c.bf16 %v3060_v61, %v3059_v42  ;;  %v3434_v7 = vpop.f32.mrf.mxu1 }
 0x335   : > { %v3435_v29 = vpop.f32.mrf.mxu1  ;;  %3543 = vmatmul.mubr.bf16.gmra.mxu1 %v3093_v15 }
 0x336   : > { %v3436_v63 = vadd.f32 %v7020_v43, %v3435_v29  ;;  %4087 = vmatprep.mubr.msk.bf16.mxu1 %vm1728_vm5, %v6786_v11  ;;  %v7259_v43 = vld [vmem:[%s7363_s4] ss:$0 sm:$0xff] }
 0x337   : > { %v3437_v12 = vpop.f32.mrf.mxu1 }
 0x338   : > { %v4307_v34 = vpack.c.bf16 %v3436_v63, %v3433_v6 }
 0x339   : > { %v4771_v59 = vpop.eup %4770 }
 0x33a   : > { %4399 = vst [vmem:[%s7028_s13 + $0x80] sm:$0xff] %v4307_v34   ;;  %v3061_v1 = vmul.f32 %v4771_v59, %v7232_v2 }
 0x33d   : > { %v4773_v51 = vpop.eup %4772 }
 0x33e   : > { %v3062_v58 = vmul.f32 %v4773_v51, %v2676_v5  ;;  %v3440_v14 = vpop.f32.mrf.mxu1 }
 0x33f   : > { %v3441_v11 = vadd.f32 %v7259_v43, %v3440_v14 }
 0x340   : > { %v3094_v39 = vpack.c.bf16 %v3062_v58, %v3061_v1  ;;  %v3442_v4 = vpop.f32.mrf.mxu1 }
 0x342   : > { %v3443_v56 = vpop.f32.mrf.mxu1  ;;  %3551 = vmatmul.mubr.bf16.gmra.mxu1 %v3094_v39 }
 0x343   : > { %v3444_v46 = vadd.f32 %v7259_v43, %v3443_v56 }
 0x344   : > { %v3445_v27 = vpop.f32.mrf.mxu1 }
 0x345   : > { %v4312_v33 = vpack.c.bf16 %v3444_v46, %v3441_v11 }
 0x347   : > { %4400 = vst [vmem:[%s7028_s13 + $0x88] sm:$0xff] %v4312_v33  }
 0x34d   : > { %v3448_v9 = vpop.f32.mrf.mxu1 }
 0x34e   : > { %v3449_v16 = vadd.f32 %v7259_v43, %v3448_v9 }
 0x34f   : > { %v3450_v0 = vpop.f32.mrf.mxu1 }
 0x351   : > { %v3451_v2 = vpop.f32.mrf.mxu1 }
 0x352   : > { %v3452_v13 = vadd.f32 %v7259_v43, %v3451_v2 }
 0x353   : > { %v3453_v32 = vpop.f32.mrf.mxu1 }
 0x354   : > { %v4317_v8 = vpack.c.bf16 %v3452_v13, %v3449_v16 }
 0x356   : > { %4401 = vst [vmem:[%s7028_s13 + $0x90] sm:$0xff] %v4317_v8  }
 0x35a   : > { %v3456_v19 = vpop.f32.mrf.mxu1 }
 0x35b   : > { %v3457_v40 = vadd.f32 %v7259_v43, %v3456_v19 }
 0x35c   : > { %v3458_v37 = vpop.f32.mrf.mxu1 }
 0x35e   : > { %v3459_v44 = vpop.f32.mrf.mxu1 }
 0x35f   : > { %v3460_v5 = vadd.f32 %v7259_v43, %v3459_v44 }
 0x360   : > { %v3461_v57 = vpop.f32.mrf.mxu1 }
 0x361   : > { %v4322_v41 = vpack.c.bf16 %v3460_v5, %v3457_v40 }
 0x363   : > { %4402 = vst [vmem:[%s7028_s13 + $0x98] sm:$0xff] %v4322_v41  }
 0x369   : > { %v3464_v20 = vpop.f32.mrf.mxu1 }
 0x36a   : > { %v3465_v23 = vadd.f32 %v7259_v43, %v3464_v20 }
 0x36b   : > { %v3466_v54 = vpop.f32.mrf.mxu1 }
 0x36d   : > { %v3467_v62 = vpop.f32.mrf.mxu1 }
 0x36e   : > { %v3468_v18 = vadd.f32 %v7259_v43, %v3467_v62 }
 0x36f   : > { %v3469_v53 = vpop.f32.mrf.mxu1 }
 0x370   : > { %v4327_v22 = vpack.c.bf16 %v3468_v18, %v3465_v23 }
 0x372   : > { %4403 = vst [vmem:[%s7028_s13 + $0xa0] sm:$0xff] %v4327_v22  }
 0x376   : > { %v3472_v38 = vpop.f32.mrf.mxu1 }
 0x377   : > { %v3473_v30 = vadd.f32 %v7259_v43, %v3472_v38 }
 0x378   : > { %v3474_v45 = vpop.f32.mrf.mxu1 }
 0x37a   : > { %v3475_v48 = vpop.f32.mrf.mxu1 }
 0x37b   : > { %v3476_v26 = vadd.f32 %v7259_v43, %v3475_v48 }
 0x37c   : > { %v3477_v31 = vpop.f32.mrf.mxu1 }
 0x37d   : > { %v4332_v25 = vpack.c.bf16 %v3476_v26, %v3473_v30 }
 0x37f   : > { %4404 = vst [vmem:[%s7028_s13 + $0xa8] sm:$0xff] %v4332_v25  }
 0x385   : > { %v3480_v24 = vpop.f32.mrf.mxu1 }
 0x386   : > { %v3481_v49 = vadd.f32 %v7259_v43, %v3480_v24 }
 0x387   : > { %v3482_v35 = vpop.f32.mrf.mxu1 }
 0x389   : > { %v3483_v17 = vpop.f32.mrf.mxu1 }
 0x38a   : > { %v3484_v50 = vadd.f32 %v7259_v43, %v3483_v17 }
 0x38b   : > { %v3485_v47 = vpop.f32.mrf.mxu1 }
 0x38c   : > { %v4337_v28 = vpack.c.bf16 %v3484_v50, %v3481_v49 }
 0x38e   : > { %4405 = vst [vmem:[%s7028_s13 + $0xb0] sm:$0xff] %v4337_v28  }
 0x392   : > { %v3488_v60 = vpop.f32.mrf.mxu1 }
 0x393   : > { %v3489_v21 = vadd.f32 %v7259_v43, %v3488_v60 }
 0x394   : > { %v3490_v3 = vpop.f32.mrf.mxu1 }
 0x396   : > { %v3491_v10 = vpop.f32.mrf.mxu1 }
 0x397   : > { %v3492_v55 = vadd.f32 %v7259_v43, %v3491_v10 }
 0x398   : > { %v3493_v52 = vpop.f32.mrf.mxu1 }
 0x399   : > { %v4342_v42 = vpack.c.bf16 %v3492_v55, %v3489_v21 }
 0x39b   : > { %4406 = vst [vmem:[%s7028_s13 + $0xb8] sm:$0xff] %v4342_v42  }
 0x3a1   : > { %v3496_v61 = vpop.f32.mrf.mxu1 }
 0x3a2   : > { %v3497_v7 = vadd.f32 %v7259_v43, %v3496_v61 }
 0x3a3   : > { %v3498_v36 = vpop.f32.mrf.mxu1 }
 0x3a5   : > { %v3499_v15 = vpop.f32.mrf.mxu1 }
 0x3a6   : > { %v3500_v29 = vadd.f32 %v7259_v43, %v3499_v15 }
 0x3a7   : > { %v3501_v6 = vpop.f32.mrf.mxu1 }
 0x3a8   : > { %v4347_v63 = vpack.c.bf16 %v3500_v29, %v3497_v7 }
 0x3aa   : > { %4407 = vst [vmem:[%s7028_s13 + $0xc0] sm:$0xff] %v4347_v63  }
 0x3ae   : > { %v3504_v12 = vpop.f32.mrf.mxu1 }
 0x3af   : > { %v3505_v51 = vadd.f32 %v7259_v43, %v3504_v12 }
 0x3b0   : > { %v3506_v34 = vpop.f32.mrf.mxu1 }
 0x3b2   : > { %v3507_v59 = vpop.f32.mrf.mxu1 }
 0x3b3   : > { %v3508_v1 = vadd.f32 %v7259_v43, %v3507_v59 }
 0x3b4   : > { %v3509_v58 = vpop.f32.mrf.mxu1 }
 0x3b5   : > { %v4352_v14 = vpack.c.bf16 %v3508_v1, %v3505_v51 }
 0x3b7   : > { %4408 = vst [vmem:[%s7028_s13 + $0xc8] sm:$0xff] %v4352_v14  }
 0x3bd   : > { %v3512_v39 = vpop.f32.mrf.mxu1 }
 0x3be   : > { %v3513_v11 = vadd.f32 %v7259_v43, %v3512_v39 }
 0x3bf   : > { %v3514_v4 = vpop.f32.mrf.mxu1 }
 0x3c1   : > { %v3515_v56 = vpop.f32.mrf.mxu1 }
 0x3c2   : > { %v3516_v46 = vadd.f32 %v7259_v43, %v3515_v56 }
 0x3c3   : > { %v3517_v27 = vpop.f32.mrf.mxu1 }
 0x3c4   : > { %v4357_v33 = vpack.c.bf16 %v3516_v46, %v3513_v11 }
 0x3c6   : > { %4409 = vst [vmem:[%s7028_s13 + $0xd0] sm:$0xff] %v4357_v33  }
 0x3ca   : > { %v3520_v9 = vpop.f32.mrf.mxu1 }
 0x3cb   : > { %v3521_v16 = vadd.f32 %v7259_v43, %v3520_v9 }
 0x3cc   : > { %v3522_v0 = vpop.f32.mrf.mxu1 }
 0x3ce   : > { %v3523_v2 = vpop.f32.mrf.mxu1 }
 0x3cf   : > { %v3524_v13 = vadd.f32 %v7259_v43, %v3523_v2 }
 0x3d0   : > { %v3525_v32 = vpop.f32.mrf.mxu1 }
 0x3d1   : > { %v4362_v8 = vpack.c.bf16 %v3524_v13, %v3521_v16 }
 0x3d3   : > { %4410 = vst [vmem:[%s7028_s13 + $0xd8] sm:$0xff] %v4362_v8  }
 0x3d9   : > { %v3528_v19 = vpop.f32.mrf.mxu1 }
 0x3da   : > { %v3529_v40 = vadd.f32 %v7259_v43, %v3528_v19 }
 0x3db   : > { %v3530_v37 = vpop.f32.mrf.mxu1 }
 0x3dd   : > { %v3531_v44 = vpop.f32.mrf.mxu1 }
 0x3de   : > { %v3532_v5 = vadd.f32 %v7259_v43, %v3531_v44 }
 0x3df   : > { %v3533_v57 = vpop.f32.mrf.mxu1 }
 0x3e0   : > { %v4367_v41 = vpack.c.bf16 %v3532_v5, %v3529_v40 }
 0x3e2   : > { %4411 = vst [vmem:[%s7028_s13 + $0xe0] sm:$0xff] %v4367_v41  }
 0x3e6   : > { %v3536_v20 = vpop.f32.mrf.mxu1 }
 0x3e7   : > { %v3537_v23 = vadd.f32 %v7259_v43, %v3536_v20 }
 0x3e8   : > { %v3538_v54 = vpop.f32.mrf.mxu1 }
 0x3ea   : > { %v3539_v62 = vpop.f32.mrf.mxu1 }
 0x3eb   : > { %v3540_v18 = vadd.f32 %v7259_v43, %v3539_v62 }
 0x3ec   : > { %v3541_v53 = vpop.f32.mrf.mxu1 }
 0x3ed   : > { %v4372_v22 = vpack.c.bf16 %v3540_v18, %v3537_v23 }
 0x3ef   : > { %4412 = vst [vmem:[%s7028_s13 + $0xe8] sm:$0xff] %v4372_v22  }
 0x3f5   : > { %v3544_v38 = vpop.f32.mrf.mxu1 }
 0x3f6   : > { %v3545_v30 = vadd.f32 %v7259_v43, %v3544_v38 }
 0x3f7   : > { %v3546_v45 = vpop.f32.mrf.mxu1 }
 0x3f9   : > { %v3547_v48 = vpop.f32.mrf.mxu1 }
 0x3fa   : > { %v3548_v26 = vadd.f32 %v7259_v43, %v3547_v48 }
 0x3fb   : > { %v3549_v31 = vpop.f32.mrf.mxu1 }
 0x3fc   : > { %v4377_v25 = vpack.c.bf16 %v3548_v26, %v3545_v30 }
 0x3fe   : > { %4413 = vst [vmem:[%s7028_s13 + $0xf0] sm:$0xff] %v4377_v25  }
 0x402   : > { %v3552_v24 = vpop.f32.mrf.mxu1 }
 0x403   : > { %v3553_v49 = vadd.f32 %v7259_v43, %v3552_v24 }
 0x404   : > { %v3554_v35 = vpop.f32.mrf.mxu1 }
 0x406   : > { %v3555_v17 = vpop.f32.mrf.mxu1 }
 0x407   : > { %v3556_v50 = vadd.f32 %v7259_v43, %v3555_v17 }
 0x408   : > { %v3557_v47 = vpop.f32.mrf.mxu1 }
 0x409   : > { %v4382_v28 = vpack.c.bf16 %v3556_v50, %v3553_v49 }
 0x40b   : > { %4414 = vst [vmem:[%s7028_s13 + $0xf8] sm:$0xff] %v4382_v28  }
 0x40c   : > { %4811 = shalt.err (!%p4808_p4)
}
 0x40d   : > { %s4812_s30 = scalar_lea.hbm %s7310_s16, 4096  ;;  %s4816_s7 = scalar_lea.hbm %s7364_s5, 8192 }
 0x40e   : > { %p4813_p7 = scmp.ne.s32.totalorder %s7310_s16, %s4812_s30  ;;  %p4817_p10 = scmp.lt.s32.totalorder %s7310_s16, %s7364_s5 }
 0x40f   : > { %p4818_p11 = scmp.lt.s32.totalorder %s4816_s7, %s4812_s30 }
 0x410   : > { %p4814_p8 = pnand %p4813_p7, %p4938_p5 }
 0x411   : > { %p4819_p12 = por %p4818_p11, %p4817_p10 }
 0x412   : > { %p4815_p9 = pneg %p4814_p8 }
 0x414   : > { %p4820_p13 = pnand %p4819_p12, %p4815_p9 }
 0x416   : > { %4823 = shalt.err (!%p4820_p13)
}
 0x417   : > { %s4869_s10 = smov 4  }
 0x418   : > { %4415 = dma.vmem_to_hbm [thread:$0]  (%p4938_p5), %s7312_s11, 4096, %s7310_s16, %s7317_s22, %s4866_s25, %s4866_s25, %s4869_s10  }
 0x419 PF: > { %p4421_p0 = scmp.ge.s32.totalorder %s4858_s21, 2  ;;  %s3908_s14 = sand.u32 1, %s4846_s18  }
 0x41a   : > { %s3909_s15 = scalar_lea.sflag [#allocation3], %s3908_s14 }
 0x41b   : > { %p4418_p1 = pnand %p4421_p0, %p4942_p6 }
 0x41d   : > { %p4419_p2 = pneg %p4418_p1 }
 0x41f   : > { %4841 = dma.done.wait (%p4419_p2), %s3909_s15, 4096  }
 0x420   : > { %4843 = vsyncadd (%p4419_p2), %s3909_s15, 4294963200  ;;  %p15_p3 = scmp.ge.s32.totalorder %s4925_s24, 4   ;;  %s7418_s18 = smov %s4850_s19 }
 0x421   : > { %s7419_s19 = smov %s4854_s20  ;;  %s7420_s20 = smov %s4936_s27 }
 0x422   : > { %s7421_s21 = smov %s4925_s24  ;;  %17 = sbr.rel (!%p15_p3) target bundleno = 3 (0x3), region = 75 }
 0x427   :  { %3914 = vsyncpa [#allocation3], 1 }
 0x428   :  { %3916 = vsyncpa [#allocation3 + $0x1], 1 }

// kernel: tpu_custom_call.1
= control target key start
LH: loop header
LB: loop body
LE: loop exit
PB: predicated region body
PF: predicated region fallthrough
CT: control target
= control target key end

     0   :  { %11 = vsyncpa [#allocation3], 0  ;;  %s7374_s0 = inlined_call_operand.vmem [shape: bf16[1536,16], index: 0, kind: input, shape index: {}]   ;;  %s7375_s1 = inlined_call_operand.vmem [shape: bf16[1536,16], index: 1, kind: input, shape index: {}]   ;;  %s7376_s2 = inlined_call_operand.vmem [shape: bf16[144,128], index: 2, kind: input, shape index: {}]   ;;  %s7377_s3 = inlined_call_operand.vmem [shape: f32[1,128], index: 3, kind: input, shape index: {}]   ;;  %s7378_s4 = inlined_call_operand.vmem [shape: bf16[144,128], index: 4, kind: input, shape index: {}]   ;;  %s7379_s5 = inlined_call_operand.vmem [shape: f32[1,128], index: 5, kind: input, shape index: {}]   ;;  %s7380_s6 = inlined_call_operand.hbm [shape: bf16[1024,128], index: 6, kind: output, shape index: {}]  }
   0x1   :  { %13 = vsyncpa [#allocation3 + $0x1], 0  ;;  %s4897_s21 = smov 0   ;;  %s4899_s22 = smov 0  }
   0x2   :  { %s4901_s23 = smov 0   ;;  %s4903_s24 = smov 0  }
   0x3 LB: > { %s4918_s25 = sadd.s32 4294967295, %s4850_s24   ;;  %s3954_s26 = sadd.s32 4294967294, %s4850_s24   ;;  %s4850_s24 = sphi %s4903_s24, %s7430_s24   ;;  %s4846_s23 = sphi %s4901_s23, %s7429_s23   ;;  %s4842_s22 = sphi %s4899_s22, %s7428_s22   ;;  %s4838_s21 = sphi %s4897_s21, %s7427_s21  }
   0x4   : > { %s4922_s27 = sadd.s32 1, %s4850_s24   ;;  %s164_s28 = sadd.s32 1, %s4846_s23 }
   0x5   : > { %s161_s29 = ssub.s32 %s4850_s24, %s4922_s27  ;;  %p174_p0 = scmp.ne.s32.totalorder %s4846_s23, %s4842_s22 }
   0x6   : > { %p162_p1 = scmp.eq.s32.totalorder %s161_s29, 0  ;;  %p175_p2 = scmp.eq.s32.totalorder %s4918_s25, 1 }
   0x7   : > { %p180_p3 = scmp.ne.s32.totalorder %s4842_s22, %s4838_s21  ;;  %p181_p4 = scmp.eq.s32.totalorder %s3954_s26, 1 }
   0x8   : > { %s4933_s30 = scalar_select %p162_p1, %s4846_s23, %s164_s28  }
   0x9   : > { %p4935_p5 = por %p175_p2, %p174_p0  ;;  %p4939_p6 = por %p181_p4, %p180_p3 }
   0xa   : > { %p3957_p7 = scmp.ge.s32.totalorder %s4850_s24, 1  ;;  %p231_p8 = scmp.lt.s32.totalorder %s4850_s24, 3 }
   0xc   : > { %p232_p9 = pnand %p3957_p7, %p231_p8 }
   0xe   : > { %235 = sbr.rel (%p232_p9) target bundleno = 1045 (0x415), region = 44 }
  0x13   : > { %s4946_s9 = sshll.u32 %s4918_s25, 6  ;;  %v4467_v0 = vld [vmem:[%s7376_s2 + $0x38] sm:$0xff]   ;;  %v4852_v1 = vmov 0   ;;  %v4468_v2 = vld [vmem:[%s7376_s2 + $0x30] sm:$0xff]   ;;  %vm853_vm0 = vcmask 1046528   ;;  %v4469_v3 = vld [vmem:[%s7376_s2 + $0x28] sm:$0xff]  }
  0x14   : > { %p268_p10 = scmp.lt.s32.totalorder %s4946_s9, 191  ;;  %2377 = vmatprep.subr.bf16.mxu0 %v4852_v1  ;;  %3257 = vmatprep.subr.bf16.mxu1 %v4852_v1  ;;  %vm1252_vm1 = vcmask 1045504   ;;  %v4471_v18 = vld [vmem:[%s7376_s2 + $0x20] sm:$0xff]   ;;  %s4853_s29 = smov 48   ;;  %vm1049_vm2 = vsmask.f32 6400 }
  0x15   : > { %2378 = vmatpush1.bf16.msra.mxu0 %v4467_v0  ;;  %s4854_s10 = smov 32   ;;  %s4855_s11 = smov 96   ;;  %vm528_vm3 = vsmask.f32 7424  ;;  %v4472_v45 = vld [vmem:[%s7376_s2 + $0x18] sm:$0xff]   ;;  %v4473_v54 = vld [vmem:[%s7376_s2 + $0x10] sm:$0xff]  }
  0x16   : > { %s269_s12 = scalar_select %p268_p10, %s4946_s9, 191  ;;  %2379 = vmatprep.subr.bf16.mxu0 %v4852_v1  ;;  %vm1448_vm4 = vsmask.f32 5376  ;;  %v4475_v60 = vld [vmem:[%s7376_s2 + $0x8] sm:$0xff]   ;;  %v4476_v0 = vld [vmem:[%s7376_s2] sm:$0xff]   ;;  %vm1715_vm5 = vcmask 130048  }
  0x17   : > { %s4857_s17 = smov 64   ;;  %s4858_s19 = smov 16   ;;  %vm1649_vm6 = vcmask 1044480   ;;  %vm1780_vm7 = vcmask 261120   ;;  %vm1845_vm8 = vcmask 392192   ;;  %vm1910_vm9 = vcmask 523264  }
  0x18   : > { %s3960_s15 = sshll.u32 %s269_s12, 2  ;;  %s4856_s12 = smov 80   ;;  %vm1975_vm10 = vcmask 654336   ;;  %vm2040_vm11 = vcmask 785408   ;;  %vm2105_vm12 = vcmask 916480  }
  0x19   : > { %s4962_s18 = scalar_lea.vmem %s7374_s0, %s3960_s15  ;;  %2380 = vmatpush1.bf16.msra.mxu0 %v4468_v2  ;;  %s4859_s28 = smov 112  }
  0x1a   : > { %v4968_v4 = vld [vmem:[%s4962_s18 + $0x8] sm:$0xff]   ;;  %v4971_v5 = vld [vmem:[%s4962_s18 + $0x10] sm:$0xff]   ;;  %v4974_v6 = vld [vmem:[%s4962_s18] sm:$0xff]   ;;  %2381 = vmatprep.subr.bf16.mxu0 %v4852_v1  ;;  %s4152_s20 = sadd.s32 64, %s4946_s9 }
  0x1b   : > { %v855_v7 = vrot.slane %v4968_v4, 1  ;;  %v857_v8 = vrot.slane %v4971_v5, 1  ;;  %v854_v9 = vrot.slane %v4974_v6, 1  ;;  %v4981_v10 = vld [vmem:[%s4962_s18 + $0x18] sm:$0xff]   ;;  %v1254_v11 = vrot.slane %v4971_v5, 2  ;;  %v5024_v34 = vld [vmem:[%s4962_s18 + $0x20] sm:$0xff]  }
  0x1c   : > { %v1253_v12 = vrot.slane %v4968_v4, 2  ;;  %v537_v13 = vshll.u32 %v4968_v4, 16  ;;  %v541_v15 = vshrl.u32 %v4968_v4, 16  ;;  %v4989_v16 = vshll.u32 %v4971_v5, 16  ;;  %v5078_v2 = vld [vmem:[%s4962_s18 + $0x28] sm:$0xff]   ;;  %p275_p11 = scmp.lt.s32.totalorder %s4152_s20, 191 }
  0x1d   : > { %v858_v14 = vsel %vm853_vm0, %v855_v7, %v857_v8  ;;  %v4992_v17 = vshrl.u32 %v4971_v5, 16  ;;  %2382 = vmatpush1.bf16.msra.mxu0 %v4469_v3  ;;  %v856_v19 = vsel %vm853_vm0, %v854_v9, %v855_v7  ;;  %v1256_v20 = vrot.slane %v4981_v10, 2 }
  0x1e   : > { %985 = vrot.lane.b32.xlu1 %v858_v14, %s4853_s29  ;;  %v859_v21 = vrot.slane %v4981_v10, 1  ;;  %2383 = vmatprep.subr.bf16.mxu0 %v4852_v1  ;;  %v1050_v22 = vrot.slane %v541_v15, 1  ;;  %v1051_v23 = vrot.slane %v537_v13, 2  ;;  %v1054_v25 = vrot.slane %v4989_v16, 2  ;;  %s7432_s20 = smov (!%p275_p11, %s4152_s20), 191 }
  0x1f   : > { %919 = vrot.lane.b32.xlu0 %v856_v19, %s4854_s10  ;;  %v1053_v24 = vrot.slane %v4992_v17, 1  ;;  %v1257_v26 = vsel %vm1252_vm1, %v1254_v11, %v1256_v20  ;;  %v1255_v27 = vsel %vm1252_vm1, %v1253_v12, %v1254_v11  ;;  %v530_v28 = vshrl.u32 %v4974_v6, 16  ;;  %s3962_s9 = sshll.u32 %s7432_s20, 2 }
  0x20   : > { %v532_v29 = vshll.u32 %v4974_v6, 16  ;;  %v5015_v30 = vsel %vm853_vm0, %v857_v8, %v859_v21  ;;  %v5018_v32 = vshll.u32 %v4981_v10, 16  ;;  %v5021_v33 = vshrl.u32 %v4981_v10, 16  ;;  %s5964_s14 = scalar_lea.vmem %s7375_s1, %s3962_s9 }
  0x21   : > { %2384 = vmatpush1.bf16.msra.mxu0 %v4471_v18  ;;  %v1052_v35 = vor.u32 %v1051_v23, %v1050_v22  ;;  %v1055_v36 = vor.u32 %v1054_v25, %v1053_v24  ;;  %v539_v37 = vrot.slane %v537_v13, 1  ;;  %v1449_v38 = vrot.slane %v4992_v17, 2  ;;  %v4477_v13 = vld [vmem:[%s7376_s2 + $0x40] sm:$0xff]  }
  0x22   : > { %1384 = vrot.lane.b32.xlu1 %v1257_v26, %s4855_s11  ;;  %v534_v31 = vrot.slane %v532_v29, 1  ;;  %2385 = vmatprep.subr.bf16.mxu0 %v4852_v1  ;;  %v1450_v40 = vrot.slane %v4989_v16, 3  ;;  %v1452_v41 = vrot.slane %v5021_v33, 2  ;;  %v1453_v42 = vrot.slane %v5018_v32, 3 }
  0x23   : > { %1318 = vrot.lane.b32.xlu0 %v1255_v27, %s4856_s12  ;;  %v547_v43 = vrot.slane %v4989_v16, 1  ;;  %v1057_v44 = vrot.slane %v5021_v33, 1  ;;  %v5041_v46 = vsel %vm1049_vm2, %v1052_v35, %v1055_v36  ;;  %v543_v47 = vor.u32 %v541_v15, %v539_v37 }
  0x24   : > { %v535_v39 = vor.u32 %v534_v31, %v530_v28  ;;  %v5044_v48 = vshll.u32 %v5024_v34, 16  ;;  %v5047_v49 = vshrl.u32 %v5024_v34, 16  ;;  %v1451_v51 = vor.u32 %v1450_v40, %v1449_v38  ;;  %v5123_v28 = vld [vmem:[%s4962_s18 + $0x30] sm:$0xff]   ;;  %4050 = vmatprep.mubr.msk.bf16.mxu1 %vm1715_vm5, %v5041_v46 }
  0x25   : > { %v1454_v52 = vor.u32 %v1453_v42, %v1452_v41  ;;  %v1058_v53 = vrot.slane %v5018_v32, 2  ;;  %2386 = vmatpush1.bf16.msra.mxu0 %v4472_v45  ;;  %v548_v55 = vsel %vm528_vm3, %v543_v47, %v547_v43  ;;  %v1258_v63 = vrot.slane %v5024_v34, 2 }
  0x26   : > { %987 = vrot.lane.b32.xlu1 %v5015_v30, %s4853_s29  ;;  %v540_v50 = vsel %vm528_vm3, %v535_v39, %v539_v37  ;;  %2387 = vmatprep.subr.bf16.mxu0 %v4852_v1  ;;  %v1456_v56 = vrot.slane %v5047_v49, 2  ;;  %v1457_v57 = vrot.slane %v5044_v48, 3  ;;  %v1061_v7 = vrot.slane %v5047_v49, 1 }
  0x27   : > { %921 = vrot.lane.b32.xlu0 %v858_v14, %s4854_s10  ;;  %v1455_v58 = vsel %vm1448_vm4, %v1451_v51, %v1454_v52  ;;  %v1059_v59 = vor.u32 %v1058_v53, %v1057_v44  ;;  %v1062_v8 = vrot.slane %v5044_v48, 2  ;;  %v1259_v9 = vsel %vm1252_vm1, %v1256_v20, %v1258_v63 }
  0x28   : > { %v1458_v61 = vor.u32 %v1457_v57, %v1456_v56  ;;  %v551_v11 = vor.u32 %v4992_v17, %v547_v43  ;;  %v555_v12 = vrot.slane %v5018_v32, 1  ;;  %v861_v14 = vrot.slane %v5024_v34, 1 }
  0x29   : > { %2388 = vmatpush1.bf16.msra.mxu0 %v4473_v54  ;;  %v5069_v62 = vsel %vm1049_vm2, %v1055_v36, %v1059_v59  ;;  %v1063_v15 = vor.u32 %v1062_v8, %v1061_v7  ;;  %v5099_v17 = vshll.u32 %v5078_v2, 16  ;;  %v5102_v18 = vshrl.u32 %v5078_v2, 16  ;;  %v5167_v54 = vld [vmem:[%s4962_s18 + $0x38] sm:$0xff]  }
  0x2a   : > { %1188 = vrot.lane.b32.xlu1 %v5041_v46, %s4857_s17  ;;  %2389 = vmatprep.subr.bf16.mxu0 %v4852_v1  ;;  %v1459_v3 = vsel %vm1448_vm4, %v1454_v52, %v1458_v61  ;;  %v556_v16 = vsel %vm528_vm3, %v551_v11, %v555_v12  ;;  %v1260_v20 = vrot.slane %v5078_v2, 2  ;;  %v862_v22 = vsel %vm853_vm0, %v859_v21, %v861_v14 }
  0x2b   : > { %789 = vrot.lane.b32.xlu0 %v540_v50, %s4858_s19  ;;  %v5108_v19 = vsel %vm1049_vm2, %v1059_v59, %v1063_v15  ;;  %v1460_v23 = vrot.slane %v5102_v18, 2  ;;  %v1461_v24 = vrot.slane %v5099_v17, 3  ;;  %v563_v27 = vrot.slane %v5044_v48, 1 }
  0x2c   : > { %v1261_v25 = vsel %vm1252_vm1, %v1258_v63, %v1260_v20  ;;  %v5130_v31 = vshll.u32 %v5123_v28, 16  ;;  %v5133_v32 = vshrl.u32 %v5123_v28, 16  ;;  %v1065_v35 = vrot.slane %v5102_v18, 1 }
  0x2d   : > { %2390 = vmatpush1.bf16.msra.mxu0 %v4475_v60  ;;  %v1462_v29 = vor.u32 %v1461_v24, %v1460_v23  ;;  %v1066_v36 = vrot.slane %v5099_v17, 2  ;;  %v1650_v41 = vrot.slane %v4971_v5, 3  ;;  %v1651_v42 = vrot.slane %v4981_v10, 3 }
  0x2e   : > { %791 = vrot.lane.b32.xlu1 %v548_v55, %s4858_s19  ;;  %2391 = vmatprep.subr.bf16.mxu0 %v4852_v1  ;;  %v1464_v38 = vrot.slane %v5133_v32, 2  ;;  %v1465_v39 = vrot.slane %v5130_v31, 3  ;;  %v1262_v46 = vrot.slane %v5123_v28, 2  ;;  %v1069_v48 = vrot.slane %v5133_v32, 1 }
  0x2f   : > { %1585 = vrot.lane.b32.xlu0 %v1455_v58, %s4859_s28  ;;  %v1067_v40 = vor.u32 %v1066_v36, %v1065_v35  ;;  %v1652_v44 = vsel %vm1649_vm6, %v1650_v41, %v1651_v42  ;;  %v1070_v50 = vrot.slane %v5130_v31, 2  ;;  %v567_v52 = vor.u32 %v5047_v49, %v563_v27  ;;  %v5227_v36 = vld [vmem:[%s4962_s18 + $0x48] sm:$0xff]  }
  0x30   : > { %v1466_v43 = vor.u32 %v1465_v39, %v1464_v38  ;;  %4008 = vmatprep.mubr.msk.bf16.mxu0 %vm1715_vm5, %v1652_v44  ;;  %v1263_v51 = vsel %vm1252_vm1, %v1260_v20, %v1262_v46  ;;  %v571_v53 = vrot.slane %v5099_v17, 1  ;;  %v865_v57 = vrot.slane %v5123_v28, 1 }
  0x31   : > { %2392 = vmatpush1.bf16.msra.mxu0 %v4476_v0  ;;  %v5153_v45 = vsel %vm1049_vm2, %v1063_v15, %v1067_v40  ;;  %v1071_v55 = vor.u32 %v1070_v50, %v1069_v48  ;;  %v5174_v58 = vshll.u32 %v5167_v54, 16  ;;  %v589_v59 = vshrl.u32 %v5167_v54, 16 }
  0x32   : > { %1320 = vrot.lane.b32.xlu1 %v1257_v26, %s4856_s12  ;;  %2407 = vmatprep.subr.bf16.mxu0 %v4852_v1  ;;  %v559_v26 = vor.u32 %v5021_v33, %v555_v12  ;;  %v1463_v33 = vsel %vm1448_vm4, %v1458_v61, %v1462_v29  ;;  %v1467_v47 = vsel %vm1448_vm4, %v1462_v29, %v1466_v43  ;;  %v1264_v60 = vrot.slane %v5167_v54, 2 }
  0x33   : > { %1190 = vrot.lane.b32.xlu0 %v5069_v62, %s4857_s17  ;;  %v572_v56 = vsel %vm528_vm3, %v567_v52, %v571_v53  ;;  %v5180_v49 = vsel %vm1049_vm2, %v1067_v40, %v1071_v55  ;;  %v1468_v63 = vrot.slane %v589_v59, 2  ;;  %v1469_v0 = vrot.slane %v5174_v58, 3  ;;  %v5254_v52 = vld [vmem:[%s4962_s18 + $0x50] sm:$0xff]  }
  0x34   : > { %v564_v21 = vsel %vm528_vm3, %v559_v26, %v563_v27  ;;  %v575_v7 = vor.u32 %v5102_v18, %v571_v53  ;;  %v579_v8 = vrot.slane %v5130_v31, 1  ;;  %v1073_v17 = vrot.slane %v589_v59, 1 }
  0x35   : > { %2408 = vmatpush2.bf16.msra.mxu0 %v4477_v13  ;;  %v1470_v11 = vor.u32 %v1469_v0, %v1468_v63  ;;  %v867_v13 = vrot.slane %v5167_v54, 1  ;;  %v1074_v18 = vrot.slane %v5174_v58, 2  ;;  %v587_v35 = vrot.slane %v5174_v58, 1 }
  0x36   : > { %1587 = vrot.lane.b32.xlu1 %v1459_v3, %s4859_s28  ;;  %v1265_v3 = vsel %vm1252_vm1, %v1262_v46, %v1264_v60  ;;  %v580_v12 = vsel %vm528_vm3, %v575_v7, %v579_v8  ;;  %v5234_v40 = vshll.u32 %v5227_v36, 16  ;;  %v5237_v41 = vshrl.u32 %v5227_v36, 16 }
  0x37   : > { %1386 = vrot.lane.b32.xlu0 %v1259_v9, %s4855_s11  ;;  %v868_v20 = vsel %vm853_vm0, %v865_v57, %v867_v13  ;;  %v1075_v24 = vor.u32 %v1074_v18, %v1073_v17  ;;  %v591_v50 = vor.u32 %v589_v59, %v587_v35  ;;  %v5264_v58 = vshrl.u32 %v5254_v52, 16 }
  0x38   : > { %v1476_v46 = vrot.slane %v5237_v41, 2 }
  0x39   : > { %v5214_v26 = vsel %vm1049_vm2, %v1071_v55, %v1075_v24  ;;  %v1480_v0 = vrot.slane %v5264_v58, 2 }
  0x3a   : > { %923 = vrot.lane.b32.xlu1 %v5015_v30, %s4854_s10  ;;  %v863_v30 = vrot.slane %v5078_v2, 1 }
  0x3b   : > { %793 = vrot.lane.b32.xlu0 %v556_v16, %s4858_s19  ;;  %v1471_v16 = vsel %vm1448_vm4, %v1466_v43, %v1470_v11  ;;  %v1268_v43 = vrot.slane %v5227_v36, 2 }
  0x3c   : > { %v864_v37 = vsel %vm853_vm0, %v861_v14, %v863_v30  ;;  %v866_v61 = vsel %vm853_vm0, %v863_v30, %v865_v57  ;;  %v5261_v57 = vshll.u32 %v5254_v52, 16 }
  0x3e   : > { %1192 = vrot.lane.b32.xlu1 %v5108_v19, %s4857_s17 }
  0x3f   : > { %989 = vrot.lane.b32.xlu0 %v862_v22, %s4853_s29 }
  0x42   : > { %1388 = vrot.lane.b32.xlu1 %v1261_v25, %s4855_s11 }
  0x43   : > { %1322 = vrot.lane.b32.xlu0 %v1259_v9, %s4856_s12  ;;  %v5192_v9 = vld [vmem:[%s4962_s18 + $0x40] sm:$0xff]  }
  0x44   : > { %v5199_v14 = vshll.u32 %v5192_v9, 16  ;;  %v5202_v15 = vshrl.u32 %v5192_v9, 16  ;;  %v1266_v27 = vrot.slane %v5192_v9, 2  ;;  %v869_v39 = vrot.slane %v5192_v9, 1 }
  0x46   : > { %795 = vrot.lane.b32.xlu1 %v564_v21, %s4858_s19  ;;  %v1473_v23 = vrot.slane %v5199_v14, 3  ;;  %v1077_v21 = vrot.slane %v5202_v15, 1  ;;  %v1078_v30 = vrot.slane %v5199_v14, 2  ;;  %v1267_v31 = vsel %vm1252_vm1, %v1264_v60, %v1266_v27 }
  0x47   : > { %1589 = vrot.lane.b32.xlu0 %v1463_v33, %s4859_s28  ;;  %v583_v33 = vor.u32 %v5133_v32, %v579_v8  ;;  %v870_v44 = vsel %vm853_vm0, %v867_v13, %v869_v39  ;;  %v1269_v48 = vsel %vm1252_vm1, %v1266_v27, %v1268_v43  ;;  %v1081_v60 = vrot.slane %v5237_v41, 1 }
  0x49   : > { %v588_v38 = vsel %vm528_vm3, %v583_v33, %v587_v35 }
  0x4a   : > { %991 = vrot.lane.b32.xlu1 %v864_v37, %s4853_s29 }
  0x4b   : > { %925 = vrot.lane.b32.xlu0 %v862_v22, %s4854_s10  ;;  %v1472_v22 = vrot.slane %v5202_v15, 2 }
  0x4e   : > { %1324 = vrot.lane.b32.xlu1 %v1261_v25, %s4856_s12  ;;  %v1474_v25 = vor.u32 %v1473_v23, %v1472_v22  ;;  %v5290_v22 = vld [vmem:[%s4962_s18 + $0x58] sm:$0xff]  }
  0x4f   : > { %1194 = vrot.lane.b32.xlu0 %v5153_v45, %s4857_s17  ;;  %v5297_v27 = vshll.u32 %v5290_v22, 16 }
  0x50   : > { %v1475_v29 = vsel %vm1448_vm4, %v1470_v11, %v1474_v25 }
  0x51   : > { %v1485_v35 = vrot.slane %v5297_v27, 3 }
  0x52   : > { %1591 = vrot.lane.b32.xlu1 %v1467_v47, %s4859_s28  ;;  %v1477_v47 = vrot.slane %v5234_v40, 3 }
  0x53   : > { %1390 = vrot.lane.b32.xlu0 %v1263_v51, %s4855_s11 }
  0x54   : > { %v1478_v53 = vor.u32 %v1477_v47, %v1476_v46 }
  0x56   : > { %927 = vrot.lane.b32.xlu1 %v864_v37, %s4854_s10  ;;  %v1079_v37 = vor.u32 %v1078_v30, %v1077_v21  ;;  %v1479_v59 = vsel %vm1448_vm4, %v1474_v25, %v1478_v53  ;;  %v873_v25 = vrot.slane %v5254_v52, 1  ;;  %v1272_v21 = vrot.slane %v5290_v22, 2 }
  0x57   : > { %797 = vrot.lane.b32.xlu0 %v572_v56, %s4858_s19  ;;  %v871_v56 = vrot.slane %v5227_v36, 1 }
  0x58   : > { %v5242_v32 = vsel %vm1049_vm2, %v1075_v24, %v1079_v37 }
  0x59   : > { %v872_v63 = vsel %vm853_vm0, %v869_v39, %v871_v56 }
  0x5a   : > { %1196 = vrot.lane.b32.xlu1 %v5180_v49, %s4857_s17 }
  0x5b   : > { %993 = vrot.lane.b32.xlu0 %v866_v61, %s4853_s29 }
  0x5e   : > { %1392 = vrot.lane.b32.xlu1 %v1265_v3, %s4855_s11 }
  0x5f   : > { %1326 = vrot.lane.b32.xlu0 %v1263_v51, %s4856_s12  ;;  %v595_v51 = vrot.slane %v5199_v14, 1  ;;  %v1085_v14 = vrot.slane %v5264_v58, 1 }
  0x61   : > { %v596_v55 = vsel %vm528_vm3, %v591_v50, %v595_v51  ;;  %v599_v18 = vor.u32 %v5202_v15, %v595_v51  ;;  %v875_v50 = vrot.slane %v5290_v22, 1 }
  0x62   : > { %799 = vrot.lane.b32.xlu1 %v580_v12, %s4858_s19  ;;  %v1270_v12 = vrot.slane %v5254_v52, 2 }
  0x63   : > { %1593 = vrot.lane.b32.xlu0 %v1471_v16, %s4859_s28  ;;  %v1086_v16 = vrot.slane %v5261_v57, 2 }
  0x64   : > { %v1271_v17 = vsel %vm1252_vm1, %v1268_v43, %v1270_v12  ;;  %v5320_v43 = vld [vmem:[%s4962_s18 + $0x60] sm:$0xff]  }
  0x65   : > { %v1087_v23 = vor.u32 %v1086_v16, %v1085_v14  ;;  %v5327_v51 = vshll.u32 %v5320_v43, 16 }
  0x66   : > { %995 = vrot.lane.b32.xlu1 %v868_v20, %s4853_s29 }
  0x67   : > { %929 = vrot.lane.b32.xlu0 %v866_v61, %s4854_s10  ;;  %v1082_v61 = vrot.slane %v5234_v40, 2 }
  0x69   : > { %v1083_v7 = vor.u32 %v1082_v61, %v1081_v60  ;;  %v876_v60 = vsel %vm853_vm0, %v873_v25, %v875_v50 }
  0x6a   : > { %1328 = vrot.lane.b32.xlu1 %v1265_v3, %s4856_s12  ;;  %v1481_v3 = vrot.slane %v5261_v57, 3 }
  0x6b   : > { %1198 = vrot.lane.b32.xlu0 %v5214_v26, %s4857_s17  ;;  %v5277_v11 = vsel %vm1049_vm2, %v1079_v37, %v1083_v7  ;;  %v5305_v15 = vsel %vm1049_vm2, %v1083_v7, %v1087_v23 }
  0x6c   : > { %v1482_v8 = vor.u32 %v1481_v3, %v1480_v0 }
  0x6e   : > { %1595 = vrot.lane.b32.xlu1 %v1475_v29, %s4859_s28  ;;  %v1483_v13 = vsel %vm1448_vm4, %v1478_v53, %v1482_v8  ;;  %v5300_v29 = vshrl.u32 %v5290_v22, 16 }
  0x6f   : > { %1394 = vrot.lane.b32.xlu0 %v1267_v31, %s4855_s11 }
  0x70   : > { %v1484_v33 = vrot.slane %v5300_v29, 2 }
  0x72   : > { %931 = vrot.lane.b32.xlu1 %v868_v20, %s4854_s10  ;;  %v603_v20 = vrot.slane %v5234_v40, 1  ;;  %v611_v40 = vrot.slane %v5261_v57, 1  ;;  %v1486_v46 = vor.u32 %v1485_v35, %v1484_v33  ;;  %v1090_v57 = vrot.slane %v5297_v27, 2 }
  0x73   : > { %801 = vrot.lane.b32.xlu0 %v588_v38, %s4858_s19  ;;  %v1273_v38 = vsel %vm1252_vm1, %v1270_v12, %v1272_v21  ;;  %v1653_v12 = vrot.slane %v5024_v34, 3 }
  0x74   : > { %v604_v24 = vsel %vm528_vm3, %v599_v18, %v603_v20  ;;  %v607_v39 = vor.u32 %v5237_v41, %v603_v20  ;;  %v5330_v41 = vshrl.u32 %v5320_v43, 16 }
  0x76   : > { %1200 = vrot.lane.b32.xlu1 %v5242_v32, %s4857_s17  ;;  %v1488_v61 = vrot.slane %v5330_v41, 2  ;;  %v1093_v33 = vrot.slane %v5330_v41, 1 }
  0x77   : > { %997 = vrot.lane.b32.xlu0 %v870_v44, %s4853_s29 }
  0x7a   : > { %1396 = vrot.lane.b32.xlu1 %v1269_v48, %s4855_s11 }
  0x7b   : > { %1330 = vrot.lane.b32.xlu0 %v1267_v31, %s4856_s12  ;;  %v874_v31 = vsel %vm853_vm0, %v871_v56, %v873_v25  ;;  %v1089_v56 = vrot.slane %v5300_v29, 1 }
  0x7d   : > { %v1091_v3 = vor.u32 %v1090_v57, %v1089_v56  ;;  %v5379_v56 = vld [vmem:[%s4962_s18 + $0x68] sm:$0xff]  }
  0x7e   : > { %803 = vrot.lane.b32.xlu1 %v596_v55, %s4858_s19  ;;  %v1487_v55 = vsel %vm1448_vm4, %v1482_v8, %v1486_v46 }
  0x7f   : > { %1597 = vrot.lane.b32.xlu0 %v1479_v59, %s4859_s28  ;;  %v5352_v18 = vsel %vm1049_vm2, %v1087_v23, %v1091_v3  ;;  %v1654_v23 = vsel %vm1649_vm6, %v1651_v42, %v1653_v12 }
  0x82   : > { %999 = vrot.lane.b32.xlu1 %v872_v63, %s4853_s29 }
  0x83   : > { %933 = vrot.lane.b32.xlu0 %v870_v44, %s4854_s10 }
  0x86   : > { %1332 = vrot.lane.b32.xlu1 %v1269_v48, %s4856_s12  ;;  %v612_v48 = vsel %vm528_vm3, %v607_v39, %v611_v40 }
  0x87   : > { %1202 = vrot.lane.b32.xlu0 %v5277_v11, %s4857_s17 }
  0x8a   : > { %1599 = vrot.lane.b32.xlu1 %v1483_v13, %s4859_s28 }
  0x8b   : > { %1398 = vrot.lane.b32.xlu0 %v1271_v17, %s4855_s11 }
  0x8e   : > { %935 = vrot.lane.b32.xlu1 %v872_v63, %s4854_s10  ;;  %v1489_v63 = vrot.slane %v5327_v51, 3 }
  0x8f   : > { %805 = vrot.lane.b32.xlu0 %v604_v24, %s4858_s19 }
  0x90   : > { %v986_v30 = vpop.permute.xlu1 %985  ;;  %v5348_v14 = vor.u32 %v1489_v63, %v1488_v61 }
  0x91   : > { %v920_v37 = vpop.permute.xlu0 %919 }
  0x92   : > { %1204 = vrot.lane.b32.xlu1 %v5305_v15, %s4857_s17 }
  0x93   : > { %1001 = vrot.lane.b32.xlu0 %v874_v31, %s4853_s29 }
  0x94   : > { %v1385_v44 = vpop.permute.xlu1 %1384 }
  0x95   : > { %v1319_v47 = vpop.permute.xlu0 %1318 }
  0x96   : > { %1400 = vrot.lane.b32.xlu1 %v1273_v38, %s4855_s11 }
  0x97   : > { %1334 = vrot.lane.b32.xlu0 %v1271_v17, %s4856_s12 }
  0x98   : > { %v988_v53 = vpop.permute.xlu1 %987 }
  0x99   : > { %v922_v59 = vpop.permute.xlu0 %921 }
  0x9a   : > { %807 = vrot.lane.b32.xlu1 %v612_v48, %s4858_s19  ;;  %v615_v48 = vor.u32 %v5264_v58, %v611_v40  ;;  %v5391_v40 = vshll.u32 %v5379_v56, 16 }
  0x9b   : > { %1601 = vrot.lane.b32.xlu0 %v1487_v55, %s4859_s28  ;;  %v619_v55 = vrot.slane %v5297_v27, 1  ;;  %v877_v27 = vrot.slane %v5320_v43, 1 }
  0x9c   : > { %v1189_v0 = vpop.permute.xlu1 %1188 }
  0x9d   : > { %v790_v7 = vpop.permute.xlu0 %789  ;;  %v620_v58 = vsel %vm528_vm3, %v615_v48, %v619_v55  ;;  %v1098_v48 = vrot.slane %v5391_v40, 2 }
  0x9e   : > { %v1717_v8 = vsel %vm1715_vm5, %v4974_v6, %v790_v7  ;;  %1003 = vrot.lane.b32.xlu1 %v876_v60, %s4853_s29  ;;  %v1274_v6 = vrot.slane %v5320_v43, 2 }
  0x9f   : > { %v1782_v13 = vsel %vm1780_vm7, %v1717_v8, %v920_v37  ;;  %937 = vrot.lane.b32.xlu0 %v874_v31, %s4854_s10  ;;  %v1491_v37 = vsel %vm1448_vm4, %v1486_v46, %v5348_v14 }
  0xa0   : > { %v1847_v16 = vsel %vm1845_vm8, %v1782_v13, %v986_v30  ;;  %v792_v17 = vpop.permute.xlu1 %791  ;;  %v1275_v42 = vsel %vm1252_vm1, %v1272_v21, %v1274_v6  ;;  %v1655_v21 = vrot.slane %v5078_v2, 3  ;;  %v1276_v13 = vrot.slane %v5379_v56, 2 }
  0xa1   : > { %v1719_v20 = vsel %vm1715_vm5, %v4968_v4, %v792_v17  ;;  %v1586_v24 = vpop.permute.xlu0 %1585  ;;  %v1912_v25 = vsel %vm1910_vm9, %v1847_v16, %v1189_v0 }
  0xa2   : > { %v1784_v31 = vsel %vm1780_vm7, %v1719_v20, %v922_v59  ;;  %1336 = vrot.lane.b32.xlu1 %v1273_v38, %s4856_s12  ;;  %v1977_v30 = vsel %vm1975_vm10, %v1912_v25, %v1319_v47  ;;  %v1094_v38 = vrot.slane %v5327_v51, 2  ;;  %v5394_v59 = vshrl.u32 %v5379_v56, 16 }
  0xa3   : > { %1206 = vrot.lane.b32.xlu0 %v5352_v18, %s4857_s17  ;;  %v2042_v4 = vsel %vm2040_vm11, %v1977_v30, %v1385_v44  ;;  %v1849_v35 = vsel %vm1845_vm8, %v1784_v31, %v988_v53  ;;  %v1656_v16 = vsel %vm1649_vm6, %v1653_v12, %v1655_v21  ;;  %v878_v20 = vsel %vm853_vm0, %v875_v50, %v877_v27  ;;  %v5424_v30 = vld [vmem:[%s4962_s18 + $0x70] sm:$0xff]  }
  0xa4   : > { %v2107_v39 = vsel %vm2105_vm12, %v2042_v4, %v1586_v24  ;;  %v1321_v47 = vpop.permute.xlu1 %1320  ;;  %v5385_v46 = vor.u32 %v1094_v38, %v1093_v33  ;;  %v1493_v24 = vrot.slane %v5391_v40, 3  ;;  %v1277_v50 = vsel %vm1252_vm1, %v1274_v6, %v1276_v13 }
  0xa5   : > { %2410 = vmatmul.mubr.bf16.vlgmr.msra.gmra.mxu0 %v2107_v39  ;;  %v1191_v44 = vpop.permute.xlu0 %1190  ;;  %v623_v12 = vor.u32 %v5300_v29, %v619_v55  ;;  %v627_v31 = vrot.slane %v5327_v51, 1  ;;  %v879_v6 = vrot.slane %v5379_v56, 1  ;;  %v5433_v29 = vshll.u32 %v5424_v30, 16 }
  0xa6   : > { %v1914_v53 = vsel %vm1910_vm9, %v1849_v35, %v1191_v44  ;;  %1603 = vrot.lane.b32.xlu1 %v1491_v37, %s4859_s28  ;;  %4009 = vmatprep.mubr.msk.bf16.mxu0 %vm1715_vm5, %v1654_v23  ;;  %v5403_v8 = vsel %vm1049_vm2, %v1091_v3, %v5385_v46  ;;  %v5436_v51 = vshrl.u32 %v5424_v30, 16  ;;  %v1657_v44 = vrot.slane %v5123_v28, 3 }
  0xa7   : > { %1402 = vrot.lane.b32.xlu0 %v1275_v42, %s4855_s11  ;;  %v1979_v61 = vsel %vm1975_vm10, %v1914_v53, %v1321_v47  ;;  %v628_v37 = vsel %vm528_vm3, %v623_v12, %v627_v31  ;;  %v1097_v47 = vrot.slane %v5394_v59, 1 }
  0xa8   : > { %v1588_v57 = vpop.permute.xlu1 %1587 }
  0xa9   : > { %v1387_v63 = vpop.permute.xlu0 %1386 }
  0xaa   : > { %v2044_v0 = vsel %vm2040_vm11, %v1979_v61, %v1387_v63  ;;  %939 = vrot.lane.b32.xlu1 %v876_v60, %s4854_s10  ;;  %v1492_v60 = vrot.slane %v5394_v59, 2  ;;  %v1099_v63 = vor.u32 %v1098_v48, %v1097_v47 }
  0xab   : > { %809 = vrot.lane.b32.xlu0 %v620_v58, %s4858_s19  ;;  %v2110_v7 = vsel %vm2105_vm12, %v2044_v0, %v1588_v57  ;;  %v880_v57 = vsel %vm853_vm0, %v877_v27, %v879_v6  ;;  %v1497_v58 = vrot.slane %v5433_v29, 3 }
  0xac   : > { %v924_v17 = vpop.permute.xlu1 %923  ;;  %v1494_v33 = vor.u32 %v1493_v24, %v1492_v60  ;;  %v5461_v24 = vsel %vm1049_vm2, %v5385_v46, %v1099_v63  ;;  %v1101_v46 = vrot.slane %v5436_v51, 1 }
  0xad   : > { %2418 = vmatmul.mubr.bf16.gmra.mxu0 %v2110_v7  ;;  %v794_v25 = vpop.permute.xlu0 %793 }
  0xae   : > { %v1721_v3 = vsel %vm1715_vm5, %v4971_v5, %v794_v25  ;;  %1208 = vrot.lane.b32.xlu1 %v5403_v8, %s4857_s17  ;;  %4010 = vmatprep.mubr.msk.bf16.mxu0 %vm1715_vm5, %v1656_v16  ;;  %v1495_v39 = vsel %vm1448_vm4, %v5348_v14, %v1494_v33  ;;  %v1496_v14 = vrot.slane %v5436_v51, 2  ;;  %v1658_v16 = vsel %vm1649_vm6, %v1655_v21, %v1657_v44 }
  0xaf   : > { %1005 = vrot.lane.b32.xlu0 %v878_v20, %s4853_s29  ;;  %v1786_v5 = vsel %vm1780_vm7, %v1721_v3, %v924_v17  ;;  %v1278_v25 = vrot.slane %v5424_v30, 2 }
  0xb0   : > { %v1193_v23 = vpop.permute.xlu1 %1192  ;;  %v5457_v60 = vor.u32 %v1497_v58, %v1496_v14 }
  0xb1   : > { %v990_v4 = vpop.permute.xlu0 %989 }
  0xb2   : > { %v1851_v35 = vsel %vm1845_vm8, %v1786_v5, %v990_v4  ;;  %1404 = vrot.lane.b32.xlu1 %v1277_v50, %s4855_s11  ;;  %v631_v4 = vor.u32 %v5330_v41, %v627_v31 }
  0xb3   : > { %1338 = vrot.lane.b32.xlu0 %v1275_v42, %s4856_s12  ;;  %v1916_v42 = vsel %vm1910_vm9, %v1851_v35, %v1193_v23  ;;  %v1102_v23 = vrot.slane %v5433_v29, 2  ;;  %v635_v35 = vrot.slane %v5391_v40, 1  ;;  %v881_v40 = vrot.slane %v5424_v30, 1 }
  0xb4   : > { %v1389_v38 = vpop.permute.xlu1 %1388 }
  0xb5   : > { %v1323_v55 = vpop.permute.xlu0 %1322  ;;  %v5488_v47 = vor.u32 %v1102_v23, %v1101_v46  ;;  %v636_v41 = vsel %vm528_vm3, %v631_v4, %v635_v35 }
  0xb6   : > { %v1981_v53 = vsel %vm1975_vm10, %v1916_v42, %v1323_v55  ;;  %811 = vrot.lane.b32.xlu1 %v628_v37, %s4858_s19 }
  0xb7   : > { %1605 = vrot.lane.b32.xlu0 %v1495_v39, %s4859_s28  ;;  %v2046_v0 = vsel %vm2040_vm11, %v1981_v53, %v1389_v38  ;;  %v1659_v39 = vrot.slane %v5167_v54, 3 }
  0xb8   : > { %v796_v61 = vpop.permute.xlu1 %795 }
  0xb9   : > { %v1590_v7 = vpop.permute.xlu0 %1589  ;;  %v1723_v21 = vsel %vm1715_vm5, %v4981_v10, %v796_v61  ;;  %v1279_v10 = vsel %vm1252_vm1, %v1276_v13, %v1278_v25  ;;  %v1660_v14 = vsel %vm1649_vm6, %v1657_v44, %v1659_v39  ;;  %v5506_v61 = vsel %vm1049_vm2, %v1099_v63, %v5488_v47 }
  0xba   : > { %v2113_v17 = vsel %vm2105_vm12, %v2046_v0, %v1590_v7  ;;  %1007 = vrot.lane.b32.xlu1 %v880_v57, %s4853_s29 }
  0xbb   : > { %941 = vrot.lane.b32.xlu0 %v878_v20, %s4854_s10  ;;  %2426 = vmatmul.mubr.bf16.gmra.mxu0 %v2113_v17  ;;  %v1499_v20 = vsel %vm1448_vm4, %v1494_v33, %v5457_v60 }
  0xbc   : > { %v992_v27 = vpop.permute.xlu1 %991  ;;  %4011 = vmatprep.mubr.msk.bf16.mxu0 %vm1715_vm5, %v1658_v16  ;;  %v882_v16 = vsel %vm853_vm0, %v879_v6, %v881_v40  ;;  %v639_v6 = vor.u32 %v5394_v59, %v635_v35 }
  0xbd   : > { %v926_v3 = vpop.permute.xlu0 %925 }
  0xbe   : > { %v1788_v12 = vsel %vm1780_vm7, %v1723_v21, %v926_v3  ;;  %1340 = vrot.lane.b32.xlu1 %v1277_v50, %s4856_s12  ;;  %v5481_v50 = vld [vmem:[%s4962_s18 + $0x78] sm:$0xff]   ;;  %v643_v21 = vrot.slane %v5433_v29, 1  ;;  %v5526_v3 = vld [vmem:[%s4962_s18 + $0x80] sm:$0xff]  }
  0xbf   : > { %1210 = vrot.lane.b32.xlu0 %v5461_v24, %s4857_s17  ;;  %v1853_v37 = vsel %vm1845_vm8, %v1788_v12, %v992_v27  ;;  %v5493_v31 = vshll.u32 %v5481_v50, 16  ;;  %v5496_v48 = vshrl.u32 %v5481_v50, 16  ;;  %v1280_v0 = vrot.slane %v5481_v50, 2 }
  0xc0   : > { %v1325_v5 = vpop.permute.xlu1 %1324  ;;  %v5535_v59 = vshll.u32 %v5526_v3, 16  ;;  %v5538_v29 = vshrl.u32 %v5526_v3, 16 }
  0xc1   : > { %v1195_v38 = vpop.permute.xlu0 %1194  ;;  %v1501_v44 = vrot.slane %v5493_v31, 3  ;;  %v1281_v63 = vsel %vm1252_vm1, %v1278_v25, %v1280_v0  ;;  %v883_v25 = vrot.slane %v5481_v50, 1 }
  0xc2   : > { %v1918_v33 = vsel %vm1910_vm9, %v1853_v37, %v1195_v38  ;;  %1607 = vrot.lane.b32.xlu1 %v1499_v20, %s4859_s28  ;;  %v1105_v37 = vrot.slane %v5496_v48, 1  ;;  %v1106_v38 = vrot.slane %v5493_v31, 2 }
  0xc3   : > { %1406 = vrot.lane.b32.xlu0 %v1279_v10, %s4855_s11  ;;  %v1983_v42 = vsel %vm1975_vm10, %v1918_v33, %v1325_v5  ;;  %v644_v5 = vsel %vm528_vm3, %v639_v6, %v643_v21  ;;  %v1282_v6 = vrot.slane %v5526_v3, 2 }
  0xc4   : > { %v1592_v13 = vpop.permute.xlu1 %1591 }
  0xc5   : > { %v1391_v55 = vpop.permute.xlu0 %1390 }
  0xc6   : > { %v2048_v53 = vsel %vm2040_vm11, %v1983_v42, %v1391_v55  ;;  %943 = vrot.lane.b32.xlu1 %v880_v57, %s4854_s10  ;;  %v1500_v57 = vrot.slane %v5496_v48, 2  ;;  %v884_v42 = vsel %vm853_vm0, %v881_v40, %v883_v25  ;;  %v1505_v55 = vrot.slane %v5535_v59, 3 }
  0xc7   : > { %813 = vrot.lane.b32.xlu0 %v636_v41, %s4858_s19  ;;  %v2116_v58 = vsel %vm2105_vm12, %v2048_v53, %v1592_v13  ;;  %v1661_v13 = vrot.slane %v5192_v9, 3 }
  0xc8   : > { %2434 = vmatmul.mubr.bf16.gmra.mxu0 %v2116_v58  ;;  %v928_v7 = vpop.permute.xlu1 %927  ;;  %v1502_v20 = vor.u32 %v1501_v44, %v1500_v57 }
  0xc9   : > { %v798_v17 = vpop.permute.xlu0 %797  ;;  %4012 = vmatprep.mubr.msk.bf16.mxu0 %vm1715_vm5, %v1660_v14  ;;  %v1107_v14 = vor.u32 %v1106_v38, %v1105_v37  ;;  %v1662_v57 = vsel %vm1649_vm6, %v1659_v39, %v1661_v13  ;;  %v1663_v38 = vrot.slane %v5227_v36, 3 }
  0xca   : > { %v1725_v27 = vsel %vm1715_vm5, %v5024_v34, %v798_v17  ;;  %1212 = vrot.lane.b32.xlu1 %v5506_v61, %s4857_s17  ;;  %v1503_v35 = vsel %vm1448_vm4, %v5457_v60, %v1502_v20  ;;  %v1504_v60 = vrot.slane %v5538_v29, 2 }
  0xcb   : > { %1009 = vrot.lane.b32.xlu0 %v882_v16, %s4853_s29  ;;  %v1790_v46 = vsel %vm1780_vm7, %v1725_v27, %v928_v7  ;;  %v5563_v27 = vsel %vm1049_vm2, %v5488_v47, %v1107_v14  ;;  %v1109_v47 = vrot.slane %v5538_v29, 1 }
  0xcc   : > { %v1197_v12 = vpop.permute.xlu1 %1196  ;;  %v5559_v17 = vor.u32 %v1505_v55, %v1504_v60 }
  0xcd   : > { %v994_v34 = vpop.permute.xlu0 %993 }
  0xce   : > { %v1855_v23 = vsel %vm1845_vm8, %v1790_v46, %v994_v34  ;;  %1408 = vrot.lane.b32.xlu1 %v1281_v63, %s4855_s11  ;;  %v1110_v34 = vrot.slane %v5535_v59, 2 }
  0xcf   : > { %1342 = vrot.lane.b32.xlu0 %v1279_v10, %s4856_s12  ;;  %v1920_v10 = vsel %vm1910_vm9, %v1855_v23, %v1197_v12 }
  0xd0   : > { %v1393_v4 = vpop.permute.xlu1 %1392 }
  0xd1   : > { %v1327_v33 = vpop.permute.xlu0 %1326 }
  0xd2   : > { %v1985_v41 = vsel %vm1975_vm10, %v1920_v10, %v1327_v33  ;;  %815 = vrot.lane.b32.xlu1 %v644_v5, %s4858_s19  ;;  %v647_v5 = vor.u32 %v5436_v51, %v643_v21  ;;  %v5590_v10 = vor.u32 %v1110_v34, %v1109_v47 }
  0xd3   : > { %1609 = vrot.lane.b32.xlu0 %v1503_v35, %s4859_s28  ;;  %v2050_v58 = vsel %vm2040_vm11, %v1985_v41, %v1393_v4  ;;  %v651_v4 = vrot.slane %v5493_v31, 1  ;;  %v885_v31 = vrot.slane %v5526_v3, 1 }
  0xd4   : > { %v800_v53 = vpop.permute.xlu1 %799 }
  0xd5   : > { %v1594_v7 = vpop.permute.xlu0 %1593  ;;  %v1727_v39 = vsel %vm1715_vm5, %v5078_v2, %v800_v53  ;;  %v1283_v2 = vsel %vm1252_vm1, %v1280_v0, %v1282_v6  ;;  %v652_v51 = vsel %vm528_vm3, %v647_v5, %v651_v4  ;;  %v1664_v53 = vsel %vm1649_vm6, %v1661_v13, %v1663_v38 }
  0xd6   : > { %v2119_v44 = vsel %vm2105_vm12, %v2050_v58, %v1594_v7  ;;  %1011 = vrot.lane.b32.xlu1 %v884_v42, %s4853_s29  ;;  %v5610_v7 = vsel %vm1049_vm2, %v1107_v14, %v5590_v10 }
  0xd7   : > { %945 = vrot.lane.b32.xlu0 %v882_v16, %s4854_s10  ;;  %2442 = vmatmul.mubr.bf16.gmra.mxu0 %v2119_v44  ;;  %v1507_v16 = vsel %vm1448_vm4, %v1502_v20, %v5559_v17 }
  0xd8   : > { %v996_v40 = vpop.permute.xlu1 %995  ;;  %4013 = vmatprep.mubr.msk.bf16.mxu0 %vm1715_vm5, %v1662_v57 }
  0xd9   : > { %v930_v12 = vpop.permute.xlu0 %929 }
  0xda   : > { %v1792_v46 = vsel %vm1780_vm7, %v1727_v39, %v930_v12  ;;  %1344 = vrot.lane.b32.xlu1 %v1281_v63, %s4856_s12  ;;  %v5583_v63 = vld [vmem:[%s4962_s18 + $0x88] sm:$0xff]  }
  0xdb   : > { %1214 = vrot.lane.b32.xlu0 %v5563_v27, %s4857_s17  ;;  %v1857_v35 = vsel %vm1845_vm8, %v1792_v46, %v996_v40  ;;  %v5595_v21 = vshll.u32 %v5583_v63, 16  ;;  %v5598_v33 = vshrl.u32 %v5583_v63, 16  ;;  %v1284_v57 = vrot.slane %v5583_v63, 2 }
  0xdc   : > { %v1329_v23 = vpop.permute.xlu1 %1328  ;;  %v659_v46 = vrot.slane %v5535_v59, 1 }
  0xdd   : > { %v1199_v37 = vpop.permute.xlu0 %1198  ;;  %v1508_v40 = vrot.slane %v5598_v33, 2  ;;  %v1509_v13 = vrot.slane %v5595_v21, 3  ;;  %v1285_v14 = vsel %vm1252_vm1, %v1282_v6, %v1284_v57  ;;  %v887_v6 = vrot.slane %v5583_v63, 1 }
  0xde   : > { %v1922_v20 = vsel %vm1910_vm9, %v1857_v35, %v1199_v37  ;;  %1611 = vrot.lane.b32.xlu1 %v1507_v16, %s4859_s28  ;;  %v5630_v16 = vld [vmem:[%s4962_s18 + $0x90] sm:$0xff]  }
  0xdf   : > { %1410 = vrot.lane.b32.xlu0 %v1283_v2, %s4855_s11  ;;  %v1987_v41 = vsel %vm1975_vm10, %v1922_v20, %v1329_v23  ;;  %v1510_v34 = vor.u32 %v1509_v13, %v1508_v40  ;;  %v5642_v59 = vshrl.u32 %v5630_v16, 16  ;;  %v1113_v20 = vrot.slane %v5598_v33, 1 }
  0xe0   : > { %v1596_v0 = vpop.permute.xlu1 %1595 }
  0xe1   : > { %v1395_v60 = vpop.permute.xlu0 %1394  ;;  %v1511_v37 = vsel %vm1448_vm4, %v5559_v17, %v1510_v34  ;;  %v888_v17 = vsel %vm853_vm0, %v885_v31, %v887_v6 }
  0xe2   : > { %v2052_v55 = vsel %vm2040_vm11, %v1987_v41, %v1395_v60  ;;  %947 = vrot.lane.b32.xlu1 %v884_v42, %s4854_s10  ;;  %v886_v42 = vsel %vm853_vm0, %v883_v25, %v885_v31  ;;  %v655_v25 = vor.u32 %v5496_v48, %v651_v4  ;;  %v5639_v48 = vshll.u32 %v5630_v16, 16  ;;  %v4493_v60 = vld [vmem:[%s7378_s4 + $0x38] sm:$0xff]   ;;  %v4494_v31 = vld [vmem:[%s7378_s4 + $0x30] sm:$0xff]  }
  0xe3   : > { %817 = vrot.lane.b32.xlu0 %v652_v51, %s4858_s19  ;;  %v2122_v58 = vsel %vm2105_vm12, %v2052_v55, %v1596_v0  ;;  %v1114_v0 = vrot.slane %v5595_v21, 2  ;;  %v1665_v41 = vrot.slane %v5254_v52, 3  ;;  %3258 = vmatpush1.bf16.msra.mxu1 %v4493_v60 }
  0xe4   : > { %2450 = vmatmul.mubr.bf16.gmra.mxu0 %v2122_v58  ;;  %v932_v44 = vpop.permute.xlu1 %931  ;;  %v660_v35 = vsel %vm528_vm3, %v655_v25, %v659_v46  ;;  %v1513_v58 = vrot.slane %v5639_v48, 3  ;;  %3259 = vmatprep.subr.bf16.mxu1 %v4852_v1 }
  0xe5   : > { %v802_v39 = vpop.permute.xlu0 %801  ;;  %4014 = vmatprep.mubr.msk.bf16.mxu0 %vm1715_vm5, %v1664_v53  ;;  %v1512_v53 = vrot.slane %v5642_v59, 2  ;;  %v1115_v40 = vor.u32 %v1114_v0, %v1113_v20 }
  0xe6   : > { %v1729_v12 = vsel %vm1715_vm5, %v5123_v28, %v802_v39  ;;  %1216 = vrot.lane.b32.xlu1 %v5610_v7, %s4857_s17 }
  0xe7   : > { %1013 = vrot.lane.b32.xlu0 %v886_v42, %s4853_s29  ;;  %v1794_v23 = vsel %vm1780_vm7, %v1729_v12, %v932_v44  ;;  %v1666_v12 = vsel %vm1649_vm6, %v1663_v38, %v1665_v41  ;;  %v1286_v38 = vrot.slane %v5630_v16, 2  ;;  %3260 = vmatpush1.bf16.msra.mxu1 %v4494_v31  ;;  %v4498_v31 = vld [vmem:[%s7378_s4 + $0x18] sm:$0xff]  }
  0xe8   : > { %v1201_v47 = vpop.permute.xlu1 %1200  ;;  %3261 = vmatprep.subr.bf16.mxu1 %v4852_v1 }
  0xe9   : > { %v998_v28 = vpop.permute.xlu0 %997  ;;  %v1287_v0 = vsel %vm1252_vm1, %v1284_v57, %v1286_v38 }
  0xea   : > { %v1859_v5 = vsel %vm1845_vm8, %v1794_v23, %v998_v28  ;;  %1412 = vrot.lane.b32.xlu1 %v1285_v14, %s4855_s11  ;;  %v5678_v28 = vsel %vm1049_vm2, %v5590_v10, %v1115_v40 }
  0xeb   : > { %1346 = vrot.lane.b32.xlu0 %v1283_v2, %s4856_s12  ;;  %v1924_v2 = vsel %vm1910_vm9, %v1859_v5, %v1201_v47  ;;  %v5674_v47 = vor.u32 %v1513_v58, %v1512_v53  ;;  %v889_v58 = vrot.slane %v5630_v16, 1 }
  0xec   : > { %v1397_v4 = vpop.permute.xlu1 %1396 }
  0xed   : > { %v1331_v51 = vpop.permute.xlu0 %1330  ;;  %v1515_v10 = vsel %vm1448_vm4, %v1510_v34, %v5674_v47  ;;  %v4497_v34 = vld [vmem:[%s7378_s4 + $0x20] sm:$0xff]  }
  0xee   : > { %v1989_v55 = vsel %vm1975_vm10, %v1924_v2, %v1331_v51  ;;  %819 = vrot.lane.b32.xlu1 %v660_v35, %s4858_s19  ;;  %v663_v2 = vor.u32 %v5538_v29, %v659_v46  ;;  %v667_v51 = vrot.slane %v5595_v21, 1  ;;  %v1667_v29 = vrot.slane %v5290_v22, 3 }
  0xef   : > { %1613 = vrot.lane.b32.xlu0 %v1511_v37, %s4859_s28  ;;  %v2054_v13 = vsel %vm2040_vm11, %v1989_v55, %v1397_v4  ;;  %v1117_v37 = vrot.slane %v5642_v59, 1 }
  0xf0   : > { %v804_v44 = vpop.permute.xlu1 %803  ;;  %v668_v46 = vsel %vm528_vm3, %v663_v2, %v667_v51  ;;  %v675_v2 = vrot.slane %v5639_v48, 1 }
  0xf1   : > { %v1598_v39 = vpop.permute.xlu0 %1597  ;;  %v1731_v5 = vsel %vm1715_vm5, %v5167_v54, %v804_v44  ;;  %v1118_v54 = vrot.slane %v5639_v48, 2 }
  0xf2   : > { %v2125_v25 = vsel %vm2105_vm12, %v2054_v13, %v1598_v39  ;;  %1015 = vrot.lane.b32.xlu1 %v888_v17, %s4853_s29 }
  0xf3   : > { %949 = vrot.lane.b32.xlu0 %v886_v42, %s4854_s10  ;;  %2458 = vmatmul.mubr.bf16.gmra.mxu0 %v2125_v25  ;;  %v4495_v42 = vld [vmem:[%s7378_s4 + $0x28] sm:$0xff]   ;;  %v5713_v21 = vor.u32 %v1118_v54, %v1117_v37 }
  0xf4   : > { %v1000_v23 = vpop.permute.xlu1 %999  ;;  %4015 = vmatprep.mubr.msk.bf16.mxu0 %vm1715_vm5, %v1666_v12  ;;  %3262 = vmatpush1.bf16.msra.mxu1 %v4495_v42 }
  0xf5   : > { %v934_v35 = vpop.permute.xlu0 %933  ;;  %3263 = vmatprep.subr.bf16.mxu1 %v4852_v1 }
  0xf6   : > { %v1796_v4 = vsel %vm1780_vm7, %v1731_v5, %v934_v35  ;;  %1348 = vrot.lane.b32.xlu1 %v1285_v14, %s4856_s12  ;;  %v5702_v14 = vld [vmem:[%s4962_s18 + $0x98] sm:$0xff]   ;;  %v5739_v35 = vsel %vm1049_vm2, %v1115_v40, %v5713_v21  ;;  %v4499_v40 = vld [vmem:[%s7378_s4 + $0x10] sm:$0xff]  }
  0xf7   : > { %1218 = vrot.lane.b32.xlu0 %v5678_v28, %s4857_s17  ;;  %v1861_v60 = vsel %vm1845_vm8, %v1796_v4, %v1000_v23  ;;  %v5718_v44 = vshll.u32 %v5702_v14, 16  ;;  %v5721_v13 = vshrl.u32 %v5702_v14, 16  ;;  %v1668_v23 = vsel %vm1649_vm6, %v1665_v41, %v1667_v29 }
  0xf8   : > { %v1333_v20 = vpop.permute.xlu1 %1332  ;;  %3264 = vmatpush1.bf16.msra.mxu1 %v4497_v34  ;;  %v1288_v42 = vrot.slane %v5702_v14, 2  ;;  %v891_v48 = vrot.slane %v5702_v14, 1 }
  0xf9   : > { %v1203_v55 = vpop.permute.xlu0 %1202  ;;  %3265 = vmatprep.subr.bf16.mxu1 %v4852_v1  ;;  %v1517_v41 = vrot.slane %v5718_v44, 3 }
  0xfa   : > { %v1926_v53 = vsel %vm1910_vm9, %v1861_v60, %v1203_v55  ;;  %1615 = vrot.lane.b32.xlu1 %v1515_v10, %s4859_s28  ;;  %v1516_v10 = vrot.slane %v5721_v13, 2  ;;  %v5763_v60 = vld [vmem:[%s4962_s18 + $0xa0] sm:$0xff]  }
  0xfb   : > { %1414 = vrot.lane.b32.xlu0 %v1287_v0, %s4855_s11  ;;  %v1991_v39 = vsel %vm1975_vm10, %v1926_v53, %v1333_v20  ;;  %v671_v20 = vor.u32 %v5598_v33, %v667_v51  ;;  %v5776_v51 = vshll.u32 %v5763_v60, 16 }
  0xfc   : > { %v1600_v57 = vpop.permute.xlu1 %1599  ;;  %3266 = vmatpush1.bf16.msra.mxu1 %v4498_v31  ;;  %v1518_v34 = vor.u32 %v1517_v41, %v1516_v10  ;;  %v1121_v31 = vrot.slane %v5721_v13, 1 }
  0xfd   : > { %v1399_v12 = vpop.permute.xlu0 %1398  ;;  %3267 = vmatprep.subr.bf16.mxu1 %v4852_v1  ;;  %v676_v33 = vsel %vm528_vm3, %v671_v20, %v675_v2 }
  0xfe   : > { %v2056_v25 = vsel %vm2040_vm11, %v1991_v39, %v1399_v12  ;;  %951 = vrot.lane.b32.xlu1 %v888_v17, %s4854_s10  ;;  %v890_v17 = vsel %vm853_vm0, %v887_v6, %v889_v58  ;;  %v1289_v6 = vsel %vm1252_vm1, %v1286_v38, %v1288_v42  ;;  %v1519_v12 = vsel %vm1448_vm4, %v5674_v47, %v1518_v34 }
  0xff   : > { %821 = vrot.lane.b32.xlu0 %v668_v46, %s4858_s19  ;;  %v2128_v5 = vsel %vm2105_vm12, %v2056_v25, %v1600_v57  ;;  %v4500_v57 = vld [vmem:[%s7378_s4 + $0x8] sm:$0xff]   ;;  %v5779_v46 = vshrl.u32 %v5763_v60, 16  ;;  %v1122_v25 = vrot.slane %v5718_v44, 2  ;;  %v892_v47 = vsel %vm853_vm0, %v889_v58, %v891_v48  ;;  %v4503_v58 = vld [vmem:[%s7378_s4 + $0x40] sm:$0xff]  }
 0x100   : > { %2466 = vmatmul.mubr.bf16.gmra.mxu0 %v2128_v5  ;;  %v936_v4 = vpop.permute.xlu1 %935  ;;  %3268 = vmatpush1.bf16.msra.mxu1 %v4499_v40  ;;  %v1669_v5 = vrot.slane %v5320_v43, 3  ;;  %v1521_v43 = vrot.slane %v5776_v51, 3 }
 0x101   : > { %v806_v37 = vpop.permute.xlu0 %805  ;;  %4016 = vmatprep.mubr.msk.bf16.mxu0 %vm1715_vm5, %v1668_v23  ;;  %3269 = vmatprep.subr.bf16.mxu1 %v4852_v1  ;;  %v1520_v41 = vrot.slane %v5779_v46, 2  ;;  %v1123_v40 = vor.u32 %v1122_v25, %v1121_v31  ;;  %v679_v31 = vor.u32 %v5642_v59, %v675_v2  ;;  %v683_v25 = vrot.slane %v5718_v44, 1 }
 0x102   : > { %v1733_v54 = vsel %vm1715_vm5, %v5192_v9, %v806_v37  ;;  %1220 = vrot.lane.b32.xlu1 %v5739_v35, %s4857_s17  ;;  %v893_v44 = vrot.slane %v5763_v60, 1 }
 0x103   : > { %1017 = vrot.lane.b32.xlu0 %v890_v17, %s4853_s29  ;;  %v1798_v9 = vsel %vm1780_vm7, %v1733_v54, %v936_v4  ;;  %v4502_v4 = vld [vmem:[%s7378_s4] sm:$0xff]   ;;  %v5814_v22 = vsel %vm1049_vm2, %v5713_v21, %v1123_v40  ;;  %v684_v59 = vsel %vm528_vm3, %v679_v31, %v683_v25 }
 0x104   : > { %v1205_v55 = vpop.permute.xlu1 %1204  ;;  %3270 = vmatpush1.bf16.msra.mxu1 %v4500_v57 }
 0x105   : > { %v1002_v53 = vpop.permute.xlu0 %1001  ;;  %3271 = vmatprep.subr.bf16.mxu1 %v4852_v1 }
 0x106   : > { %v1863_v38 = vsel %vm1845_vm8, %v1798_v9, %v1002_v53  ;;  %1416 = vrot.lane.b32.xlu1 %v1289_v6, %s4855_s11  ;;  %v5810_v53 = vor.u32 %v1521_v43, %v1520_v41 }
 0x107   : > { %1350 = vrot.lane.b32.xlu0 %v1287_v0, %s4856_s12  ;;  %v1928_v0 = vsel %vm1910_vm9, %v1863_v38, %v1205_v55  ;;  %v1670_v55 = vsel %vm1649_vm6, %v1667_v29, %v1669_v5 }
 0x108   : > { %v1401_v39 = vpop.permute.xlu1 %1400  ;;  %3272 = vmatpush1.bf16.msra.mxu1 %v4502_v4  ;;  %v1523_v21 = vsel %vm1448_vm4, %v1518_v34, %v5810_v53  ;;  %v1671_v4 = vrot.slane %v5379_v56, 3 }
 0x109   : > { %v1335_v23 = vpop.permute.xlu0 %1334  ;;  %3287 = vmatprep.subr.bf16.mxu1 %v4852_v1  ;;  %v1290_v1 = vrot.slane %v5763_v60, 2 }
 0x10a   : > { %v1993_v10 = vsel %vm1975_vm10, %v1928_v0, %v1335_v23  ;;  %823 = vrot.lane.b32.xlu1 %v676_v33, %s4858_s19  ;;  %v1125_v33 = vrot.slane %v5779_v46, 1 }
 0x10b   : > { %1617 = vrot.lane.b32.xlu0 %v1519_v12, %s4859_s28  ;;  %v2058_v54 = vsel %vm2040_vm11, %v1993_v10, %v1401_v39  ;;  %v1126_v39 = vrot.slane %v5776_v51, 2 }
 0x10c   : > { %v808_v37 = vpop.permute.xlu1 %807  ;;  %3288 = vmatpush2.bf16.msra.mxu1 %v4503_v58 }
 0x10d   : > { %v1602_v20 = vpop.permute.xlu0 %1601  ;;  %v1735_v29 = vsel %vm1715_vm5, %v5227_v36, %v808_v37  ;;  %v1291_v36 = vsel %vm1252_vm1, %v1288_v42, %v1290_v1  ;;  %v5841_v10 = vor.u32 %v1126_v39, %v1125_v33 }
 0x10e   : > { %v2131_v9 = vsel %vm2105_vm12, %v2058_v54, %v1602_v20  ;;  %1019 = vrot.lane.b32.xlu1 %v892_v47, %s4853_s29  ;;  %v1672_v54 = vsel %vm1649_vm6, %v1669_v5, %v1671_v4 }
 0x10f   : > { %953 = vrot.lane.b32.xlu0 %v890_v17, %s4854_s10  ;;  %2474 = vmatmul.mubr.bf16.gmra.mxu0 %v2131_v9 }
 0x110   : > { %v1004_v57 = vpop.permute.xlu1 %1003  ;;  %4017 = vmatprep.mubr.msk.bf16.mxu0 %vm1715_vm5, %v1670_v55  ;;  %v5859_v55 = vsel %vm1049_vm2, %v1123_v40, %v5841_v10 }
 0x111   : > { %v938_v38 = vpop.permute.xlu0 %937 }
 0x112   : > { %v1800_v17 = vsel %vm1780_vm7, %v1735_v29, %v938_v38  ;;  %1352 = vrot.lane.b32.xlu1 %v1289_v6, %s4856_s12  ;;  %v5834_v6 = vld [vmem:[%s4962_s18 + $0xa8] sm:$0xff]  }
 0x113   : > { %1222 = vrot.lane.b32.xlu0 %v5814_v22, %s4857_s17  ;;  %v1865_v0 = vsel %vm1845_vm8, %v1800_v17, %v1004_v57  ;;  %v5846_v2 = vshll.u32 %v5834_v6, 16  ;;  %v5849_v41 = vshrl.u32 %v5834_v6, 16  ;;  %v1292_v58 = vrot.slane %v5834_v6, 2 }
 0x114   : > { %v1337_v12 = vpop.permute.xlu1 %1336  ;;  %v894_v57 = vsel %vm853_vm0, %v891_v48, %v893_v44  ;;  %v687_v48 = vor.u32 %v5721_v13, %v683_v25  ;;  %v691_v17 = vrot.slane %v5776_v51, 1 }
 0x115   : > { %v1207_v23 = vpop.permute.xlu0 %1206  ;;  %v1525_v5 = vrot.slane %v5846_v2, 3  ;;  %v1293_v40 = vsel %vm1252_vm1, %v1290_v1, %v1292_v58  ;;  %v895_v1 = vrot.slane %v5834_v6, 1 }
 0x116   : > { %v1930_v34 = vsel %vm1910_vm9, %v1865_v0, %v1207_v23  ;;  %1619 = vrot.lane.b32.xlu1 %v1523_v21, %s4859_s28  ;;  %v5879_v21 = vld [vmem:[%s4962_s18 + $0xb0] sm:$0xff]   ;;  %v692_v0 = vsel %vm528_vm3, %v687_v48, %v691_v17 }
 0x117   : > { %1418 = vrot.lane.b32.xlu0 %v1291_v36, %s4855_s11  ;;  %v1995_v43 = vsel %vm1975_vm10, %v1930_v34, %v1337_v12  ;;  %v5888_v13 = vshll.u32 %v5879_v21, 16  ;;  %v5891_v51 = vshrl.u32 %v5879_v21, 16  ;;  %v1129_v34 = vrot.slane %v5849_v41, 1 }
 0x118   : > { %v1604_v42 = vpop.permute.xlu1 %1603 }
 0x119   : > { %v1403_v37 = vpop.permute.xlu0 %1402 }
 0x11a   : > { %v2060_v56 = vsel %vm2040_vm11, %v1995_v43, %v1403_v37  ;;  %955 = vrot.lane.b32.xlu1 %v892_v47, %s4854_s10  ;;  %v1524_v47 = vrot.slane %v5849_v41, 2  ;;  %v1673_v43 = vrot.slane %v5424_v30, 3 }
 0x11b   : > { %825 = vrot.lane.b32.xlu0 %v684_v59, %s4858_s19  ;;  %v2134_v20 = vsel %vm2105_vm12, %v2060_v56, %v1604_v42  ;;  %v1130_v42 = vrot.slane %v5846_v2, 2  ;;  %v896_v56 = vsel %vm853_vm0, %v893_v44, %v895_v1 }
 0x11c   : > { %2482 = vmatmul.mubr.bf16.gmra.mxu0 %v2134_v20  ;;  %v940_v9 = vpop.permute.xlu1 %939  ;;  %v1526_v39 = vor.u32 %v1525_v5, %v1524_v47  ;;  %v1674_v5 = vsel %vm1649_vm6, %v1671_v4, %v1673_v43  ;;  %v4766_v4 = vld [vmem:[%s4962_s18 + $0x58] sm:$0xff]  }
 0x11d   : > { %v810_v29 = vpop.permute.xlu0 %809  ;;  %4018 = vmatprep.mubr.msk.bf16.mxu0 %vm1715_vm5, %v1672_v54  ;;  %v1529_v54 = vrot.slane %v5888_v13, 3 }
 0x11e   : > { %v1737_v38 = vsel %vm1715_vm5, %v5254_v52, %v810_v29  ;;  %1224 = vrot.lane.b32.xlu1 %v5859_v55, %s4857_s17  ;;  %v1527_v23 = vsel %vm1448_vm4, %v5810_v53, %v1526_v39  ;;  %v1528_v53 = vrot.slane %v5891_v51, 2 }
 0x11f   : > { %1021 = vrot.lane.b32.xlu0 %v894_v57, %s4853_s29  ;;  %v1802_v12 = vsel %vm1780_vm7, %v1737_v38, %v940_v9  ;;  %v1131_v9 = vor.u32 %v1130_v42, %v1129_v34  ;;  %v695_v42 = vor.u32 %v5779_v46, %v691_v17 }
 0x120   : > { %v1209_v33 = vpop.permute.xlu1 %1208  ;;  %v5912_v44 = vor.u32 %v1529_v54, %v1528_v53  ;;  %v897_v54 = vrot.slane %v5879_v21, 1 }
 0x121   : > { %v1006_v52 = vpop.permute.xlu0 %1005  ;;  %v5916_v48 = vsel %vm1049_vm2, %v5841_v10, %v1131_v9 }
 0x122   : > { %v1867_v31 = vsel %vm1845_vm8, %v1802_v12, %v1006_v52  ;;  %1420 = vrot.lane.b32.xlu1 %v1293_v40, %s4855_s11  ;;  %v1531_v10 = vsel %vm1448_vm4, %v1526_v39, %v5912_v44 }
 0x123   : > { %1354 = vrot.lane.b32.xlu0 %v1291_v36, %s4856_s12  ;;  %v1932_v36 = vsel %vm1910_vm9, %v1867_v31, %v1209_v33  ;;  %v1294_v33 = vrot.slane %v5879_v21, 2  ;;  %v1133_v31 = vrot.slane %v5891_v51, 1 }
 0x124   : > { %v1405_v25 = vpop.permute.xlu1 %1404 }
 0x125   : > { %v1339_v59 = vpop.permute.xlu0 %1338  ;;  %v1295_v34 = vsel %vm1252_vm1, %v1292_v58, %v1294_v33 }
 0x126   : > { %v1997_v37 = vsel %vm1975_vm10, %v1932_v36, %v1339_v59  ;;  %827 = vrot.lane.b32.xlu1 %v692_v0, %s4858_s19  ;;  %v1134_v0 = vrot.slane %v5888_v13, 2 }
 0x127   : > { %1621 = vrot.lane.b32.xlu0 %v1527_v23, %s4859_s28  ;;  %v2062_v47 = vsel %vm2040_vm11, %v1997_v37, %v1405_v25  ;;  %v5931_v25 = vld [vmem:[%s4962_s18 + $0xb8] sm:$0xff]   ;;  %v1675_v37 = vrot.slane %v5481_v50, 3  ;;  %v4768_v50 = vld [vmem:[%s4962_s18 + $0x68] sm:$0xff]  }
 0x128   : > { %v812_v20 = vpop.permute.xlu1 %811  ;;  %v5944_v53 = vor.u32 %v1134_v0, %v1133_v31  ;;  %v5947_v58 = vshll.u32 %v5931_v25, 16  ;;  %v5950_v46 = vshrl.u32 %v5931_v25, 16 }
 0x129   : > { %v1606_v30 = vpop.permute.xlu0 %1605  ;;  %v1739_v12 = vsel %vm1715_vm5, %v4766_v4, %v812_v20 }
 0x12a   : > { %v2137_v29 = vsel %vm2105_vm12, %v2062_v47, %v1606_v30  ;;  %1023 = vrot.lane.b32.xlu1 %v896_v56, %s4853_s29  ;;  %v5970_v4 = vsel %vm1049_vm2, %v1131_v9, %v5944_v53 }
 0x12b   : > { %957 = vrot.lane.b32.xlu0 %v894_v57, %s4854_s10  ;;  %2490 = vmatmul.mubr.bf16.gmra.mxu0 %v2137_v29  ;;  %v1676_v29 = vsel %vm1649_vm6, %v1673_v43, %v1675_v37  ;;  %7400 = vst [vmem:[#allocation5_spill] sm:$0xff] %v5970_v4 }
 0x12c   : > { %v1008_v38 = vpop.permute.xlu1 %1007  ;;  %4019 = vmatprep.mubr.msk.bf16.mxu0 %vm1715_vm5, %v1674_v5  ;;  %v1296_v5 = vrot.slane %v5931_v25, 2 }
 0x12d   : > { %v942_v52 = vpop.permute.xlu0 %941 }
 0x12e   : > { %v1804_v57 = vsel %vm1780_vm7, %v1739_v12, %v942_v52  ;;  %1356 = vrot.lane.b32.xlu1 %v1293_v40, %s4856_s12  ;;  %v699_v40 = vrot.slane %v5846_v2, 1  ;;  %v1533_v12 = vrot.slane %v5947_v58, 3  ;;  %v898_v52 = vsel %vm853_vm0, %v895_v1, %v897_v54  ;;  %v5989_v1 = vld [vmem:[%s4962_s18 + $0xc0] sm:$0xff]  }
 0x12f   : > { %1226 = vrot.lane.b32.xlu0 %v5916_v48, %s4857_s17  ;;  %v1869_v36 = vsel %vm1845_vm8, %v1804_v57, %v1008_v38  ;;  %v1297_v9 = vsel %vm1252_vm1, %v1294_v33, %v1296_v5  ;;  %v899_v33 = vrot.slane %v5931_v25, 1 }
 0x130   : > { %v1341_v23 = vpop.permute.xlu1 %1340  ;;  %v700_v17 = vsel %vm528_vm3, %v695_v42, %v699_v40  ;;  %v703_v0 = vor.u32 %v5849_v41, %v699_v40  ;;  %v5998_v41 = vshll.u32 %v5989_v1, 16 }
 0x131   : > { %v1211_v59 = vpop.permute.xlu0 %1210 }
 0x132   : > { %v1934_v39 = vsel %vm1910_vm9, %v1869_v36, %v1211_v59  ;;  %1623 = vrot.lane.b32.xlu1 %v1531_v10, %s4859_s28  ;;  %v4767_v10 = vld [vmem:[%s4962_s18 + $0x60] sm:$0xff]  }
 0x133   : > { %1422 = vrot.lane.b32.xlu0 %v1295_v34, %s4855_s11  ;;  %v1999_v20 = vsel %vm1975_vm10, %v1934_v39, %v1341_v23  ;;  %v707_v23 = vrot.slane %v5888_v13, 1  ;;  %v6001_v13 = vshrl.u32 %v5989_v1, 16 }
 0x134   : > { %v1608_v2 = vpop.permute.xlu1 %1607 }
 0x135   : > { %v1407_v47 = vpop.permute.xlu0 %1406 }
 0x136   : > { %v2064_v30 = vsel %vm2040_vm11, %v1999_v20, %v1407_v47  ;;  %959 = vrot.lane.b32.xlu1 %v896_v56, %s4854_s10  ;;  %v1532_v56 = vrot.slane %v5950_v46, 2  ;;  %v1137_v47 = vrot.slane %v5950_v46, 1 }
 0x137   : > { %829 = vrot.lane.b32.xlu0 %v700_v17, %s4858_s19  ;;  %v2140_v38 = vsel %vm2105_vm12, %v2064_v30, %v1608_v2  ;;  %v708_v17 = vsel %vm528_vm3, %v703_v0, %v707_v23  ;;  %v1138_v30 = vrot.slane %v5947_v58, 2 }
 0x138   : > { %2498 = vmatmul.mubr.bf16.gmra.mxu0 %v2140_v38  ;;  %v944_v43 = vpop.permute.xlu1 %943  ;;  %v1534_v36 = vor.u32 %v1533_v12, %v1532_v56  ;;  %v1677_v38 = vrot.slane %v5526_v3, 3  ;;  %v900_v12 = vsel %vm853_vm0, %v897_v54, %v899_v33 }
 0x139   : > { %v814_v57 = vpop.permute.xlu0 %813  ;;  %4020 = vmatprep.mubr.msk.bf16.mxu0 %vm1715_vm5, %v1676_v29 }
 0x13a   : > { %v1741_v31 = vsel %vm1715_vm5, %v4767_v10, %v814_v57  ;;  %1228 = vrot.lane.b32.xlu1 %v5970_v4, %s4857_s17  ;;  %v1535_v20 = vsel %vm1448_vm4, %v5912_v44, %v1534_v36  ;;  %v1536_v44 = vrot.slane %v6001_v13, 2  ;;  %v1139_v10 = vor.u32 %v1138_v30, %v1137_v47 }
 0x13b   : > { %1025 = vrot.lane.b32.xlu0 %v898_v52, %s4853_s29  ;;  %v1806_v59 = vsel %vm1780_vm7, %v1741_v31, %v944_v43  ;;  %v1537_v43 = vrot.slane %v5998_v41, 3  ;;  %v1678_v0 = vsel %vm1649_vm6, %v1675_v37, %v1677_v38 }
 0x13c   : > { %v1213_v42 = vpop.permute.xlu1 %1212 }
 0x13d   : > { %v1010_v39 = vpop.permute.xlu0 %1009  ;;  %v6024_v54 = vor.u32 %v1537_v43, %v1536_v44  ;;  %v1679_v43 = vrot.slane %v5583_v63, 3 }
 0x13e   : > { %v1871_v2 = vsel %vm1845_vm8, %v1806_v59, %v1010_v39  ;;  %1424 = vrot.lane.b32.xlu1 %v1297_v9, %s4855_s11  ;;  %v6028_v39 = vsel %vm1049_vm2, %v5944_v53, %v1139_v10 }
 0x13f   : > { %1358 = vrot.lane.b32.xlu0 %v1295_v34, %s4856_s12  ;;  %v1936_v34 = vsel %vm1910_vm9, %v1871_v2, %v1213_v42  ;;  %7401 = vst [vmem:[#allocation6_spill] sm:$0xff] %v6028_v39  ;;  %v1298_v2 = vrot.slane %v5989_v1, 2  ;;  %v1539_v53 = vsel %vm1448_vm4, %v1534_v36, %v6024_v54 }
 0x140   : > { %v1409_v40 = vpop.permute.xlu1 %1408 }
 0x141   : > { %v1343_v29 = vpop.permute.xlu0 %1342  ;;  %v1299_v30 = vsel %vm1252_vm1, %v1296_v5, %v1298_v2 }
 0x142   : > { %v2001_v56 = vsel %vm1975_vm10, %v1936_v34, %v1343_v29  ;;  %831 = vrot.lane.b32.xlu1 %v708_v17, %s4858_s19  ;;  %v711_v34 = vor.u32 %v5891_v51, %v707_v23  ;;  %v715_v29 = vrot.slane %v5947_v58, 1  ;;  %v901_v58 = vrot.slane %v5989_v1, 1 }
 0x143   : > { %1625 = vrot.lane.b32.xlu0 %v1535_v20, %s4859_s28  ;;  %v2066_v31 = vsel %vm2040_vm11, %v2001_v56, %v1409_v40  ;;  %v1142_v20 = vrot.slane %v5998_v41, 2 }
 0x144   : > { %v816_v57 = vpop.permute.xlu1 %815  ;;  %v716_v51 = vsel %vm528_vm3, %v711_v34, %v715_v29  ;;  %v723_v34 = vrot.slane %v5998_v41, 1 }
 0x145   : > { %v1610_v3 = vpop.permute.xlu0 %1609  ;;  %v1743_v37 = vsel %vm1715_vm5, %v4768_v50, %v816_v57 }
 0x146   : > { %v2143_v42 = vsel %vm2105_vm12, %v2066_v31, %v1610_v3  ;;  %1027 = vrot.lane.b32.xlu1 %v900_v12, %s4853_s29 }
 0x147   : > { %961 = vrot.lane.b32.xlu0 %v898_v52, %s4854_s10  ;;  %2506 = vmatmul.mubr.bf16.gmra.mxu0 %v2143_v42  ;;  %v1141_v52 = vrot.slane %v6001_v13, 1  ;;  %v1680_v42 = vsel %vm1649_vm6, %v1677_v38, %v1679_v43 }
 0x148   : > { %v1012_v59 = vpop.permute.xlu1 %1011  ;;  %4021 = vmatprep.mubr.msk.bf16.mxu0 %vm1715_vm5, %v1678_v0 }
 0x149   : > { %v946_v17 = vpop.permute.xlu0 %945  ;;  %v6055_v57 = vor.u32 %v1142_v20, %v1141_v52  ;;  %v4769_v52 = vld [vmem:[%s4962_s18 + $0x70] sm:$0xff]  }
 0x14a   : > { %v1808_v40 = vsel %vm1780_vm7, %v1743_v37, %v946_v17  ;;  %1360 = vrot.lane.b32.xlu1 %v1297_v9, %s4856_s12  ;;  %v6048_v9 = vld [vmem:[%s4962_s18 + $0xc8] sm:$0xff]  }
 0x14b   : > { %1230 = vrot.lane.b32.xlu0 %v6028_v39, %s4857_s17  ;;  %v1873_v56 = vsel %vm1845_vm8, %v1808_v40, %v1012_v59  ;;  %v6060_v23 = vshll.u32 %v6048_v9, 16  ;;  %v6063_v31 = vshrl.u32 %v6048_v9, 16  ;;  %v6073_v50 = vsel %vm1049_vm2, %v1139_v10, %v6055_v57  ;;  %v6087_v10 = vld [vmem:[%s4962_s18 + $0xd0] sm:$0xff]  }
 0x14c   : > { %v1345_v47 = vpop.permute.xlu1 %1344  ;;  %7402 = vst [vmem:[#allocation7_spill] sm:$0xff] %v6073_v50  ;;  %v1300_v37 = vrot.slane %v6048_v9, 2  ;;  %v902_v40 = vsel %vm853_vm0, %v899_v33, %v901_v58  ;;  %v903_v41 = vrot.slane %v6048_v9, 1 }
 0x14d   : > { %v1215_v44 = vpop.permute.xlu0 %1214  ;;  %v1541_v38 = vrot.slane %v6060_v23, 3 }
 0x14e   : > { %v1938_v36 = vsel %vm1910_vm9, %v1873_v56, %v1215_v44  ;;  %1627 = vrot.lane.b32.xlu1 %v1539_v53, %s4859_s28  ;;  %v1301_v33 = vsel %vm1252_vm1, %v1298_v2, %v1300_v37 }
 0x14f   : > { %1426 = vrot.lane.b32.xlu0 %v1299_v30, %s4855_s11  ;;  %v2003_v3 = vsel %vm1975_vm10, %v1938_v36, %v1345_v47  ;;  %v719_v47 = vor.u32 %v5950_v46, %v715_v29 }
 0x150   : > { %v1612_v5 = vpop.permute.xlu1 %1611 }
 0x151   : > { %v1411_v0 = vpop.permute.xlu0 %1410  ;;  %v724_v46 = vsel %vm528_vm3, %v719_v47, %v723_v34 }
 0x152   : > { %v2068_v63 = vsel %vm2040_vm11, %v2003_v3, %v1411_v0  ;;  %963 = vrot.lane.b32.xlu1 %v900_v12, %s4854_s10  ;;  %v1540_v12 = vrot.slane %v6063_v31, 2  ;;  %v6099_v3 = vshll.u32 %v6087_v10, 16  ;;  %v6102_v0 = vshrl.u32 %v6087_v10, 16 }
 0x153   : > { %833 = vrot.lane.b32.xlu0 %v716_v51, %s4858_s19  ;;  %v2146_v59 = vsel %vm2105_vm12, %v2068_v63, %v1612_v5  ;;  %v1145_v63 = vrot.slane %v6063_v31, 1 }
 0x154   : > { %2514 = vmatmul.mubr.bf16.gmra.mxu0 %v2146_v59  ;;  %v948_v17 = vpop.permute.xlu1 %947  ;;  %v1542_v44 = vor.u32 %v1541_v38, %v1540_v12  ;;  %v1681_v12 = vrot.slane %v5630_v16, 3 }
 0x155   : > { %v818_v53 = vpop.permute.xlu0 %817  ;;  %4022 = vmatprep.mubr.msk.bf16.mxu0 %vm1715_vm5, %v1680_v42  ;;  %v1146_v42 = vrot.slane %v6060_v23, 2 }
 0x156   : > { %v1745_v20 = vsel %vm1715_vm5, %v4769_v52, %v818_v53  ;;  %1232 = vrot.lane.b32.xlu1 %v6073_v50, %s4857_s17  ;;  %v1543_v29 = vsel %vm1448_vm4, %v6024_v54, %v1542_v44  ;;  %v1545_v53 = vrot.slane %v6099_v3, 3  ;;  %v904_v54 = vsel %vm853_vm0, %v901_v58, %v903_v41  ;;  %v6135_v58 = vld [vmem:[%s7377_s3] ss:$0 sm:$0xff] }
 0x157   : > { %1029 = vrot.lane.b32.xlu0 %v902_v40, %s4853_s29  ;;  %v1810_v36 = vsel %vm1780_vm7, %v1745_v20, %v948_v17  ;;  %v6121_v20 = vor.u32 %v1146_v42, %v1145_v63 }
 0x158   : > { %v1217_v56 = vpop.permute.xlu1 %1216 }
 0x159   : > { %v1014_v5 = vpop.permute.xlu0 %1013 }
 0x15a   : > { %v1875_v51 = vsel %vm1845_vm8, %v1810_v36, %v1014_v5  ;;  %1428 = vrot.lane.b32.xlu1 %v1301_v33, %s4855_s11  ;;  %v1682_v36 = vsel %vm1649_vm6, %v1679_v43, %v1681_v12  ;;  %v7381_v43 = vrot.slane %v6087_v10, 2 }
 0x15b   : > { %1362 = vrot.lane.b32.xlu0 %v1299_v30, %s4856_s12  ;;  %v1940_v59 = vsel %vm1910_vm9, %v1875_v51, %v1217_v56  ;;  %v1544_v30 = vrot.slane %v6102_v0, 2 }
 0x15c   : > { %v1413_v2 = vpop.permute.xlu1 %1412 }
 0x15d   : > { %v1347_v17 = vpop.permute.xlu0 %1346  ;;  %v6129_v51 = vor.u32 %v1545_v53, %v1544_v30  ;;  %v727_v30 = vor.u32 %v6001_v13, %v723_v34  ;;  %v731_v53 = vrot.slane %v6060_v23, 1 }
 0x15e   : > { %v2005_v38 = vsel %vm1975_vm10, %v1940_v59, %v1347_v17  ;;  %835 = vrot.lane.b32.xlu1 %v724_v46, %s4858_s19 }
 0x15f   : > { %1629 = vrot.lane.b32.xlu0 %v1543_v29, %s4859_s28  ;;  %v2070_v47 = vsel %vm2040_vm11, %v2005_v38, %v1413_v2  ;;  %v6140_v2 = vsel %vm1049_vm2, %v6055_v57, %v6121_v20  ;;  %v4770_v29 = vld [vmem:[%s4962_s18 + $0x78] sm:$0xff]   ;;  %v1547_v57 = vsel %vm1448_vm4, %v1542_v44, %v6129_v51 }
 0x160   : > { %v820_v52 = vpop.permute.xlu1 %819  ;;  %7403 = vst [vmem:[#allocation8_spill] sm:$0xff] %v6140_v2  ;;  %v6168_v44 = vld [vmem:[%s4962_s18 + $0xd8] sm:$0xff]  }
 0x161   : > { %v1614_v56 = vpop.permute.xlu0 %1613  ;;  %v1747_v63 = vsel %vm1715_vm5, %v4770_v29, %v820_v52  ;;  %v1149_v52 = vrot.slane %v6102_v0, 1  ;;  %v7385_v16 = vrot.slane %v6168_v44, 2 }
 0x162   : > { %v2149_v5 = vsel %vm2105_vm12, %v2070_v47, %v1614_v56  ;;  %1031 = vrot.lane.b32.xlu1 %v904_v54, %s4853_s29  ;;  %v1150_v47 = vrot.slane %v6099_v3, 2 }
 0x163   : > { %965 = vrot.lane.b32.xlu0 %v902_v40, %s4854_s10  ;;  %2522 = vmatmul.mubr.bf16.gmra.mxu0 %v2149_v5 }
 0x164   : > { %v1016_v46 = vpop.permute.xlu1 %1015  ;;  %4023 = vmatprep.mubr.msk.bf16.mxu0 %vm1715_vm5, %v1682_v36 }
 0x165   : > { %v2411_v40 = vpop.f32.mrf.mxu0  ;;  %v950_v42 = vpop.permute.xlu0 %949 }
 0x166   : > { %v6147_v59 = vadd.f32 %v6135_v58, %v2411_v40  ;;  %v1812_v17 = vsel %vm1780_vm7, %v1747_v63, %v950_v42  ;;  %1364 = vrot.lane.b32.xlu1 %v1301_v33, %s4856_s12  ;;  %v6165_v33 = vsel %vm1252_vm1, %v1300_v37, %v7381_v43  ;;  %v7382_v40 = vrot.slane %v5702_v14, 3 }
 0x167   : > { %v2413_v38 = vpop.f32.mrf.mxu0  ;;  %1234 = vrot.lane.b32.xlu0 %v6140_v2, %s4857_s17  ;;  %v1877_v13 = vsel %vm1845_vm8, %v1812_v17, %v1016_v46  ;;  %v732_v37 = vsel %vm528_vm3, %v727_v30, %v731_v53  ;;  %v7383_v46 = vrot.slane %v6087_v10, 1  ;;  %v6181_v17 = vor.u32 %v1150_v47, %v1149_v52 }
 0x168   : > { %v2666_v56 = vsub.f32 0.0, %v6147_v59  ;;  %v1349_v36 = vpop.permute.xlu1 %1348  ;;  %v1684_v47 = vsel %vm1649_vm6, %v1681_v12, %v7382_v40  ;;  %v7407_v2 = vrot.slane %v6087_v10, 1 }
 0x169   : > { %v2414_v34 = vpop.f32.mrf.mxu0  ;;  %v1219_v23 = vpop.permute.xlu0 %1218 }
 0x16a   : > { %v2730_v5 = vmul.f32 1.442695, %v2666_v56  ;;  %v6172_v29 = vadd.f32 %v6135_v58, %v2414_v34  ;;  %v1942_v63 = vsel %vm1910_vm9, %v1877_v13, %v1219_v23  ;;  %1631 = vrot.lane.b32.xlu1 %v1547_v57, %s4859_s28  ;;  %v6185_v13 = vshll.u32 %v6168_v44, 16 }
 0x16b   : > { %v2416_v42 = vpop.f32.mrf.mxu0  ;;  %1430 = vrot.lane.b32.xlu0 %v6165_v33, %s4855_s11  ;;  %v6188_v57 = vshrl.u32 %v6168_v44, 16  ;;  %v2007_v34 = vsel %vm1975_vm10, %v1942_v63, %v1349_v36  ;;  %v6208_v63 = vsel %vm853_vm0, %v903_v41, %v7383_v46 }
 0x16c   : > { %4510 = vpow2.f32 %v2730_v5  ;;  %v2667_v38 = vsub.f32 0.0, %v6172_v29  ;;  %v1616_v56 = vpop.permute.xlu1 %1615 }
 0x16d   : > { %v2419_v23 = vpop.f32.mrf.mxu0  ;;  %v1415_v42 = vpop.permute.xlu0 %1414 }
 0x16e   : > { %v2732_v43 = vmul.f32 1.442695, %v2667_v38  ;;  %v6192_v30 = vadd.f32 %v6135_v58, %v2419_v23  ;;  %v2072_v52 = vsel %vm2040_vm11, %v2007_v34, %v1415_v42  ;;  %967 = vrot.lane.b32.xlu1 %v904_v54, %s4854_s10  ;;  %v6213_v54 = vsel %vm1049_vm2, %v6121_v20, %v6181_v17 }
 0x16f   : > { %v2421_v5 = vpop.f32.mrf.mxu0  ;;  %837 = vrot.lane.b32.xlu0 %v732_v37, %s4858_s19  ;;  %v2152_v36 = vsel %vm2105_vm12, %v2072_v52, %v1616_v56  ;;  %7404 = vst [vmem:[#allocation9_spill] sm:$0xff] %v6213_v54  ;;  %v1548_v38 = vrot.slane %v6188_v57, 2  ;;  %v1549_v56 = vrot.slane %v6185_v13, 3  ;;  %v735_v23 = vor.u32 %v6063_v31, %v731_v53 }
 0x170   : > { %4512 = vpow2.f32 %v2732_v43  ;;  %v2668_v12 = vsub.f32 0.0, %v6192_v30  ;;  %2530 = vmatmul.mubr.bf16.gmra.mxu0 %v2152_v36  ;;  %v952_v37 = vpop.permute.xlu1 %951  ;;  %v4771_v43 = vld [vmem:[%s4962_s18 + $0x80] sm:$0xff]   ;;  %v7384_v5 = vrot.slane %v6099_v3, 1  ;;  %v7405_v31 = vrot.slane %v6087_v10, 2 }
 0x171   : > { %v2422_v34 = vpop.f32.mrf.mxu0  ;;  %v822_v41 = vpop.permute.xlu0 %821  ;;  %4024 = vmatprep.mubr.msk.bf16.mxu0 %vm1715_vm5, %v1684_v47  ;;  %v6239_v47 = vld [vmem:[%s4962_s18 + $0xe0] sm:$0xff]   ;;  %v7408_v10 = vrot.slane %v5763_v60, 3 }
 0x172   : > { %v2734_v20 = vmul.f32 1.442695, %v2668_v12  ;;  %v6222_v42 = vadd.f32 %v6135_v58, %v2422_v34  ;;  %v1749_v52 = vsel %vm1715_vm5, %v4771_v43, %v822_v41  ;;  %1236 = vrot.lane.b32.xlu1 %v6213_v54, %s4857_s17  ;;  %v6236_v53 = vsel %vm1252_vm1, %v7405_v31, %v7385_v16 }
 0x173   : > { %v2424_v36 = vpop.f32.mrf.mxu0  ;;  %1033 = vrot.lane.b32.xlu0 %v6208_v63, %s4853_s29  ;;  %v6242_v41 = vor.u32 %v1549_v56, %v1548_v38  ;;  %v1814_v43 = vsel %vm1780_vm7, %v1749_v52, %v952_v37  ;;  %v740_v31 = vsel %vm528_vm3, %v735_v23, %v7384_v5  ;;  %v1153_v38 = vrot.slane %v6188_v57, 1 }
 0x174   : > { %4514 = vpow2.f32 %v2734_v20  ;;  %v2669_v12 = vsub.f32 0.0, %v6222_v42  ;;  %v1221_v34 = vpop.permute.xlu1 %1220  ;;  %v1154_v37 = vrot.slane %v6185_v13, 2  ;;  %v6257_v56 = vshll.u32 %v6239_v47, 16 }
 0x175   : > { %v1018_v36 = vpop.permute.xlu0 %1017  ;;  %v6260_v52 = vshrl.u32 %v6239_v47, 16  ;;  %v1551_v23 = vsel %vm1448_vm4, %v6129_v51, %v6242_v41 }
 0x176   : > { %v2736_v40 = vmul.f32 1.442695, %v2669_v12  ;;  %v1879_v46 = vsel %vm1845_vm8, %v1814_v43, %v1018_v36  ;;  %1432 = vrot.lane.b32.xlu1 %v6236_v53, %s4855_s11  ;;  %v6277_v50 = vor.u32 %v1154_v37, %v1153_v38 }
 0x177   : > { %1366 = vrot.lane.b32.xlu0 %v6165_v33, %s4856_s12  ;;  %v1944_v36 = vsel %vm1910_vm9, %v1879_v46, %v1221_v34  ;;  %v1552_v46 = vrot.slane %v6260_v52, 2  ;;  %v1553_v34 = vrot.slane %v6257_v56, 3 }
 0x178   : > { %4516 = vpow2.f32 %v2736_v40  ;;  %v1417_v12 = vpop.permute.xlu1 %1416  ;;  %v7406_v40 = vrot.slane %v6168_v44, 1 }
 0x179   : > { %v4511_v43 = vpop.eup %4510  ;;  %v1351_v33 = vpop.permute.xlu0 %1350 }
 0x17a   : > { %v2858_v16 = vadd.f32 1.0, %v4511_v43  ;;  %v2009_v20 = vsel %vm1975_vm10, %v1944_v36, %v1351_v33  ;;  %839 = vrot.lane.b32.xlu1 %v740_v31, %s4858_s19  ;;  %v6275_v51 = vsel %vm853_vm0, %v7407_v2, %v7406_v40  ;;  %v7409_v2 = vrot.slane %v5702_v14, 3 }
 0x17b   : > { %v2427_v54 = vpop.f32.mrf.mxu0  ;;  %1633 = vrot.lane.b32.xlu0 %v1551_v23, %s4859_s28  ;;  %v2074_v23 = vsel %vm2040_vm11, %v2009_v20, %v1417_v12  ;;  %v6299_v14 = vsel %vm1049_vm2, %v6181_v17, %v6277_v50  ;;  %v6311_v17 = vld [vmem:[%s4962_s18 + $0xe8] sm:$0xff]  }
 0x17c   : > { %v6282_v43 = vadd.f32 %v6135_v58, %v2427_v54  ;;  %v824_v31 = vpop.permute.xlu1 %823  ;;  %v1686_v38 = vsel %vm1649_vm6, %v7409_v2, %v7408_v10  ;;  %4518 = vrcp.f32 %v2858_v16  ;;  %7410 = vst [vmem:[#allocation10_spill] sm:$0xff] %v6299_v14  ;;  %v6301_v16 = vor.u32 %v1553_v34, %v1552_v46 }
 0x17d   : > { %v4513_v36 = vpop.eup %4512  ;;  %v2429_v33 = vpop.f32.mrf.mxu0 }
 0x17e   : > { %v1618_v5 = vpop.permute.xlu0 %1617  ;;  %v2859_v37 = vadd.f32 1.0, %v4513_v36  ;;  %v2670_v40 = vsub.f32 0.0, %v6282_v43  ;;  %1035 = vrot.lane.b32.xlu1 %v6275_v51, %s4853_s29  ;;  %v7393_v36 = vrot.slane %v6239_v47, 2 }
 0x17f   : > { %v2155_v54 = vsel %vm2105_vm12, %v2074_v23, %v1618_v5  ;;  %v2430_v39 = vpop.f32.mrf.mxu0  ;;  %969 = vrot.lane.b32.xlu0 %v6208_v63, %s4854_s10  ;;  %v4772_v63 = vld [vmem:[%s4962_s18 + $0x88] sm:$0xff]  }
 0x180   : > { %2538 = vmatmul.mubr.bf16.gmra.mxu0 %v2155_v54  ;;  %4520 = vrcp.f32 %v2859_v37  ;;  %v2738_v20 = vmul.f32 1.442695, %v2670_v40  ;;  %v6304_v5 = vadd.f32 %v6135_v58, %v2430_v39  ;;  %v1020_v12 = vpop.permute.xlu1 %1019  ;;  %v1751_v33 = vsel %vm1715_vm5, %v4772_v63, %v824_v31 }
 0x181   : > { %4025 = vmatprep.mubr.msk.bf16.mxu0 %vm1715_vm5, %v1686_v38  ;;  %v4515_v23 = vpop.eup %4514  ;;  %v2432_v10 = vpop.f32.mrf.mxu0  ;;  %v1555_v31 = vsel %vm1448_vm4, %v6242_v41, %v6301_v16  ;;  %v1157_v38 = vrot.slane %v6260_v52, 1  ;;  %v1158_v37 = vrot.slane %v6257_v56, 2 }
 0x182   : > { %v954_v2 = vpop.permute.xlu0 %953  ;;  %v2860_v46 = vadd.f32 1.0, %v4515_v23  ;;  %4522 = vpow2.f32 %v2738_v20  ;;  %v2671_v34 = vsub.f32 0.0, %v6304_v5  ;;  %1368 = vrot.lane.b32.xlu1 %v6236_v53, %s4856_s12  ;;  %v7411_v20 = vrot.slane %v6168_v44, 2 }
 0x183   : > { %v1816_v39 = vsel %vm1780_vm7, %v1751_v33, %v954_v2  ;;  %1238 = vrot.lane.b32.xlu0 %v6299_v14, %s4857_s17  ;;  %v7412_v53 = vrot.slane %v6099_v3, 1  ;;  %v747_v33 = vrot.slane %v6185_v13, 1  ;;  %v6340_v14 = vshrl.u32 %v6311_v17, 16 }
 0x184   : > { %v2740_v40 = vmul.f32 1.442695, %v2671_v34  ;;  %v1353_v54 = vpop.permute.xlu1 %1352  ;;  %v6329_v23 = vsel %vm1252_vm1, %v7411_v20, %v7393_v36  ;;  %4524 = vrcp.f32 %v2860_v46  ;;  %v1881_v10 = vsel %vm1845_vm8, %v1816_v39, %v1020_v12  ;;  %v4773_v36 = vld [vmem:[%s4962_s18 + $0x90] sm:$0xff]  }
 0x185   : > { %v743_v63 = vor.u32 %v6102_v0, %v7412_v53  ;;  %v4517_v41 = vpop.eup %4516  ;;  %v6337_v34 = vshll.u32 %v6311_v17, 16  ;;  %v7392_v3 = vrot.slane %v5834_v6, 3  ;;  %v6347_v0 = vor.u32 %v1158_v37, %v1157_v38 }
 0x186   : > { %v1223_v2 = vpop.permute.xlu0 %1222  ;;  %v2861_v4 = vadd.f32 1.0, %v4517_v41  ;;  %4526 = vpow2.f32 %v2740_v40  ;;  %1635 = vrot.lane.b32.xlu1 %v1555_v31, %s4859_s28  ;;  %v7394_v39 = vrot.slane %v6239_v47, 1  ;;  %v1556_v41 = vrot.slane %v6340_v14, 2 }
 0x187   : > { %v1946_v20 = vsel %vm1910_vm9, %v1881_v10, %v1223_v2  ;;  %1434 = vrot.lane.b32.xlu0 %v6329_v23, %s4855_s11  ;;  %v748_v46 = vsel %vm528_vm3, %v743_v63, %v747_v33  ;;  %v1557_v10 = vrot.slane %v6337_v34, 3 }
 0x188   : > { %4528 = vrcp.f32 %v2861_v4  ;;  %v2435_v13 = vpop.f32.mrf.mxu0  ;;  %v1620_v12 = vpop.permute.xlu1 %1619  ;;  %v2011_v40 = vsel %vm1975_vm10, %v1946_v20, %v1353_v54  ;;  %v7413_v4 = vrot.slane %v5763_v60, 3 }
 0x189   : > { %v6353_v53 = vadd.f32 %v6135_v58, %v2435_v13  ;;  %v4519_v63 = vpop.eup %4518  ;;  %v6371_v13 = vsel %vm1049_vm2, %v6277_v50, %v6347_v0  ;;  %v6384_v50 = vor.u32 %v1557_v10, %v1556_v41 }
 0x18a   : > { %v1419_v31 = vpop.permute.xlu0 %1418  ;;  %v2437_v37 = vpop.f32.mrf.mxu0  ;;  %971 = vrot.lane.b32.xlu1 %v6275_v51, %s4854_s10  ;;  %v1688_v54 = vsel %vm1649_vm6, %v7413_v4, %v7392_v3  ;;  %v1308_v51 = vrot.slane %v6311_v17, 2  ;;  %v751_v3 = vor.u32 %v6188_v57, %v747_v33  ;;  %v6406_v57 = vld [vmem:[%s4962_s18 + $0xf0] sm:$0xff]  }
 0x18b   : > { %v2076_v38 = vsel %vm2040_vm11, %v2011_v40, %v1419_v31  ;;  %v2672_v2 = vsub.f32 0.0, %v6353_v53  ;;  %841 = vrot.lane.b32.xlu0 %v748_v46, %s4858_s19  ;;  %v7414_v31 = vrot.slane %v6168_v44, 1 }
 0x18c   : > { %v2158_v20 = vsel %vm2105_vm12, %v2076_v38, %v1620_v12  ;;  %v2438_v40 = vpop.f32.mrf.mxu0  ;;  %v956_v60 = vpop.permute.xlu1 %955 }
 0x18d   : > { %2546 = vmatmul.mubr.bf16.gmra.mxu0 %v2158_v20  ;;  %v6379_v37 = vsel %vm853_vm0, %v7414_v31, %v7394_v39  ;;  %v4521_v46 = vpop.eup %4520  ;;  %v2742_v12 = vmul.f32 1.442695, %v2672_v2  ;;  %v6382_v38 = vadd.f32 %v6135_v58, %v2438_v40  ;;  %v2986_v20 = vmul.f32 %v4519_v63, %v6147_v59 }
 0x18e   : > { %v826_v4 = vpop.permute.xlu0 %825  ;;  %4026 = vmatprep.mubr.msk.bf16.mxu0 %vm1715_vm5, %v1688_v54  ;;  %v2987_v44 = vmul.f32 %v4521_v46, %v6172_v29  ;;  %v2440_v39 = vpop.f32.mrf.mxu0  ;;  %1240 = vrot.lane.b32.xlu1 %v6371_v13, %s4857_s17  ;;  %v7395_v2 = vrot.slane %v6257_v56, 1  ;;  %v7415_v59 = vrot.slane %v6239_v47, 2 }
 0x18f   : > { %v1753_v31 = vsel %vm1715_vm5, %v4773_v36, %v826_v4  ;;  %v4523_v40 = vpop.eup %4522  ;;  %4530 = vpow2.f32 %v2742_v12  ;;  %v2673_v41 = vsub.f32 0.0, %v6382_v38  ;;  %1037 = vrot.lane.b32.xlu0 %v6379_v37, %s4853_s29  ;;  %v1559_v4 = vsel %vm1448_vm4, %v6301_v16, %v6384_v50 }
 0x190   : > { %v6403_v29 = vsel %vm1252_vm1, %v7415_v59, %v1308_v51  ;;  %v2862_v36 = vadd.f32 1.0, %v4523_v40  ;;  %v1225_v33 = vpop.permute.xlu1 %1224  ;;  %v3050_v39 = vpack.c.bf16 %v2987_v44, %v2986_v20  ;;  %v1818_v54 = vsel %vm1780_vm7, %v1753_v31, %v956_v60 }
 0x191   : > { %v2744_v10 = vmul.f32 1.442695, %v2673_v41  ;;  %v4525_v46 = vpop.eup %4524  ;;  %v756_v40 = vsel %vm528_vm3, %v751_v3, %v7395_v2  ;;  %v7396_v60 = vrot.slane %v6311_v17, 1  ;;  %v6424_v44 = vshll.u32 %v6406_v57, 16 }
 0x192   : > { %v1022_v63 = vpop.permute.xlu0 %1021  ;;  %3290 = vmatmul.mubr.bf16.vlgmr.msra.gmra.mxu1 %v3050_v39  ;;  %1436 = vrot.lane.b32.xlu1 %v6403_v29, %s4855_s11  ;;  %v6427_v31 = vshrl.u32 %v6406_v57, 16  ;;  %v1161_v3 = vrot.slane %v6340_v14, 1  ;;  %v1162_v59 = vrot.slane %v6337_v34, 2 }
 0x193   : > { %v1883_v12 = vsel %vm1845_vm8, %v1818_v54, %v1022_v63  ;;  %v4527_v20 = vpop.eup %4526  ;;  %4532 = vpow2.f32 %v2744_v10  ;;  %1370 = vrot.lane.b32.xlu0 %v6329_v23, %s4856_s12  ;;  %4051 = vmatprep.mubr.msk.bf16.mxu1 %vm1715_vm5, %v5069_v62  ;;  %v1689_v62 = vrot.slane %v5879_v21, 3  ;;  %v2988_v54 = vmul.f32 %v4525_v46, %v6192_v30 }
 0x194   : > { %4534 = vrcp.f32 %v2862_v36  ;;  %v2863_v16 = vadd.f32 1.0, %v4527_v20  ;;  %v1421_v41 = vpop.permute.xlu1 %1420  ;;  %v1948_v23 = vsel %vm1910_vm9, %v1883_v12, %v1225_v33  ;;  %v7416_v20 = vrot.slane %v6239_v47, 1 }
 0x195   : > { %v4529_v39 = vpop.eup %4528  ;;  %v1560_v12 = vrot.slane %v6427_v31, 2  ;;  %v1561_v30 = vrot.slane %v6424_v44, 3  ;;  %v7417_v47 = vrot.slane %v5834_v6, 3 }
 0x196   : > { %v1355_v10 = vpop.permute.xlu0 %1354  ;;  %v2989_v63 = vmul.f32 %v4529_v39, %v6222_v42  ;;  %4536 = vrcp.f32 %v2863_v16  ;;  %843 = vrot.lane.b32.xlu1 %v756_v40, %s4858_s19  ;;  %v6443_v33 = vsel %vm853_vm0, %v7416_v20, %v7396_v60  ;;  %v6450_v40 = vor.u32 %v1162_v59, %v1161_v3 }
 0x197   : > { %v2013_v2 = vsel %vm1975_vm10, %v1948_v23, %v1355_v10  ;;  %v2443_v36 = vpop.f32.mrf.mxu0  ;;  %1637 = vrot.lane.b32.xlu0 %v1559_v4, %s4859_s28  ;;  %v1690_v10 = vsel %vm1649_vm6, %v7417_v47, %v1689_v62 }
 0x198   : > { %v6448_v42 = vadd.f32 %v6135_v58, %v2443_v36  ;;  %v828_v46 = vpop.permute.xlu1 %827  ;;  %v3051_v16 = vpack.c.bf16 %v2989_v63, %v2988_v54  ;;  %v2078_v4 = vsel %vm2040_vm11, %v2013_v2, %v1421_v41  ;;  %v6464_v2 = vor.u32 %v1561_v30, %v1560_v12  ;;  %v4774_v12 = vld [vmem:[%s4962_s18 + $0x98] sm:$0xff]  }
 0x199   : > { %v2445_v39 = vpop.f32.mrf.mxu0  ;;  %v6472_v63 = vsel %vm1049_vm2, %v6347_v0, %v6450_v40  ;;  %v1755_v30 = vsel %vm1715_vm5, %v4774_v12, %v828_v46  ;;  %v1165_v46 = vrot.slane %v6427_v31, 1 }
 0x19a   : > { %v1622_v23 = vpop.permute.xlu0 %1621  ;;  %v2674_v20 = vsub.f32 0.0, %v6448_v42  ;;  %3298 = vmatmul.mubr.bf16.gmra.mxu1 %v3051_v16  ;;  %1039 = vrot.lane.b32.xlu1 %v6443_v33, %s4853_s29  ;;  %v1310_v16 = vrot.slane %v6406_v57, 2 }
 0x19b   : > { %v2161_v36 = vsel %vm2105_vm12, %v2078_v4, %v1622_v23  ;;  %v2446_v3 = vpop.f32.mrf.mxu0  ;;  %973 = vrot.lane.b32.xlu0 %v6379_v37, %s4854_s10  ;;  %4052 = vmatprep.mubr.msk.bf16.mxu1 %vm1715_vm5, %v5108_v19  ;;  %v6481_v23 = vld [vmem:[%s4962_s18 + $0xf8] sm:$0xff]   ;;  %v1563_v19 = vsel %vm1448_vm4, %v6384_v50, %v6464_v2  ;;  %v763_v50 = vrot.slane %v6337_v34, 1 }
 0x19c   : > { %2554 = vmatmul.mubr.bf16.gmra.mxu0 %v2161_v36  ;;  %v4531_v6 = vpop.eup %4530  ;;  %v2746_v41 = vmul.f32 1.442695, %v2674_v20  ;;  %v6467_v59 = vadd.f32 %v6135_v58, %v2446_v3  ;;  %v1024_v54 = vpop.permute.xlu1 %1023 }
 0x19d   : > { %4027 = vmatprep.mubr.msk.bf16.mxu0 %vm1715_vm5, %v1690_v10  ;;  %v2864_v37 = vadd.f32 1.0, %v4531_v6  ;;  %v2448_v4 = vpop.f32.mrf.mxu0  ;;  %v1166_v10 = vrot.slane %v6424_v44, 2  ;;  %v7418_v6 = vrot.slane %v6257_v56, 1  ;;  %v6512_v56 = vshll.u32 %v6481_v23, 16 }
 0x19e   : > { %v958_v39 = vpop.permute.xlu0 %957  ;;  %4538 = vpow2.f32 %v2746_v41  ;;  %v2675_v47 = vsub.f32 0.0, %v6467_v59  ;;  %1372 = vrot.lane.b32.xlu1 %v6403_v29, %s4856_s12  ;;  %v6499_v29 = vsel %vm1252_vm1, %v1308_v51, %v1310_v16 }
 0x19f   : > { %v1820_v0 = vsel %vm1780_vm7, %v1755_v30, %v958_v39  ;;  %1242 = vrot.lane.b32.xlu0 %v6472_v63, %s4857_s17  ;;  %v759_v41 = vor.u32 %v6260_v52, %v7418_v6  ;;  %4540 = vrcp.f32 %v2864_v37  ;;  %v1691_v52 = vrot.slane %v5931_v25, 3 }
 0x1a0   : > { %v4533_v20 = vpop.eup %4532  ;;  %v2748_v36 = vmul.f32 1.442695, %v2675_v47  ;;  %v1357_v3 = vpop.permute.xlu1 %1356  ;;  %v1885_v4 = vsel %vm1845_vm8, %v1820_v0, %v1024_v54  ;;  %v6507_v47 = vshrl.u32 %v6481_v23, 16  ;;  %v6517_v51 = vor.u32 %v1166_v10, %v1165_v46 }
 0x1a1   : > { %v4535_v12 = vpop.eup %4534  ;;  %v2865_v30 = vadd.f32 1.0, %v4533_v20 }
 0x1a2   : > { %v1227_v39 = vpop.permute.xlu0 %1226  ;;  %4542 = vpow2.f32 %v2748_v36  ;;  %1639 = vrot.lane.b32.xlu1 %v1563_v19, %s4859_s28  ;;  %v2990_v54 = vmul.f32 %v4535_v12, %v6282_v43  ;;  %v764_v19 = vsel %vm528_vm3, %v759_v41, %v763_v50  ;;  %v913_v36 = vrot.slane %v6406_v57, 1 }
 0x1a3   : > { %v1950_v60 = vsel %vm1910_vm9, %v1885_v4, %v1227_v39  ;;  %v4537_v34 = vpop.eup %4536  ;;  %4544 = vrcp.f32 %v2865_v30  ;;  %1438 = vrot.lane.b32.xlu0 %v6499_v29, %s4855_s11  ;;  %v1564_v39 = vrot.slane %v6507_v47, 2  ;;  %v1312_v12 = vrot.slane %v6481_v23, 2 }
 0x1a4   : > { %v2991_v37 = vmul.f32 %v4537_v34, %v6304_v5  ;;  %v2451_v0 = vpop.f32.mrf.mxu0  ;;  %v1624_v20 = vpop.permute.xlu1 %1623  ;;  %v2015_v6 = vsel %vm1975_vm10, %v1950_v60, %v1357_v3  ;;  %v1565_v5 = vrot.slane %v6512_v56, 3  ;;  %v1692_v60 = vsel %vm1649_vm6, %v1689_v62, %v1691_v52 }
 0x1a5   : > { %v6525_v4 = vadd.f32 %v6135_v58, %v2451_v0  ;;  %v7419_v62 = vrot.slane %v6311_v17, 1 }
 0x1a6   : > { %v1423_v30 = vpop.permute.xlu0 %1422  ;;  %v2453_v10 = vpop.f32.mrf.mxu0  ;;  %975 = vrot.lane.b32.xlu1 %v6443_v33, %s4854_s10  ;;  %v3052_v43 = vpack.c.bf16 %v2991_v37, %v2990_v54  ;;  %v6543_v33 = vsel %vm1049_vm2, %v6450_v40, %v6517_v51  ;;  %v6563_v17 = vor.u32 %v1565_v5, %v1564_v39  ;;  %v6578_v39 = vld [vmem:[%s5964_s14] sm:$0xff]  }
 0x1a7   : > { %v2080_v46 = vsel %vm2040_vm11, %v2015_v6, %v1423_v30  ;;  %v2676_v3 = vsub.f32 0.0, %v6525_v4  ;;  %845 = vrot.lane.b32.xlu0 %v764_v19, %s4858_s19  ;;  %v6551_v54 = vsel %vm853_vm0, %v7419_v62, %v913_v36  ;;  %v767_v30 = vor.u32 %v6340_v14, %v763_v50 }
 0x1a8   : > { %v2164_v41 = vsel %vm2105_vm12, %v2080_v46, %v1624_v20  ;;  %v2454_v34 = vpop.f32.mrf.mxu0  ;;  %3306 = vmatmul.mubr.bf16.gmra.mxu1 %v3052_v43  ;;  %v960_v21 = vpop.permute.xlu1 %959  ;;  %v4775_v20 = vld [vmem:[%s4962_s18 + $0xa0] sm:$0xff]   ;;  %v7397_v46 = vrot.slane %v6424_v44, 1  ;;  %v1567_v62 = vsel %vm1448_vm4, %v6464_v2, %v6563_v17 }
 0x1a9   : > { %2562 = vmatmul.mubr.bf16.gmra.mxu0 %v2164_v41  ;;  %v2750_v37 = vmul.f32 1.442695, %v2676_v3  ;;  %v6554_v0 = vadd.f32 %v6135_v58, %v2454_v34  ;;  %4053 = vmatprep.mubr.msk.bf16.mxu1 %vm1715_vm5, %v5153_v45  ;;  %v6575_v45 = vsel %vm1252_vm1, %v1310_v16, %v1312_v12 }
 0x1aa   : > { %v830_v40 = vpop.permute.xlu0 %829  ;;  %4028 = vmatprep.mubr.msk.bf16.mxu0 %vm1715_vm5, %v1692_v60  ;;  %v2456_v6 = vpop.f32.mrf.mxu0  ;;  %1244 = vrot.lane.b32.xlu1 %v6543_v33, %s4857_s17  ;;  %v772_v16 = vsel %vm528_vm3, %v767_v30, %v7397_v46  ;;  %v1170_v30 = vrot.slane %v6512_v56, 2 }
 0x1ab   : > { %v1757_v19 = vsel %vm1715_vm5, %v4775_v20, %v830_v40  ;;  %v4539_v10 = vpop.eup %4538  ;;  %4546 = vpow2.f32 %v2750_v37  ;;  %v2677_v43 = vsub.f32 0.0, %v6554_v0  ;;  %1041 = vrot.lane.b32.xlu0 %v6551_v54, %s4853_s29  ;;  %v6594_v40 = vshll.u32 %v6578_v39, 16 }
 0x1ac   : > { %v2866_v5 = vadd.f32 1.0, %v4539_v10  ;;  %v1229_v14 = vpop.permute.xlu1 %1228  ;;  %v1822_v60 = vsel %vm1780_vm7, %v1757_v19, %v960_v21  ;;  %v4541_v41 = vpop.eup %4540  ;;  %v915_v21 = vrot.slane %v6481_v23, 1  ;;  %v1173_v20 = vshrl.u32 %v6578_v39, 16 }
 0x1ad   : > { %v2752_v50 = vmul.f32 1.442695, %v2677_v43  ;;  %v1169_v10 = vrot.slane %v6507_v47, 1  ;;  %v2992_v43 = vmul.f32 %v4541_v41, %v6353_v53 }
 0x1ae   : > { %v1026_v3 = vpop.permute.xlu0 %1025  ;;  %1440 = vrot.lane.b32.xlu1 %v6575_v45, %s4855_s11  ;;  %v6611_v53 = vsel %vm853_vm0, %v913_v36, %v915_v21 }
 0x1af   : > { %v1887_v34 = vsel %vm1845_vm8, %v1822_v60, %v1026_v3  ;;  %v4543_v37 = vpop.eup %4542  ;;  %4548 = vpow2.f32 %v2752_v50  ;;  %1374 = vrot.lane.b32.xlu0 %v6499_v29, %s4856_s12  ;;  %v1693_v3 = vrot.slane %v5989_v1, 3 }
 0x1b0   : > { %v4545_v19 = vpop.eup %4544  ;;  %4550 = vrcp.f32 %v2866_v5  ;;  %v2867_v6 = vadd.f32 1.0, %v4543_v37  ;;  %v1425_v2 = vpop.permute.xlu1 %1424  ;;  %v1952_v29 = vsel %vm1910_vm9, %v1887_v34, %v1229_v14  ;;  %v1569_v14 = vrot.slane %v6594_v40, 3 }
 0x1b1   : > { %v2993_v50 = vmul.f32 %v4545_v19, %v6382_v38  ;;  %v1568_v38 = vrot.slane %v1173_v20, 2  ;;  %v6617_v19 = vor.u32 %v1170_v30, %v1169_v10  ;;  %v1694_v36 = vsel %vm1649_vm6, %v1691_v52, %v1693_v3 }
 0x1b2   : > { %v1359_v60 = vpop.permute.xlu0 %1358  ;;  %4552 = vrcp.f32 %v2867_v6  ;;  %847 = vrot.lane.b32.xlu1 %v772_v16, %s4858_s19 }
 0x1b3   : > { %v2017_v46 = vsel %vm1975_vm10, %v1952_v29, %v1359_v60  ;;  %v2459_v5 = vpop.f32.mrf.mxu0  ;;  %1641 = vrot.lane.b32.xlu0 %v1567_v62, %s4859_s28  ;;  %v3053_v37 = vpack.c.bf16 %v2993_v50, %v2992_v43  ;;  %v6633_v25 = vor.u32 %v1569_v14, %v1568_v38  ;;  %v6641_v29 = vsel %vm1049_vm2, %v6517_v51, %v6617_v19  ;;  %v6648_v14 = vld [vmem:[%s5964_s14 + $0x8] sm:$0xff]  }
 0x1b4   : > { %v6615_v41 = vadd.f32 %v6135_v58, %v2459_v5  ;;  %v832_v34 = vpop.permute.xlu1 %831  ;;  %v2082_v16 = vsel %vm2040_vm11, %v2017_v46, %v1425_v2 }
 0x1b5   : > { %v2461_v62 = vpop.f32.mrf.mxu0  ;;  %3314 = vmatmul.mubr.bf16.gmra.mxu1 %v3053_v37  ;;  %v1571_v51 = vsel %vm1448_vm4, %v6563_v17, %v6633_v25 }
 0x1b6   : > { %v1626_v6 = vpop.permute.xlu0 %1625  ;;  %v2678_v43 = vsub.f32 0.0, %v6615_v41  ;;  %1043 = vrot.lane.b32.xlu1 %v6611_v53, %s4853_s29  ;;  %4054 = vmatprep.mubr.msk.bf16.mxu1 %vm1715_vm5, %v5180_v49  ;;  %v1314_v49 = vrot.slane %v6578_v39, 2 }
 0x1b7   : > { %v2167_v50 = vsel %vm2105_vm12, %v2082_v16, %v1626_v6  ;;  %v2462_v46 = vpop.f32.mrf.mxu0  ;;  %977 = vrot.lane.b32.xlu0 %v6551_v54, %s4854_s10  ;;  %v4776_v54 = vld [vmem:[%s4962_s18 + $0xa8] sm:$0xff]   ;;  %v1176_v6 = vrot.slane %v6594_v40, 2 }
 0x1b8   : > { %2570 = vmatmul.mubr.bf16.gmra.mxu0 %v2167_v50  ;;  %v4547_v52 = vpop.eup %4546  ;;  %v2754_v2 = vmul.f32 1.442695, %v2678_v43  ;;  %v6636_v10 = vadd.f32 %v6135_v58, %v2462_v46  ;;  %v1028_v30 = vpop.permute.xlu1 %1027  ;;  %v1759_v5 = vsel %vm1715_vm5, %v4776_v54, %v832_v34  ;;  %v1175_v34 = vrot.slane %v1173_v20, 1 }
 0x1b9   : > { %4029 = vmatprep.mubr.msk.bf16.mxu0 %vm1715_vm5, %v1694_v36  ;;  %v2868_v60 = vadd.f32 1.0, %v4547_v52  ;;  %v2464_v37 = vpop.f32.mrf.mxu0  ;;  %v6665_v46 = vsel %vm1252_vm1, %v1312_v12, %v1314_v49  ;;  %v1183_v12 = vshll.u32 %v6648_v14, 16 }
 0x1ba   : > { %v962_v38 = vpop.permute.xlu0 %961  ;;  %4554 = vpow2.f32 %v2754_v2  ;;  %v2679_v16 = vsub.f32 0.0, %v6636_v10  ;;  %1376 = vrot.lane.b32.xlu1 %v6575_v45, %s4856_s12  ;;  %v7420_v45 = vrot.slane %v6424_v44, 1  ;;  %v779_v2 = vrot.slane %v6512_v56, 1 }
 0x1bb   : > { %v1824_v62 = vsel %vm1780_vm7, %v1759_v5, %v962_v38  ;;  %1246 = vrot.lane.b32.xlu0 %v6641_v29, %s4857_s17  ;;  %4556 = vrcp.f32 %v2868_v60  ;;  %v1180_v37 = vshrl.u32 %v6648_v14, 16  ;;  %v1695_v44 = vrot.slane %v6048_v9, 3 }
 0x1bc   : > { %v4549_v36 = vpop.eup %4548  ;;  %v2756_v43 = vmul.f32 1.442695, %v2679_v16  ;;  %v1361_v50 = vpop.permute.xlu1 %1360  ;;  %v775_v52 = vor.u32 %v6427_v31, %v7420_v45  ;;  %v1889_v54 = vsel %vm1845_vm8, %v1824_v62, %v1028_v30  ;;  %v6679_v56 = vor.u32 %v1176_v6, %v1175_v34 }
 0x1bd   : > { %v4551_v17 = vpop.eup %4550  ;;  %v2869_v20 = vadd.f32 1.0, %v4549_v36  ;;  %v1572_v34 = vrot.slane %v1180_v37, 2 }
 0x1be   : > { %v1231_v5 = vpop.permute.xlu0 %1230  ;;  %4558 = vpow2.f32 %v2756_v43  ;;  %1643 = vrot.lane.b32.xlu1 %v1571_v51, %s4859_s28  ;;  %v2994_v30 = vmul.f32 %v4551_v17, %v6448_v42  ;;  %v780_v36 = vsel %vm528_vm3, %v775_v52, %v779_v2  ;;  %v917_v51 = vrot.slane %v6578_v39, 1 }
 0x1bf   : > { %v1954_v38 = vsel %vm1910_vm9, %v1889_v54, %v1231_v5  ;;  %v4553_v31 = vpop.eup %4552  ;;  %4560 = vrcp.f32 %v2869_v20  ;;  %1442 = vrot.lane.b32.xlu0 %v6665_v46, %s4855_s11  ;;  %v1573_v52 = vrot.slane %v1183_v12, 3  ;;  %v1316_v5 = vrot.slane %v6648_v14, 2 }
 0x1c0   : > { %v2995_v60 = vmul.f32 %v4553_v31, %v6467_v59  ;;  %v2467_v16 = vpop.f32.mrf.mxu0  ;;  %v1628_v62 = vpop.permute.xlu1 %1627  ;;  %v2019_v43 = vsel %vm1975_vm10, %v1954_v38, %v1361_v50  ;;  %v1696_v50 = vsel %vm1649_vm6, %v1693_v3, %v1695_v44  ;;  %v6715_v3 = vsel %vm853_vm0, %v915_v21, %v917_v51 }
 0x1c1   : > { %v6687_v45 = vadd.f32 %v6135_v58, %v2467_v16  ;;  %v6727_v21 = vor.u32 %v1573_v52, %v1572_v34  ;;  %v6742_v34 = vld [vmem:[%s5964_s14 + $0x10] sm:$0xff]   ;;  %s4217_s14 = sshll.u32 %s4918_s25, 12 }
 0x1c2   : > { %v1427_v20 = vpop.permute.xlu0 %1426  ;;  %v2469_v42 = vpop.f32.mrf.mxu0  ;;  %979 = vrot.lane.b32.xlu1 %v6611_v53, %s4854_s10  ;;  %v3054_v59 = vpack.c.bf16 %v2995_v60, %v2994_v30  ;;  %v6707_v53 = vsel %vm1049_vm2, %v6617_v19, %v6679_v56  ;;  %v4777_v60 = vld [vmem:[%s4962_s18 + $0xb0] sm:$0xff]   ;;  %s7325_s9 = scalar_lea.hbm %s7380_s6, %s4217_s14 }
 0x1c3   : > { %v2084_v6 = vsel %vm2040_vm11, %v2019_v43, %v1427_v20  ;;  %v2680_v17 = vsub.f32 0.0, %v6687_v45  ;;  %849 = vrot.lane.b32.xlu0 %v780_v36, %s4858_s19  ;;  %v783_v36 = vor.u32 %v6507_v47, %v779_v2 }
 0x1c4   : > { %v2170_v54 = vsel %vm2105_vm12, %v2084_v6, %v1628_v62  ;;  %v2470_v38 = vpop.f32.mrf.mxu0  ;;  %3322 = vmatmul.mubr.bf16.gmra.mxu1 %v3054_v59  ;;  %v964_v1 = vpop.permute.xlu1 %963 }
 0x1c5   : > { %2578 = vmatmul.mubr.bf16.gmra.mxu0 %v2170_v54  ;;  %v2758_v31 = vmul.f32 1.442695, %v2680_v17  ;;  %v6718_v30 = vadd.f32 %v6135_v58, %v2470_v38  ;;  %4055 = vmatprep.mubr.msk.bf16.mxu1 %vm1715_vm5, %v5214_v26  ;;  %v787_v58 = vrot.slane %v6594_v40, 1  ;;  %v6739_v26 = vsel %vm1252_vm1, %v1314_v49, %v1316_v5 }
 0x1c6   : > { %v834_v19 = vpop.permute.xlu0 %833  ;;  %4030 = vmatprep.mubr.msk.bf16.mxu0 %vm1715_vm5, %v1696_v50  ;;  %v2472_v62 = vpop.f32.mrf.mxu0  ;;  %1248 = vrot.lane.b32.xlu1 %v6707_v53, %s4857_s17  ;;  %v1575_v50 = vsel %vm1448_vm4, %v6633_v25, %v6727_v21  ;;  %v983_v54 = vrot.slane %v6648_v14, 1  ;;  %v1577_v38 = vshrl.u32 %v6742_v34, 16  ;;  %v1182_v25 = vrot.slane %v1180_v37, 1 }
 0x1c7   : > { %v1761_v16 = vsel %vm1715_vm5, %v4777_v60, %v834_v19  ;;  %v4555_v43 = vpop.eup %4554  ;;  %4562 = vpow2.f32 %v2758_v31  ;;  %v2681_v20 = vsub.f32 0.0, %v6718_v30  ;;  %1045 = vrot.lane.b32.xlu0 %v6715_v3, %s4853_s29  ;;  %v788_v49 = vsel %vm528_vm3, %v783_v36, %v787_v58 }
 0x1c8   : > { %v2870_v6 = vadd.f32 1.0, %v4555_v43  ;;  %v1233_v47 = vpop.permute.xlu1 %1232  ;;  %v1826_v40 = vsel %vm1780_vm7, %v1761_v16, %v964_v1  ;;  %v4557_v59 = vpop.eup %4556  ;;  %v1580_v1 = vshll.u32 %v6742_v34, 16  ;;  %v1185_v16 = vrot.slane %v1183_v12, 2  ;;  %v6765_v43 = vld [vmem:[%s4962_s18 + $0xd0] sm:$0xff]  }
 0x1c9   : > { %v2760_v2 = vmul.f32 1.442695, %v2681_v20  ;;  %v2996_v62 = vmul.f32 %v4557_v59, %v6525_v4  ;;  %v1697_v20 = vrot.slane %v6765_v43, 3  ;;  %v984_v4 = vsel %vm853_vm0, %v917_v51, %v983_v54 }
 0x1ca   : > { %v1030_v42 = vpop.permute.xlu0 %1029  ;;  %1444 = vrot.lane.b32.xlu1 %v6739_v26, %s4855_s11  ;;  %v1186_v59 = vor.u32 %v1185_v16, %v1182_v25  ;;  %v1382_v25 = vrot.slane %v6742_v34, 2  ;;  %v4780_v16 = vld [vmem:[%s4962_s18 + $0xb8] sm:$0xff]  }
 0x1cb   : > { %v1891_v52 = vsel %vm1845_vm8, %v1826_v40, %v1030_v42  ;;  %v4559_v17 = vpop.eup %4558  ;;  %4564 = vpow2.f32 %v2760_v2  ;;  %1378 = vrot.lane.b32.xlu0 %v6665_v46, %s4856_s12  ;;  %v6777_v2 = vld [vmem:[%s7377_s3] ss:$0 sm:$0xff]  ;;  %v1698_v51 = vsel %vm1649_vm6, %v1695_v44, %v1697_v20 }
 0x1cc   : > { %v4561_v31 = vpop.eup %4560  ;;  %4566 = vrcp.f32 %v2870_v6  ;;  %v2871_v19 = vadd.f32 1.0, %v4559_v17  ;;  %v1429_v60 = vpop.permute.xlu1 %1428  ;;  %v1956_v36 = vsel %vm1910_vm9, %v1891_v52, %v1233_v47  ;;  %v1582_v47 = vrot.slane %v1580_v1, 3 }
 0x1cd   : > { %v2997_v46 = vmul.f32 %v4561_v31, %v6554_v0  ;;  %v1579_v0 = vrot.slane %v1577_v38, 2 }
 0x1ce   : > { %v1363_v58 = vpop.permute.xlu0 %1362  ;;  %4568 = vrcp.f32 %v2871_v19  ;;  %851 = vrot.lane.b32.xlu1 %v788_v49, %s4858_s19 }
 0x1cf   : > { %v2021_v6 = vsel %vm1975_vm10, %v1956_v36, %v1363_v58  ;;  %v2475_v37 = vpop.f32.mrf.mxu0  ;;  %1645 = vrot.lane.b32.xlu0 %v1575_v50, %s4859_s28  ;;  %v3055_v12 = vpack.c.bf16 %v2997_v46, %v2996_v62  ;;  %v1583_v1 = vor.u32 %v1582_v47, %v1579_v0 }
 0x1d0   : > { %v6780_v40 = vadd.f32 %v6777_v2, %v2475_v37  ;;  %v836_v42 = vpop.permute.xlu1 %835  ;;  %v2086_v52 = vsel %vm2040_vm11, %v2021_v6, %v1429_v60  ;;  %v6800_v60 = vsel %vm1049_vm2, %v6679_v56, %v1186_v59 }
 0x1d1   : > { %v2477_v50 = vpop.f32.mrf.mxu0  ;;  %3330 = vmatmul.mubr.bf16.gmra.mxu1 %v3055_v12  ;;  %v1584_v56 = vsel %vm1448_vm4, %v6727_v21, %v1583_v1 }
 0x1d2   : > { %v1630_v49 = vpop.permute.xlu0 %1629  ;;  %v2682_v17 = vsub.f32 0.0, %v6780_v40  ;;  %1047 = vrot.lane.b32.xlu1 %v984_v4, %s4853_s29  ;;  %4056 = vmatprep.mubr.msk.bf16.mxu1 %vm1715_vm5, %v5242_v32  ;;  %v1383_v4 = vsel %vm1252_vm1, %v1316_v5, %v1382_v25 }
 0x1d3   : > { %v2173_v54 = vsel %vm2105_vm12, %v2086_v52, %v1630_v49  ;;  %v2478_v38 = vpop.f32.mrf.mxu0  ;;  %981 = vrot.lane.b32.xlu0 %v6715_v3, %s4854_s10  ;;  %v1763_v3 = vsel %vm1715_vm5, %v4780_v16, %v836_v42  ;;  %v6821_v52 = vld [vmem:[%s4962_s18 + $0xd8] sm:$0xff]   ;;  %s4860_s10 = smov [#allocation2]  }
 0x1d4   : > { %2586 = vmatmul.mubr.bf16.gmra.mxu0 %v2173_v54  ;;  %v4563_v31 = vpop.eup %4562  ;;  %v2762_v9 = vmul.f32 1.442695, %v2682_v17  ;;  %v6796_v44 = vadd.f32 %v6777_v2, %v2478_v38  ;;  %v1032_v19 = vpop.permute.xlu1 %1031  ;;  %v1699_v21 = vrot.slane %v6821_v52, 3 }
 0x1d5   : > { %4031 = vmatprep.mubr.msk.bf16.mxu0 %vm1715_vm5, %v1698_v51  ;;  %v2872_v32 = vadd.f32 1.0, %v4563_v31  ;;  %v2480_v62 = vpop.f32.mrf.mxu0 }
 0x1d6   : > { %v966_v46 = vpop.permute.xlu0 %965  ;;  %4570 = vpow2.f32 %v2762_v9  ;;  %v2683_v36 = vsub.f32 0.0, %v6796_v44  ;;  %1380 = vrot.lane.b32.xlu1 %v6739_v26, %s4856_s12  ;;  %v1700_v25 = vsel %vm1649_vm6, %v1697_v20, %v1699_v21 }
 0x1d7   : > { %v1828_v58 = vsel %vm1780_vm7, %v1763_v3, %v966_v46  ;;  %1250 = vrot.lane.b32.xlu0 %v6800_v60, %s4857_s17  ;;  %4572 = vrcp.f32 %v2872_v32 }
 0x1d8   : > { %v4565_v6 = vpop.eup %4564  ;;  %v2764_v37 = vmul.f32 1.442695, %v2683_v36  ;;  %v1365_v12 = vpop.permute.xlu1 %1364  ;;  %v1893_v42 = vsel %vm1845_vm8, %v1828_v58, %v1032_v19  ;;  %v4782_v36 = vld [vmem:[%s4962_s18 + $0xc0] sm:$0xff]  }
 0x1d9   : > { %v4567_v0 = vpop.eup %4566  ;;  %v2873_v47 = vadd.f32 1.0, %v4565_v6 }
 0x1da   : > { %v1235_v59 = vpop.permute.xlu0 %1234  ;;  %4574 = vpow2.f32 %v2764_v37  ;;  %1647 = vrot.lane.b32.xlu1 %v1584_v56, %s4859_s28  ;;  %v2998_v5 = vmul.f32 %v4567_v0, %v6615_v41 }
 0x1db   : > { %v1958_v26 = vsel %vm1910_vm9, %v1893_v42, %v1235_v59  ;;  %v4569_v50 = vpop.eup %4568  ;;  %4576 = vrcp.f32 %v2873_v47  ;;  %1446 = vrot.lane.b32.xlu0 %v1383_v4, %s4855_s11 }
 0x1dc   : > { %v2999_v49 = vmul.f32 %v4569_v50, %v6636_v10  ;;  %v2483_v51 = vpop.f32.mrf.mxu0  ;;  %v1632_v17 = vpop.permute.xlu1 %1631  ;;  %v2023_v54 = vsel %vm1975_vm10, %v1958_v26, %v1365_v12 }
 0x1dd   : > { %v6829_v38 = vadd.f32 %v6777_v2, %v2483_v51 }
 0x1de   : > { %v1431_v1 = vpop.permute.xlu0 %1430  ;;  %v2485_v9 = vpop.f32.mrf.mxu0  ;;  %v3056_v19 = vpack.c.bf16 %v2999_v49, %v2998_v5 }
 0x1df   : > { %v2088_v31 = vsel %vm2040_vm11, %v2023_v54, %v1431_v1  ;;  %v2684_v41 = vsub.f32 0.0, %v6829_v38  ;;  %v6852_v1 = vld [vmem:[%s4962_s18 + $0xe0] sm:$0xff]  }
 0x1e0   : > { %v2176_v10 = vsel %vm2105_vm12, %v2088_v31, %v1632_v17  ;;  %v2486_v32 = vpop.f32.mrf.mxu0  ;;  %3338 = vmatmul.mubr.bf16.gmra.mxu1 %v3056_v19  ;;  %v968_v16 = vpop.permute.xlu1 %967  ;;  %v1701_v31 = vrot.slane %v6852_v1, 3 }
 0x1e1   : > { %2594 = vmatmul.mubr.bf16.gmra.mxu0 %v2176_v10  ;;  %v2766_v3 = vmul.f32 1.442695, %v2684_v41  ;;  %v6838_v62 = vadd.f32 %v6777_v2, %v2486_v32  ;;  %4057 = vmatprep.mubr.msk.bf16.mxu1 %vm1715_vm5, %v5277_v11 }
 0x1e2   : > { %v838_v46 = vpop.permute.xlu0 %837  ;;  %4032 = vmatprep.mubr.msk.bf16.mxu0 %vm1715_vm5, %v1700_v25  ;;  %v2488_v58 = vpop.f32.mrf.mxu0 }
 0x1e3   : > { %v1765_v20 = vsel %vm1715_vm5, %v4782_v36, %v838_v46  ;;  %v4571_v56 = vpop.eup %4570  ;;  %4578 = vpow2.f32 %v2766_v3  ;;  %v2685_v6 = vsub.f32 0.0, %v6838_v62 }
 0x1e4   : > { %v2874_v37 = vadd.f32 1.0, %v4571_v56  ;;  %v1237_v12 = vpop.permute.xlu1 %1236  ;;  %v1830_v0 = vsel %vm1780_vm7, %v1765_v20, %v968_v16  ;;  %v4573_v42 = vpop.eup %4572  ;;  %v1702_v16 = vsel %vm1649_vm6, %v1699_v21, %v1701_v31 }
 0x1e5   : > { %v2768_v4 = vmul.f32 1.442695, %v2685_v6  ;;  %v3000_v49 = vmul.f32 %v4573_v42, %v6687_v45 }
 0x1e6   : > { %v1034_v47 = vpop.permute.xlu0 %1033 }
 0x1e7   : > { %v1895_v11 = vsel %vm1845_vm8, %v1830_v0, %v1034_v47  ;;  %v4575_v59 = vpop.eup %4574  ;;  %4580 = vpow2.f32 %v2768_v4 }
 0x1e8   : > { %v4577_v26 = vpop.eup %4576  ;;  %4582 = vrcp.f32 %v2874_v37  ;;  %v2875_v50 = vadd.f32 1.0, %v4575_v59  ;;  %v1433_v5 = vpop.permute.xlu1 %1432  ;;  %v1960_v17 = vsel %vm1910_vm9, %v1895_v11, %v1237_v12  ;;  %v4784_v12 = vld [vmem:[%s4962_s18 + $0xc8] sm:$0xff]  }
 0x1e9   : > { %v3001_v51 = vmul.f32 %v4577_v26, %v6718_v30 }
 0x1ea   : > { %v1367_v54 = vpop.permute.xlu0 %1366  ;;  %4584 = vrcp.f32 %v2875_v50 }
 0x1eb   : > { %v2025_v9 = vsel %vm1975_vm10, %v1960_v17, %v1367_v54  ;;  %v2491_v19 = vpop.f32.mrf.mxu0  ;;  %v3057_v25 = vpack.c.bf16 %v3001_v51, %v3000_v49  ;;  %v6876_v17 = vld [vmem:[%s4962_s18 + $0xe8] sm:$0xff]  }
 0x1ec   : > { %v6857_v41 = vadd.f32 %v6777_v2, %v2491_v19  ;;  %v840_v10 = vpop.permute.xlu1 %839  ;;  %v2090_v45 = vsel %vm2040_vm11, %v2025_v9, %v1433_v5  ;;  %v1703_v54 = vrot.slane %v6876_v17, 3 }
 0x1ed   : > { %v2493_v30 = vpop.f32.mrf.mxu0  ;;  %3346 = vmatmul.mubr.bf16.gmra.mxu1 %v3057_v25  ;;  %v1767_v21 = vsel %vm1715_vm5, %v4784_v12, %v840_v10 }
 0x1ee   : > { %v1634_v32 = vpop.permute.xlu0 %1633  ;;  %v2686_v3 = vsub.f32 0.0, %v6857_v41  ;;  %4058 = vmatprep.mubr.msk.bf16.mxu1 %vm1715_vm5, %v5305_v15 }
 0x1ef   : > { %v2179_v46 = vsel %vm2105_vm12, %v2090_v45, %v1634_v32  ;;  %v2494_v36 = vpop.f32.mrf.mxu0 }
 0x1f0   : > { %2602 = vmatmul.mubr.bf16.gmra.mxu0 %v2179_v46  ;;  %v4579_v20 = vpop.eup %4578  ;;  %v2770_v58 = vmul.f32 1.442695, %v2686_v3  ;;  %v6866_v56 = vadd.f32 %v6777_v2, %v2494_v36  ;;  %v1036_v6 = vpop.permute.xlu1 %1035 }
 0x1f1   : > { %4033 = vmatprep.mubr.msk.bf16.mxu0 %vm1715_vm5, %v1702_v16  ;;  %v2876_v37 = vadd.f32 1.0, %v4579_v20  ;;  %v2496_v4 = vpop.f32.mrf.mxu0  ;;  %v1704_v20 = vsel %vm1649_vm6, %v1701_v31, %v1703_v54 }
 0x1f2   : > { %v970_v0 = vpop.permute.xlu0 %969  ;;  %4586 = vpow2.f32 %v2770_v58  ;;  %v2687_v15 = vsub.f32 0.0, %v6866_v56 }
 0x1f3   : > { %v1832_v47 = vsel %vm1780_vm7, %v1767_v21, %v970_v0  ;;  %4588 = vrcp.f32 %v2876_v37 }
 0x1f4   : > { %v4581_v42 = vpop.eup %4580  ;;  %v2772_v11 = vmul.f32 1.442695, %v2687_v15  ;;  %v1369_v59 = vpop.permute.xlu1 %1368  ;;  %v1897_v5 = vsel %vm1845_vm8, %v1832_v47, %v1036_v6 }
 0x1f5   : > { %v4583_v26 = vpop.eup %4582  ;;  %v2877_v50 = vadd.f32 1.0, %v4581_v42 }
 0x1f6   : > { %v1239_v49 = vpop.permute.xlu0 %1238  ;;  %4590 = vpow2.f32 %v2772_v11  ;;  %v3002_v19 = vmul.f32 %v4583_v26, %v6780_v40 }
 0x1f7   : > { %v1962_v51 = vsel %vm1910_vm9, %v1897_v5, %v1239_v49  ;;  %v4585_v9 = vpop.eup %4584  ;;  %4592 = vrcp.f32 %v2877_v50 }
 0x1f8   : > { %v3003_v25 = vmul.f32 %v4585_v9, %v6796_v44  ;;  %v2499_v10 = vpop.f32.mrf.mxu0  ;;  %v1636_v45 = vpop.permute.xlu1 %1635  ;;  %v2027_v30 = vsel %vm1975_vm10, %v1962_v51, %v1369_v59 }
 0x1f9   : > { %v6883_v32 = vadd.f32 %v6777_v2, %v2499_v10 }
 0x1fa   : > { %v1435_v16 = vpop.permute.xlu0 %1434  ;;  %v2501_v46 = vpop.f32.mrf.mxu0  ;;  %v3058_v36 = vpack.c.bf16 %v3003_v25, %v3002_v19 }
 0x1fb   : > { %v2092_v3 = vsel %vm2040_vm11, %v2027_v30, %v1435_v16  ;;  %v2688_v58 = vsub.f32 0.0, %v6883_v32 }
 0x1fc   : > { %v2182_v40 = vsel %vm2105_vm12, %v2092_v3, %v1636_v45  ;;  %v2502_v6 = vpop.f32.mrf.mxu0  ;;  %3354 = vmatmul.mubr.bf16.gmra.mxu1 %v3058_v36  ;;  %v972_v44 = vpop.permute.xlu1 %971  ;;  %v1705_v45 = vrot.slane %v6406_v57, 3 }
 0x1fd   : > { %2610 = vmatmul.mubr.bf16.gmra.mxu0 %v2182_v40  ;;  %v2774_v37 = vmul.f32 1.442695, %v2688_v58  ;;  %v6890_v12 = vadd.f32 %v6777_v2, %v2502_v6  ;;  %4059 = vmatprep.mubr.msk.bf16.mxu1 %vm1715_vm5, %v5352_v18 }
 0x1fe   : > { %v842_v21 = vpop.permute.xlu0 %841  ;;  %4034 = vmatprep.mubr.msk.bf16.mxu0 %vm1715_vm5, %v1704_v20  ;;  %v2504_v4 = vpop.f32.mrf.mxu0 }
 0x1ff   : > { %v1769_v31 = vsel %vm1715_vm5, %v6765_v43, %v842_v21  ;;  %v4587_v0 = vpop.eup %4586  ;;  %4594 = vpow2.f32 %v2774_v37  ;;  %v2689_v15 = vsub.f32 0.0, %v6890_v12 }
 0x200   : > { %v2878_v47 = vadd.f32 1.0, %v4587_v0  ;;  %v1241_v42 = vpop.permute.xlu1 %1240  ;;  %v1834_v59 = vsel %vm1780_vm7, %v1769_v31, %v972_v44  ;;  %v4589_v50 = vpop.eup %4588 }
 0x201   : > { %v2776_v11 = vmul.f32 1.442695, %v2689_v15  ;;  %v3004_v9 = vmul.f32 %v4589_v50, %v6829_v38 }
 0x202   : > { %v1038_v26 = vpop.permute.xlu0 %1037 }
 0x203   : > { %v1899_v5 = vsel %vm1845_vm8, %v1834_v59, %v1038_v26  ;;  %v4591_v18 = vpop.eup %4590  ;;  %4596 = vpow2.f32 %v2776_v11 }
 0x204   : > { %v4593_v49 = vpop.eup %4592  ;;  %4598 = vrcp.f32 %v2878_v47  ;;  %v2879_v51 = vadd.f32 1.0, %v4591_v18  ;;  %v1437_v43 = vpop.permute.xlu1 %1436  ;;  %v1964_v25 = vsel %vm1910_vm9, %v1899_v5, %v1241_v42 }
 0x205   : > { %v3005_v19 = vmul.f32 %v4593_v49, %v6838_v62  ;;  %v1706_v62 = vsel %vm1649_vm6, %v1703_v54, %v1705_v45 }
 0x206   : > { %v1371_v10 = vpop.permute.xlu0 %1370  ;;  %4600 = vrcp.f32 %v2879_v51 }
 0x207   : > { %v2029_v30 = vsel %vm1975_vm10, %v1964_v25, %v1371_v10  ;;  %v2507_v16 = vpop.f32.mrf.mxu0  ;;  %v3059_v3 = vpack.c.bf16 %v3005_v19, %v3004_v9 }
 0x208   : > { %v6906_v46 = vadd.f32 %v6777_v2, %v2507_v16  ;;  %v844_v36 = vpop.permute.xlu1 %843  ;;  %v2094_v20 = vsel %vm2040_vm11, %v2029_v30, %v1437_v43 }
 0x209   : > { %v2509_v58 = vpop.f32.mrf.mxu0  ;;  %3362 = vmatmul.mubr.bf16.gmra.mxu1 %v3059_v3  ;;  %v1771_v54 = vsel %vm1715_vm5, %v6821_v52, %v844_v36  ;;  %v1707_v52 = vrot.slane %v6481_v23, 3 }
 0x20a   : > { %v1638_v38 = vpop.permute.xlu0 %1637  ;;  %v2690_v40 = vsub.f32 0.0, %v6906_v46  ;;  %4060 = vmatprep.mubr.msk.bf16.mxu1 %vm1715_vm5, %v5403_v8 }
 0x20b   : > { %v2185_v57 = vsel %vm2105_vm12, %v2094_v20, %v1638_v38  ;;  %v2510_v6 = vpop.f32.mrf.mxu0  ;;  %v1708_v23 = vsel %vm1649_vm6, %v1705_v45, %v1707_v52 }
 0x20c   : > { %2618 = vmatmul.mubr.bf16.gmra.mxu0 %v2185_v57  ;;  %v4595_v44 = vpop.eup %4594  ;;  %v2778_v37 = vmul.f32 1.442695, %v2690_v40  ;;  %v6915_v21 = vadd.f32 %v6777_v2, %v2510_v6  ;;  %v1040_v31 = vpop.permute.xlu1 %1039 }
 0x20d   : > { %4035 = vmatprep.mubr.msk.bf16.mxu0 %vm1715_vm5, %v1706_v62  ;;  %v2880_v4 = vadd.f32 1.0, %v4595_v44  ;;  %v2512_v0 = vpop.f32.mrf.mxu0 }
 0x20e   : > { %v974_v15 = vpop.permute.xlu0 %973  ;;  %4602 = vpow2.f32 %v2778_v37  ;;  %v2691_v47 = vsub.f32 0.0, %v6915_v21 }
 0x20f   : > { %v1836_v8 = vsel %vm1780_vm7, %v1771_v54, %v974_v15  ;;  %4604 = vrcp.f32 %v2880_v4 }
 0x210   : > { %v4597_v42 = vpop.eup %4596  ;;  %v2780_v11 = vmul.f32 1.442695, %v2691_v47  ;;  %v1373_v59 = vpop.permute.xlu1 %1372  ;;  %v1901_v5 = vsel %vm1845_vm8, %v1836_v8, %v1040_v31 }
 0x211   : > { %v4599_v26 = vpop.eup %4598  ;;  %v2881_v50 = vadd.f32 1.0, %v4597_v42 }
 0x212   : > { %v1243_v18 = vpop.permute.xlu0 %1242  ;;  %4606 = vpow2.f32 %v2780_v11  ;;  %v3006_v43 = vmul.f32 %v4599_v26, %v6857_v41 }
 0x213   : > { %v1966_v49 = vsel %vm1910_vm9, %v1901_v5, %v1243_v18  ;;  %v4601_v51 = vpop.eup %4600  ;;  %4608 = vrcp.f32 %v2881_v50  ;;  %v1709_v18 = vrot.slane %v6578_v39, 3 }
 0x214   : > { %v3007_v9 = vmul.f32 %v4601_v51, %v6866_v56  ;;  %v2515_v19 = vpop.f32.mrf.mxu0  ;;  %v1640_v25 = vpop.permute.xlu1 %1639  ;;  %v2031_v10 = vsel %vm1975_vm10, %v1966_v49, %v1373_v59 }
 0x215   : > { %v6929_v30 = vadd.f32 %v6777_v2, %v2515_v19 }
 0x216   : > { %v1439_v16 = vpop.permute.xlu0 %1438  ;;  %v2517_v36 = vpop.f32.mrf.mxu0  ;;  %v3060_v20 = vpack.c.bf16 %v3007_v9, %v3006_v43 }
 0x217   : > { %v2096_v3 = vsel %vm2040_vm11, %v2031_v10, %v1439_v16  ;;  %v2692_v58 = vsub.f32 0.0, %v6929_v30 }
 0x218   : > { %v2188_v41 = vsel %vm2105_vm12, %v2096_v3, %v1640_v25  ;;  %v2518_v38 = vpop.f32.mrf.mxu0  ;;  %3370 = vmatmul.mubr.bf16.gmra.mxu1 %v3060_v20  ;;  %v976_v56 = vpop.permute.xlu1 %975 }
 0x219   : > { %2626 = vmatmul.mubr.bf16.gmra.mxu0 %v2188_v41  ;;  %v2782_v62 = vmul.f32 1.442695, %v2692_v58  ;;  %v6936_v40 = vadd.f32 %v6777_v2, %v2518_v38  ;;  %4061 = vmatprep.mubr.msk.bf16.mxu1 %vm1715_vm5, %v5461_v24 }
 0x21a   : > { %v846_v57 = vpop.permute.xlu0 %845  ;;  %4036 = vmatprep.mubr.msk.bf16.mxu0 %vm1715_vm5, %v1708_v23  ;;  %v2520_v6 = vpop.f32.mrf.mxu0 }
 0x21b   : > { %v1773_v45 = vsel %vm1715_vm5, %v6852_v1, %v846_v57  ;;  %v4603_v44 = vpop.eup %4602  ;;  %4610 = vpow2.f32 %v2782_v62  ;;  %v2693_v37 = vsub.f32 0.0, %v6936_v40 }
 0x21c   : > { %v2882_v31 = vadd.f32 1.0, %v4603_v44  ;;  %v1245_v4 = vpop.permute.xlu1 %1244  ;;  %v1838_v0 = vsel %vm1780_vm7, %v1773_v45, %v976_v56  ;;  %v4605_v47 = vpop.eup %4604 }
 0x21d   : > { %v2784_v54 = vmul.f32 1.442695, %v2693_v37  ;;  %v3008_v59 = vmul.f32 %v4605_v47, %v6883_v32 }
 0x21e   : > { %v1042_v15 = vpop.permute.xlu0 %1041 }
 0x21f   : > { %v1903_v8 = vsel %vm1845_vm8, %v1838_v0, %v1042_v15  ;;  %v4607_v24 = vpop.eup %4606  ;;  %4612 = vpow2.f32 %v2784_v54 }
 0x220   : > { %v4609_v42 = vpop.eup %4608  ;;  %4614 = vrcp.f32 %v2882_v31  ;;  %v2883_v11 = vadd.f32 1.0, %v4607_v24  ;;  %v1441_v1 = vpop.permute.xlu1 %1440  ;;  %v1968_v50 = vsel %vm1910_vm9, %v1903_v8, %v1245_v4 }
 0x221   : > { %v3009_v26 = vmul.f32 %v4609_v42, %v6890_v12  ;;  %v1710_v12 = vsel %vm1649_vm6, %v1707_v52, %v1709_v18 }
 0x222   : > { %v1375_v5 = vpop.permute.xlu0 %1374  ;;  %4616 = vrcp.f32 %v2883_v11 }
 0x223   : > { %v2033_v49 = vsel %vm1975_vm10, %v1968_v50, %v1375_v5  ;;  %v2523_v51 = vpop.f32.mrf.mxu0  ;;  %v3061_v43 = vpack.c.bf16 %v3009_v26, %v3008_v59 }
 0x224   : > { %v6952_v9 = vadd.f32 %v6777_v2, %v2523_v51  ;;  %v848_v19 = vpop.permute.xlu1 %847  ;;  %v2098_v25 = vsel %vm2040_vm11, %v2033_v49, %v1441_v1 }
 0x225   : > { %v2525_v10 = vpop.f32.mrf.mxu0  ;;  %3378 = vmatmul.mubr.bf16.gmra.mxu1 %v3061_v43  ;;  %v1775_v52 = vsel %vm1715_vm5, %v6876_v17, %v848_v19  ;;  %v1711_v17 = vrot.slane %v6648_v14, 3 }
 0x226   : > { %v1642_v32 = vpop.permute.xlu0 %1641  ;;  %v2694_v16 = vsub.f32 0.0, %v6952_v9  ;;  %4062 = vmatprep.mubr.msk.bf16.mxu1 %vm1715_vm5, %v5506_v61 }
 0x227   : > { %v2191_v39 = vsel %vm2105_vm12, %v2098_v25, %v1642_v32  ;;  %v2526_v3 = vpop.f32.mrf.mxu0  ;;  %v1712_v14 = vsel %vm1649_vm6, %v1709_v18, %v1711_v17  ;;  %v4786_v25 = vld [vmem:[%s4962_s18 + $0xf0] sm:$0xff]  }
 0x228   : > { %2634 = vmatmul.mubr.bf16.gmra.mxu0 %v2191_v39  ;;  %v4611_v36 = vpop.eup %4610  ;;  %v2786_v20 = vmul.f32 1.442695, %v2694_v16  ;;  %v6961_v23 = vadd.f32 %v6777_v2, %v2526_v3  ;;  %v1044_v58 = vpop.permute.xlu1 %1043 }
 0x229   : > { %4037 = vmatprep.mubr.msk.bf16.mxu0 %vm1715_vm5, %v1710_v12  ;;  %v2884_v41 = vadd.f32 1.0, %v4611_v36  ;;  %v2528_v38 = vpop.f32.mrf.mxu0 }
 0x22a   : > { %v978_v56 = vpop.permute.xlu0 %977  ;;  %4618 = vpow2.f32 %v2786_v20  ;;  %v2695_v62 = vsub.f32 0.0, %v6961_v23 }
 0x22b   : > { %v1840_v61 = vsel %vm1780_vm7, %v1775_v52, %v978_v56  ;;  %4620 = vrcp.f32 %v2884_v41 }
 0x22c   : > { %v4613_v57 = vpop.eup %4612  ;;  %v2788_v45 = vmul.f32 1.442695, %v2695_v62  ;;  %v1377_v6 = vpop.permute.xlu1 %1376  ;;  %v1905_v31 = vsel %vm1845_vm8, %v1840_v61, %v1044_v58 }
 0x22d   : > { %v4615_v44 = vpop.eup %4614  ;;  %v2885_v37 = vadd.f32 1.0, %v4613_v57 }
 0x22e   : > { %v1247_v4 = vpop.permute.xlu0 %1246  ;;  %4622 = vpow2.f32 %v2788_v45  ;;  %v3010_v15 = vmul.f32 %v4615_v44, %v6906_v46 }
 0x22f   : > { %v1970_v54 = vsel %vm1910_vm9, %v1905_v31, %v1247_v4  ;;  %v4617_v0 = vpop.eup %4616  ;;  %4624 = vrcp.f32 %v2885_v37 }
 0x230   : > { %v3011_v47 = vmul.f32 %v4617_v0, %v6915_v21  ;;  %v2531_v8 = vpop.f32.mrf.mxu0  ;;  %v1644_v24 = vpop.permute.xlu1 %1643  ;;  %v2035_v42 = vsel %vm1975_vm10, %v1970_v54, %v1377_v6  ;;  %v1713_v6 = vrot.slane %v6742_v34, 3 }
 0x231   : > { %v6975_v11 = vadd.f32 %v6777_v2, %v2531_v8 }
 0x232   : > { %v1443_v1 = vpop.permute.xlu0 %1442  ;;  %v2533_v26 = vpop.f32.mrf.mxu0  ;;  %v3062_v50 = vpack.c.bf16 %v3011_v47, %v3010_v15  ;;  %v1714_v15 = vsel %vm1649_vm6, %v1711_v17, %v1713_v6 }
 0x233   : > { %v2100_v59 = vsel %vm2040_vm11, %v2035_v42, %v1443_v1  ;;  %v2696_v5 = vsub.f32 0.0, %v6975_v11 }
 0x234   : > { %v2194_v46 = vsel %vm2105_vm12, %v2100_v59, %v1644_v24  ;;  %v2534_v21 = vpop.f32.mrf.mxu0  ;;  %3386 = vmatmul.mubr.bf16.gmra.mxu1 %v3062_v50  ;;  %v980_v49 = vpop.permute.xlu1 %979  ;;  %v4787_v50 = vld [vmem:[%s4962_s18 + $0xf8] sm:$0xff]   ;;  %s264_s18 = sand.u32 1, %s4842_s22  }
 0x235   : > { %2642 = vmatmul.mubr.bf16.gmra.mxu0 %v2194_v46  ;;  %v2790_v51 = vmul.f32 1.442695, %v2696_v5  ;;  %v6982_v43 = vadd.f32 %v6777_v2, %v2534_v21  ;;  %4063 = vmatprep.mubr.msk.bf16.mxu1 %vm1715_vm5, %v5563_v27  ;;  %s3958_s11 = sshll.u32 %s264_s18, 8  ;;  %s7332_s25 = scalar_lea.sflag [#allocation3], %s264_s18 }
 0x236   : > { %v850_v19 = vpop.permute.xlu0 %849  ;;  %4038 = vmatprep.mubr.msk.bf16.mxu0 %vm1715_vm5, %v1712_v14  ;;  %v2536_v10 = vpop.f32.mrf.mxu0  ;;  %s7043_s12 = scalar_lea.vmem [#allocation2], %s3958_s11  ;;  %s4794_s11 = sshll.u32 %s4860_s10, 4  ;;  %s4795_s11 = int_to_ptr.vmem [resolvable:$false] %s4794_s11 }
 0x237   : > { %v1777_v18 = vsel %vm1715_vm5, %v4786_v25, %v850_v19  ;;  %v4619_v32 = vpop.eup %4618  ;;  %4626 = vpow2.f32 %v2790_v51  ;;  %v2697_v12 = vsub.f32 0.0, %v6982_v43  ;;  %s3880_s15 = sshll.u32 %s7043_s12, 4  ;;  %s4796_s19 = scalar_lea.vmem %s4795_s11, 8192  ;;  %s7327_s15 = int_to_ptr.vmem [resolvable:$true] %s3880_s15 }
 0x238   : > { %v2886_v16 = vadd.f32 1.0, %v4619_v32  ;;  %v1249_v39 = vpop.permute.xlu1 %1248  ;;  %v1842_v36 = vsel %vm1780_vm7, %v1777_v18, %v980_v49  ;;  %v4621_v58 = vpop.eup %4620  ;;  %s4790_s29 = scalar_lea.vmem %s7327_s15, 4096  ;;  %p4797_p1 = scmp.lt.s32.totalorder %s7327_s15, %s4795_s11 }
 0x239   : > { %v2792_v3 = vmul.f32 1.442695, %v2697_v12  ;;  %v3012_v62 = vmul.f32 %v4621_v58, %v6929_v30  ;;  %p4791_p12 = scmp.ne.s32.totalorder %s7327_s15, %s4790_s29  ;;  %p4798_p2 = scmp.lt.s32.totalorder %s4796_s19, %s4790_s29 }
 0x23a   : > { %v1046_v20 = vpop.permute.xlu0 %1045 }
 0x23b   : > { %v1907_v41 = vsel %vm1845_vm8, %v1842_v36, %v1046_v20  ;;  %v4623_v27 = vpop.eup %4622  ;;  %4628 = vpow2.f32 %v2792_v3  ;;  %p4792_p13 = pnand %p4791_p12, %p4935_p5  ;;  %p4799_p3 = por %p4798_p2, %p4797_p1 }
 0x23c   : > { %v4625_v52 = vpop.eup %4624  ;;  %4630 = vrcp.f32 %v2886_v16  ;;  %v2887_v38 = vadd.f32 1.0, %v4623_v27  ;;  %v1445_v56 = vpop.permute.xlu1 %1444  ;;  %v1972_v57 = vsel %vm1910_vm9, %v1907_v41, %v1249_v39 }
 0x23d   : > { %v3013_v61 = vmul.f32 %v4625_v52, %v6936_v40  ;;  %p4793_p0 = pneg %p4792_p13 }
 0x23e   : > { %v1379_v45 = vpop.permute.xlu0 %1378  ;;  %4632 = vrcp.f32 %v2887_v38 }
 0x23f   : > { %v2037_v44 = vsel %vm1975_vm10, %v1972_v57, %v1379_v45  ;;  %v3063_v31 = vpack.c.bf16 %v3013_v61, %v3012_v62  ;;  %p4800_p4 = pnand %p4799_p3, %p4793_p0 }
 0x240   : > { %v2539_v37 = vpop.f32.mrf.mxu0  ;;  %v852_v54 = vpop.permute.xlu1 %851  ;;  %v2102_v0 = vsel %vm2040_vm11, %v2037_v44, %v1445_v56 }
 0x241   : > { %v6998_v4 = vadd.f32 %v6777_v2, %v2539_v37  ;;  %3394 = vmatmul.mubr.bf16.gmra.mxu1 %v3063_v31  ;;  %v1779_v17 = vsel %vm1715_vm5, %v4787_v50, %v852_v54  ;;  %v7035_v31 = vld [vmem:[%s7379_s5] ss:$0 sm:$0xff] }
 0x242   : > { %v2541_v30 = vpop.f32.mrf.mxu0  ;;  %v1646_v40 = vpop.permute.xlu0 %1645  ;;  %4064 = vmatprep.mubr.msk.bf16.mxu1 %vm1715_vm5, %v5610_v7 }
 0x243   : > { %v2698_v47 = vsub.f32 0.0, %v6998_v4  ;;  %v2197_v34 = vsel %vm2105_vm12, %v2102_v0, %v1646_v40 }
 0x244   : > { %v2542_v8 = vpop.f32.mrf.mxu0  ;;  %2650 = vmatmul.mubr.bf16.gmra.mxu0 %v2197_v34  ;;  %v4627_v24 = vpop.eup %4626 }
 0x245   : > { %v2794_v42 = vmul.f32 1.442695, %v2698_v47  ;;  %v7007_v1 = vadd.f32 %v6777_v2, %v2542_v8  ;;  %v1048_v59 = vpop.permute.xlu1 %1047  ;;  %4039 = vmatprep.mubr.msk.bf16.mxu0 %vm1715_vm5, %v1714_v15  ;;  %v2888_v26 = vadd.f32 1.0, %v4627_v24 }
 0x246   : > { %v2544_v14 = vpop.f32.mrf.mxu0  ;;  %v982_v5 = vpop.permute.xlu0 %981 }
 0x247   : > { %4634 = vpow2.f32 %v2794_v42  ;;  %v2699_v46 = vsub.f32 0.0, %v7007_v1  ;;  %v1844_v7 = vsel %vm1780_vm7, %v1779_v17, %v982_v5 }
 0x248   : > { %v4629_v21 = vpop.eup %4628  ;;  %4636 = vrcp.f32 %v2888_v26  ;;  %v1909_v18 = vsel %vm1845_vm8, %v1844_v7, %v1048_v59 }
 0x249   : > { %v2796_v49 = vmul.f32 1.442695, %v2699_v46  ;;  %v1381_v51 = vpop.permute.xlu1 %1380  ;;  %v4631_v19 = vpop.eup %4630  ;;  %v2889_v25 = vadd.f32 1.0, %v4629_v21 }
 0x24a   : > { %v1251_v10 = vpop.permute.xlu0 %1250  ;;  %v3014_v16 = vmul.f32 %v4631_v19, %v6952_v9 }
 0x24b   : > { %4638 = vpow2.f32 %v2796_v49  ;;  %v1974_v32 = vsel %vm1910_vm9, %v1909_v18, %v1251_v10  ;;  %v4633_v12 = vpop.eup %4632 }
 0x24c   : > { %4640 = vrcp.f32 %v2889_v25  ;;  %v3015_v39 = vmul.f32 %v4633_v12, %v6961_v23  ;;  %v2039_v20 = vsel %vm1975_vm10, %v1974_v32, %v1381_v51 }
 0x24d   : > { %v2547_v3 = vpop.f32.mrf.mxu0  ;;  %v1648_v36 = vpop.permute.xlu1 %1647 }
 0x24e   : > { %v7020_v58 = vadd.f32 %v6777_v2, %v2547_v3  ;;  %v1447_v41 = vpop.permute.xlu0 %1446  ;;  %v3064_v38 = vpack.c.bf16 %v3015_v39, %v3014_v16 }
 0x24f   : > { %v2104_v27 = vsel %vm2040_vm11, %v2039_v20, %v1447_v41  ;;  %v2549_v52 = vpop.f32.mrf.mxu0 }
 0x250   : > { %v2700_v56 = vsub.f32 0.0, %v7020_v58  ;;  %v2200_v62 = vsel %vm2105_vm12, %v2104_v27, %v1648_v36  ;;  %3402 = vmatmul.mubr.bf16.gmra.mxu1 %v3064_v38 }
 0x251   : > { %v2550_v9 = vpop.f32.mrf.mxu0  ;;  %2658 = vmatmul.mubr.bf16.gmra.mxu0 %v2200_v62  ;;  %4065 = vmatprep.mubr.msk.bf16.mxu1 %vm1715_vm5, %v5678_v28 }
 0x252   : > { %v2798_v23 = vmul.f32 1.442695, %v2700_v56  ;;  %v7026_v61 = vadd.f32 %v6777_v2, %v2550_v9  ;;  %v3291_v45 = vpop.f32.mrf.mxu1 }
 0x253   : > { %v2552_v57 = vpop.f32.mrf.mxu0  ;;  %v3292_v15 = vadd.f32 %v7035_v31, %v3291_v45 }
 0x254   : > { %v4635_v6 = vpop.eup %4634  ;;  %4642 = vpow2.f32 %v2798_v23  ;;  %v2701_v44 = vsub.f32 0.0, %v7026_v61  ;;  %v3293_v54 = vpop.f32.mrf.mxu1 }
 0x255   : > { %v2890_v37 = vadd.f32 1.0, %v4635_v6  ;;  %v4637_v30 = vpop.eup %4636 }
 0x256   : > { %v2800_v0 = vmul.f32 1.442695, %v2701_v44  ;;  %v3294_v40 = vpop.f32.mrf.mxu1  ;;  %v3016_v42 = vmul.f32 %v4637_v30, %v6975_v11 }
 0x257   : > { %v3295_v47 = vadd.f32 %v7035_v31, %v3294_v40 }
 0x258   : > { %v4639_v28 = vpop.eup %4638  ;;  %4644 = vpow2.f32 %v2800_v0  ;;  %v3296_v24 = vpop.f32.mrf.mxu1 }
 0x259   : > { %v4641_v34 = vpop.eup %4640  ;;  %4646 = vrcp.f32 %v2890_v37  ;;  %v2891_v8 = vadd.f32 1.0, %v4639_v28  ;;  %v4221_v26 = vpack.c.bf16 %v3295_v47, %v3292_v15 }
 0x25a   : > { %v3017_v59 = vmul.f32 %v4641_v34, %v6982_v43  ;;  %v3299_v50 = vpop.f32.mrf.mxu1 }
 0x25b   : > { %4648 = vrcp.f32 %v2891_v8  ;;  %4222 = vst [vmem:[%s7043_s12] sm:$0xff] %v4221_v26   ;;  %v3300_v43 = vadd.f32 %v7035_v31, %v3299_v50 }
 0x25c   : > { %v2555_v17 = vpop.f32.mrf.mxu0  ;;  %v3065_v14 = vpack.c.bf16 %v3017_v59, %v3016_v42  ;;  %v3301_v46 = vpop.f32.mrf.mxu1 }
 0x25d   : > { %v7047_v5 = vadd.f32 %v6777_v2, %v2555_v17 }
 0x25e   : > { %v2557_v7 = vpop.f32.mrf.mxu0  ;;  %3410 = vmatmul.mubr.bf16.gmra.mxu1 %v3065_v14  ;;  %v3302_v21 = vpop.f32.mrf.mxu1 }
 0x25f   : > { %v2702_v11 = vsub.f32 0.0, %v7047_v5  ;;  %4066 = vmatprep.mubr.msk.bf16.mxu1 %vm1715_vm5, %v5739_v35  ;;  %v3303_v49 = vadd.f32 %v7035_v31, %v3302_v21 }
 0x260   : > { %v2558_v51 = vpop.f32.mrf.mxu0  ;;  %v3304_v10 = vpop.f32.mrf.mxu1 }
 0x261   : > { %v4643_v19 = vpop.eup %4642  ;;  %v2802_v25 = vmul.f32 1.442695, %v2702_v11  ;;  %v7055_v18 = vadd.f32 %v6777_v2, %v2558_v51  ;;  %v4226_v12 = vpack.c.bf16 %v3303_v49, %v3300_v43 }
 0x262   : > { %v2892_v32 = vadd.f32 1.0, %v4643_v19  ;;  %v2560_v16 = vpop.f32.mrf.mxu0 }
 0x263   : > { %4650 = vpow2.f32 %v2802_v25  ;;  %v2703_v39 = vsub.f32 0.0, %v7055_v18  ;;  %4378 = vst [vmem:[%s7043_s12 + $0x8] sm:$0xff] %v4226_v12  }
 0x264   : > { %4652 = vrcp.f32 %v2892_v32 }
 0x265   : > { %v4645_v3 = vpop.eup %4644  ;;  %v2804_v35 = vmul.f32 1.442695, %v2703_v39 }
 0x266   : > { %v4647_v36 = vpop.eup %4646  ;;  %v2893_v20 = vadd.f32 1.0, %v4645_v3 }
 0x267   : > { %4654 = vpow2.f32 %v2804_v35  ;;  %v3018_v27 = vmul.f32 %v4647_v36, %v6998_v4 }
 0x268   : > { %v4649_v41 = vpop.eup %4648  ;;  %4656 = vrcp.f32 %v2893_v20  ;;  %v3307_v56 = vpop.f32.mrf.mxu1 }
 0x269   : > { %v3019_v52 = vmul.f32 %v4649_v41, %v7007_v1  ;;  %v2563_v38 = vpop.f32.mrf.mxu0  ;;  %v3308_v54 = vadd.f32 %v7035_v31, %v3307_v56 }
 0x26a   : > { %v7062_v62 = vadd.f32 %v6777_v2, %v2563_v38  ;;  %v3309_v23 = vpop.f32.mrf.mxu1 }
 0x26b   : > { %v2565_v9 = vpop.f32.mrf.mxu0  ;;  %v3066_v57 = vpack.c.bf16 %v3019_v52, %v3018_v27 }
 0x26c   : > { %v2704_v45 = vsub.f32 0.0, %v7062_v62  ;;  %v3310_v44 = vpop.f32.mrf.mxu1 }
 0x26d   : > { %v2566_v6 = vpop.f32.mrf.mxu0  ;;  %3418 = vmatmul.mubr.bf16.gmra.mxu1 %v3066_v57  ;;  %v3311_v1 = vadd.f32 %v7035_v31, %v3310_v44 }
 0x26e   : > { %v2806_v37 = vmul.f32 1.442695, %v2704_v45  ;;  %v7067_v4 = vadd.f32 %v6777_v2, %v2566_v6  ;;  %4067 = vmatprep.mubr.msk.bf16.mxu1 %vm1715_vm5, %v5814_v22  ;;  %v3312_v30 = vpop.f32.mrf.mxu1 }
 0x26f   : > { %v2568_v0 = vpop.f32.mrf.mxu0  ;;  %v4231_v15 = vpack.c.bf16 %v3311_v1, %v3308_v54 }
 0x270   : > { %v4651_v40 = vpop.eup %4650  ;;  %4658 = vpow2.f32 %v2806_v37  ;;  %v2705_v28 = vsub.f32 0.0, %v7067_v4 }
 0x271   : > { %v2894_v47 = vadd.f32 1.0, %v4651_v40  ;;  %4379 = vst [vmem:[%s7043_s12 + $0x10] sm:$0xff] %v4231_v15   ;;  %v4653_v8 = vpop.eup %4652 }
 0x272   : > { %v2808_v34 = vmul.f32 1.442695, %v2705_v28  ;;  %v3020_v26 = vmul.f32 %v4653_v8, %v7020_v58 }
 0x274   : > { %v4655_v24 = vpop.eup %4654  ;;  %4660 = vpow2.f32 %v2808_v34 }
 0x275   : > { %v4657_v42 = vpop.eup %4656  ;;  %4662 = vrcp.f32 %v2894_v47  ;;  %v2895_v59 = vadd.f32 1.0, %v4655_v24  ;;  %v3315_v50 = vpop.f32.mrf.mxu1 }
 0x276   : > { %v3021_v22 = vmul.f32 %v4657_v42, %v7026_v61  ;;  %v3316_v43 = vadd.f32 %v7035_v31, %v3315_v50 }
 0x277   : > { %4664 = vrcp.f32 %v2895_v59  ;;  %v3317_v14 = vpop.f32.mrf.mxu1 }
 0x278   : > { %v2571_v17 = vpop.f32.mrf.mxu0  ;;  %v3067_v46 = vpack.c.bf16 %v3021_v22, %v3020_v26 }
 0x279   : > { %v7077_v7 = vadd.f32 %v6777_v2, %v2571_v17  ;;  %v3318_v21 = vpop.f32.mrf.mxu1  ;;  %v7087_v2 = vld [vmem:[%s7377_s3] ss:$0 sm:$0xff] }
 0x27a   : > { %v2573_v11 = vpop.f32.mrf.mxu0  ;;  %3426 = vmatmul.mubr.bf16.gmra.mxu1 %v3067_v46  ;;  %v3319_v58 = vadd.f32 %v7035_v31, %v3318_v21 }
 0x27b   : > { %v2706_v49 = vsub.f32 0.0, %v7077_v7  ;;  %4068 = vmatprep.mubr.msk.bf16.mxu1 %vm1715_vm5, %v5859_v55  ;;  %v3320_v51 = vpop.f32.mrf.mxu1 }
 0x27c   : > { %v2574_v61 = vpop.f32.mrf.mxu0  ;;  %v4236_v10 = vpack.c.bf16 %v3319_v58, %v3316_v43 }
 0x27d   : > { %v4659_v19 = vpop.eup %4658  ;;  %v2810_v25 = vmul.f32 1.442695, %v2706_v49  ;;  %v7090_v32 = vadd.f32 %v7087_v2, %v2574_v61  ;;  %v7421_v49 = vld [vmem:[#allocation5_spill] sm:$0xff] }
 0x27e   : > { %v2896_v12 = vadd.f32 1.0, %v4659_v19  ;;  %v2576_v16 = vpop.f32.mrf.mxu0  ;;  %4380 = vst [vmem:[%s7043_s12 + $0x18] sm:$0xff] %v4236_v10  }
 0x27f   : > { %4666 = vpow2.f32 %v2810_v25  ;;  %v2707_v39 = vsub.f32 0.0, %v7090_v32 }
 0x280   : > { %4668 = vrcp.f32 %v2896_v12 }
 0x281   : > { %v4661_v55 = vpop.eup %4660  ;;  %v2812_v3 = vmul.f32 1.442695, %v2707_v39 }
 0x282   : > { %v4663_v35 = vpop.eup %4662  ;;  %v2897_v36 = vadd.f32 1.0, %v4661_v55 }
 0x283   : > { %4670 = vpow2.f32 %v2812_v3  ;;  %v3022_v41 = vmul.f32 %v4663_v35, %v7047_v5 }
 0x284   : > { %v4665_v20 = vpop.eup %4664  ;;  %4672 = vrcp.f32 %v2897_v36  ;;  %v3323_v38 = vpop.f32.mrf.mxu1 }
 0x285   : > { %v3023_v27 = vmul.f32 %v4665_v20, %v7055_v18  ;;  %v2579_v52 = vpop.f32.mrf.mxu0  ;;  %v3324_v54 = vadd.f32 %v7035_v31, %v3323_v38 }
 0x286   : > { %v7097_v56 = vadd.f32 %v7087_v2, %v2579_v52  ;;  %v3325_v23 = vpop.f32.mrf.mxu1 }
 0x287   : > { %v2581_v9 = vpop.f32.mrf.mxu0  ;;  %v3068_v57 = vpack.c.bf16 %v3023_v27, %v3022_v41 }
 0x288   : > { %v2708_v45 = vsub.f32 0.0, %v7097_v56  ;;  %v3326_v44 = vpop.f32.mrf.mxu1 }
 0x289   : > { %v2582_v6 = vpop.f32.mrf.mxu0  ;;  %3434 = vmatmul.mubr.bf16.gmra.mxu1 %v3068_v57  ;;  %v3327_v18 = vadd.f32 %v7035_v31, %v3326_v44 }
 0x28a   : > { %v2814_v37 = vmul.f32 1.442695, %v2708_v45  ;;  %v7102_v5 = vadd.f32 %v7087_v2, %v2582_v6  ;;  %4069 = vmatprep.mubr.msk.bf16.mxu1 %vm1715_vm5, %v5916_v48  ;;  %v3328_v0 = vpop.f32.mrf.mxu1 }
 0x28b   : > { %v2584_v1 = vpop.f32.mrf.mxu0  ;;  %v4241_v28 = vpack.c.bf16 %v3327_v18, %v3324_v54  ;;  %v7422_v18 = vld [vmem:[#allocation6_spill] sm:$0xff] }
 0x28c   : > { %v4667_v30 = vpop.eup %4666  ;;  %4674 = vpow2.f32 %v2814_v37  ;;  %v2709_v40 = vsub.f32 0.0, %v7102_v5 }
 0x28d   : > { %v2898_v15 = vadd.f32 1.0, %v4667_v30  ;;  %4381 = vst [vmem:[%s7043_s12 + $0x20] sm:$0xff] %v4241_v28   ;;  %v4669_v34 = vpop.eup %4668 }
 0x28e   : > { %v2816_v47 = vmul.f32 1.442695, %v2709_v40  ;;  %v3024_v59 = vmul.f32 %v4669_v34, %v7062_v62 }
 0x290   : > { %v4671_v8 = vpop.eup %4670  ;;  %4676 = vpow2.f32 %v2816_v47 }
 0x291   : > { %v4673_v24 = vpop.eup %4672  ;;  %4678 = vrcp.f32 %v2898_v15  ;;  %v2899_v42 = vadd.f32 1.0, %v4671_v8  ;;  %v3331_v26 = vpop.f32.mrf.mxu1 }
 0x292   : > { %v3025_v48 = vmul.f32 %v4673_v24, %v7067_v4  ;;  %v3332_v21 = vadd.f32 %v7035_v31, %v3331_v26 }
 0x293   : > { %4680 = vrcp.f32 %v2899_v42  ;;  %v3333_v50 = vpop.f32.mrf.mxu1 }
 0x294   : > { %v2587_v22 = vpop.f32.mrf.mxu0  ;;  %v3069_v17 = vpack.c.bf16 %v3025_v48, %v3024_v59 }
 0x295   : > { %v7112_v14 = vadd.f32 %v7087_v2, %v2587_v22  ;;  %v3334_v11 = vpop.f32.mrf.mxu1 }
 0x296   : > { %v2589_v46 = vpop.f32.mrf.mxu0  ;;  %3442 = vmatmul.mubr.bf16.gmra.mxu1 %v3069_v17  ;;  %v3335_v62 = vadd.f32 %v7035_v31, %v3334_v11 }
 0x297   : > { %v2710_v43 = vsub.f32 0.0, %v7112_v14  ;;  %4070 = vmatprep.mubr.msk.bf16.mxu1 %vm1715_vm5, %v7421_v49  ;;  %v3336_v58 = vpop.f32.mrf.mxu1  ;;  %v7423_v49 = vld [vmem:[#allocation7_spill] sm:$0xff] }
 0x298   : > { %v2590_v4 = vpop.f32.mrf.mxu0  ;;  %v4246_v19 = vpack.c.bf16 %v3335_v62, %v3332_v21 }
 0x299   : > { %v4675_v61 = vpop.eup %4674  ;;  %v2818_v51 = vmul.f32 1.442695, %v2710_v43  ;;  %v7120_v25 = vadd.f32 %v7087_v2, %v2590_v4 }
 0x29a   : > { %v2900_v10 = vadd.f32 1.0, %v4675_v61  ;;  %v2592_v12 = vpop.f32.mrf.mxu0  ;;  %4382 = vst [vmem:[%s7043_s12 + $0x28] sm:$0xff] %v4246_v19  }
 0x29b   : > { %4682 = vpow2.f32 %v2818_v51  ;;  %v2711_v16 = vsub.f32 0.0, %v7120_v25 }
 0x29c   : > { %4684 = vrcp.f32 %v2900_v10 }
 0x29d   : > { %v4677_v39 = vpop.eup %4676  ;;  %v2820_v55 = vmul.f32 1.442695, %v2711_v16 }
 0x29e   : > { %v4679_v3 = vpop.eup %4678  ;;  %v2901_v35 = vadd.f32 1.0, %v4677_v39 }
 0x29f   : > { %4686 = vpow2.f32 %v2820_v55  ;;  %v3026_v20 = vmul.f32 %v4679_v3, %v7077_v7 }
 0x2a0   : > { %v4681_v36 = vpop.eup %4680  ;;  %4688 = vrcp.f32 %v2901_v35  ;;  %v3339_v52 = vpop.f32.mrf.mxu1 }
 0x2a1   : > { %v3027_v41 = vmul.f32 %v4681_v36, %v7090_v32  ;;  %v2595_v27 = vpop.f32.mrf.mxu0  ;;  %v3340_v54 = vadd.f32 %v7035_v31, %v3339_v52 }
 0x2a2   : > { %v7127_v38 = vadd.f32 %v7087_v2, %v2595_v27  ;;  %v3341_v23 = vpop.f32.mrf.mxu1 }
 0x2a3   : > { %v2597_v9 = vpop.f32.mrf.mxu0  ;;  %v3070_v57 = vpack.c.bf16 %v3027_v41, %v3026_v20 }
 0x2a4   : > { %v2712_v45 = vsub.f32 0.0, %v7127_v38  ;;  %v3342_v44 = vpop.f32.mrf.mxu1 }
 0x2a5   : > { %v2598_v6 = vpop.f32.mrf.mxu0  ;;  %3450 = vmatmul.mubr.bf16.gmra.mxu1 %v3070_v57  ;;  %v3343_v32 = vadd.f32 %v7035_v31, %v3342_v44 }
 0x2a6   : > { %v2822_v37 = vmul.f32 1.442695, %v2712_v45  ;;  %v7132_v7 = vadd.f32 %v7087_v2, %v2598_v6  ;;  %4071 = vmatprep.mubr.msk.bf16.mxu1 %vm1715_vm5, %v7422_v18  ;;  %v3344_v0 = vpop.f32.mrf.mxu1  ;;  %v7424_v18 = vld [vmem:[#allocation8_spill] sm:$0xff] }
 0x2a7   : > { %v2600_v1 = vpop.f32.mrf.mxu0  ;;  %v4251_v28 = vpack.c.bf16 %v3343_v32, %v3340_v54 }
 0x2a8   : > { %v4683_v30 = vpop.eup %4682  ;;  %4690 = vpow2.f32 %v2822_v37  ;;  %v2713_v40 = vsub.f32 0.0, %v7132_v7 }
 0x2a9   : > { %v2902_v15 = vadd.f32 1.0, %v4683_v30  ;;  %4383 = vst [vmem:[%s7043_s12 + $0x30] sm:$0xff] %v4251_v28   ;;  %v4685_v34 = vpop.eup %4684 }
 0x2aa   : > { %v2824_v47 = vmul.f32 1.442695, %v2713_v40  ;;  %v3028_v59 = vmul.f32 %v4685_v34, %v7097_v56 }
 0x2ac   : > { %v4687_v8 = vpop.eup %4686  ;;  %4692 = vpow2.f32 %v2824_v47 }
 0x2ad   : > { %v4689_v24 = vpop.eup %4688  ;;  %4694 = vrcp.f32 %v2902_v15  ;;  %v2903_v42 = vadd.f32 1.0, %v4687_v8  ;;  %v3347_v26 = vpop.f32.mrf.mxu1 }
 0x2ae   : > { %v3029_v48 = vmul.f32 %v4689_v24, %v7102_v5  ;;  %v3348_v43 = vadd.f32 %v7035_v31, %v3347_v26 }
 0x2af   : > { %4696 = vrcp.f32 %v2903_v42  ;;  %v3349_v50 = vpop.f32.mrf.mxu1 }
 0x2b0   : > { %v2603_v22 = vpop.f32.mrf.mxu0  ;;  %v3071_v17 = vpack.c.bf16 %v3029_v48, %v3028_v59 }
 0x2b1   : > { %v7142_v46 = vadd.f32 %v7087_v2, %v2603_v22  ;;  %v3350_v21 = vpop.f32.mrf.mxu1 }
 0x2b2   : > { %v2605_v11 = vpop.f32.mrf.mxu0  ;;  %3458 = vmatmul.mubr.bf16.gmra.mxu1 %v3071_v17  ;;  %v3351_v56 = vadd.f32 %v7035_v31, %v3350_v21 }
 0x2b3   : > { %v2714_v62 = vsub.f32 0.0, %v7142_v46  ;;  %4072 = vmatprep.mubr.msk.bf16.mxu1 %vm1715_vm5, %v7423_v49  ;;  %v3352_v4 = vpop.f32.mrf.mxu1  ;;  %v7425_v49 = vld [vmem:[#allocation9_spill] sm:$0xff] }
 0x2b4   : > { %v2606_v5 = vpop.f32.mrf.mxu0  ;;  %v4256_v51 = vpack.c.bf16 %v3351_v56, %v3348_v43 }
 0x2b5   : > { %v4691_v58 = vpop.eup %4690  ;;  %v2826_v61 = vmul.f32 1.442695, %v2714_v62  ;;  %v7150_v19 = vadd.f32 %v7087_v2, %v2606_v5 }
 0x2b6   : > { %v2904_v10 = vadd.f32 1.0, %v4691_v58  ;;  %v2608_v12 = vpop.f32.mrf.mxu0  ;;  %4384 = vst [vmem:[%s7043_s12 + $0x38] sm:$0xff] %v4256_v51  }
 0x2b7   : > { %4698 = vpow2.f32 %v2826_v61  ;;  %v2715_v16 = vsub.f32 0.0, %v7150_v19 }
 0x2b8   : > { %4700 = vrcp.f32 %v2904_v10 }
 0x2b9   : > { %v4693_v39 = vpop.eup %4692  ;;  %v2828_v55 = vmul.f32 1.442695, %v2715_v16 }
 0x2ba   : > { %v4695_v3 = vpop.eup %4694  ;;  %v2905_v35 = vadd.f32 1.0, %v4693_v39 }
 0x2bb   : > { %4702 = vpow2.f32 %v2828_v55  ;;  %v3030_v20 = vmul.f32 %v4695_v3, %v7112_v14 }
 0x2bc   : > { %v4697_v36 = vpop.eup %4696  ;;  %4704 = vrcp.f32 %v2905_v35  ;;  %v3355_v52 = vpop.f32.mrf.mxu1 }
 0x2bd   : > { %v3031_v41 = vmul.f32 %v4697_v36, %v7120_v25  ;;  %v2611_v27 = vpop.f32.mrf.mxu0  ;;  %v3356_v32 = vadd.f32 %v7035_v31, %v3355_v52 }
 0x2be   : > { %v7157_v9 = vadd.f32 %v7087_v2, %v2611_v27  ;;  %v3357_v57 = vpop.f32.mrf.mxu1 }
 0x2bf   : > { %v2613_v23 = vpop.f32.mrf.mxu0  ;;  %v3072_v45 = vpack.c.bf16 %v3031_v41, %v3030_v20 }
 0x2c0   : > { %v2716_v6 = vsub.f32 0.0, %v7157_v9  ;;  %v3358_v37 = vpop.f32.mrf.mxu1 }
 0x2c1   : > { %v2614_v44 = vpop.f32.mrf.mxu0  ;;  %3466 = vmatmul.mubr.bf16.gmra.mxu1 %v3072_v45  ;;  %v3359_v25 = vadd.f32 %v7035_v31, %v3358_v37 }
 0x2c2   : > { %v2830_v54 = vmul.f32 1.442695, %v2716_v6  ;;  %v7162_v14 = vadd.f32 %v7087_v2, %v2614_v44  ;;  %4073 = vmatprep.mubr.msk.bf16.mxu1 %vm1715_vm5, %v7424_v18  ;;  %v3360_v0 = vpop.f32.mrf.mxu1  ;;  %v7426_v18 = vld [vmem:[#allocation10_spill] sm:$0xff] }
 0x2c3   : > { %v2616_v1 = vpop.f32.mrf.mxu0  ;;  %v4261_v28 = vpack.c.bf16 %v3359_v25, %v3356_v32 }
 0x2c4   : > { %v4699_v30 = vpop.eup %4698  ;;  %4706 = vpow2.f32 %v2830_v54  ;;  %v2717_v40 = vsub.f32 0.0, %v7162_v14 }
 0x2c5   : > { %v2906_v15 = vadd.f32 1.0, %v4699_v30  ;;  %4385 = vst [vmem:[%s7043_s12 + $0x40] sm:$0xff] %v4261_v28   ;;  %v4701_v34 = vpop.eup %4700 }
 0x2c6   : > { %v2832_v47 = vmul.f32 1.442695, %v2717_v40  ;;  %v3032_v59 = vmul.f32 %v4701_v34, %v7127_v38 }
 0x2c8   : > { %v4703_v8 = vpop.eup %4702  ;;  %4708 = vpow2.f32 %v2832_v47 }
 0x2c9   : > { %v4705_v24 = vpop.eup %4704  ;;  %4710 = vrcp.f32 %v2906_v15  ;;  %v2907_v42 = vadd.f32 1.0, %v4703_v8  ;;  %v3363_v26 = vpop.f32.mrf.mxu1 }
 0x2ca   : > { %v3033_v48 = vmul.f32 %v4705_v24, %v7132_v7  ;;  %v3364_v62 = vadd.f32 %v7035_v31, %v3363_v26 }
 0x2cb   : > { %4712 = vrcp.f32 %v2907_v42  ;;  %v3365_v50 = vpop.f32.mrf.mxu1 }
 0x2cc   : > { %v2619_v22 = vpop.f32.mrf.mxu0  ;;  %v3073_v17 = vpack.c.bf16 %v3033_v48, %v3032_v59 }
 0x2cd   : > { %v7172_v11 = vadd.f32 %v7087_v2, %v2619_v22  ;;  %v3366_v43 = vpop.f32.mrf.mxu1 }
 0x2ce   : > { %v2621_v21 = vpop.f32.mrf.mxu0  ;;  %3474 = vmatmul.mubr.bf16.gmra.mxu1 %v3073_v17  ;;  %v3367_v38 = vadd.f32 %v7035_v31, %v3366_v43 }
 0x2cf   : > { %v2718_v56 = vsub.f32 0.0, %v7172_v11  ;;  %4074 = vmatprep.mubr.msk.bf16.mxu1 %vm1715_vm5, %v7425_v49  ;;  %v3368_v5 = vpop.f32.mrf.mxu1 }
 0x2d0   : > { %v2622_v7 = vpop.f32.mrf.mxu0  ;;  %v4266_v61 = vpack.c.bf16 %v3367_v38, %v3364_v62 }
 0x2d1   : > { %v4707_v4 = vpop.eup %4706  ;;  %v2834_v58 = vmul.f32 1.442695, %v2718_v56  ;;  %v7180_v51 = vadd.f32 %v7087_v2, %v2622_v7 }
 0x2d2   : > { %v2908_v10 = vadd.f32 1.0, %v4707_v4  ;;  %v2624_v12 = vpop.f32.mrf.mxu0  ;;  %4386 = vst [vmem:[%s7043_s12 + $0x48] sm:$0xff] %v4266_v61  }
 0x2d3   : > { %4714 = vpow2.f32 %v2834_v58  ;;  %v2719_v16 = vsub.f32 0.0, %v7180_v51 }
 0x2d4   : > { %4716 = vrcp.f32 %v2908_v10 }
 0x2d5   : > { %v4709_v39 = vpop.eup %4708  ;;  %v2836_v55 = vmul.f32 1.442695, %v2719_v16 }
 0x2d6   : > { %v4711_v3 = vpop.eup %4710  ;;  %v2909_v35 = vadd.f32 1.0, %v4709_v39 }
 0x2d7   : > { %4718 = vpow2.f32 %v2836_v55  ;;  %v3034_v20 = vmul.f32 %v4711_v3, %v7142_v46 }
 0x2d8   : > { %v4713_v36 = vpop.eup %4712  ;;  %4720 = vrcp.f32 %v2909_v35  ;;  %v3371_v52 = vpop.f32.mrf.mxu1 }
 0x2d9   : > { %v3035_v41 = vmul.f32 %v4713_v36, %v7150_v19  ;;  %v2627_v27 = vpop.f32.mrf.mxu0  ;;  %v3372_v25 = vadd.f32 %v7035_v31, %v3371_v52 }
 0x2da   : > { %v7187_v23 = vadd.f32 %v7087_v2, %v2627_v27  ;;  %v3373_v45 = vpop.f32.mrf.mxu1 }
 0x2db   : > { %v2629_v57 = vpop.f32.mrf.mxu0  ;;  %v3074_v6 = vpack.c.bf16 %v3035_v41, %v3034_v20 }
 0x2dc   : > { %v2720_v44 = vsub.f32 0.0, %v7187_v23  ;;  %v3374_v54 = vpop.f32.mrf.mxu1 }
 0x2dd   : > { %v2630_v37 = vpop.f32.mrf.mxu0  ;;  %3482 = vmatmul.mubr.bf16.gmra.mxu1 %v3074_v6  ;;  %v3375_v19 = vadd.f32 %v7035_v31, %v3374_v54 }
 0x2de   : > { %v2838_v32 = vmul.f32 1.442695, %v2720_v44  ;;  %v7192_v46 = vadd.f32 %v7087_v2, %v2630_v37  ;;  %4075 = vmatprep.mubr.msk.bf16.mxu1 %vm1715_vm5, %v7426_v18  ;;  %v3376_v0 = vpop.f32.mrf.mxu1 }
 0x2df   : > { %v2632_v1 = vpop.f32.mrf.mxu0  ;;  %v4271_v28 = vpack.c.bf16 %v3375_v19, %v3372_v25 }
 0x2e0   : > { %v4715_v30 = vpop.eup %4714  ;;  %4722 = vpow2.f32 %v2838_v32  ;;  %v2721_v40 = vsub.f32 0.0, %v7192_v46 }
 0x2e1   : > { %v2910_v15 = vadd.f32 1.0, %v4715_v30  ;;  %4387 = vst [vmem:[%s7043_s12 + $0x50] sm:$0xff] %v4271_v28   ;;  %v4717_v34 = vpop.eup %4716 }
 0x2e2   : > { %v2840_v47 = vmul.f32 1.442695, %v2721_v40  ;;  %v3036_v59 = vmul.f32 %v4717_v34, %v7157_v9 }
 0x2e4   : > { %v4719_v8 = vpop.eup %4718  ;;  %4724 = vpow2.f32 %v2840_v47 }
 0x2e5   : > { %v4721_v24 = vpop.eup %4720  ;;  %4726 = vrcp.f32 %v2910_v15  ;;  %v2911_v42 = vadd.f32 1.0, %v4719_v8  ;;  %v3379_v26 = vpop.f32.mrf.mxu1 }
 0x2e6   : > { %v3037_v48 = vmul.f32 %v4721_v24, %v7162_v14  ;;  %v3380_v56 = vadd.f32 %v7035_v31, %v3379_v26 }
 0x2e7   : > { %4728 = vrcp.f32 %v2911_v42  ;;  %v3381_v50 = vpop.f32.mrf.mxu1 }
 0x2e8   : > { %v2635_v22 = vpop.f32.mrf.mxu0  ;;  %v3075_v17 = vpack.c.bf16 %v3037_v48, %v3036_v59 }
 0x2e9   : > { %v7202_v21 = vadd.f32 %v7087_v2, %v2635_v22  ;;  %v3382_v62 = vpop.f32.mrf.mxu1 }
 0x2ea   : > { %v2637_v43 = vpop.f32.mrf.mxu0  ;;  %3490 = vmatmul.mubr.bf16.gmra.mxu1 %v3075_v17  ;;  %v3383_v9 = vadd.f32 %v7035_v31, %v3382_v62 }
 0x2eb   : > { %v2722_v38 = vsub.f32 0.0, %v7202_v21  ;;  %4076 = vmatprep.mubr.msk.bf16.mxu1 %vm1715_vm5, %v6371_v13  ;;  %v3384_v49 = vpop.f32.mrf.mxu1 }
 0x2ec   : > { %v2638_v14 = vpop.f32.mrf.mxu0  ;;  %v4276_v4 = vpack.c.bf16 %v3383_v9, %v3380_v56 }
 0x2ed   : > { %v4723_v7 = vpop.eup %4722  ;;  %v2842_v5 = vmul.f32 1.442695, %v2722_v38  ;;  %v7210_v58 = vadd.f32 %v7087_v2, %v2638_v14 }
 0x2ee   : > { %v2912_v61 = vadd.f32 1.0, %v4723_v7  ;;  %v2640_v10 = vpop.f32.mrf.mxu0  ;;  %4388 = vst [vmem:[%s7043_s12 + $0x58] sm:$0xff] %v4276_v4  }
 0x2ef   : > { %4730 = vpow2.f32 %v2842_v5  ;;  %v2723_v12 = vsub.f32 0.0, %v7210_v58 }
 0x2f0   : > { %4732 = vrcp.f32 %v2912_v61 }
 0x2f1   : > { %v4725_v16 = vpop.eup %4724  ;;  %v2844_v39 = vmul.f32 1.442695, %v2723_v12 }
 0x2f2   : > { %v4727_v55 = vpop.eup %4726  ;;  %v2913_v3 = vadd.f32 1.0, %v4725_v16 }
 0x2f3   : > { %4734 = vpow2.f32 %v2844_v39  ;;  %v3038_v35 = vmul.f32 %v4727_v55, %v7172_v11 }
 0x2f4   : > { %v4729_v13 = vpop.eup %4728  ;;  %4736 = vrcp.f32 %v2913_v3  ;;  %v3387_v41 = vpop.f32.mrf.mxu1 }
 0x2f5   : > { %v3039_v36 = vmul.f32 %v4729_v13, %v7180_v51  ;;  %v2643_v20 = vpop.f32.mrf.mxu0  ;;  %v3388_v32 = vadd.f32 %v7035_v31, %v3387_v41 }
 0x2f6   : > { %v7217_v27 = vadd.f32 %v7087_v2, %v2643_v20  ;;  %v3389_v57 = vpop.f32.mrf.mxu1 }
 0x2f7   : > { %v2645_v52 = vpop.f32.mrf.mxu0  ;;  %v3076_v45 = vpack.c.bf16 %v3039_v36, %v3038_v35 }
 0x2f8   : > { %v2724_v6 = vsub.f32 0.0, %v7217_v27  ;;  %v3390_v37 = vpop.f32.mrf.mxu1 }
 0x2f9   : > { %v2646_v44 = vpop.f32.mrf.mxu0  ;;  %3498 = vmatmul.mubr.bf16.gmra.mxu1 %v3076_v45  ;;  %v3391_v51 = vadd.f32 %v7035_v31, %v3390_v37 }
 0x2fa   : > { %v2846_v54 = vmul.f32 1.442695, %v2724_v6  ;;  %v7222_v11 = vadd.f32 %v7087_v2, %v2646_v44  ;;  %4077 = vmatprep.mubr.msk.bf16.mxu1 %vm1715_vm5, %v6472_v63  ;;  %v3392_v19 = vpop.f32.mrf.mxu1 }
 0x2fb   : > { %v2648_v25 = vpop.f32.mrf.mxu0  ;;  %v4281_v0 = vpack.c.bf16 %v3391_v51, %v3388_v32 }
 0x2fc   : > { %v4731_v18 = vpop.eup %4730  ;;  %4738 = vpow2.f32 %v2846_v54  ;;  %v2725_v1 = vsub.f32 0.0, %v7222_v11 }
 0x2fd   : > { %v2914_v30 = vadd.f32 1.0, %v4731_v18  ;;  %4389 = vst [vmem:[%s7043_s12 + $0x60] sm:$0xff] %v4281_v0   ;;  %v4733_v28 = vpop.eup %4732 }
 0x2fe   : > { %v2848_v40 = vmul.f32 1.442695, %v2725_v1  ;;  %v3040_v8 = vmul.f32 %v4733_v28, %v7187_v23 }
 0x300   : > { %v4735_v15 = vpop.eup %4734  ;;  %4740 = vpow2.f32 %v2848_v40 }
 0x301   : > { %v4737_v47 = vpop.eup %4736  ;;  %4742 = vrcp.f32 %v2914_v30  ;;  %v2915_v34 = vadd.f32 1.0, %v4735_v15  ;;  %v3395_v24 = vpop.f32.mrf.mxu1 }
 0x302   : > { %v3041_v63 = vmul.f32 %v4737_v47, %v7192_v46  ;;  %v3396_v17 = vadd.f32 %v7035_v31, %v3395_v24 }
 0x303   : > { %4744 = vrcp.f32 %v2915_v34  ;;  %v3397_v59 = vpop.f32.mrf.mxu1 }
 0x304   : > { %v2651_v42 = vpop.f32.mrf.mxu0  ;;  %v3077_v48 = vpack.c.bf16 %v3041_v63, %v3040_v8 }
 0x305   : > { %v7232_v26 = vadd.f32 %v7087_v2, %v2651_v42  ;;  %v3398_v50 = vpop.f32.mrf.mxu1 }
 0x306   : > { %v2653_v22 = vpop.f32.mrf.mxu0  ;;  %3506 = vmatmul.mubr.bf16.gmra.mxu1 %v3077_v48  ;;  %v3399_v23 = vadd.f32 %v7035_v31, %v3398_v50 }
 0x307   : > { %v2726_v43 = vsub.f32 0.0, %v7232_v26  ;;  %4078 = vmatprep.mubr.msk.bf16.mxu1 %vm1715_vm5, %v6543_v33  ;;  %v3400_v62 = vpop.f32.mrf.mxu1 }
 0x308   : > { %v2654_v46 = vpop.f32.mrf.mxu0  ;;  %v4286_v9 = vpack.c.bf16 %v3399_v23, %v3396_v17 }
 0x309   : > { %v4739_v56 = vpop.eup %4738  ;;  %v2850_v38 = vmul.f32 1.442695, %v2726_v43  ;;  %v7240_v14 = vadd.f32 %v7087_v2, %v2654_v46 }
 0x30a   : > { %v2916_v49 = vadd.f32 1.0, %v4739_v56  ;;  %v2656_v7 = vpop.f32.mrf.mxu0  ;;  %4390 = vst [vmem:[%s7043_s12 + $0x68] sm:$0xff] %v4286_v9  }
 0x30b   : > { %4746 = vpow2.f32 %v2850_v38  ;;  %v2727_v5 = vsub.f32 0.0, %v7240_v14 }
 0x30c   : > { %4748 = vrcp.f32 %v2916_v49 }
 0x30d   : > { %v4741_v4 = vpop.eup %4740  ;;  %v2852_v61 = vmul.f32 1.442695, %v2727_v5 }
 0x30e   : > { %v4743_v10 = vpop.eup %4742  ;;  %v2917_v12 = vadd.f32 1.0, %v4741_v4 }
 0x30f   : > { %4750 = vpow2.f32 %v2852_v61  ;;  %v3042_v16 = vmul.f32 %v4743_v10, %v7202_v21 }
 0x310   : > { %v4745_v33 = vpop.eup %4744  ;;  %4752 = vrcp.f32 %v2917_v12  ;;  %v3403_v3 = vpop.f32.mrf.mxu1 }
 0x311   : > { %v3043_v39 = vmul.f32 %v4745_v33, %v7210_v58  ;;  %v2659_v55 = vpop.f32.mrf.mxu0  ;;  %v3404_v6 = vadd.f32 %v7035_v31, %v3403_v3 }
 0x312   : > { %v7247_v13 = vadd.f32 %v7087_v2, %v2659_v55  ;;  %v3405_v20 = vpop.f32.mrf.mxu1 }
 0x313   : > { %v3078_v35 = vpack.c.bf16 %v3043_v39, %v3042_v16  ;;  %v2661_v36 = vpop.f32.mrf.mxu0 }
 0x314   : > { %v2728_v41 = vsub.f32 0.0, %v7247_v13  ;;  %v3406_v57 = vpop.f32.mrf.mxu1 }
 0x315   : > { %v2662_v52 = vpop.f32.mrf.mxu0  ;;  %3514 = vmatmul.mubr.bf16.gmra.mxu1 %v3078_v35  ;;  %v3407_v58 = vadd.f32 %v7035_v31, %v3406_v57 }
 0x316   : > { %v2854_v45 = vmul.f32 1.442695, %v2728_v41  ;;  %v2663_v21 = vadd.f32 %v7087_v2, %v2662_v52  ;;  %4079 = vmatprep.mubr.msk.bf16.mxu1 %vm1715_vm5, %v6641_v29  ;;  %v3408_v37 = vpop.f32.mrf.mxu1 }
 0x317   : > { %v2664_v44 = vpop.f32.mrf.mxu0  ;;  %v4291_v51 = vpack.c.bf16 %v3407_v58, %v3404_v6 }
 0x318   : > { %v4747_v54 = vpop.eup %4746  ;;  %4754 = vpow2.f32 %v2854_v45  ;;  %v2729_v32 = vsub.f32 0.0, %v2663_v21 }
 0x319   : > { %v2918_v25 = vadd.f32 1.0, %v4747_v54  ;;  %4391 = vst [vmem:[%s7043_s12 + $0x70] sm:$0xff] %v4291_v51   ;;  %v4749_v18 = vpop.eup %4748 }
 0x31a   : > { %v2856_v19 = vmul.f32 1.442695, %v2729_v32  ;;  %v3044_v30 = vmul.f32 %v4749_v18, %v7217_v27 }
 0x31c   : > { %v4751_v1 = vpop.eup %4750  ;;  %4756 = vpow2.f32 %v2856_v19 }
 0x31d   : > { %v4753_v0 = vpop.eup %4752  ;;  %4758 = vrcp.f32 %v2918_v25  ;;  %v2919_v2 = vadd.f32 1.0, %v4751_v1 }
 0x31e   : > { %v3045_v29 = vmul.f32 %v4753_v0, %v7222_v11  ;;  %v3411_v40 = vpop.f32.mrf.mxu1 }
 0x31f   : > { %4760 = vrcp.f32 %v2919_v2  ;;  %v3412_v34 = vadd.f32 %v7035_v31, %v3411_v40 }
 0x320   : > { %v3079_v28 = vpack.c.bf16 %v3045_v29, %v3044_v30  ;;  %v3413_v15 = vpop.f32.mrf.mxu1 }
 0x322   : > { %v3414_v47 = vpop.f32.mrf.mxu1  ;;  %3522 = vmatmul.mubr.bf16.gmra.mxu1 %v3079_v28 }
 0x323   : > { %v3415_v8 = vadd.f32 %v7035_v31, %v3414_v47  ;;  %4080 = vmatprep.mubr.msk.bf16.mxu1 %vm1715_vm5, %v6707_v53 }
 0x324   : > { %v3416_v63 = vpop.f32.mrf.mxu1 }
 0x325   : > { %v4755_v24 = vpop.eup %4754  ;;  %v4296_v42 = vpack.c.bf16 %v3415_v8, %v3412_v34 }
 0x326   : > { %v2920_v59 = vadd.f32 1.0, %v4755_v24 }
 0x327   : > { %4392 = vst [vmem:[%s7043_s12 + $0x78] sm:$0xff] %v4296_v42  }
 0x328   : > { %4762 = vrcp.f32 %v2920_v59 }
 0x329   : > { %v4757_v27 = vpop.eup %4756 }
 0x32a   : > { %v4759_v11 = vpop.eup %4758  ;;  %v2921_v48 = vadd.f32 1.0, %v4757_v27 }
 0x32b   : > { %v3046_v50 = vmul.f32 %v4759_v11, %v7232_v26 }
 0x32c   : > { %v4761_v22 = vpop.eup %4760  ;;  %4764 = vrcp.f32 %v2921_v48 }
 0x32d   : > { %v3047_v17 = vmul.f32 %v4761_v22, %v7240_v14  ;;  %v3419_v43 = vpop.f32.mrf.mxu1 }
 0x32e   : > { %v3420_v62 = vadd.f32 %v7035_v31, %v3419_v43 }
 0x32f   : > { %v3080_v23 = vpack.c.bf16 %v3047_v17, %v3046_v50  ;;  %v3421_v46 = vpop.f32.mrf.mxu1 }
 0x331   : > { %v3422_v53 = vpop.f32.mrf.mxu1  ;;  %3530 = vmatmul.mubr.bf16.gmra.mxu1 %v3080_v23 }
 0x332   : > { %v3423_v56 = vadd.f32 %v7035_v31, %v3422_v53  ;;  %4081 = vmatprep.mubr.msk.bf16.mxu1 %vm1715_vm5, %v6800_v60  ;;  %v7274_v31 = vld [vmem:[%s7379_s5] ss:$0 sm:$0xff] }
 0x333   : > { %v3424_v38 = vpop.f32.mrf.mxu1 }
 0x334   : > { %v4301_v9 = vpack.c.bf16 %v3423_v56, %v3420_v62 }
 0x335   : > { %v4763_v49 = vpop.eup %4762 }
 0x336   : > { %4393 = vst [vmem:[%s7043_s12 + $0x80] sm:$0xff] %v4301_v9   ;;  %v3048_v14 = vmul.f32 %v4763_v49, %v7247_v13 }
 0x339   : > { %v4765_v26 = vpop.eup %4764 }
 0x33a   : > { %v3049_v7 = vmul.f32 %v4765_v26, %v2663_v21  ;;  %v3427_v5 = vpop.f32.mrf.mxu1 }
 0x33b   : > { %v3428_v60 = vadd.f32 %v7274_v31, %v3427_v5 }
 0x33c   : > { %v3081_v4 = vpack.c.bf16 %v3049_v7, %v3048_v14  ;;  %v3429_v61 = vpop.f32.mrf.mxu1 }
 0x33e   : > { %v3430_v10 = vpop.f32.mrf.mxu1  ;;  %3538 = vmatmul.mubr.bf16.gmra.mxu1 %v3081_v4 }
 0x33f   : > { %v3431_v12 = vadd.f32 %v7274_v31, %v3430_v10 }
 0x340   : > { %v3432_v33 = vpop.f32.mrf.mxu1 }
 0x341   : > { %v4306_v16 = vpack.c.bf16 %v3431_v12, %v3428_v60 }
 0x343   : > { %4394 = vst [vmem:[%s7043_s12 + $0x88] sm:$0xff] %v4306_v16  }
 0x349   : > { %v3435_v39 = vpop.f32.mrf.mxu1 }
 0x34a   : > { %v3436_v13 = vadd.f32 %v7274_v31, %v3435_v39 }
 0x34b   : > { %v3437_v55 = vpop.f32.mrf.mxu1 }
 0x34d   : > { %v3438_v3 = vpop.f32.mrf.mxu1 }
 0x34e   : > { %v3439_v35 = vadd.f32 %v7274_v31, %v3438_v3 }
 0x34f   : > { %v3440_v36 = vpop.f32.mrf.mxu1 }
 0x350   : > { %v4311_v20 = vpack.c.bf16 %v3439_v35, %v3436_v13 }
 0x352   : > { %4395 = vst [vmem:[%s7043_s12 + $0x90] sm:$0xff] %v4311_v20  }
 0x356   : > { %v3443_v41 = vpop.f32.mrf.mxu1 }
 0x357   : > { %v3444_v45 = vadd.f32 %v7274_v31, %v3443_v41 }
 0x358   : > { %v3445_v52 = vpop.f32.mrf.mxu1 }
 0x35a   : > { %v3446_v57 = vpop.f32.mrf.mxu1 }
 0x35b   : > { %v3447_v6 = vadd.f32 %v7274_v31, %v3446_v57 }
 0x35c   : > { %v3448_v21 = vpop.f32.mrf.mxu1 }
 0x35d   : > { %v4316_v58 = vpack.c.bf16 %v3447_v6, %v3444_v45 }
 0x35f   : > { %4396 = vst [vmem:[%s7043_s12 + $0x98] sm:$0xff] %v4316_v58  }
 0x365   : > { %v3451_v44 = vpop.f32.mrf.mxu1 }
 0x366   : > { %v3452_v32 = vadd.f32 %v7274_v31, %v3451_v44 }
 0x367   : > { %v3453_v37 = vpop.f32.mrf.mxu1 }
 0x369   : > { %v3454_v54 = vpop.f32.mrf.mxu1 }
 0x36a   : > { %v3455_v51 = vadd.f32 %v7274_v31, %v3454_v54 }
 0x36b   : > { %v3456_v25 = vpop.f32.mrf.mxu1 }
 0x36c   : > { %v4321_v19 = vpack.c.bf16 %v3455_v51, %v3452_v32 }
 0x36e   : > { %4397 = vst [vmem:[%s7043_s12 + $0xa0] sm:$0xff] %v4321_v19  }
 0x372   : > { %v3459_v18 = vpop.f32.mrf.mxu1 }
 0x373   : > { %v3460_v2 = vadd.f32 %v7274_v31, %v3459_v18 }
 0x374   : > { %v3461_v1 = vpop.f32.mrf.mxu1 }
 0x376   : > { %v3462_v0 = vpop.f32.mrf.mxu1 }
 0x377   : > { %v3463_v30 = vadd.f32 %v7274_v31, %v3462_v0 }
 0x378   : > { %v3464_v29 = vpop.f32.mrf.mxu1 }
 0x379   : > { %v4326_v40 = vpack.c.bf16 %v3463_v30, %v3460_v2 }
 0x37b   : > { %4398 = vst [vmem:[%s7043_s12 + $0xa8] sm:$0xff] %v4326_v40  }
 0x381   : > { %v3467_v28 = vpop.f32.mrf.mxu1 }
 0x382   : > { %v3468_v34 = vadd.f32 %v7274_v31, %v3467_v28 }
 0x383   : > { %v3469_v15 = vpop.f32.mrf.mxu1 }
 0x385   : > { %v3470_v47 = vpop.f32.mrf.mxu1 }
 0x386   : > { %v3471_v8 = vadd.f32 %v7274_v31, %v3470_v47 }
 0x387   : > { %v3472_v63 = vpop.f32.mrf.mxu1 }
 0x388   : > { %v4331_v24 = vpack.c.bf16 %v3471_v8, %v3468_v34 }
 0x38a   : > { %4399 = vst [vmem:[%s7043_s12 + $0xb0] sm:$0xff] %v4331_v24  }
 0x38e   : > { %v3475_v42 = vpop.f32.mrf.mxu1 }
 0x38f   : > { %v3476_v11 = vadd.f32 %v7274_v31, %v3475_v42 }
 0x390   : > { %v3477_v59 = vpop.f32.mrf.mxu1 }
 0x392   : > { %v3478_v27 = vpop.f32.mrf.mxu1 }
 0x393   : > { %v3479_v48 = vadd.f32 %v7274_v31, %v3478_v27 }
 0x394   : > { %v3480_v22 = vpop.f32.mrf.mxu1 }
 0x395   : > { %v4336_v50 = vpack.c.bf16 %v3479_v48, %v3476_v11 }
 0x397   : > { %4400 = vst [vmem:[%s7043_s12 + $0xb8] sm:$0xff] %v4336_v50  }
 0x39d   : > { %v3483_v17 = vpop.f32.mrf.mxu1 }
 0x39e   : > { %v3484_v46 = vadd.f32 %v7274_v31, %v3483_v17 }
 0x39f   : > { %v3485_v43 = vpop.f32.mrf.mxu1 }
 0x3a1   : > { %v3486_v23 = vpop.f32.mrf.mxu1 }
 0x3a2   : > { %v3487_v53 = vadd.f32 %v7274_v31, %v3486_v23 }
 0x3a3   : > { %v3488_v62 = vpop.f32.mrf.mxu1 }
 0x3a4   : > { %v4341_v56 = vpack.c.bf16 %v3487_v53, %v3484_v46 }
 0x3a6   : > { %4401 = vst [vmem:[%s7043_s12 + $0xc0] sm:$0xff] %v4341_v56  }
 0x3aa   : > { %v3491_v38 = vpop.f32.mrf.mxu1 }
 0x3ab   : > { %v3492_v26 = vadd.f32 %v7274_v31, %v3491_v38 }
 0x3ac   : > { %v3493_v9 = vpop.f32.mrf.mxu1 }
 0x3ae   : > { %v3494_v49 = vpop.f32.mrf.mxu1 }
 0x3af   : > { %v3495_v14 = vadd.f32 %v7274_v31, %v3494_v49 }
 0x3b0   : > { %v3496_v7 = vpop.f32.mrf.mxu1 }
 0x3b1   : > { %v4346_v5 = vpack.c.bf16 %v3495_v14, %v3492_v26 }
 0x3b3   : > { %4402 = vst [vmem:[%s7043_s12 + $0xc8] sm:$0xff] %v4346_v5  }
 0x3b9   : > { %v3499_v4 = vpop.f32.mrf.mxu1 }
 0x3ba   : > { %v3500_v60 = vadd.f32 %v7274_v31, %v3499_v4 }
 0x3bb   : > { %v3501_v61 = vpop.f32.mrf.mxu1 }
 0x3bd   : > { %v3502_v10 = vpop.f32.mrf.mxu1 }
 0x3be   : > { %v3503_v12 = vadd.f32 %v7274_v31, %v3502_v10 }
 0x3bf   : > { %v3504_v33 = vpop.f32.mrf.mxu1 }
 0x3c0   : > { %v4351_v16 = vpack.c.bf16 %v3503_v12, %v3500_v60 }
 0x3c2   : > { %4403 = vst [vmem:[%s7043_s12 + $0xd0] sm:$0xff] %v4351_v16  }
 0x3c6   : > { %v3507_v39 = vpop.f32.mrf.mxu1 }
 0x3c7   : > { %v3508_v13 = vadd.f32 %v7274_v31, %v3507_v39 }
 0x3c8   : > { %v3509_v55 = vpop.f32.mrf.mxu1 }
 0x3ca   : > { %v3510_v3 = vpop.f32.mrf.mxu1 }
 0x3cb   : > { %v3511_v35 = vadd.f32 %v7274_v31, %v3510_v3 }
 0x3cc   : > { %v3512_v36 = vpop.f32.mrf.mxu1 }
 0x3cd   : > { %v4356_v20 = vpack.c.bf16 %v3511_v35, %v3508_v13 }
 0x3cf   : > { %4404 = vst [vmem:[%s7043_s12 + $0xd8] sm:$0xff] %v4356_v20  }
 0x3d5   : > { %v3515_v41 = vpop.f32.mrf.mxu1 }
 0x3d6   : > { %v3516_v45 = vadd.f32 %v7274_v31, %v3515_v41 }
 0x3d7   : > { %v3517_v52 = vpop.f32.mrf.mxu1 }
 0x3d9   : > { %v3518_v57 = vpop.f32.mrf.mxu1 }
 0x3da   : > { %v3519_v6 = vadd.f32 %v7274_v31, %v3518_v57 }
 0x3db   : > { %v3520_v21 = vpop.f32.mrf.mxu1 }
 0x3dc   : > { %v4361_v58 = vpack.c.bf16 %v3519_v6, %v3516_v45 }
 0x3de   : > { %4405 = vst [vmem:[%s7043_s12 + $0xe0] sm:$0xff] %v4361_v58  }
 0x3e2   : > { %v3523_v44 = vpop.f32.mrf.mxu1 }
 0x3e3   : > { %v3524_v32 = vadd.f32 %v7274_v31, %v3523_v44 }
 0x3e4   : > { %v3525_v37 = vpop.f32.mrf.mxu1 }
 0x3e6   : > { %v3526_v54 = vpop.f32.mrf.mxu1 }
 0x3e7   : > { %v3527_v51 = vadd.f32 %v7274_v31, %v3526_v54 }
 0x3e8   : > { %v3528_v25 = vpop.f32.mrf.mxu1 }
 0x3e9   : > { %v4366_v19 = vpack.c.bf16 %v3527_v51, %v3524_v32 }
 0x3eb   : > { %4406 = vst [vmem:[%s7043_s12 + $0xe8] sm:$0xff] %v4366_v19  }
 0x3f1   : > { %v3531_v18 = vpop.f32.mrf.mxu1 }
 0x3f2   : > { %v3532_v2 = vadd.f32 %v7274_v31, %v3531_v18 }
 0x3f3   : > { %v3533_v1 = vpop.f32.mrf.mxu1 }
 0x3f5   : > { %v3534_v0 = vpop.f32.mrf.mxu1 }
 0x3f6   : > { %v3535_v30 = vadd.f32 %v7274_v31, %v3534_v0 }
 0x3f7   : > { %v3536_v29 = vpop.f32.mrf.mxu1 }
 0x3f8   : > { %v4371_v40 = vpack.c.bf16 %v3535_v30, %v3532_v2 }
 0x3fa   : > { %4407 = vst [vmem:[%s7043_s12 + $0xf0] sm:$0xff] %v4371_v40  }
 0x3fe   : > { %v3539_v28 = vpop.f32.mrf.mxu1 }
 0x3ff   : > { %v3540_v34 = vadd.f32 %v7274_v31, %v3539_v28 }
 0x400   : > { %v3541_v15 = vpop.f32.mrf.mxu1 }
 0x402   : > { %v3542_v47 = vpop.f32.mrf.mxu1 }
 0x403   : > { %v3543_v8 = vadd.f32 %v7274_v31, %v3542_v47 }
 0x404   : > { %v3544_v63 = vpop.f32.mrf.mxu1 }
 0x405   : > { %v4376_v24 = vpack.c.bf16 %v3543_v8, %v3540_v34 }
 0x407   : > { %4408 = vst [vmem:[%s7043_s12 + $0xf8] sm:$0xff] %v4376_v24  }
 0x408   : > { %4803 = shalt.err (!%p4800_p4)
}
 0x409   : > { %s4804_s18 = scalar_lea.hbm %s7325_s9, 4096  ;;  %s4808_s26 = scalar_lea.hbm %s7380_s6, 8192 }
 0x40a   : > { %p4805_p7 = scmp.ne.s32.totalorder %s7325_s9, %s4804_s18  ;;  %p4809_p10 = scmp.lt.s32.totalorder %s7325_s9, %s7380_s6 }
 0x40b   : > { %p4810_p11 = scmp.lt.s32.totalorder %s4808_s26, %s4804_s18 }
 0x40c   : > { %p4806_p8 = pnand %p4805_p7, %p4935_p5 }
 0x40d   : > { %p4811_p12 = por %p4810_p11, %p4809_p10 }
 0x40e   : > { %p4807_p9 = pneg %p4806_p8 }
 0x410   : > { %p4812_p13 = pnand %p4811_p12, %p4807_p9 }
 0x412   : > { %4815 = shalt.err (!%p4812_p13)
}
 0x413   : > { %s4861_s16 = smov 4  }
 0x414   : > { %4409 = dma.vmem_to_hbm [thread:$0]  (%p4935_p5), %s7327_s15, 4096, %s7325_s9, %s7332_s25, %s4857_s17, %s4857_s17, %s4861_s16  }
 0x415 PF: > { %p4415_p0 = scmp.ge.s32.totalorder %s4850_s24, 2  ;;  %s3895_s20 = sand.u32 1, %s4838_s21  }
 0x416   : > { %s3896_s29 = scalar_lea.sflag [#allocation3], %s3895_s20 }
 0x417   : > { %p4412_p1 = pnand %p4415_p0, %p4939_p6 }
 0x419   : > { %p4413_p2 = pneg %p4412_p1 }
 0x41b   : > { %4833 = dma.done.wait (%p4413_p2), %s3896_s29, 4096  }
 0x41c   : > { %4835 = vsyncadd (%p4413_p2), %s3896_s29, 4294963200  ;;  %p16_p3 = scmp.ge.s32.totalorder %s4922_s27, 4   ;;  %s7427_s21 = smov %s4842_s22 }
 0x41d   : > { %s7428_s22 = smov %s4846_s23  ;;  %s7429_s23 = smov %s4933_s30 }
 0x41e   : > { %s7430_s24 = smov %s4922_s27  ;;  %18 = sbr.rel (!%p16_p3) target bundleno = 3 (0x3), region = 82 }
 0x423   :  { %3901 = vsyncpa [#allocation3], 1 }
 0x424   :  { %3903 = vsyncpa [#allocation3 + $0x1], 1 }

</bundles_post_ra>
